<compile_context>
chip_gen: v7x
topology: tpu7x:2x2x1
jax: 0.10.0
libtpu: 0.0.40
codegen_flags: <defaults>
</compile_context>

<pallas_src>
import functools

import jax
import jax.numpy as jnp
import numpy as np
from jax import lax
from jax.experimental import pallas as pl
from jax.experimental.pallas import tpu as pltpu

LANE = 128  # TPU lane width; channel axis padded to a multiple of this.


# ----------------------------- in-kernel helpers ----------------------------

def _silu(x):
    # tanh form: one EUP push per vreg (vs exp + reciprocal = two).
    return 0.5 * x * (1.0 + jnp.tanh(0.5 * x))


def _norm_silu_to_col(src_ref, sc, sh, col_ref):
    """Fused (x*scale + shift) -> SiLU -> bf16 cast -> im2col scatter.

    col_ref is (F, tS, 3*Cp) bf16; lane block [k*Cp:(k+1)*Cp] of output frame f
    holds input frame f + k - 1 (zero outside [0, F)), so conv becomes a single
    (F*tS, 3*Cp) @ (3*Cp, Cp) matmul.  Processed one frame at a time so the f32
    intermediates never exceed one (tS, Cp) slab (F is small & static, so this
    Python loop is the fully-unrolled form of lax.fori_loop(..., unroll=True)).
    """
    F, tS, Cp = src_ref.shape
    zero = jnp.zeros((1, tS, Cp), dtype=col_ref.dtype)
    col_ref[0:1, :, 0:Cp] = zero                        # tap 0 has no frame -1
    col_ref[F - 1:F, :, 2 * Cp:3 * Cp] = zero           # tap 2 has no frame F
    for fi in range(F):
        hf = _silu(src_ref[fi:fi + 1] * sc + sh).astype(col_ref.dtype)
        col_ref[fi:fi + 1, :, Cp:2 * Cp] = hf           # tap 1 (center)
        if fi + 1 < F:
            col_ref[fi + 1:fi + 2, :, 0:Cp] = hf        # tap 0 of frame fi+1
        if fi > 0:
            col_ref[fi - 1:fi, :, 2 * Cp:3 * Cp] = hf   # tap 2 of frame fi-1


# --------------------------------- kernels ----------------------------------

def _stage1_kernel(x_ref, sc_ref, sh_ref, w_ref, b_ref,
                   c1_ref, st_ref, col_ref):
    """norm1 (precomputed scale/shift) + SiLU + conv1 (+ folded time-emb).

    Also emits single-pass partial GroupNorm statistics (per-channel sum and
    sum of squares, f32) for norm2."""
    F, tS, Cp = x_ref.shape
    _norm_silu_to_col(x_ref, sc_ref[...], sh_ref[...], col_ref)
    c1 = jnp.dot(col_ref[...].reshape(F * tS, 3 * Cp), w_ref[...],
                 preferred_element_type=jnp.float32) + b_ref[...]
    c1_ref[...] = c1.reshape(F, tS, Cp).astype(c1_ref.dtype)
    st_ref[0:1, 0:1, :] = jnp.sum(c1, axis=0, keepdims=True).reshape(1, 1, Cp)
    st_ref[0:1, 1:2, :] = jnp.sum(c1 * c1, axis=0, keepdims=True).reshape(1, 1, Cp)


def _stage2_kernel(c1_ref, x_ref, sc_ref, sh_ref, w_ref, b_ref,
                   out_ref, col_ref):
    """norm2 (precomputed scale/shift) + SiLU + conv2 + residual add."""
    F, tS, Cp = x_ref.shape
    _norm_silu_to_col(c1_ref, sc_ref[...], sh_ref[...], col_ref)
    c2 = jnp.dot(col_ref[...].reshape(F * tS, 3 * Cp), w_ref[...],
                 preferred_element_type=jnp.float32) + b_ref[...]
    out_ref[...] = x_ref[...] + c2.reshape(F, tS, Cp)


# --------------------------------- wrapper -----------------------------------

def _pad_to(x, target, axis):
    pad = target - x.shape[axis]
    if pad == 0:
        return x
    widths = [(0, 0)] * x.ndim
    widths[axis] = (0, pad)
    return jnp.pad(x, widths)


def _vmem_limits():
    """(scoped vmem limit to request, per-step tile budget) in bytes."""
    try:
        phys = int(pltpu.get_tpu_info().vmem_capacity_bytes)
    except Exception:
        phys = 64 << 20                      # conservative: assume v7x-class
    if phys <= (64 << 20):                   # v7x: 64 MiB physical per TC
        return 28 << 20, 20 << 20
    return 64 << 20, 48 << 20                # v5e / v6e: 128 MiB physical


def _choose_tile(s, f, cp, tile_budget, max_s_tile):
    """Largest S-tile (multiple of 8, dividing S) fitting the VMEM budget."""
    per_row = 28 * f * cp                    # live bytes per spatial row (worst stage)
    fixed = 3 * cp * cp * 2 + 64 * cp        # tap-stacked bf16 weights + vectors
    max_ts = max(8, (tile_budget - fixed) // per_row)
    if max_s_tile is not None:
        max_ts = min(max_ts, max_s_tile)
    if s <= max_ts:
        return s
    best, t = 0, 8
    while t <= max_ts:
        if s % t == 0:
            best = t
        t += 8
    # TODO(synk): support ragged / padded S tiles instead of this fallback.
    return best if best > 0 else s


@functools.partial(jax.jit, static_argnames=("groups", "eps", "max_s_tile"))
def temporal_resnet_block_pallas(hidden_states, time_emb, params, *,
                                 groups, eps=1e-5, max_s_tile=None):
    """hidden_states: (f, c, h, w) f32; time_emb: (1, temb_channels) f32."""
    f, c, h, w = hidden_states.shape
    co = params["conv1_w"].shape[0]
    assert c == co, "conv_shortcut path not supported (in_channels must equal out_channels)"
    assert c % groups == 0

    s = h * w
    cp = max(LANE, ((max(c, co) + LANE - 1) // LANE) * LANE)
    cpg = c // groups

    vmem_limit, tile_budget = _vmem_limits()
    ts = _choose_tile(s, f, cp, tile_budget, max_s_tile)
    n_t = s // ts

    # ---- norm1 statistics: single-pass XLA reduce over the NCHW input ------
    xg = hidden_states.reshape(f, groups, cpg, s).astype(jnp.float32)
    mean1 = jnp.mean(xg, axis=(0, 2, 3))                              # (G,)
    var1 = jnp.mean(jnp.square(xg), axis=(0, 2, 3)) - jnp.square(mean1)
    inv1 = lax.rsqrt(jnp.maximum(var1, 0.0) + eps)
    scale1 = params["norm1_g"].astype(jnp.float32) * jnp.repeat(inv1, cpg)
    shift1 = params["norm1_b"].astype(jnp.float32) - jnp.repeat(mean1, cpg) * scale1

    # ---- relayout to channels-last (F, S, Cp) ------------------------------
    # TODO(synk): accept channels-last activations (or fold the relayout into
    # the kernel via strided DMA) to avoid this extra HBM pass.
    x = jnp.transpose(hidden_states, (0, 2, 3, 1)).reshape(f, s, c)
    x = _pad_to(x.astype(jnp.float32), cp, axis=2)

    # ---- conv weights: torch (Co, Ci, 3) -> tap-stacked (3*Cp, Cp) bf16 ----
    def prep_w(wt, ci, cot):
        wt = jnp.transpose(wt, (2, 1, 0))                             # (3, ci, co)
        full = jnp.zeros((3, cp, cp), jnp.float32).at[:, :ci, :cot].set(wt)
        return full.reshape(3 * cp, cp).astype(jnp.bfloat16)          # row = k*Cp+ci

    w1 = prep_w(params["conv1_w"], c, co)
    w2 = prep_w(params["conv2_w"], co, co)

    vec = lambda v: _pad_to(v.reshape(1, -1).astype(jnp.float32), cp, axis=1)

    # Time-embedding projection hoisted out of the kernel, folded into conv1's
    # bias (exact: the broadcast add commutes with the conv bias add).
    emb = jax.nn.silu(time_emb) @ params["te_w"].T + params["te_b"]   # (1, co)
    b1e = vec(params["conv1_b"] + emb[0])
    b2v = vec(params["conv2_b"])

    vspec = pl.BlockSpec((1, cp), lambda i: (0, 0))
    wspec = pl.BlockSpec((3 * cp, cp), lambda i: (0, 0))
    tspec = pl.BlockSpec((f, ts, cp), lambda i: (0, i, 0))
    cparams = pltpu.CompilerParams(dimension_semantics=("parallel",),
                                   vmem_limit_bytes=vmem_limit)

    # ------------- stage 1: norm1 + SiLU + conv1 (+ temb) -------------------
    c1, st = pl.pallas_call(
        _stage1_kernel,
        grid=(n_t,),
        in_specs=[tspec, vspec, vspec, wspec, vspec],
        out_specs=(tspec, pl.BlockSpec((1, 2, cp), lambda i: (i, 0, 0))),
        out_shape=(jax.ShapeDtypeStruct((f, s, cp), jnp.bfloat16),
                   jax.ShapeDtypeStruct((n_t, 2, cp), jnp.float32)),
        scratch_shapes=[pltpu.VMEM((f, ts, 3 * cp), jnp.bfloat16)],
        compiler_params=cparams,
    )(x, vec(scale1), vec(shift1), w1, b1e)

    # ---- norm2 statistics from the per-tile partial sums (tiny XLA reduce) --
    tot = jnp.sum(st, axis=0)                                         # (2, Cp)
    ch = np.arange(cp)
    M = jnp.asarray(((ch[:, None] // (co // groups)) == np.arange(groups)[None, :])
                    & (ch[:, None] < co), jnp.float32)                # (Cp, G)
    n2 = float(f * s * (co // groups))
    mean2 = (tot[0:1] @ M) / n2                                       # (1, G)
    var2 = (tot[1:2] @ M) / n2 - jnp.square(mean2)
    inv2 = lax.rsqrt(jnp.maximum(var2, 0.0) + eps)
    scale2 = vec(params["norm2_g"]) * (inv2 @ M.T)                    # (1, Cp)
    shift2 = vec(params["norm2_b"]) - (mean2 @ M.T) * scale2

    # ------------- stage 2: norm2 + SiLU + conv2 + residual -----------------
    out = pl.pallas_call(
        _stage2_kernel,
        grid=(n_t,),
        in_specs=[tspec, tspec, vspec, vspec, wspec, vspec],
        out_specs=tspec,
        out_shape=jax.ShapeDtypeStruct((f, s, cp), jnp.float32),
        scratch_shapes=[pltpu.VMEM((f, ts, 3 * cp), jnp.bfloat16)],
        compiler_params=cparams,
        input_output_aliases={1: 0},          # residual x buffer -> output
    )(c1, x, scale2, shift2, w2, b2v)

    out = out[:, :, :co].reshape(f, h, w, co)
    return jnp.transpose(out, (0, 3, 1, 2))


# ----------------------------- numpy reference -------------------------------

def _reference(x, temb, p, groups, eps):
    x = np.asarray(x, np.float64)
    temb = np.asarray(temb, np.float64)
    f, c, h, w = x.shape

    def silu(v):
        return v / (1.0 + np.exp(-v))

    def gn(v, gamma, beta, G):                       # v: (C, f, h, w), batch=1
        C = v.shape[0]
        vg = v.reshape(G, C // G, f, h, w)
        m = vg.mean(axis=(1, 2, 3, 4), keepdims=True)
        var = vg.var(axis=(1, 2, 3, 4), keepdims=True)
        out = ((vg - m) / np.sqrt(var + eps)).reshape(C, f, h, w)
        return out * gamma[:, None, None, None] + beta[:, None, None, None]

    def tconv(v, wt, b):                             # v: (Ci, f, h, w)
        Ci = v.shape[0]
        Co = wt.shape[0]
        vp = np.zeros((Ci, f + 2, h, w))
        vp[:, 1:f + 1] = v
        out = np.zeros((Co, f, h, w))
        for k in range(3):
            out += np.einsum("oc,cfhw->ofhw", wt[:, :, k], vp[:, k:k + f])
        return out + b[:, None, None, None]

    g = lambda k: np.asarray(p[k], np.float64)
    xt = np.transpose(x, (1, 0, 2, 3))               # (c, f, h, w)
    y = silu(gn(xt, g("norm1_g"), g("norm1_b"), groups))
    y = tconv(y, g("conv1_w"), g("conv1_b"))
    emb = silu(temb) @ g("te_w").T + g("te_b")       # (1, Co)
    y = y + emb[0][:, None, None, None]
    y = silu(gn(y, g("norm2_g"), g("norm2_b"), groups))
    y = tconv(y, g("conv2_w"), g("conv2_b"))
    return np.transpose(y, (1, 0, 2, 3)) + x


# ------------------------------------ main ------------------------------------

if __name__ == "__main__":
    F, C_IN, C_OUT, H, W = 8, 32, 32, 16, 16
    GROUPS, TEMB, EPS = 8, 64, 1e-5

    key = jax.random.PRNGKey(0)
    ks = jax.random.split(key, 12)
    nrm = lambda k, s, sc=1.0: (sc * jax.random.normal(k, s)).astype(jnp.float32)

    params = {
        "norm1_g": 1.0 + nrm(ks[0], (C_IN,), 0.1),
        "norm1_b": nrm(ks[1], (C_IN,), 0.1),
        "conv1_w": nrm(ks[2], (C_OUT, C_IN, 3), 0.05),   # torch (Co, Ci, 3, 1, 1) squeezed
        "conv1_b": nrm(ks[3], (C_OUT,), 0.05),
        "te_w": nrm(ks[4], (C_OUT, TEMB), 0.05),         # torch Linear weight (out, in)
        "te_b": nrm(ks[5], (C_OUT,), 0.05),
        "norm2_g": 1.0 + nrm(ks[6], (C_OUT,), 0.1),
        "norm2_b": nrm(ks[7], (C_OUT,), 0.1),
        "conv2_w": nrm(ks[8], (C_OUT, C_OUT, 3), 0.05),
        "conv2_b": nrm(ks[9], (C_OUT,), 0.05),
    }
    hidden_states = nrm(ks[10], (F, C_IN, H, W))
    time_emb = nrm(ks[11], (1, TEMB))

    # max_s_tile=128 forces a 2-tile spatial grid at this toy size so the
    # gridded / partial-stats path is exercised.
    out = temporal_resnet_block_pallas(hidden_states, time_emb, params,
                                       groups=GROUPS, eps=EPS, max_s_tile=128)
    out = jax.block_until_ready(out)

    ref = _reference(hidden_states, time_emb, params, GROUPS, EPS)
    np.testing.assert_allclose(np.asarray(out, np.float64), ref,
                               rtol=2e-2, atol=2e-2)
    print("KERNEL_OK")
</pallas_src>

<mosaic_0001>
module attributes {stable_mosaic.version = 11 : i64} {
  func.func @_stage1_kernel(%arg0: i32, %arg1: memref<8x128x128xf32, #tpu.memory_space<vmem>>, %arg2: memref<1x128xf32, #tpu.memory_space<vmem>>, %arg3: memref<1x128xf32, #tpu.memory_space<vmem>>, %arg4: memref<384x128xbf16, #tpu.memory_space<vmem>>, %arg5: memref<1x128xf32, #tpu.memory_space<vmem>>, %arg6: memref<8x128x128xbf16, #tpu.memory_space<vmem>>, %arg7: memref<1x2x128xf32, #tpu.memory_space<vmem>>, %arg8: memref<8x128x384xbf16, #tpu.memory_space<vmem>>) attributes {dimension_semantics = [#tpu.dimension_semantics<parallel>], iteration_bounds = array<i64: 2>, scalar_prefetch = 0 : i64, scratch_operands = 1 : i64, tpu.core_type = #tpu.core_type<tc>, window_params = [{transform_indices = @transform_0, window_bounds = array<i64: 8, 128, 128>}, {pipeline_mode = #tpu.pipeline_mode<synchronous>, transform_indices = @transform_1, window_bounds = array<i64: 1, 128>}, {pipeline_mode = #tpu.pipeline_mode<synchronous>, transform_indices = @transform_2, window_bounds = array<i64: 1, 128>}, {pipeline_mode = #tpu.pipeline_mode<synchronous>, transform_indices = @transform_3, window_bounds = array<i64: 384, 128>}, {pipeline_mode = #tpu.pipeline_mode<synchronous>, transform_indices = @transform_4, window_bounds = array<i64: 1, 128>}, {transform_indices = @transform_5, window_bounds = array<i64: 8, 128, 128>}, {transform_indices = @transform_6, window_bounds = array<i64: 1, 2, 128>}]} {
    %c0 = arith.constant 0 : index
    %c0_0 = arith.constant 0 : index
    %0 = vector.load %arg2[%c0, %c0_0] : memref<1x128xf32, #tpu.memory_space<vmem>>, vector<1x128xf32>
    %c0_1 = arith.constant 0 : index
    %c0_2 = arith.constant 0 : index
    %1 = vector.load %arg3[%c0_1, %c0_2] : memref<1x128xf32, #tpu.memory_space<vmem>>, vector<1x128xf32>
    %cst = arith.constant 0.000000e+00 : bf16
    %2 = vector.broadcast %cst : bf16 to vector<1x128x128xbf16>
    %c0_3 = arith.constant 0 : index
    %c0_4 = arith.constant 0 : index
    %c0_5 = arith.constant 0 : index
    %3 = vector.load %arg8[%c0_3, %c0_4, %c0_5] : memref<8x128x384xbf16, #tpu.memory_space<vmem>>, vector<1x128x128xbf16>
    tpu.vector_store %arg8[%c0_3, %c0_4, %c0_5], %2 {strides = array<i32>} : memref<8x128x384xbf16, #tpu.memory_space<vmem>>, vector<1x128x128xbf16>,
    %c7 = arith.constant 7 : index
    %c0_6 = arith.constant 0 : index
    %c256 = arith.constant 256 : index
    %4 = vector.load %arg8[%c7, %c0_6, %c256] : memref<8x128x384xbf16, #tpu.memory_space<vmem>>, vector<1x128x128xbf16>
    tpu.vector_store %arg8[%c7, %c0_6, %c256], %2 {strides = array<i32>} : memref<8x128x384xbf16, #tpu.memory_space<vmem>>, vector<1x128x128xbf16>,
    %c0_7 = arith.constant 0 : index
    %c0_8 = arith.constant 0 : index
    %c0_9 = arith.constant 0 : index
    %5 = vector.load %arg1[%c0_7, %c0_8, %c0_9] : memref<8x128x128xf32, #tpu.memory_space<vmem>>, vector<1x128x128xf32>
    %6 = vector.shape_cast %0 : vector<1x128xf32> to vector<1x1x128xf32>
    %7 = vector.broadcast %6 : vector<1x1x128xf32> to vector<1x128x128xf32>
    %8 = arith.mulf %5, %7 : vector<1x128x128xf32>
    %9 = vector.shape_cast %1 : vector<1x128xf32> to vector<1x1x128xf32>
    %10 = vector.broadcast %9 : vector<1x1x128xf32> to vector<1x128x128xf32>
    %11 = arith.addf %8, %10 : vector<1x128x128xf32>
    %cst_10 = arith.constant 5.000000e-01 : f32
    %12 = vector.broadcast %cst_10 : f32 to vector<1x128x128xf32>
    %13 = arith.mulf %12, %11 : vector<1x128x128xf32>
    %cst_11 = arith.constant 5.000000e-01 : f32
    %14 = vector.broadcast %cst_11 : f32 to vector<1x128x128xf32>
    %15 = arith.mulf %14, %11 : vector<1x128x128xf32>
    %16 = math.tanh %15 : vector<1x128x128xf32>
    %cst_12 = arith.constant 1.000000e+00 : f32
    %17 = vector.broadcast %cst_12 : f32 to vector<1x128x128xf32>
    %18 = arith.addf %17, %16 : vector<1x128x128xf32>
    %19 = arith.mulf %13, %18 : vector<1x128x128xf32>
    %20 = arith.truncf %19 : vector<1x128x128xf32> to vector<1x128x128xbf16>
    %c0_13 = arith.constant 0 : index
    %c0_14 = arith.constant 0 : index
    %c128 = arith.constant 128 : index
    %21 = vector.load %arg8[%c0_13, %c0_14, %c128] : memref<8x128x384xbf16, #tpu.memory_space<vmem>>, vector<1x128x128xbf16>
    tpu.vector_store %arg8[%c0_13, %c0_14, %c128], %20 {strides = array<i32>} : memref<8x128x384xbf16, #tpu.memory_space<vmem>>, vector<1x128x128xbf16>,
    %c1 = arith.constant 1 : index
    %c0_15 = arith.constant 0 : index
    %c0_16 = arith.constant 0 : index
    %22 = vector.load %arg8[%c1, %c0_15, %c0_16] : memref<8x128x384xbf16, #tpu.memory_space<vmem>>, vector<1x128x128xbf16>
    tpu.vector_store %arg8[%c1, %c0_15, %c0_16], %20 {strides = array<i32>} : memref<8x128x384xbf16, #tpu.memory_space<vmem>>, vector<1x128x128xbf16>,
    %c1_17 = arith.constant 1 : index
    %c0_18 = arith.constant 0 : index
    %c0_19 = arith.constant 0 : index
    %23 = vector.load %arg1[%c1_17, %c0_18, %c0_19] : memref<8x128x128xf32, #tpu.memory_space<vmem>>, vector<1x128x128xf32>
    %24 = vector.shape_cast %0 : vector<1x128xf32> to vector<1x1x128xf32>
    %25 = vector.broadcast %24 : vector<1x1x128xf32> to vector<1x128x128xf32>
    %26 = arith.mulf %23, %25 : vector<1x128x128xf32>
    %27 = vector.shape_cast %1 : vector<1x128xf32> to vector<1x1x128xf32>
    %28 = vector.broadcast %27 : vector<1x1x128xf32> to vector<1x128x128xf32>
    %29 = arith.addf %26, %28 : vector<1x128x128xf32>
    %cst_20 = arith.constant 5.000000e-01 : f32
    %30 = vector.broadcast %cst_20 : f32 to vector<1x128x128xf32>
    %31 = arith.mulf %30, %29 : vector<1x128x128xf32>
    %cst_21 = arith.constant 5.000000e-01 : f32
    %32 = vector.broadcast %cst_21 : f32 to vector<1x128x128xf32>
    %33 = arith.mulf %32, %29 : vector<1x128x128xf32>
    %34 = math.tanh %33 : vector<1x128x128xf32>
    %cst_22 = arith.constant 1.000000e+00 : f32
    %35 = vector.broadcast %cst_22 : f32 to vector<1x128x128xf32>
    %36 = arith.addf %35, %34 : vector<1x128x128xf32>
    %37 = arith.mulf %31, %36 : vector<1x128x128xf32>
    %38 = arith.truncf %37 : vector<1x128x128xf32> to vector<1x128x128xbf16>
    %c1_23 = arith.constant 1 : index
    %c0_24 = arith.constant 0 : index
    %c128_25 = arith.constant 128 : index
    %39 = vector.load %arg8[%c1_23, %c0_24, %c128_25] : memref<8x128x384xbf16, #tpu.memory_space<vmem>>, vector<1x128x128xbf16>
    tpu.vector_store %arg8[%c1_23, %c0_24, %c128_25], %38 {strides = array<i32>} : memref<8x128x384xbf16, #tpu.memory_space<vmem>>, vector<1x128x128xbf16>,
    %c2 = arith.constant 2 : index
    %c0_26 = arith.constant 0 : index
    %c0_27 = arith.constant 0 : index
    %40 = vector.load %arg8[%c2, %c0_26, %c0_27] : memref<8x128x384xbf16, #tpu.memory_space<vmem>>, vector<1x128x128xbf16>
    tpu.vector_store %arg8[%c2, %c0_26, %c0_27], %38 {strides = array<i32>} : memref<8x128x384xbf16, #tpu.memory_space<vmem>>, vector<1x128x128xbf16>,
    %c0_28 = arith.constant 0 : index
    %c0_29 = arith.constant 0 : index
    %c256_30 = arith.constant 256 : index
    %41 = vector.load %arg8[%c0_28, %c0_29, %c256_30] : memref<8x128x384xbf16, #tpu.memory_space<vmem>>, vector<1x128x128xbf16>
    tpu.vector_store %arg8[%c0_28, %c0_29, %c256_30], %38 {strides = array<i32>} : memref<8x128x384xbf16, #tpu.memory_space<vmem>>, vector<1x128x128xbf16>,
    %c2_31 = arith.constant 2 : index
    %c0_32 = arith.constant 0 : index
    %c0_33 = arith.constant 0 : index
    %42 = vector.load %arg1[%c2_31, %c0_32, %c0_33] : memref<8x128x128xf32, #tpu.memory_space<vmem>>, vector<1x128x128xf32>
    %43 = vector.shape_cast %0 : vector<1x128xf32> to vector<1x1x128xf32>
    %44 = vector.broadcast %43 : vector<1x1x128xf32> to vector<1x128x128xf32>
    %45 = arith.mulf %42, %44 : vector<1x128x128xf32>
    %46 = vector.shape_cast %1 : vector<1x128xf32> to vector<1x1x128xf32>
    %47 = vector.broadcast %46 : vector<1x1x128xf32> to vector<1x128x128xf32>
    %48 = arith.addf %45, %47 : vector<1x128x128xf32>
    %cst_34 = arith.constant 5.000000e-01 : f32
    %49 = vector.broadcast %cst_34 : f32 to vector<1x128x128xf32>
    %50 = arith.mulf %49, %48 : vector<1x128x128xf32>
    %cst_35 = arith.constant 5.000000e-01 : f32
    %51 = vector.broadcast %cst_35 : f32 to vector<1x128x128xf32>
    %52 = arith.mulf %51, %48 : vector<1x128x128xf32>
    %53 = math.tanh %52 : vector<1x128x128xf32>
    %cst_36 = arith.constant 1.000000e+00 : f32
    %54 = vector.broadcast %cst_36 : f32 to vector<1x128x128xf32>
    %55 = arith.addf %54, %53 : vector<1x128x128xf32>
    %56 = arith.mulf %50, %55 : vector<1x128x128xf32>
    %57 = arith.truncf %56 : vector<1x128x128xf32> to vector<1x128x128xbf16>
    %c2_37 = arith.constant 2 : index
    %c0_38 = arith.constant 0 : index
    %c128_39 = arith.constant 128 : index
    %58 = vector.load %arg8[%c2_37, %c0_38, %c128_39] : memref<8x128x384xbf16, #tpu.memory_space<vmem>>, vector<1x128x128xbf16>
    tpu.vector_store %arg8[%c2_37, %c0_38, %c128_39], %57 {strides = array<i32>} : memref<8x128x384xbf16, #tpu.memory_space<vmem>>, vector<1x128x128xbf16>,
    %c3 = arith.constant 3 : index
    %c0_40 = arith.constant 0 : index
    %c0_41 = arith.constant 0 : index
    %59 = vector.load %arg8[%c3, %c0_40, %c0_41] : memref<8x128x384xbf16, #tpu.memory_space<vmem>>, vector<1x128x128xbf16>
    tpu.vector_store %arg8[%c3, %c0_40, %c0_41], %57 {strides = array<i32>} : memref<8x128x384xbf16, #tpu.memory_space<vmem>>, vector<1x128x128xbf16>,
    %c1_42 = arith.constant 1 : index
    %c0_43 = arith.constant 0 : index
    %c256_44 = arith.constant 256 : index
    %60 = vector.load %arg8[%c1_42, %c0_43, %c256_44] : memref<8x128x384xbf16, #tpu.memory_space<vmem>>, vector<1x128x128xbf16>
    tpu.vector_store %arg8[%c1_42, %c0_43, %c256_44], %57 {strides = array<i32>} : memref<8x128x384xbf16, #tpu.memory_space<vmem>>, vector<1x128x128xbf16>,
    %c3_45 = arith.constant 3 : index
    %c0_46 = arith.constant 0 : index
    %c0_47 = arith.constant 0 : index
    %61 = vector.load %arg1[%c3_45, %c0_46, %c0_47] : memref<8x128x128xf32, #tpu.memory_space<vmem>>, vector<1x128x128xf32>
    %62 = vector.shape_cast %0 : vector<1x128xf32> to vector<1x1x128xf32>
    %63 = vector.broadcast %62 : vector<1x1x128xf32> to vector<1x128x128xf32>
    %64 = arith.mulf %61, %63 : vector<1x128x128xf32>
    %65 = vector.shape_cast %1 : vector<1x128xf32> to vector<1x1x128xf32>
    %66 = vector.broadcast %65 : vector<1x1x128xf32> to vector<1x128x128xf32>
    %67 = arith.addf %64, %66 : vector<1x128x128xf32>
    %cst_48 = arith.constant 5.000000e-01 : f32
    %68 = vector.broadcast %cst_48 : f32 to vector<1x128x128xf32>
    %69 = arith.mulf %68, %67 : vector<1x128x128xf32>
    %cst_49 = arith.constant 5.000000e-01 : f32
    %70 = vector.broadcast %cst_49 : f32 to vector<1x128x128xf32>
    %71 = arith.mulf %70, %67 : vector<1x128x128xf32>
    %72 = math.tanh %71 : vector<1x128x128xf32>
    %cst_50 = arith.constant 1.000000e+00 : f32
    %73 = vector.broadcast %cst_50 : f32 to vector<1x128x128xf32>
    %74 = arith.addf %73, %72 : vector<1x128x128xf32>
    %75 = arith.mulf %69, %74 : vector<1x128x128xf32>
    %76 = arith.truncf %75 : vector<1x128x128xf32> to vector<1x128x128xbf16>
    %c3_51 = arith.constant 3 : index
    %c0_52 = arith.constant 0 : index
    %c128_53 = arith.constant 128 : index
    %77 = vector.load %arg8[%c3_51, %c0_52, %c128_53] : memref<8x128x384xbf16, #tpu.memory_space<vmem>>, vector<1x128x128xbf16>
    tpu.vector_store %arg8[%c3_51, %c0_52, %c128_53], %76 {strides = array<i32>} : memref<8x128x384xbf16, #tpu.memory_space<vmem>>, vector<1x128x128xbf16>,
    %c4 = arith.constant 4 : index
    %c0_54 = arith.constant 0 : index
    %c0_55 = arith.constant 0 : index
    %78 = vector.load %arg8[%c4, %c0_54, %c0_55] : memref<8x128x384xbf16, #tpu.memory_space<vmem>>, vector<1x128x128xbf16>
    tpu.vector_store %arg8[%c4, %c0_54, %c0_55], %76 {strides = array<i32>} : memref<8x128x384xbf16, #tpu.memory_space<vmem>>, vector<1x128x128xbf16>,
    %c2_56 = arith.constant 2 : index
    %c0_57 = arith.constant 0 : index
    %c256_58 = arith.constant 256 : index
    %79 = vector.load %arg8[%c2_56, %c0_57, %c256_58] : memref<8x128x384xbf16, #tpu.memory_space<vmem>>, vector<1x128x128xbf16>
    tpu.vector_store %arg8[%c2_56, %c0_57, %c256_58], %76 {strides = array<i32>} : memref<8x128x384xbf16, #tpu.memory_space<vmem>>, vector<1x128x128xbf16>,
    %c4_59 = arith.constant 4 : index
    %c0_60 = arith.constant 0 : index
    %c0_61 = arith.constant 0 : index
    %80 = vector.load %arg1[%c4_59, %c0_60, %c0_61] : memref<8x128x128xf32, #tpu.memory_space<vmem>>, vector<1x128x128xf32>
    %81 = vector.shape_cast %0 : vector<1x128xf32> to vector<1x1x128xf32>
    %82 = vector.broadcast %81 : vector<1x1x128xf32> to vector<1x128x128xf32>
    %83 = arith.mulf %80, %82 : vector<1x128x128xf32>
    %84 = vector.shape_cast %1 : vector<1x128xf32> to vector<1x1x128xf32>
    %85 = vector.broadcast %84 : vector<1x1x128xf32> to vector<1x128x128xf32>
    %86 = arith.addf %83, %85 : vector<1x128x128xf32>
    %cst_62 = arith.constant 5.000000e-01 : f32
    %87 = vector.broadcast %cst_62 : f32 to vector<1x128x128xf32>
    %88 = arith.mulf %87, %86 : vector<1x128x128xf32>
    %cst_63 = arith.constant 5.000000e-01 : f32
    %89 = vector.broadcast %cst_63 : f32 to vector<1x128x128xf32>
    %90 = arith.mulf %89, %86 : vector<1x128x128xf32>
    %91 = math.tanh %90 : vector<1x128x128xf32>
    %cst_64 = arith.constant 1.000000e+00 : f32
    %92 = vector.broadcast %cst_64 : f32 to vector<1x128x128xf32>
    %93 = arith.addf %92, %91 : vector<1x128x128xf32>
    %94 = arith.mulf %88, %93 : vector<1x128x128xf32>
    %95 = arith.truncf %94 : vector<1x128x128xf32> to vector<1x128x128xbf16>
    %c4_65 = arith.constant 4 : index
    %c0_66 = arith.constant 0 : index
    %c128_67 = arith.constant 128 : index
    %96 = vector.load %arg8[%c4_65, %c0_66, %c128_67] : memref<8x128x384xbf16, #tpu.memory_space<vmem>>, vector<1x128x128xbf16>
    tpu.vector_store %arg8[%c4_65, %c0_66, %c128_67], %95 {strides = array<i32>} : memref<8x128x384xbf16, #tpu.memory_space<vmem>>, vector<1x128x128xbf16>,
    %c5 = arith.constant 5 : index
    %c0_68 = arith.constant 0 : index
    %c0_69 = arith.constant 0 : index
    %97 = vector.load %arg8[%c5, %c0_68, %c0_69] : memref<8x128x384xbf16, #tpu.memory_space<vmem>>, vector<1x128x128xbf16>
    tpu.vector_store %arg8[%c5, %c0_68, %c0_69], %95 {strides = array<i32>} : memref<8x128x384xbf16, #tpu.memory_space<vmem>>, vector<1x128x128xbf16>,
    %c3_70 = arith.constant 3 : index
    %c0_71 = arith.constant 0 : index
    %c256_72 = arith.constant 256 : index
    %98 = vector.load %arg8[%c3_70, %c0_71, %c256_72] : memref<8x128x384xbf16, #tpu.memory_space<vmem>>, vector<1x128x128xbf16>
    tpu.vector_store %arg8[%c3_70, %c0_71, %c256_72], %95 {strides = array<i32>} : memref<8x128x384xbf16, #tpu.memory_space<vmem>>, vector<1x128x128xbf16>,
    %c5_73 = arith.constant 5 : index
    %c0_74 = arith.constant 0 : index
    %c0_75 = arith.constant 0 : index
    %99 = vector.load %arg1[%c5_73, %c0_74, %c0_75] : memref<8x128x128xf32, #tpu.memory_space<vmem>>, vector<1x128x128xf32>
    %100 = vector.shape_cast %0 : vector<1x128xf32> to vector<1x1x128xf32>
    %101 = vector.broadcast %100 : vector<1x1x128xf32> to vector<1x128x128xf32>
    %102 = arith.mulf %99, %101 : vector<1x128x128xf32>
    %103 = vector.shape_cast %1 : vector<1x128xf32> to vector<1x1x128xf32>
    %104 = vector.broadcast %103 : vector<1x1x128xf32> to vector<1x128x128xf32>
    %105 = arith.addf %102, %104 : vector<1x128x128xf32>
    %cst_76 = arith.constant 5.000000e-01 : f32
    %106 = vector.broadcast %cst_76 : f32 to vector<1x128x128xf32>
    %107 = arith.mulf %106, %105 : vector<1x128x128xf32>
    %cst_77 = arith.constant 5.000000e-01 : f32
    %108 = vector.broadcast %cst_77 : f32 to vector<1x128x128xf32>
    %109 = arith.mulf %108, %105 : vector<1x128x128xf32>
    %110 = math.tanh %109 : vector<1x128x128xf32>
    %cst_78 = arith.constant 1.000000e+00 : f32
    %111 = vector.broadcast %cst_78 : f32 to vector<1x128x128xf32>
    %112 = arith.addf %111, %110 : vector<1x128x128xf32>
    %113 = arith.mulf %107, %112 : vector<1x128x128xf32>
    %114 = arith.truncf %113 : vector<1x128x128xf32> to vector<1x128x128xbf16>
    %c5_79 = arith.constant 5 : index
    %c0_80 = arith.constant 0 : index
    %c128_81 = arith.constant 128 : index
    %115 = vector.load %arg8[%c5_79, %c0_80, %c128_81] : memref<8x128x384xbf16, #tpu.memory_space<vmem>>, vector<1x128x128xbf16>
    tpu.vector_store %arg8[%c5_79, %c0_80, %c128_81], %114 {strides = array<i32>} : memref<8x128x384xbf16, #tpu.memory_space<vmem>>, vector<1x128x128xbf16>,
    %c6 = arith.constant 6 : index
    %c0_82 = arith.constant 0 : index
    %c0_83 = arith.constant 0 : index
    %116 = vector.load %arg8[%c6, %c0_82, %c0_83] : memref<8x128x384xbf16, #tpu.memory_space<vmem>>, vector<1x128x128xbf16>
    tpu.vector_store %arg8[%c6, %c0_82, %c0_83], %114 {strides = array<i32>} : memref<8x128x384xbf16, #tpu.memory_space<vmem>>, vector<1x128x128xbf16>,
    %c4_84 = arith.constant 4 : index
    %c0_85 = arith.constant 0 : index
    %c256_86 = arith.constant 256 : index
    %117 = vector.load %arg8[%c4_84, %c0_85, %c256_86] : memref<8x128x384xbf16, #tpu.memory_space<vmem>>, vector<1x128x128xbf16>
    tpu.vector_store %arg8[%c4_84, %c0_85, %c256_86], %114 {strides = array<i32>} : memref<8x128x384xbf16, #tpu.memory_space<vmem>>, vector<1x128x128xbf16>,
    %c6_87 = arith.constant 6 : index
    %c0_88 = arith.constant 0 : index
    %c0_89 = arith.constant 0 : index
    %118 = vector.load %arg1[%c6_87, %c0_88, %c0_89] : memref<8x128x128xf32, #tpu.memory_space<vmem>>, vector<1x128x128xf32>
    %119 = vector.shape_cast %0 : vector<1x128xf32> to vector<1x1x128xf32>
    %120 = vector.broadcast %119 : vector<1x1x128xf32> to vector<1x128x128xf32>
    %121 = arith.mulf %118, %120 : vector<1x128x128xf32>
    %122 = vector.shape_cast %1 : vector<1x128xf32> to vector<1x1x128xf32>
    %123 = vector.broadcast %122 : vector<1x1x128xf32> to vector<1x128x128xf32>
    %124 = arith.addf %121, %123 : vector<1x128x128xf32>
    %cst_90 = arith.constant 5.000000e-01 : f32
    %125 = vector.broadcast %cst_90 : f32 to vector<1x128x128xf32>
    %126 = arith.mulf %125, %124 : vector<1x128x128xf32>
    %cst_91 = arith.constant 5.000000e-01 : f32
    %127 = vector.broadcast %cst_91 : f32 to vector<1x128x128xf32>
    %128 = arith.mulf %127, %124 : vector<1x128x128xf32>
    %129 = math.tanh %128 : vector<1x128x128xf32>
    %cst_92 = arith.constant 1.000000e+00 : f32
    %130 = vector.broadcast %cst_92 : f32 to vector<1x128x128xf32>
    %131 = arith.addf %130, %129 : vector<1x128x128xf32>
    %132 = arith.mulf %126, %131 : vector<1x128x128xf32>
    %133 = arith.truncf %132 : vector<1x128x128xf32> to vector<1x128x128xbf16>
    %c6_93 = arith.constant 6 : index
    %c0_94 = arith.constant 0 : index
    %c128_95 = arith.constant 128 : index
    %134 = vector.load %arg8[%c6_93, %c0_94, %c128_95] : memref<8x128x384xbf16, #tpu.memory_space<vmem>>, vector<1x128x128xbf16>
    tpu.vector_store %arg8[%c6_93, %c0_94, %c128_95], %133 {strides = array<i32>} : memref<8x128x384xbf16, #tpu.memory_space<vmem>>, vector<1x128x128xbf16>,
    %c7_96 = arith.constant 7 : index
    %c0_97 = arith.constant 0 : index
    %c0_98 = arith.constant 0 : index
    %135 = vector.load %arg8[%c7_96, %c0_97, %c0_98] : memref<8x128x384xbf16, #tpu.memory_space<vmem>>, vector<1x128x128xbf16>
    tpu.vector_store %arg8[%c7_96, %c0_97, %c0_98], %133 {strides = array<i32>} : memref<8x128x384xbf16, #tpu.memory_space<vmem>>, vector<1x128x128xbf16>,
    %c5_99 = arith.constant 5 : index
    %c0_100 = arith.constant 0 : index
    %c256_101 = arith.constant 256 : index
    %136 = vector.load %arg8[%c5_99, %c0_100, %c256_101] : memref<8x128x384xbf16, #tpu.memory_space<vmem>>, vector<1x128x128xbf16>
    tpu.vector_store %arg8[%c5_99, %c0_100, %c256_101], %133 {strides = array<i32>} : memref<8x128x384xbf16, #tpu.memory_space<vmem>>, vector<1x128x128xbf16>,
    %c7_102 = arith.constant 7 : index
    %c0_103 = arith.constant 0 : index
    %c0_104 = arith.constant 0 : index
    %137 = vector.load %arg1[%c7_102, %c0_103, %c0_104] : memref<8x128x128xf32, #tpu.memory_space<vmem>>, vector<1x128x128xf32>
    %138 = vector.shape_cast %0 : vector<1x128xf32> to vector<1x1x128xf32>
    %139 = vector.broadcast %138 : vector<1x1x128xf32> to vector<1x128x128xf32>
    %140 = arith.mulf %137, %139 : vector<1x128x128xf32>
    %141 = vector.shape_cast %1 : vector<1x128xf32> to vector<1x1x128xf32>
    %142 = vector.broadcast %141 : vector<1x1x128xf32> to vector<1x128x128xf32>
    %143 = arith.addf %140, %142 : vector<1x128x128xf32>
    %cst_105 = arith.constant 5.000000e-01 : f32
    %144 = vector.broadcast %cst_105 : f32 to vector<1x128x128xf32>
    %145 = arith.mulf %144, %143 : vector<1x128x128xf32>
    %cst_106 = arith.constant 5.000000e-01 : f32
    %146 = vector.broadcast %cst_106 : f32 to vector<1x128x128xf32>
    %147 = arith.mulf %146, %143 : vector<1x128x128xf32>
    %148 = math.tanh %147 : vector<1x128x128xf32>
    %cst_107 = arith.constant 1.000000e+00 : f32
    %149 = vector.broadcast %cst_107 : f32 to vector<1x128x128xf32>
    %150 = arith.addf %149, %148 : vector<1x128x128xf32>
    %151 = arith.mulf %145, %150 : vector<1x128x128xf32>
    %152 = arith.truncf %151 : vector<1x128x128xf32> to vector<1x128x128xbf16>
    %c7_108 = arith.constant 7 : index
    %c0_109 = arith.constant 0 : index
    %c128_110 = arith.constant 128 : index
    %153 = vector.load %arg8[%c7_108, %c0_109, %c128_110] : memref<8x128x384xbf16, #tpu.memory_space<vmem>>, vector<1x128x128xbf16>
    tpu.vector_store %arg8[%c7_108, %c0_109, %c128_110], %152 {strides = array<i32>} : memref<8x128x384xbf16, #tpu.memory_space<vmem>>, vector<1x128x128xbf16>,
    %c6_111 = arith.constant 6 : index
    %c0_112 = arith.constant 0 : index
    %c256_113 = arith.constant 256 : index
    %154 = vector.load %arg8[%c6_111, %c0_112, %c256_113] : memref<8x128x384xbf16, #tpu.memory_space<vmem>>, vector<1x128x128xbf16>
    tpu.vector_store %arg8[%c6_111, %c0_112, %c256_113], %152 {strides = array<i32>} : memref<8x128x384xbf16, #tpu.memory_space<vmem>>, vector<1x128x128xbf16>,
    %c0_114 = arith.constant 0 : index
    %c0_115 = arith.constant 0 : index
    %c0_116 = arith.constant 0 : index
    %155 = vector.load %arg8[%c0_114, %c0_115, %c0_116] : memref<8x128x384xbf16, #tpu.memory_space<vmem>>, vector<8x128x384xbf16>
    %156 = vector.shape_cast %155 : vector<8x128x384xbf16> to vector<1024x384xbf16>
    %c0_117 = arith.constant 0 : index
    %c0_118 = arith.constant 0 : index
    %157 = vector.load %arg4[%c0_117, %c0_118] : memref<384x128xbf16, #tpu.memory_space<vmem>>, vector<384x128xbf16>
    %cst_119 = arith.constant dense<0.000000e+00> : vector<1024x128xf32>
    %158 = tpu.matmul %156, %157, %cst_119 {dimension_numbers = #tpu.dot_dimension_numbers<[1], [0], [0], [1], [0, 0, 1, 1], [], []>} : vector<1024x384xbf16>, vector<384x128xbf16>, vector<1024x128xf32> -> vector<1024x128xf32>
    %c0_120 = arith.constant 0 : index
    %c0_121 = arith.constant 0 : index
    %159 = vector.load %arg5[%c0_120, %c0_121] : memref<1x128xf32, #tpu.memory_space<vmem>>, vector<1x128xf32>
    %160 = vector.broadcast %159 : vector<1x128xf32> to vector<1024x128xf32>
    %161 = arith.addf %158, %160 : vector<1024x128xf32>
    %162 = vector.shape_cast %161 : vector<1024x128xf32> to vector<8x128x128xf32>
    %163 = arith.truncf %162 : vector<8x128x128xf32> to vector<8x128x128xbf16>
    %c0_122 = arith.constant 0 : index
    %c0_123 = arith.constant 0 : index
    %c0_124 = arith.constant 0 : index
    %164 = vector.load %arg6[%c0_122, %c0_123, %c0_124] : memref<8x128x128xbf16, #tpu.memory_space<vmem>>, vector<8x128x128xbf16>
    tpu.vector_store %arg6[%c0_122, %c0_123, %c0_124], %163 {strides = array<i32>} : memref<8x128x128xbf16, #tpu.memory_space<vmem>>, vector<8x128x128xbf16>,
    %cst_125 = arith.constant dense<0.000000e+00> : vector<128xf32>
    %165 = vector.multi_reduction <add>, %161, %cst_125 [0] : vector<1024x128xf32> to vector<128xf32>
    %166 = vector.shape_cast %165 : vector<128xf32> to vector<1x128xf32>
    %167 = vector.shape_cast %166 : vector<1x128xf32> to vector<1x1x128xf32>
    %c0_126 = arith.constant 0 : index
    %c0_127 = arith.constant 0 : index
    %c0_128 = arith.constant 0 : index
    %168 = vector.load %arg7[%c0_126, %c0_127, %c0_128] : memref<1x2x128xf32, #tpu.memory_space<vmem>>, vector<1x1x128xf32>
    tpu.vector_store %arg7[%c0_126, %c0_127, %c0_128], %167 {strides = array<i32>} : memref<1x2x128xf32, #tpu.memory_space<vmem>>, vector<1x1x128xf32>,
    %169 = arith.mulf %161, %161 : vector<1024x128xf32>
    %cst_129 = arith.constant dense<0.000000e+00> : vector<128xf32>
    %170 = vector.multi_reduction <add>, %169, %cst_129 [0] : vector<1024x128xf32> to vector<128xf32>
    %171 = vector.shape_cast %170 : vector<128xf32> to vector<1x128xf32>
    %172 = vector.shape_cast %171 : vector<1x128xf32> to vector<1x1x128xf32>
    %c0_130 = arith.constant 0 : index
    %c1_131 = arith.constant 1 : index
    %c0_132 = arith.constant 0 : index
    %173 = vector.load %arg7[%c0_130, %c1_131, %c0_132] : memref<1x2x128xf32, #tpu.memory_space<vmem>>, vector<1x1x128xf32>
    tpu.vector_store %arg7[%c0_130, %c1_131, %c0_132], %172 {strides = array<i32>} : memref<1x2x128xf32, #tpu.memory_space<vmem>>, vector<1x1x128xf32>,
    return
  }
  func.func @transform_0(%arg0: i32) -> (i32, i32, i32) {
    %c0_i32 = arith.constant 0 : i32
    %c0_i32_0 = arith.constant 0 : i32
    %c0_i32_1 = arith.constant 0 : i32
    return %c0_i32, %arg0, %c0_i32_0 : i32, i32, i32
  }
  func.func @transform_1(%arg0: i32) -> (i32, i32) {
    %c0_i32 = arith.constant 0 : i32
    %c0_i32_0 = arith.constant 0 : i32
    %c0_i32_1 = arith.constant 0 : i32
    return %c0_i32, %c0_i32_0 : i32, i32
  }
  func.func @transform_2(%arg0: i32) -> (i32, i32) {
    %c0_i32 = arith.constant 0 : i32
    %c0_i32_0 = arith.constant 0 : i32
    %c0_i32_1 = arith.constant 0 : i32
    return %c0_i32, %c0_i32_0 : i32, i32
  }
  func.func @transform_3(%arg0: i32) -> (i32, i32) {
    %c0_i32 = arith.constant 0 : i32
    %c0_i32_0 = arith.constant 0 : i32
    %c0_i32_1 = arith.constant 0 : i32
    return %c0_i32, %c0_i32_0 : i32, i32
  }
  func.func @transform_4(%arg0: i32) -> (i32, i32) {
    %c0_i32 = arith.constant 0 : i32
    %c0_i32_0 = arith.constant 0 : i32
    %c0_i32_1 = arith.constant 0 : i32
    return %c0_i32, %c0_i32_0 : i32, i32
  }
  func.func @transform_5(%arg0: i32) -> (i32, i32, i32) {
    %c0_i32 = arith.constant 0 : i32
    %c0_i32_0 = arith.constant 0 : i32
    %c0_i32_1 = arith.constant 0 : i32
    return %c0_i32, %arg0, %c0_i32_0 : i32, i32, i32
  }
  func.func @transform_6(%arg0: i32) -> (i32, i32, i32) {
    %c0_i32 = arith.constant 0 : i32
    %c0_i32_0 = arith.constant 0 : i32
    %c0_i32_1 = arith.constant 0 : i32
    return %arg0, %c0_i32, %c0_i32_0 : i32, i32, i32
  }
}

module attributes {stable_mosaic.version = 11 : i64} {
  func.func @_stage2_kernel(%arg0: i32, %arg1: memref<8x128x128xbf16, #tpu.memory_space<vmem>>, %arg2: memref<8x128x128xf32, #tpu.memory_space<vmem>>, %arg3: memref<1x128xf32, #tpu.memory_space<vmem>>, %arg4: memref<1x128xf32, #tpu.memory_space<vmem>>, %arg5: memref<384x128xbf16, #tpu.memory_space<vmem>>, %arg6: memref<1x128xf32, #tpu.memory_space<vmem>>, %arg7: memref<8x128x128xf32, #tpu.memory_space<vmem>>, %arg8: memref<8x128x384xbf16, #tpu.memory_space<vmem>>) attributes {dimension_semantics = [#tpu.dimension_semantics<parallel>], iteration_bounds = array<i64: 2>, scalar_prefetch = 0 : i64, scratch_operands = 1 : i64, tpu.core_type = #tpu.core_type<tc>, window_params = [{transform_indices = @transform_0, window_bounds = array<i64: 8, 128, 128>}, {transform_indices = @transform_1, window_bounds = array<i64: 8, 128, 128>}, {pipeline_mode = #tpu.pipeline_mode<synchronous>, transform_indices = @transform_2, window_bounds = array<i64: 1, 128>}, {pipeline_mode = #tpu.pipeline_mode<synchronous>, transform_indices = @transform_3, window_bounds = array<i64: 1, 128>}, {pipeline_mode = #tpu.pipeline_mode<synchronous>, transform_indices = @transform_4, window_bounds = array<i64: 384, 128>}, {pipeline_mode = #tpu.pipeline_mode<synchronous>, transform_indices = @transform_5, window_bounds = array<i64: 1, 128>}, {transform_indices = @transform_6, window_bounds = array<i64: 8, 128, 128>}]} {
    %c0 = arith.constant 0 : index
    %c0_0 = arith.constant 0 : index
    %0 = vector.load %arg3[%c0, %c0_0] : memref<1x128xf32, #tpu.memory_space<vmem>>, vector<1x128xf32>
    %c0_1 = arith.constant 0 : index
    %c0_2 = arith.constant 0 : index
    %1 = vector.load %arg4[%c0_1, %c0_2] : memref<1x128xf32, #tpu.memory_space<vmem>>, vector<1x128xf32>
    %cst = arith.constant 0.000000e+00 : bf16
    %2 = vector.broadcast %cst : bf16 to vector<1x128x128xbf16>
    %c0_3 = arith.constant 0 : index
    %c0_4 = arith.constant 0 : index
    %c0_5 = arith.constant 0 : index
    %3 = vector.load %arg8[%c0_3, %c0_4, %c0_5] : memref<8x128x384xbf16, #tpu.memory_space<vmem>>, vector<1x128x128xbf16>
    tpu.vector_store %arg8[%c0_3, %c0_4, %c0_5], %2 {strides = array<i32>} : memref<8x128x384xbf16, #tpu.memory_space<vmem>>, vector<1x128x128xbf16>,
    %c7 = arith.constant 7 : index
    %c0_6 = arith.constant 0 : index
    %c256 = arith.constant 256 : index
    %4 = vector.load %arg8[%c7, %c0_6, %c256] : memref<8x128x384xbf16, #tpu.memory_space<vmem>>, vector<1x128x128xbf16>
    tpu.vector_store %arg8[%c7, %c0_6, %c256], %2 {strides = array<i32>} : memref<8x128x384xbf16, #tpu.memory_space<vmem>>, vector<1x128x128xbf16>,
    %c0_7 = arith.constant 0 : index
    %c0_8 = arith.constant 0 : index
    %c0_9 = arith.constant 0 : index
    %5 = vector.load %arg1[%c0_7, %c0_8, %c0_9] : memref<8x128x128xbf16, #tpu.memory_space<vmem>>, vector<1x128x128xbf16>
    %6 = arith.extf %5 : vector<1x128x128xbf16> to vector<1x128x128xf32>
    %7 = vector.shape_cast %0 : vector<1x128xf32> to vector<1x1x128xf32>
    %8 = vector.broadcast %7 : vector<1x1x128xf32> to vector<1x128x128xf32>
    %9 = arith.mulf %6, %8 : vector<1x128x128xf32>
    %10 = vector.shape_cast %1 : vector<1x128xf32> to vector<1x1x128xf32>
    %11 = vector.broadcast %10 : vector<1x1x128xf32> to vector<1x128x128xf32>
    %12 = arith.addf %9, %11 : vector<1x128x128xf32>
    %cst_10 = arith.constant 5.000000e-01 : f32
    %13 = vector.broadcast %cst_10 : f32 to vector<1x128x128xf32>
    %14 = arith.mulf %13, %12 : vector<1x128x128xf32>
    %cst_11 = arith.constant 5.000000e-01 : f32
    %15 = vector.broadcast %cst_11 : f32 to vector<1x128x128xf32>
    %16 = arith.mulf %15, %12 : vector<1x128x128xf32>
    %17 = math.tanh %16 : vector<1x128x128xf32>
    %cst_12 = arith.constant 1.000000e+00 : f32
    %18 = vector.broadcast %cst_12 : f32 to vector<1x128x128xf32>
    %19 = arith.addf %18, %17 : vector<1x128x128xf32>
    %20 = arith.mulf %14, %19 : vector<1x128x128xf32>
    %21 = arith.truncf %20 : vector<1x128x128xf32> to vector<1x128x128xbf16>
    %c0_13 = arith.constant 0 : index
    %c0_14 = arith.constant 0 : index
    %c128 = arith.constant 128 : index
    %22 = vector.load %arg8[%c0_13, %c0_14, %c128] : memref<8x128x384xbf16, #tpu.memory_space<vmem>>, vector<1x128x128xbf16>
    tpu.vector_store %arg8[%c0_13, %c0_14, %c128], %21 {strides = array<i32>} : memref<8x128x384xbf16, #tpu.memory_space<vmem>>, vector<1x128x128xbf16>,
    %c1 = arith.constant 1 : index
    %c0_15 = arith.constant 0 : index
    %c0_16 = arith.constant 0 : index
    %23 = vector.load %arg8[%c1, %c0_15, %c0_16] : memref<8x128x384xbf16, #tpu.memory_space<vmem>>, vector<1x128x128xbf16>
    tpu.vector_store %arg8[%c1, %c0_15, %c0_16], %21 {strides = array<i32>} : memref<8x128x384xbf16, #tpu.memory_space<vmem>>, vector<1x128x128xbf16>,
    %c1_17 = arith.constant 1 : index
    %c0_18 = arith.constant 0 : index
    %c0_19 = arith.constant 0 : index
    %24 = vector.load %arg1[%c1_17, %c0_18, %c0_19] : memref<8x128x128xbf16, #tpu.memory_space<vmem>>, vector<1x128x128xbf16>
    %25 = arith.extf %24 : vector<1x128x128xbf16> to vector<1x128x128xf32>
    %26 = vector.shape_cast %0 : vector<1x128xf32> to vector<1x1x128xf32>
    %27 = vector.broadcast %26 : vector<1x1x128xf32> to vector<1x128x128xf32>
    %28 = arith.mulf %25, %27 : vector<1x128x128xf32>
    %29 = vector.shape_cast %1 : vector<1x128xf32> to vector<1x1x128xf32>
    %30 = vector.broadcast %29 : vector<1x1x128xf32> to vector<1x128x128xf32>
    %31 = arith.addf %28, %30 : vector<1x128x128xf32>
    %cst_20 = arith.constant 5.000000e-01 : f32
    %32 = vector.broadcast %cst_20 : f32 to vector<1x128x128xf32>
    %33 = arith.mulf %32, %31 : vector<1x128x128xf32>
    %cst_21 = arith.constant 5.000000e-01 : f32
    %34 = vector.broadcast %cst_21 : f32 to vector<1x128x128xf32>
    %35 = arith.mulf %34, %31 : vector<1x128x128xf32>
    %36 = math.tanh %35 : vector<1x128x128xf32>
    %cst_22 = arith.constant 1.000000e+00 : f32
    %37 = vector.broadcast %cst_22 : f32 to vector<1x128x128xf32>
    %38 = arith.addf %37, %36 : vector<1x128x128xf32>
    %39 = arith.mulf %33, %38 : vector<1x128x128xf32>
    %40 = arith.truncf %39 : vector<1x128x128xf32> to vector<1x128x128xbf16>
    %c1_23 = arith.constant 1 : index
    %c0_24 = arith.constant 0 : index
    %c128_25 = arith.constant 128 : index
    %41 = vector.load %arg8[%c1_23, %c0_24, %c128_25] : memref<8x128x384xbf16, #tpu.memory_space<vmem>>, vector<1x128x128xbf16>
    tpu.vector_store %arg8[%c1_23, %c0_24, %c128_25], %40 {strides = array<i32>} : memref<8x128x384xbf16, #tpu.memory_space<vmem>>, vector<1x128x128xbf16>,
    %c2 = arith.constant 2 : index
    %c0_26 = arith.constant 0 : index
    %c0_27 = arith.constant 0 : index
    %42 = vector.load %arg8[%c2, %c0_26, %c0_27] : memref<8x128x384xbf16, #tpu.memory_space<vmem>>, vector<1x128x128xbf16>
    tpu.vector_store %arg8[%c2, %c0_26, %c0_27], %40 {strides = array<i32>} : memref<8x128x384xbf16, #tpu.memory_space<vmem>>, vector<1x128x128xbf16>,
    %c0_28 = arith.constant 0 : index
    %c0_29 = arith.constant 0 : index
    %c256_30 = arith.constant 256 : index
    %43 = vector.load %arg8[%c0_28, %c0_29, %c256_30] : memref<8x128x384xbf16, #tpu.memory_space<vmem>>, vector<1x128x128xbf16>
    tpu.vector_store %arg8[%c0_28, %c0_29, %c256_30], %40 {strides = array<i32>} : memref<8x128x384xbf16, #tpu.memory_space<vmem>>, vector<1x128x128xbf16>,
    %c2_31 = arith.constant 2 : index
    %c0_32 = arith.constant 0 : index
    %c0_33 = arith.constant 0 : index
    %44 = vector.load %arg1[%c2_31, %c0_32, %c0_33] : memref<8x128x128xbf16, #tpu.memory_space<vmem>>, vector<1x128x128xbf16>
    %45 = arith.extf %44 : vector<1x128x128xbf16> to vector<1x128x128xf32>
    %46 = vector.shape_cast %0 : vector<1x128xf32> to vector<1x1x128xf32>
    %47 = vector.broadcast %46 : vector<1x1x128xf32> to vector<1x128x128xf32>
    %48 = arith.mulf %45, %47 : vector<1x128x128xf32>
    %49 = vector.shape_cast %1 : vector<1x128xf32> to vector<1x1x128xf32>
    %50 = vector.broadcast %49 : vector<1x1x128xf32> to vector<1x128x128xf32>
    %51 = arith.addf %48, %50 : vector<1x128x128xf32>
    %cst_34 = arith.constant 5.000000e-01 : f32
    %52 = vector.broadcast %cst_34 : f32 to vector<1x128x128xf32>
    %53 = arith.mulf %52, %51 : vector<1x128x128xf32>
    %cst_35 = arith.constant 5.000000e-01 : f32
    %54 = vector.broadcast %cst_35 : f32 to vector<1x128x128xf32>
    %55 = arith.mulf %54, %51 : vector<1x128x128xf32>
    %56 = math.tanh %55 : vector<1x128x128xf32>
    %cst_36 = arith.constant 1.000000e+00 : f32
    %57 = vector.broadcast %cst_36 : f32 to vector<1x128x128xf32>
    %58 = arith.addf %57, %56 : vector<1x128x128xf32>
    %59 = arith.mulf %53, %58 : vector<1x128x128xf32>
    %60 = arith.truncf %59 : vector<1x128x128xf32> to vector<1x128x128xbf16>
    %c2_37 = arith.constant 2 : index
    %c0_38 = arith.constant 0 : index
    %c128_39 = arith.constant 128 : index
    %61 = vector.load %arg8[%c2_37, %c0_38, %c128_39] : memref<8x128x384xbf16, #tpu.memory_space<vmem>>, vector<1x128x128xbf16>
    tpu.vector_store %arg8[%c2_37, %c0_38, %c128_39], %60 {strides = array<i32>} : memref<8x128x384xbf16, #tpu.memory_space<vmem>>, vector<1x128x128xbf16>,
    %c3 = arith.constant 3 : index
    %c0_40 = arith.constant 0 : index
    %c0_41 = arith.constant 0 : index
    %62 = vector.load %arg8[%c3, %c0_40, %c0_41] : memref<8x128x384xbf16, #tpu.memory_space<vmem>>, vector<1x128x128xbf16>
    tpu.vector_store %arg8[%c3, %c0_40, %c0_41], %60 {strides = array<i32>} : memref<8x128x384xbf16, #tpu.memory_space<vmem>>, vector<1x128x128xbf16>,
    %c1_42 = arith.constant 1 : index
    %c0_43 = arith.constant 0 : index
    %c256_44 = arith.constant 256 : index
    %63 = vector.load %arg8[%c1_42, %c0_43, %c256_44] : memref<8x128x384xbf16, #tpu.memory_space<vmem>>, vector<1x128x128xbf16>
    tpu.vector_store %arg8[%c1_42, %c0_43, %c256_44], %60 {strides = array<i32>} : memref<8x128x384xbf16, #tpu.memory_space<vmem>>, vector<1x128x128xbf16>,
    %c3_45 = arith.constant 3 : index
    %c0_46 = arith.constant 0 : index
    %c0_47 = arith.constant 0 : index
    %64 = vector.load %arg1[%c3_45, %c0_46, %c0_47] : memref<8x128x128xbf16, #tpu.memory_space<vmem>>, vector<1x128x128xbf16>
    %65 = arith.extf %64 : vector<1x128x128xbf16> to vector<1x128x128xf32>
    %66 = vector.shape_cast %0 : vector<1x128xf32> to vector<1x1x128xf32>
    %67 = vector.broadcast %66 : vector<1x1x128xf32> to vector<1x128x128xf32>
    %68 = arith.mulf %65, %67 : vector<1x128x128xf32>
    %69 = vector.shape_cast %1 : vector<1x128xf32> to vector<1x1x128xf32>
    %70 = vector.broadcast %69 : vector<1x1x128xf32> to vector<1x128x128xf32>
    %71 = arith.addf %68, %70 : vector<1x128x128xf32>
    %cst_48 = arith.constant 5.000000e-01 : f32
    %72 = vector.broadcast %cst_48 : f32 to vector<1x128x128xf32>
    %73 = arith.mulf %72, %71 : vector<1x128x128xf32>
    %cst_49 = arith.constant 5.000000e-01 : f32
    %74 = vector.broadcast %cst_49 : f32 to vector<1x128x128xf32>
    %75 = arith.mulf %74, %71 : vector<1x128x128xf32>
    %76 = math.tanh %75 : vector<1x128x128xf32>
    %cst_50 = arith.constant 1.000000e+00 : f32
    %77 = vector.broadcast %cst_50 : f32 to vector<1x128x128xf32>
    %78 = arith.addf %77, %76 : vector<1x128x128xf32>
    %79 = arith.mulf %73, %78 : vector<1x128x128xf32>
    %80 = arith.truncf %79 : vector<1x128x128xf32> to vector<1x128x128xbf16>
    %c3_51 = arith.constant 3 : index
    %c0_52 = arith.constant 0 : index
    %c128_53 = arith.constant 128 : index
    %81 = vector.load %arg8[%c3_51, %c0_52, %c128_53] : memref<8x128x384xbf16, #tpu.memory_space<vmem>>, vector<1x128x128xbf16>
    tpu.vector_store %arg8[%c3_51, %c0_52, %c128_53], %80 {strides = array<i32>} : memref<8x128x384xbf16, #tpu.memory_space<vmem>>, vector<1x128x128xbf16>,
    %c4 = arith.constant 4 : index
    %c0_54 = arith.constant 0 : index
    %c0_55 = arith.constant 0 : index
    %82 = vector.load %arg8[%c4, %c0_54, %c0_55] : memref<8x128x384xbf16, #tpu.memory_space<vmem>>, vector<1x128x128xbf16>
    tpu.vector_store %arg8[%c4, %c0_54, %c0_55], %80 {strides = array<i32>} : memref<8x128x384xbf16, #tpu.memory_space<vmem>>, vector<1x128x128xbf16>,
    %c2_56 = arith.constant 2 : index
    %c0_57 = arith.constant 0 : index
    %c256_58 = arith.constant 256 : index
    %83 = vector.load %arg8[%c2_56, %c0_57, %c256_58] : memref<8x128x384xbf16, #tpu.memory_space<vmem>>, vector<1x128x128xbf16>
    tpu.vector_store %arg8[%c2_56, %c0_57, %c256_58], %80 {strides = array<i32>} : memref<8x128x384xbf16, #tpu.memory_space<vmem>>, vector<1x128x128xbf16>,
    %c4_59 = arith.constant 4 : index
    %c0_60 = arith.constant 0 : index
    %c0_61 = arith.constant 0 : index
    %84 = vector.load %arg1[%c4_59, %c0_60, %c0_61] : memref<8x128x128xbf16, #tpu.memory_space<vmem>>, vector<1x128x128xbf16>
    %85 = arith.extf %84 : vector<1x128x128xbf16> to vector<1x128x128xf32>
    %86 = vector.shape_cast %0 : vector<1x128xf32> to vector<1x1x128xf32>
    %87 = vector.broadcast %86 : vector<1x1x128xf32> to vector<1x128x128xf32>
    %88 = arith.mulf %85, %87 : vector<1x128x128xf32>
    %89 = vector.shape_cast %1 : vector<1x128xf32> to vector<1x1x128xf32>
    %90 = vector.broadcast %89 : vector<1x1x128xf32> to vector<1x128x128xf32>
    %91 = arith.addf %88, %90 : vector<1x128x128xf32>
    %cst_62 = arith.constant 5.000000e-01 : f32
    %92 = vector.broadcast %cst_62 : f32 to vector<1x128x128xf32>
    %93 = arith.mulf %92, %91 : vector<1x128x128xf32>
    %cst_63 = arith.constant 5.000000e-01 : f32
    %94 = vector.broadcast %cst_63 : f32 to vector<1x128x128xf32>
    %95 = arith.mulf %94, %91 : vector<1x128x128xf32>
    %96 = math.tanh %95 : vector<1x128x128xf32>
    %cst_64 = arith.constant 1.000000e+00 : f32
    %97 = vector.broadcast %cst_64 : f32 to vector<1x128x128xf32>
    %98 = arith.addf %97, %96 : vector<1x128x128xf32>
    %99 = arith.mulf %93, %98 : vector<1x128x128xf32>
    %100 = arith.truncf %99 : vector<1x128x128xf32> to vector<1x128x128xbf16>
    %c4_65 = arith.constant 4 : index
    %c0_66 = arith.constant 0 : index
    %c128_67 = arith.constant 128 : index
    %101 = vector.load %arg8[%c4_65, %c0_66, %c128_67] : memref<8x128x384xbf16, #tpu.memory_space<vmem>>, vector<1x128x128xbf16>
    tpu.vector_store %arg8[%c4_65, %c0_66, %c128_67], %100 {strides = array<i32>} : memref<8x128x384xbf16, #tpu.memory_space<vmem>>, vector<1x128x128xbf16>,
    %c5 = arith.constant 5 : index
    %c0_68 = arith.constant 0 : index
    %c0_69 = arith.constant 0 : index
    %102 = vector.load %arg8[%c5, %c0_68, %c0_69] : memref<8x128x384xbf16, #tpu.memory_space<vmem>>, vector<1x128x128xbf16>
    tpu.vector_store %arg8[%c5, %c0_68, %c0_69], %100 {strides = array<i32>} : memref<8x128x384xbf16, #tpu.memory_space<vmem>>, vector<1x128x128xbf16>,
    %c3_70 = arith.constant 3 : index
    %c0_71 = arith.constant 0 : index
    %c256_72 = arith.constant 256 : index
    %103 = vector.load %arg8[%c3_70, %c0_71, %c256_72] : memref<8x128x384xbf16, #tpu.memory_space<vmem>>, vector<1x128x128xbf16>
    tpu.vector_store %arg8[%c3_70, %c0_71, %c256_72], %100 {strides = array<i32>} : memref<8x128x384xbf16, #tpu.memory_space<vmem>>, vector<1x128x128xbf16>,
    %c5_73 = arith.constant 5 : index
    %c0_74 = arith.constant 0 : index
    %c0_75 = arith.constant 0 : index
    %104 = vector.load %arg1[%c5_73, %c0_74, %c0_75] : memref<8x128x128xbf16, #tpu.memory_space<vmem>>, vector<1x128x128xbf16>
    %105 = arith.extf %104 : vector<1x128x128xbf16> to vector<1x128x128xf32>
    %106 = vector.shape_cast %0 : vector<1x128xf32> to vector<1x1x128xf32>
    %107 = vector.broadcast %106 : vector<1x1x128xf32> to vector<1x128x128xf32>
    %108 = arith.mulf %105, %107 : vector<1x128x128xf32>
    %109 = vector.shape_cast %1 : vector<1x128xf32> to vector<1x1x128xf32>
    %110 = vector.broadcast %109 : vector<1x1x128xf32> to vector<1x128x128xf32>
    %111 = arith.addf %108, %110 : vector<1x128x128xf32>
    %cst_76 = arith.constant 5.000000e-01 : f32
    %112 = vector.broadcast %cst_76 : f32 to vector<1x128x128xf32>
    %113 = arith.mulf %112, %111 : vector<1x128x128xf32>
    %cst_77 = arith.constant 5.000000e-01 : f32
    %114 = vector.broadcast %cst_77 : f32 to vector<1x128x128xf32>
    %115 = arith.mulf %114, %111 : vector<1x128x128xf32>
    %116 = math.tanh %115 : vector<1x128x128xf32>
    %cst_78 = arith.constant 1.000000e+00 : f32
    %117 = vector.broadcast %cst_78 : f32 to vector<1x128x128xf32>
    %118 = arith.addf %117, %116 : vector<1x128x128xf32>
    %119 = arith.mulf %113, %118 : vector<1x128x128xf32>
    %120 = arith.truncf %119 : vector<1x128x128xf32> to vector<1x128x128xbf16>
    %c5_79 = arith.constant 5 : index
    %c0_80 = arith.constant 0 : index
    %c128_81 = arith.constant 128 : index
    %121 = vector.load %arg8[%c5_79, %c0_80, %c128_81] : memref<8x128x384xbf16, #tpu.memory_space<vmem>>, vector<1x128x128xbf16>
    tpu.vector_store %arg8[%c5_79, %c0_80, %c128_81], %120 {strides = array<i32>} : memref<8x128x384xbf16, #tpu.memory_space<vmem>>, vector<1x128x128xbf16>,
    %c6 = arith.constant 6 : index
    %c0_82 = arith.constant 0 : index
    %c0_83 = arith.constant 0 : index
    %122 = vector.load %arg8[%c6, %c0_82, %c0_83] : memref<8x128x384xbf16, #tpu.memory_space<vmem>>, vector<1x128x128xbf16>
    tpu.vector_store %arg8[%c6, %c0_82, %c0_83], %120 {strides = array<i32>} : memref<8x128x384xbf16, #tpu.memory_space<vmem>>, vector<1x128x128xbf16>,
    %c4_84 = arith.constant 4 : index
    %c0_85 = arith.constant 0 : index
    %c256_86 = arith.constant 256 : index
    %123 = vector.load %arg8[%c4_84, %c0_85, %c256_86] : memref<8x128x384xbf16, #tpu.memory_space<vmem>>, vector<1x128x128xbf16>
    tpu.vector_store %arg8[%c4_84, %c0_85, %c256_86], %120 {strides = array<i32>} : memref<8x128x384xbf16, #tpu.memory_space<vmem>>, vector<1x128x128xbf16>,
    %c6_87 = arith.constant 6 : index
    %c0_88 = arith.constant 0 : index
    %c0_89 = arith.constant 0 : index
    %124 = vector.load %arg1[%c6_87, %c0_88, %c0_89] : memref<8x128x128xbf16, #tpu.memory_space<vmem>>, vector<1x128x128xbf16>
    %125 = arith.extf %124 : vector<1x128x128xbf16> to vector<1x128x128xf32>
    %126 = vector.shape_cast %0 : vector<1x128xf32> to vector<1x1x128xf32>
    %127 = vector.broadcast %126 : vector<1x1x128xf32> to vector<1x128x128xf32>
    %128 = arith.mulf %125, %127 : vector<1x128x128xf32>
    %129 = vector.shape_cast %1 : vector<1x128xf32> to vector<1x1x128xf32>
    %130 = vector.broadcast %129 : vector<1x1x128xf32> to vector<1x128x128xf32>
    %131 = arith.addf %128, %130 : vector<1x128x128xf32>
    %cst_90 = arith.constant 5.000000e-01 : f32
    %132 = vector.broadcast %cst_90 : f32 to vector<1x128x128xf32>
    %133 = arith.mulf %132, %131 : vector<1x128x128xf32>
    %cst_91 = arith.constant 5.000000e-01 : f32
    %134 = vector.broadcast %cst_91 : f32 to vector<1x128x128xf32>
    %135 = arith.mulf %134, %131 : vector<1x128x128xf32>
    %136 = math.tanh %135 : vector<1x128x128xf32>
    %cst_92 = arith.constant 1.000000e+00 : f32
    %137 = vector.broadcast %cst_92 : f32 to vector<1x128x128xf32>
    %138 = arith.addf %137, %136 : vector<1x128x128xf32>
    %139 = arith.mulf %133, %138 : vector<1x128x128xf32>
    %140 = arith.truncf %139 : vector<1x128x128xf32> to vector<1x128x128xbf16>
    %c6_93 = arith.constant 6 : index
    %c0_94 = arith.constant 0 : index
    %c128_95 = arith.constant 128 : index
    %141 = vector.load %arg8[%c6_93, %c0_94, %c128_95] : memref<8x128x384xbf16, #tpu.memory_space<vmem>>, vector<1x128x128xbf16>
    tpu.vector_store %arg8[%c6_93, %c0_94, %c128_95], %140 {strides = array<i32>} : memref<8x128x384xbf16, #tpu.memory_space<vmem>>, vector<1x128x128xbf16>,
    %c7_96 = arith.constant 7 : index
    %c0_97 = arith.constant 0 : index
    %c0_98 = arith.constant 0 : index
    %142 = vector.load %arg8[%c7_96, %c0_97, %c0_98] : memref<8x128x384xbf16, #tpu.memory_space<vmem>>, vector<1x128x128xbf16>
    tpu.vector_store %arg8[%c7_96, %c0_97, %c0_98], %140 {strides = array<i32>} : memref<8x128x384xbf16, #tpu.memory_space<vmem>>, vector<1x128x128xbf16>,
    %c5_99 = arith.constant 5 : index
    %c0_100 = arith.constant 0 : index
    %c256_101 = arith.constant 256 : index
    %143 = vector.load %arg8[%c5_99, %c0_100, %c256_101] : memref<8x128x384xbf16, #tpu.memory_space<vmem>>, vector<1x128x128xbf16>
    tpu.vector_store %arg8[%c5_99, %c0_100, %c256_101], %140 {strides = array<i32>} : memref<8x128x384xbf16, #tpu.memory_space<vmem>>, vector<1x128x128xbf16>,
    %c7_102 = arith.constant 7 : index
    %c0_103 = arith.constant 0 : index
    %c0_104 = arith.constant 0 : index
    %144 = vector.load %arg1[%c7_102, %c0_103, %c0_104] : memref<8x128x128xbf16, #tpu.memory_space<vmem>>, vector<1x128x128xbf16>
    %145 = arith.extf %144 : vector<1x128x128xbf16> to vector<1x128x128xf32>
    %146 = vector.shape_cast %0 : vector<1x128xf32> to vector<1x1x128xf32>
    %147 = vector.broadcast %146 : vector<1x1x128xf32> to vector<1x128x128xf32>
    %148 = arith.mulf %145, %147 : vector<1x128x128xf32>
    %149 = vector.shape_cast %1 : vector<1x128xf32> to vector<1x1x128xf32>
    %150 = vector.broadcast %149 : vector<1x1x128xf32> to vector<1x128x128xf32>
    %151 = arith.addf %148, %150 : vector<1x128x128xf32>
    %cst_105 = arith.constant 5.000000e-01 : f32
    %152 = vector.broadcast %cst_105 : f32 to vector<1x128x128xf32>
    %153 = arith.mulf %152, %151 : vector<1x128x128xf32>
    %cst_106 = arith.constant 5.000000e-01 : f32
    %154 = vector.broadcast %cst_106 : f32 to vector<1x128x128xf32>
    %155 = arith.mulf %154, %151 : vector<1x128x128xf32>
    %156 = math.tanh %155 : vector<1x128x128xf32>
    %cst_107 = arith.constant 1.000000e+00 : f32
    %157 = vector.broadcast %cst_107 : f32 to vector<1x128x128xf32>
    %158 = arith.addf %157, %156 : vector<1x128x128xf32>
    %159 = arith.mulf %153, %158 : vector<1x128x128xf32>
    %160 = arith.truncf %159 : vector<1x128x128xf32> to vector<1x128x128xbf16>
    %c7_108 = arith.constant 7 : index
    %c0_109 = arith.constant 0 : index
    %c128_110 = arith.constant 128 : index
    %161 = vector.load %arg8[%c7_108, %c0_109, %c128_110] : memref<8x128x384xbf16, #tpu.memory_space<vmem>>, vector<1x128x128xbf16>
    tpu.vector_store %arg8[%c7_108, %c0_109, %c128_110], %160 {strides = array<i32>} : memref<8x128x384xbf16, #tpu.memory_space<vmem>>, vector<1x128x128xbf16>,
    %c6_111 = arith.constant 6 : index
    %c0_112 = arith.constant 0 : index
    %c256_113 = arith.constant 256 : index
    %162 = vector.load %arg8[%c6_111, %c0_112, %c256_113] : memref<8x128x384xbf16, #tpu.memory_space<vmem>>, vector<1x128x128xbf16>
    tpu.vector_store %arg8[%c6_111, %c0_112, %c256_113], %160 {strides = array<i32>} : memref<8x128x384xbf16, #tpu.memory_space<vmem>>, vector<1x128x128xbf16>,
    %c0_114 = arith.constant 0 : index
    %c0_115 = arith.constant 0 : index
    %c0_116 = arith.constant 0 : index
    %163 = vector.load %arg8[%c0_114, %c0_115, %c0_116] : memref<8x128x384xbf16, #tpu.memory_space<vmem>>, vector<8x128x384xbf16>
    %164 = vector.shape_cast %163 : vector<8x128x384xbf16> to vector<1024x384xbf16>
    %c0_117 = arith.constant 0 : index
    %c0_118 = arith.constant 0 : index
    %165 = vector.load %arg5[%c0_117, %c0_118] : memref<384x128xbf16, #tpu.memory_space<vmem>>, vector<384x128xbf16>
    %cst_119 = arith.constant dense<0.000000e+00> : vector<1024x128xf32>
    %166 = tpu.matmul %164, %165, %cst_119 {dimension_numbers = #tpu.dot_dimension_numbers<[1], [0], [0], [1], [0, 0, 1, 1], [], []>} : vector<1024x384xbf16>, vector<384x128xbf16>, vector<1024x128xf32> -> vector<1024x128xf32>
    %c0_120 = arith.constant 0 : index
    %c0_121 = arith.constant 0 : index
    %167 = vector.load %arg6[%c0_120, %c0_121] : memref<1x128xf32, #tpu.memory_space<vmem>>, vector<1x128xf32>
    %168 = vector.broadcast %167 : vector<1x128xf32> to vector<1024x128xf32>
    %169 = arith.addf %166, %168 : vector<1024x128xf32>
    %c0_122 = arith.constant 0 : index
    %c0_123 = arith.constant 0 : index
    %c0_124 = arith.constant 0 : index
    %170 = vector.load %arg2[%c0_122, %c0_123, %c0_124] : memref<8x128x128xf32, #tpu.memory_space<vmem>>, vector<8x128x128xf32>
    %171 = vector.shape_cast %169 : vector<1024x128xf32> to vector<8x128x128xf32>
    %172 = arith.addf %170, %171 : vector<8x128x128xf32>
    %c0_125 = arith.constant 0 : index
    %c0_126 = arith.constant 0 : index
    %c0_127 = arith.constant 0 : index
    %173 = vector.load %arg7[%c0_125, %c0_126, %c0_127] : memref<8x128x128xf32, #tpu.memory_space<vmem>>, vector<8x128x128xf32>
    tpu.vector_store %arg7[%c0_125, %c0_126, %c0_127], %172 {strides = array<i32>} : memref<8x128x128xf32, #tpu.memory_space<vmem>>, vector<8x128x128xf32>,
    return
  }
  func.func @transform_0(%arg0: i32) -> (i32, i32, i32) {
    %c0_i32 = arith.constant 0 : i32
    %c0_i32_0 = arith.constant 0 : i32
    %c0_i32_1 = arith.constant 0 : i32
    return %c0_i32, %arg0, %c0_i32_0 : i32, i32, i32
  }
  func.func @transform_1(%arg0: i32) -> (i32, i32, i32) {
    %c0_i32 = arith.constant 0 : i32
    %c0_i32_0 = arith.constant 0 : i32
    %c0_i32_1 = arith.constant 0 : i32
    return %c0_i32, %arg0, %c0_i32_0 : i32, i32, i32
  }
  func.func @transform_2(%arg0: i32) -> (i32, i32) {
    %c0_i32 = arith.constant 0 : i32
    %c0_i32_0 = arith.constant 0 : i32
    %c0_i32_1 = arith.constant 0 : i32
    return %c0_i32, %c0_i32_0 : i32, i32
  }
  func.func @transform_3(%arg0: i32) -> (i32, i32) {
    %c0_i32 = arith.constant 0 : i32
    %c0_i32_0 = arith.constant 0 : i32
    %c0_i32_1 = arith.constant 0 : i32
    return %c0_i32, %c0_i32_0 : i32, i32
  }
  func.func @transform_4(%arg0: i32) -> (i32, i32) {
    %c0_i32 = arith.constant 0 : i32
    %c0_i32_0 = arith.constant 0 : i32
    %c0_i32_1 = arith.constant 0 : i32
    return %c0_i32, %c0_i32_0 : i32, i32
  }
  func.func @transform_5(%arg0: i32) -> (i32, i32) {
    %c0_i32 = arith.constant 0 : i32
    %c0_i32_0 = arith.constant 0 : i32
    %c0_i32_1 = arith.constant 0 : i32
    return %c0_i32, %c0_i32_0 : i32, i32
  }
  func.func @transform_6(%arg0: i32) -> (i32, i32, i32) {
    %c0_i32 = arith.constant 0 : i32
    %c0_i32_0 = arith.constant 0 : i32
    %c0_i32_1 = arith.constant 0 : i32
    return %c0_i32, %arg0, %c0_i32_0 : i32, i32, i32
  }
}

</mosaic_0001>

<bundles_post_ra>
// kernel: temporal_resnet_block_pallas.2
= control target key start
LH: loop header
LB: loop body
LE: loop exit
PB: predicated region body
PF: predicated region fallthrough
CT: control target
= control target key end

     0   :  { %s6558_s21 = smov 0   ;;  %s6560_s22 = smov 0   ;;  %s9067_s0 = inlined_call_operand.vmem [shape: f32[8,256,128], index: 0, kind: input, shape index: {}]   ;;  %s9068_s1 = inlined_call_operand.vmem [shape: f32[1,128], index: 1, kind: input, shape index: {}]   ;;  %s9069_s2 = inlined_call_operand.vmem [shape: f32[1,128], index: 2, kind: input, shape index: {}]   ;;  %s9070_s3 = inlined_call_operand.vmem [shape: bf16[384,128], index: 3, kind: input, shape index: {}]   ;;  %s9071_s4 = inlined_call_operand.vmem [shape: f32[1,128], index: 4, kind: input, shape index: {}]   ;;  %s9072_s5 = inlined_call_operand.vmem [shape: bf16[8,256,128], index: 5, kind: output, shape index: {0}]   ;;  %s9073_s6 = inlined_call_operand.vmem [shape: f32[2,2,128], index: 6, kind: output, shape index: {1}]  }
   0x1   :  { %s6562_s23 = smov 0  }
   0x2 LB: > { %s6574_s24 = sadd.s32 4294967295, %s6520_s23   ;;  %s6577_s25 = sadd.s32 1, %s6520_s23   ;;  %s6520_s23 = sphi %s6562_s23, %s9169_s23   ;;  %s6516_s22 = sphi %s6560_s22, %s9168_s22   ;;  %s6512_s21 = sphi %s6558_s21, %s9167_s21  }
   0x3   : > { %s21_s26 = ssub.s32 %s6520_s23, %s6577_s25  ;;  %s24_s27 = sadd.s32 1, %s6516_s22 }
   0x4   : > { %p22_p0 = scmp.eq.s32.totalorder %s21_s26, 0  ;;  %p31_p1 = scmp.ne.s32.totalorder %s6516_s22, %s6512_s21 }
   0x5   : > { %p32_p2 = scmp.eq.s32.totalorder %s6520_s23, 0  ;;  %p145_p3 = scmp.eq.s32.totalorder %s6574_s24, 1 }
   0x6   : > { %s6587_s28 = scalar_select %p22_p0, %s6516_s22, %s24_s27  }
   0x7   : > { %p33_p4 = por %p32_p2, %p31_p1  ;;  %p6589_p5 = por %p145_p3, %p31_p1 }
   0x8   : > { %p5147_p6 = scmp.ge.s32.totalorder %s6520_s23, 2 }
   0xa   : > { %205 = sbr.rel (%p5147_p6) target bundleno = 85 (0x55), region = 32 }
  0x11   : > { %208 = sbr.rel (!%p33_p4) target bundleno = 85 (0x55), region = 36  ;;  %s210_s30 = sand.u32 (%p33_p4), 1, %s6516_s22  }
  0x12   : > { %s5427_s7 = sshll.u32 (%p33_p4), %s6520_s23, 7  ;;  %s5148_s8 = sshll.u32 (%p33_p4), %s210_s30, 10 }
  0x13   : > { %s6599_s11 = scalar_lea.vmem (%p33_p4), %s9067_s0, %s5427_s7  ;;  %s6604_s12 = scalar_lea.vmem (%p33_p4), [#allocation3], %s5148_s8 }
  0x14   : > { %v497_v0 = vld [vmem:[%s6599_s11] sm:$0xff] (%p33_p4)  ;;  %v499_v1 = vld [vmem:[%s6599_s11 + $0x8] sm:$0xff] (%p33_p4)  ;;  %v501_v2 = vld [vmem:[%s6599_s11 + $0x10] sm:$0xff] (%p33_p4) }
  0x15   : > { %498 = vst [vmem:[%s6604_s12] sm:$0xff] (%p33_p4), %v497_v0  ;;  %500 = vst [vmem:[%s6604_s12 + $0x8] sm:$0xff] (%p33_p4), %v499_v1  ;;  %v503_v3 = vld [vmem:[%s6599_s11 + $0x18] sm:$0xff] (%p33_p4)  ;;  %v505_v4 = vld [vmem:[%s6599_s11 + $0x20] sm:$0xff] (%p33_p4) }
  0x16   : > { %502 = vst [vmem:[%s6604_s12 + $0x10] sm:$0xff] (%p33_p4), %v501_v2  ;;  %v507_v5 = vld [vmem:[%s6599_s11 + $0x28] sm:$0xff] (%p33_p4)  ;;  %504 = vst [vmem:[%s6604_s12 + $0x18] sm:$0xff] (%p33_p4), %v503_v3  ;;  %v509_v6 = vld [vmem:[%s6599_s11 + $0x30] sm:$0xff] (%p33_p4) }
  0x17   : > { %506 = vst [vmem:[%s6604_s12 + $0x20] sm:$0xff] (%p33_p4), %v505_v4  ;;  %508 = vst [vmem:[%s6604_s12 + $0x28] sm:$0xff] (%p33_p4), %v507_v5  ;;  %v511_v7 = vld [vmem:[%s6599_s11 + $0x38] sm:$0xff] (%p33_p4)  ;;  %v513_v8 = vld [vmem:[%s6599_s11 + $0x40] sm:$0xff] (%p33_p4) }
  0x18   : > { %510 = vst [vmem:[%s6604_s12 + $0x30] sm:$0xff] %v509_v6  ;;  %512 = vst [vmem:[%s6604_s12 + $0x38] sm:$0xff] %v511_v7  ;;  %v515_v9 = vld [vmem:[%s6599_s11 + $0x48] sm:$0xff]  ;;  %v517_v10 = vld [vmem:[%s6599_s11 + $0x50] sm:$0xff] }
  0x19   : > { %514 = vst [vmem:[%s6604_s12 + $0x40] sm:$0xff] %v513_v8  ;;  %v519_v11 = vld [vmem:[%s6599_s11 + $0x58] sm:$0xff]  ;;  %516 = vst [vmem:[%s6604_s12 + $0x48] sm:$0xff] %v515_v9  ;;  %v521_v12 = vld [vmem:[%s6599_s11 + $0x60] sm:$0xff] }
  0x1a   : > { %518 = vst [vmem:[%s6604_s12 + $0x50] sm:$0xff] %v517_v10  ;;  %520 = vst [vmem:[%s6604_s12 + $0x58] sm:$0xff] %v519_v11  ;;  %v523_v13 = vld [vmem:[%s6599_s11 + $0x68] sm:$0xff]  ;;  %v525_v14 = vld [vmem:[%s6599_s11 + $0x70] sm:$0xff] }
  0x1b   : > { %522 = vst [vmem:[%s6604_s12 + $0x60] sm:$0xff] %v521_v12  ;;  %524 = vst [vmem:[%s6604_s12 + $0x68] sm:$0xff] %v523_v13  ;;  %v527_v15 = vld [vmem:[%s6599_s11 + $0x78] sm:$0xff]  ;;  %v529_v16 = vld [vmem:[%s6599_s11 + $0x100] sm:$0xff] }
  0x1c   : > { %526 = vst [vmem:[%s6604_s12 + $0x70] sm:$0xff] %v525_v14  ;;  %v531_v17 = vld [vmem:[%s6599_s11 + $0x108] sm:$0xff]  ;;  %528 = vst [vmem:[%s6604_s12 + $0x78] sm:$0xff] %v527_v15  ;;  %v533_v18 = vld [vmem:[%s6599_s11 + $0x110] sm:$0xff] }
  0x1d   : > { %530 = vst [vmem:[%s6604_s12 + $0x80] sm:$0xff] %v529_v16  ;;  %532 = vst [vmem:[%s6604_s12 + $0x88] sm:$0xff] %v531_v17  ;;  %v535_v19 = vld [vmem:[%s6599_s11 + $0x118] sm:$0xff]  ;;  %v537_v20 = vld [vmem:[%s6599_s11 + $0x120] sm:$0xff] }
  0x1e   : > { %534 = vst [vmem:[%s6604_s12 + $0x90] sm:$0xff] %v533_v18  ;;  %536 = vst [vmem:[%s6604_s12 + $0x98] sm:$0xff] %v535_v19  ;;  %v539_v21 = vld [vmem:[%s6599_s11 + $0x128] sm:$0xff]  ;;  %v541_v22 = vld [vmem:[%s6599_s11 + $0x130] sm:$0xff] }
  0x1f   : > { %538 = vst [vmem:[%s6604_s12 + $0xa0] sm:$0xff] %v537_v20  ;;  %v543_v23 = vld [vmem:[%s6599_s11 + $0x138] sm:$0xff]  ;;  %540 = vst [vmem:[%s6604_s12 + $0xa8] sm:$0xff] %v539_v21  ;;  %v545_v24 = vld [vmem:[%s6599_s11 + $0x140] sm:$0xff] }
  0x20   : > { %542 = vst [vmem:[%s6604_s12 + $0xb0] sm:$0xff] %v541_v22  ;;  %544 = vst [vmem:[%s6604_s12 + $0xb8] sm:$0xff] %v543_v23  ;;  %v547_v25 = vld [vmem:[%s6599_s11 + $0x148] sm:$0xff]  ;;  %v549_v26 = vld [vmem:[%s6599_s11 + $0x150] sm:$0xff] }
  0x21   : > { %546 = vst [vmem:[%s6604_s12 + $0xc0] sm:$0xff] %v545_v24  ;;  %548 = vst [vmem:[%s6604_s12 + $0xc8] sm:$0xff] %v547_v25  ;;  %v551_v27 = vld [vmem:[%s6599_s11 + $0x158] sm:$0xff]  ;;  %v553_v28 = vld [vmem:[%s6599_s11 + $0x160] sm:$0xff] }
  0x22   : > { %550 = vst [vmem:[%s6604_s12 + $0xd0] sm:$0xff] %v549_v26  ;;  %v555_v29 = vld [vmem:[%s6599_s11 + $0x168] sm:$0xff]  ;;  %552 = vst [vmem:[%s6604_s12 + $0xd8] sm:$0xff] %v551_v27  ;;  %v557_v30 = vld [vmem:[%s6599_s11 + $0x170] sm:$0xff] }
  0x23   : > { %554 = vst [vmem:[%s6604_s12 + $0xe0] sm:$0xff] %v553_v28  ;;  %556 = vst [vmem:[%s6604_s12 + $0xe8] sm:$0xff] %v555_v29  ;;  %v559_v31 = vld [vmem:[%s6599_s11 + $0x178] sm:$0xff]  ;;  %v561_v32 = vld [vmem:[%s6599_s11 + $0x200] sm:$0xff] }
  0x24   : > { %558 = vst [vmem:[%s6604_s12 + $0xf0] sm:$0xff] %v557_v30  ;;  %560 = vst [vmem:[%s6604_s12 + $0xf8] sm:$0xff] %v559_v31  ;;  %v563_v33 = vld [vmem:[%s6599_s11 + $0x208] sm:$0xff]  ;;  %v565_v34 = vld [vmem:[%s6599_s11 + $0x210] sm:$0xff] }
  0x25   : > { %562 = vst [vmem:[%s6604_s12 + $0x100] sm:$0xff] %v561_v32  ;;  %v567_v35 = vld [vmem:[%s6599_s11 + $0x218] sm:$0xff]  ;;  %564 = vst [vmem:[%s6604_s12 + $0x108] sm:$0xff] %v563_v33  ;;  %v569_v36 = vld [vmem:[%s6599_s11 + $0x220] sm:$0xff] }
  0x26   : > { %566 = vst [vmem:[%s6604_s12 + $0x110] sm:$0xff] %v565_v34  ;;  %568 = vst [vmem:[%s6604_s12 + $0x118] sm:$0xff] %v567_v35  ;;  %v571_v37 = vld [vmem:[%s6599_s11 + $0x228] sm:$0xff]  ;;  %v573_v38 = vld [vmem:[%s6599_s11 + $0x230] sm:$0xff] }
  0x27   : > { %570 = vst [vmem:[%s6604_s12 + $0x120] sm:$0xff] %v569_v36  ;;  %572 = vst [vmem:[%s6604_s12 + $0x128] sm:$0xff] %v571_v37  ;;  %v575_v39 = vld [vmem:[%s6599_s11 + $0x238] sm:$0xff]  ;;  %v577_v40 = vld [vmem:[%s6599_s11 + $0x240] sm:$0xff] }
  0x28   : > { %574 = vst [vmem:[%s6604_s12 + $0x130] sm:$0xff] %v573_v38  ;;  %v579_v41 = vld [vmem:[%s6599_s11 + $0x248] sm:$0xff]  ;;  %576 = vst [vmem:[%s6604_s12 + $0x138] sm:$0xff] %v575_v39  ;;  %v581_v42 = vld [vmem:[%s6599_s11 + $0x250] sm:$0xff] }
  0x29   : > { %578 = vst [vmem:[%s6604_s12 + $0x140] sm:$0xff] %v577_v40  ;;  %580 = vst [vmem:[%s6604_s12 + $0x148] sm:$0xff] %v579_v41  ;;  %v583_v43 = vld [vmem:[%s6599_s11 + $0x258] sm:$0xff]  ;;  %v585_v44 = vld [vmem:[%s6599_s11 + $0x260] sm:$0xff] }
  0x2a   : > { %582 = vst [vmem:[%s6604_s12 + $0x150] sm:$0xff] %v581_v42  ;;  %584 = vst [vmem:[%s6604_s12 + $0x158] sm:$0xff] %v583_v43  ;;  %v587_v45 = vld [vmem:[%s6599_s11 + $0x268] sm:$0xff]  ;;  %v589_v46 = vld [vmem:[%s6599_s11 + $0x270] sm:$0xff] }
  0x2b   : > { %586 = vst [vmem:[%s6604_s12 + $0x160] sm:$0xff] %v585_v44  ;;  %v591_v47 = vld [vmem:[%s6599_s11 + $0x278] sm:$0xff]  ;;  %588 = vst [vmem:[%s6604_s12 + $0x168] sm:$0xff] %v587_v45  ;;  %v593_v48 = vld [vmem:[%s6599_s11 + $0x300] sm:$0xff] }
  0x2c   : > { %590 = vst [vmem:[%s6604_s12 + $0x170] sm:$0xff] %v589_v46  ;;  %592 = vst [vmem:[%s6604_s12 + $0x178] sm:$0xff] %v591_v47  ;;  %v595_v49 = vld [vmem:[%s6599_s11 + $0x308] sm:$0xff]  ;;  %v597_v50 = vld [vmem:[%s6599_s11 + $0x310] sm:$0xff] }
  0x2d   : > { %594 = vst [vmem:[%s6604_s12 + $0x180] sm:$0xff] %v593_v48  ;;  %596 = vst [vmem:[%s6604_s12 + $0x188] sm:$0xff] %v595_v49  ;;  %v599_v51 = vld [vmem:[%s6599_s11 + $0x318] sm:$0xff]  ;;  %v601_v52 = vld [vmem:[%s6599_s11 + $0x320] sm:$0xff] }
  0x2e   : > { %598 = vst [vmem:[%s6604_s12 + $0x190] sm:$0xff] %v597_v50  ;;  %v603_v53 = vld [vmem:[%s6599_s11 + $0x328] sm:$0xff]  ;;  %600 = vst [vmem:[%s6604_s12 + $0x198] sm:$0xff] %v599_v51  ;;  %v605_v54 = vld [vmem:[%s6599_s11 + $0x330] sm:$0xff] }
  0x2f   : > { %602 = vst [vmem:[%s6604_s12 + $0x1a0] sm:$0xff] %v601_v52  ;;  %604 = vst [vmem:[%s6604_s12 + $0x1a8] sm:$0xff] %v603_v53  ;;  %v607_v55 = vld [vmem:[%s6599_s11 + $0x338] sm:$0xff]  ;;  %v609_v56 = vld [vmem:[%s6599_s11 + $0x340] sm:$0xff] }
  0x30   : > { %606 = vst [vmem:[%s6604_s12 + $0x1b0] sm:$0xff] %v605_v54  ;;  %608 = vst [vmem:[%s6604_s12 + $0x1b8] sm:$0xff] %v607_v55  ;;  %v611_v57 = vld [vmem:[%s6599_s11 + $0x348] sm:$0xff]  ;;  %v613_v58 = vld [vmem:[%s6599_s11 + $0x350] sm:$0xff] }
  0x31   : > { %610 = vst [vmem:[%s6604_s12 + $0x1c0] sm:$0xff] %v609_v56  ;;  %v615_v59 = vld [vmem:[%s6599_s11 + $0x358] sm:$0xff]  ;;  %612 = vst [vmem:[%s6604_s12 + $0x1c8] sm:$0xff] %v611_v57  ;;  %v617_v60 = vld [vmem:[%s6599_s11 + $0x360] sm:$0xff] }
  0x32   : > { %614 = vst [vmem:[%s6604_s12 + $0x1d0] sm:$0xff] %v613_v58  ;;  %616 = vst [vmem:[%s6604_s12 + $0x1d8] sm:$0xff] %v615_v59  ;;  %v619_v61 = vld [vmem:[%s6599_s11 + $0x368] sm:$0xff]  ;;  %v621_v62 = vld [vmem:[%s6599_s11 + $0x370] sm:$0xff] }
  0x33   : > { %618 = vst [vmem:[%s6604_s12 + $0x1e0] sm:$0xff] %v617_v60  ;;  %620 = vst [vmem:[%s6604_s12 + $0x1e8] sm:$0xff] %v619_v61  ;;  %v623_v63 = vld [vmem:[%s6599_s11 + $0x378] sm:$0xff]  ;;  %v625_v0 = vld [vmem:[%s6599_s11 + $0x400] sm:$0xff] }
  0x34   : > { %622 = vst [vmem:[%s6604_s12 + $0x1f0] sm:$0xff] %v621_v62  ;;  %v627_v1 = vld [vmem:[%s6599_s11 + $0x408] sm:$0xff]  ;;  %624 = vst [vmem:[%s6604_s12 + $0x1f8] sm:$0xff] %v623_v63  ;;  %v629_v2 = vld [vmem:[%s6599_s11 + $0x410] sm:$0xff] }
  0x35   : > { %626 = vst [vmem:[%s6604_s12 + $0x200] sm:$0xff] %v625_v0  ;;  %628 = vst [vmem:[%s6604_s12 + $0x208] sm:$0xff] %v627_v1  ;;  %v631_v3 = vld [vmem:[%s6599_s11 + $0x418] sm:$0xff]  ;;  %v633_v4 = vld [vmem:[%s6599_s11 + $0x420] sm:$0xff] }
  0x36   : > { %630 = vst [vmem:[%s6604_s12 + $0x210] sm:$0xff] %v629_v2  ;;  %632 = vst [vmem:[%s6604_s12 + $0x218] sm:$0xff] %v631_v3  ;;  %v635_v5 = vld [vmem:[%s6599_s11 + $0x428] sm:$0xff]  ;;  %v637_v6 = vld [vmem:[%s6599_s11 + $0x430] sm:$0xff] }
  0x37   : > { %634 = vst [vmem:[%s6604_s12 + $0x220] sm:$0xff] %v633_v4  ;;  %v639_v7 = vld [vmem:[%s6599_s11 + $0x438] sm:$0xff]  ;;  %636 = vst [vmem:[%s6604_s12 + $0x228] sm:$0xff] %v635_v5  ;;  %v641_v8 = vld [vmem:[%s6599_s11 + $0x440] sm:$0xff] }
  0x38   : > { %638 = vst [vmem:[%s6604_s12 + $0x230] sm:$0xff] %v637_v6  ;;  %640 = vst [vmem:[%s6604_s12 + $0x238] sm:$0xff] %v639_v7  ;;  %v643_v9 = vld [vmem:[%s6599_s11 + $0x448] sm:$0xff]  ;;  %v645_v10 = vld [vmem:[%s6599_s11 + $0x450] sm:$0xff] }
  0x39   : > { %642 = vst [vmem:[%s6604_s12 + $0x240] sm:$0xff] %v641_v8  ;;  %644 = vst [vmem:[%s6604_s12 + $0x248] sm:$0xff] %v643_v9  ;;  %v647_v11 = vld [vmem:[%s6599_s11 + $0x458] sm:$0xff]  ;;  %v649_v12 = vld [vmem:[%s6599_s11 + $0x460] sm:$0xff] }
  0x3a   : > { %646 = vst [vmem:[%s6604_s12 + $0x250] sm:$0xff] %v645_v10  ;;  %v651_v13 = vld [vmem:[%s6599_s11 + $0x468] sm:$0xff]  ;;  %648 = vst [vmem:[%s6604_s12 + $0x258] sm:$0xff] %v647_v11  ;;  %v653_v14 = vld [vmem:[%s6599_s11 + $0x470] sm:$0xff] }
  0x3b   : > { %650 = vst [vmem:[%s6604_s12 + $0x260] sm:$0xff] %v649_v12  ;;  %652 = vst [vmem:[%s6604_s12 + $0x268] sm:$0xff] %v651_v13  ;;  %v655_v15 = vld [vmem:[%s6599_s11 + $0x478] sm:$0xff]  ;;  %v657_v16 = vld [vmem:[%s6599_s11 + $0x500] sm:$0xff] }
  0x3c   : > { %654 = vst [vmem:[%s6604_s12 + $0x270] sm:$0xff] %v653_v14  ;;  %656 = vst [vmem:[%s6604_s12 + $0x278] sm:$0xff] %v655_v15  ;;  %v659_v17 = vld [vmem:[%s6599_s11 + $0x508] sm:$0xff]  ;;  %v661_v18 = vld [vmem:[%s6599_s11 + $0x510] sm:$0xff] }
  0x3d   : > { %658 = vst [vmem:[%s6604_s12 + $0x280] sm:$0xff] %v657_v16  ;;  %v663_v19 = vld [vmem:[%s6599_s11 + $0x518] sm:$0xff]  ;;  %660 = vst [vmem:[%s6604_s12 + $0x288] sm:$0xff] %v659_v17  ;;  %v665_v20 = vld [vmem:[%s6599_s11 + $0x520] sm:$0xff] }
  0x3e   : > { %662 = vst [vmem:[%s6604_s12 + $0x290] sm:$0xff] %v661_v18  ;;  %664 = vst [vmem:[%s6604_s12 + $0x298] sm:$0xff] %v663_v19  ;;  %v667_v21 = vld [vmem:[%s6599_s11 + $0x528] sm:$0xff]  ;;  %v669_v22 = vld [vmem:[%s6599_s11 + $0x530] sm:$0xff] }
  0x3f   : > { %666 = vst [vmem:[%s6604_s12 + $0x2a0] sm:$0xff] %v665_v20  ;;  %668 = vst [vmem:[%s6604_s12 + $0x2a8] sm:$0xff] %v667_v21  ;;  %v671_v23 = vld [vmem:[%s6599_s11 + $0x538] sm:$0xff]  ;;  %v673_v24 = vld [vmem:[%s6599_s11 + $0x540] sm:$0xff] }
  0x40   : > { %670 = vst [vmem:[%s6604_s12 + $0x2b0] sm:$0xff] %v669_v22  ;;  %v675_v25 = vld [vmem:[%s6599_s11 + $0x548] sm:$0xff]  ;;  %672 = vst [vmem:[%s6604_s12 + $0x2b8] sm:$0xff] %v671_v23  ;;  %v677_v26 = vld [vmem:[%s6599_s11 + $0x550] sm:$0xff] }
  0x41   : > { %674 = vst [vmem:[%s6604_s12 + $0x2c0] sm:$0xff] %v673_v24  ;;  %676 = vst [vmem:[%s6604_s12 + $0x2c8] sm:$0xff] %v675_v25  ;;  %v679_v27 = vld [vmem:[%s6599_s11 + $0x558] sm:$0xff]  ;;  %v681_v28 = vld [vmem:[%s6599_s11 + $0x560] sm:$0xff] }
  0x42   : > { %678 = vst [vmem:[%s6604_s12 + $0x2d0] sm:$0xff] %v677_v26  ;;  %680 = vst [vmem:[%s6604_s12 + $0x2d8] sm:$0xff] %v679_v27  ;;  %v683_v29 = vld [vmem:[%s6599_s11 + $0x568] sm:$0xff]  ;;  %v685_v30 = vld [vmem:[%s6599_s11 + $0x570] sm:$0xff] }
  0x43   : > { %682 = vst [vmem:[%s6604_s12 + $0x2e0] sm:$0xff] %v681_v28  ;;  %v687_v31 = vld [vmem:[%s6599_s11 + $0x578] sm:$0xff]  ;;  %684 = vst [vmem:[%s6604_s12 + $0x2e8] sm:$0xff] %v683_v29  ;;  %v689_v32 = vld [vmem:[%s6599_s11 + $0x600] sm:$0xff] }
  0x44   : > { %686 = vst [vmem:[%s6604_s12 + $0x2f0] sm:$0xff] %v685_v30  ;;  %688 = vst [vmem:[%s6604_s12 + $0x2f8] sm:$0xff] %v687_v31  ;;  %v691_v33 = vld [vmem:[%s6599_s11 + $0x608] sm:$0xff]  ;;  %v693_v34 = vld [vmem:[%s6599_s11 + $0x610] sm:$0xff] }
  0x45   : > { %690 = vst [vmem:[%s6604_s12 + $0x300] sm:$0xff] %v689_v32  ;;  %692 = vst [vmem:[%s6604_s12 + $0x308] sm:$0xff] %v691_v33  ;;  %v695_v35 = vld [vmem:[%s6599_s11 + $0x618] sm:$0xff]  ;;  %v697_v36 = vld [vmem:[%s6599_s11 + $0x620] sm:$0xff] }
  0x46   : > { %694 = vst [vmem:[%s6604_s12 + $0x310] sm:$0xff] %v693_v34  ;;  %v699_v37 = vld [vmem:[%s6599_s11 + $0x628] sm:$0xff]  ;;  %696 = vst [vmem:[%s6604_s12 + $0x318] sm:$0xff] %v695_v35  ;;  %v701_v38 = vld [vmem:[%s6599_s11 + $0x630] sm:$0xff] }
  0x47   : > { %698 = vst [vmem:[%s6604_s12 + $0x320] sm:$0xff] %v697_v36  ;;  %700 = vst [vmem:[%s6604_s12 + $0x328] sm:$0xff] %v699_v37  ;;  %v703_v39 = vld [vmem:[%s6599_s11 + $0x638] sm:$0xff]  ;;  %v705_v40 = vld [vmem:[%s6599_s11 + $0x640] sm:$0xff] }
  0x48   : > { %702 = vst [vmem:[%s6604_s12 + $0x330] sm:$0xff] %v701_v38  ;;  %704 = vst [vmem:[%s6604_s12 + $0x338] sm:$0xff] %v703_v39  ;;  %v707_v41 = vld [vmem:[%s6599_s11 + $0x648] sm:$0xff]  ;;  %v709_v42 = vld [vmem:[%s6599_s11 + $0x650] sm:$0xff] }
  0x49   : > { %706 = vst [vmem:[%s6604_s12 + $0x340] sm:$0xff] %v705_v40  ;;  %v711_v43 = vld [vmem:[%s6599_s11 + $0x658] sm:$0xff]  ;;  %708 = vst [vmem:[%s6604_s12 + $0x348] sm:$0xff] %v707_v41  ;;  %v713_v44 = vld [vmem:[%s6599_s11 + $0x660] sm:$0xff] }
  0x4a   : > { %710 = vst [vmem:[%s6604_s12 + $0x350] sm:$0xff] %v709_v42  ;;  %712 = vst [vmem:[%s6604_s12 + $0x358] sm:$0xff] %v711_v43  ;;  %v715_v45 = vld [vmem:[%s6599_s11 + $0x668] sm:$0xff]  ;;  %v717_v46 = vld [vmem:[%s6599_s11 + $0x670] sm:$0xff] }
  0x4b   : > { %714 = vst [vmem:[%s6604_s12 + $0x360] sm:$0xff] %v713_v44  ;;  %716 = vst [vmem:[%s6604_s12 + $0x368] sm:$0xff] %v715_v45  ;;  %v719_v47 = vld [vmem:[%s6599_s11 + $0x678] sm:$0xff]  ;;  %v721_v48 = vld [vmem:[%s6599_s11 + $0x700] sm:$0xff] }
  0x4c   : > { %718 = vst [vmem:[%s6604_s12 + $0x370] sm:$0xff] %v717_v46  ;;  %v723_v49 = vld [vmem:[%s6599_s11 + $0x708] sm:$0xff]  ;;  %720 = vst [vmem:[%s6604_s12 + $0x378] sm:$0xff] %v719_v47  ;;  %v725_v50 = vld [vmem:[%s6599_s11 + $0x710] sm:$0xff] }
  0x4d   : > { %722 = vst [vmem:[%s6604_s12 + $0x380] sm:$0xff] %v721_v48  ;;  %724 = vst [vmem:[%s6604_s12 + $0x388] sm:$0xff] %v723_v49  ;;  %v727_v51 = vld [vmem:[%s6599_s11 + $0x718] sm:$0xff]  ;;  %v729_v52 = vld [vmem:[%s6599_s11 + $0x720] sm:$0xff] }
  0x4e   : > { %726 = vst [vmem:[%s6604_s12 + $0x390] sm:$0xff] %v725_v50  ;;  %728 = vst [vmem:[%s6604_s12 + $0x398] sm:$0xff] %v727_v51  ;;  %v731_v53 = vld [vmem:[%s6599_s11 + $0x728] sm:$0xff]  ;;  %v733_v54 = vld [vmem:[%s6599_s11 + $0x730] sm:$0xff] }
  0x4f   : > { %730 = vst [vmem:[%s6604_s12 + $0x3a0] sm:$0xff] %v729_v52  ;;  %v735_v55 = vld [vmem:[%s6599_s11 + $0x738] sm:$0xff]  ;;  %732 = vst [vmem:[%s6604_s12 + $0x3a8] sm:$0xff] %v731_v53  ;;  %v737_v56 = vld [vmem:[%s6599_s11 + $0x740] sm:$0xff] }
  0x50   : > { %734 = vst [vmem:[%s6604_s12 + $0x3b0] sm:$0xff] %v733_v54  ;;  %736 = vst [vmem:[%s6604_s12 + $0x3b8] sm:$0xff] %v735_v55  ;;  %v739_v57 = vld [vmem:[%s6599_s11 + $0x748] sm:$0xff]  ;;  %v741_v58 = vld [vmem:[%s6599_s11 + $0x750] sm:$0xff] }
  0x51   : > { %738 = vst [vmem:[%s6604_s12 + $0x3c0] sm:$0xff] %v737_v56  ;;  %740 = vst [vmem:[%s6604_s12 + $0x3c8] sm:$0xff] %v739_v57  ;;  %v743_v59 = vld [vmem:[%s6599_s11 + $0x758] sm:$0xff]  ;;  %v745_v60 = vld [vmem:[%s6599_s11 + $0x760] sm:$0xff] }
  0x52   : > { %742 = vst [vmem:[%s6604_s12 + $0x3d0] sm:$0xff] %v741_v58  ;;  %v747_v61 = vld [vmem:[%s6599_s11 + $0x768] sm:$0xff]  ;;  %744 = vst [vmem:[%s6604_s12 + $0x3d8] sm:$0xff] %v743_v59  ;;  %v749_v62 = vld [vmem:[%s6599_s11 + $0x770] sm:$0xff] }
  0x53   : > { %746 = vst [vmem:[%s6604_s12 + $0x3e0] sm:$0xff] %v745_v60  ;;  %748 = vst [vmem:[%s6604_s12 + $0x3e8] sm:$0xff] %v747_v61  ;;  %v751_v63 = vld [vmem:[%s6599_s11 + $0x778] sm:$0xff] }
  0x54   : > { %750 = vst [vmem:[%s6604_s12 + $0x3f0] sm:$0xff] %v749_v62  ;;  %752 = vst [vmem:[%s6604_s12 + $0x3f8] sm:$0xff] %v751_v63 }
  0x55 PF: > { %p5151_p7 = scmp.ge.s32.totalorder %s6520_s23, 1  ;;  %p757_p8 = scmp.lt.s32.totalorder %s6520_s23, 3 }
  0x57   : > { %p758_p9 = pnand %p5151_p7, %p757_p8 }
  0x59   : > { %761 = sbr.rel (%p758_p9) target bundleno = 837 (0x345), region = 74 }
  0x60   : > { %v6213_v0 = vld [vmem:[%s9070_s3] sm:$0xff]   ;;  %v9074_v1 = vmov 0   ;;  %v6214_v2 = vld [vmem:[%s9070_s3 + $0x8] sm:$0xff]   ;;  %v6215_v3 = vld [vmem:[%s9070_s3 + $0x10] sm:$0xff]   ;;  %s764_s19 = sand.u32 1, %s6512_s21   ;;  %p798_p10 = scmp.lt.s32.totalorder %s6574_s24, 1 }
  0x61   : > { %2374 = vmatprep.subr.bf16.mxu0 %v9074_v1  ;;  %6156 = vmatprep.subr.bf16.mxu1 %v9074_v1  ;;  %v6216_v4 = vld [vmem:[%s9070_s3 + $0x18] sm:$0xff]   ;;  %s5152_s26 = sshll.u32 %s764_s19, 10  ;;  %v6217_v5 = vld [vmem:[%s9070_s3 + $0x20] sm:$0xff]   ;;  %v6218_v6 = vld [vmem:[%s9070_s3 + $0x28] sm:$0xff]   ;;  %s5153_s10 = sshll.u32 %s764_s19, 9 }
  0x62   : > { %2375 = vmatpush1.bf16.msra.mxu0 %v6213_v0  ;;  %6172 = vmatpush1.bf16.msra.mxu1 %v6213_v0  ;;  %v6895_v7 = vld [vmem:[%s9068_s1] ss:$0 sm:$0xff]  ;;  %s6902_s13 = scalar_lea.vmem [#allocation3], %s5152_s26  ;;  %v6219_v34 = vld [vmem:[%s9070_s3 + $0x30] sm:$0xff]   ;;  %v6220_v52 = vld [vmem:[%s9070_s3 + $0x38] sm:$0xff]   ;;  %s8329_s21 = scalar_lea.vmem [#allocation4], %s5153_s10 }
  0x63   : > { %2376 = vmatprep.subr.bf16.mxu0 %v9074_v1  ;;  %6157 = vmatprep.subr.bf16.mxu1 %v9074_v1  ;;  %v6900_v8 = vld [vmem:[%s9069_s2] ss:$0 sm:$0xff]  ;;  %v823_v10 = vld [vmem:[%s6902_s13 + $0x8] sm:$0xff]  ;;  %v824_v19 = vld [vmem:[%s6902_s13 + $0x10] sm:$0xff]  ;;  %s799_s12 = scalar_select %p798_p10, %s6574_s24, 1 }
  0x64   : > { %v822_v9 = vld [vmem:[%s6902_s13] sm:$0xff]  ;;  %v5238_v13 = vld [vmem:[%s6902_s13 + $0x308] sm:$0xff]  ;;  %v845_v14 = vmul.f32 %v6895_v7, %v823_v10  ;;  %v825_v23 = vld [vmem:[%s6902_s13 + $0x18] sm:$0xff]  ;;  %v846_v27 = vmul.f32 %v6895_v7, %v824_v19  ;;  %s5556_s18 = sshll.u32 (%p6589_p5), %s6574_s24, 6 }
  0x65   : > { %v844_v11 = vmul.f32 %v6895_v7, %v822_v9  ;;  %v5237_v12 = vld [vmem:[%s6902_s13 + $0x300] sm:$0xff]  ;;  %v1719_v16 = vmul.f32 %v5238_v13, %v6895_v7  ;;  %v5222_v18 = vld [vmem:[%s6902_s13 + $0x288] sm:$0xff]  ;;  %v847_v31 = vmul.f32 %v6895_v7, %v825_v23  ;;  %v5239_v32 = vld [vmem:[%s6902_s13 + $0x310] sm:$0xff]  ;;  %s5154_s14 = sshll.u32 %s799_s12, 1  ;;  %s8930_s26 = scalar_lea.vmem (%p6589_p5), %s9072_s5, %s5556_s18 }
  0x66   : > { %2377 = vmatpush1.bf16.msra.mxu0 %v6214_v2  ;;  %6173 = vmatpush1.bf16.msra.mxu1 %v6214_v2  ;;  %v1718_v15 = vmul.f32 %v5237_v12, %v6895_v7  ;;  %v5221_v17 = vld [vmem:[%s6902_s13 + $0x280] sm:$0xff]  ;;  %v1573_v22 = vmul.f32 %v5222_v18, %v6895_v7  ;;  %v867_v24 = vadd.f32 %v6900_v8, %v845_v14  ;;  %v5240_v33 = vld [vmem:[%s6902_s13 + $0x318] sm:$0xff]  ;;  %v5223_v39 = vld [vmem:[%s6902_s13 + $0x290] sm:$0xff]  ;;  %s801_s17 = scalar_lea.vmem %s9073_s6, %s5154_s14 }
  0x67   : > { %2378 = vmatprep.subr.bf16.mxu0 %v9074_v1  ;;  %6158 = vmatprep.subr.bf16.mxu1 %v9074_v1  ;;  %v866_v20 = vadd.f32 %v6900_v8, %v844_v11  ;;  %v1572_v21 = vmul.f32 %v5221_v17, %v6895_v7  ;;  %v1735_v26 = vadd.f32 %v6900_v8, %v1719_v16  ;;  %v5224_v40 = vld [vmem:[%s6902_s13 + $0x298] sm:$0xff]  ;;  %v826_v44 = vld [vmem:[%s6902_s13 + $0x20] sm:$0xff]  ;;  %v827_v48 = vld [vmem:[%s6902_s13 + $0x28] sm:$0xff] }
  0x68   : > { %v1734_v25 = vadd.f32 %v6900_v8, %v1718_v15  ;;  %v1589_v30 = vadd.f32 %v6900_v8, %v1573_v22  ;;  %v6935_v35 = vmul.f32 0.5, %v867_v24  ;;  %v868_v38 = vadd.f32 %v6900_v8, %v846_v27  ;;  %v5241_v59 = vld [vmem:[%s6902_s13 + $0x320] sm:$0xff]  ;;  %v5242_v60 = vld [vmem:[%s6902_s13 + $0x328] sm:$0xff]  ;;  %v829_v13 = vld [vmem:[%s6902_s13 + $0x38] sm:$0xff] }
  0x69   : > { %v6925_v28 = vmul.f32 0.5, %v866_v20  ;;  %v1588_v29 = vadd.f32 %v6900_v8, %v1572_v21  ;;  %v6939_v37 = vmul.f32 0.5, %v1735_v26  ;;  %v869_v43 = vadd.f32 %v6900_v8, %v847_v31  ;;  %v5225_v0 = vld [vmem:[%s6902_s13 + $0x2a0] sm:$0xff]  ;;  %v5226_v2 = vld [vmem:[%s6902_s13 + $0x2a8] sm:$0xff] }
  0x6a   : > { %2379 = vmatpush1.bf16.msra.mxu0 %v6215_v3  ;;  %6174 = vmatpush1.bf16.msra.mxu1 %v6215_v3  ;;  %v6937_v36 = vmul.f32 0.5, %v1734_v25  ;;  %v6949_v42 = vmul.f32 0.5, %v1589_v30  ;;  %v6954_v45 = vmul.f32 0.5, %v868_v38  ;;  %v1720_v46 = vmul.f32 %v5239_v32, %v6895_v7  ;;  %v6221_v9 = vld [vmem:[%s9070_s3 + $0x40] sm:$0xff]   ;;  %v6222_v25 = vld [vmem:[%s9070_s3 + $0x48] sm:$0xff]  }
  0x6b   : > { %2380 = vmatprep.subr.bf16.mxu0 %v9074_v1  ;;  %6159 = vmatprep.subr.bf16.mxu1 %v9074_v1  ;;  %6237 = vtanh.f32 %v6925_v28  ;;  %v6947_v41 = vmul.f32 0.5, %v1588_v29  ;;  %v1721_v47 = vmul.f32 %v5240_v33, %v6895_v7  ;;  %v6960_v49 = vmul.f32 0.5, %v869_v43 }
  0x6c   : > { %6239 = vtanh.f32 %v6935_v35  ;;  %v1574_v50 = vmul.f32 %v5223_v39, %v6895_v7  ;;  %v1575_v51 = vmul.f32 %v5224_v40, %v6895_v7  ;;  %v1736_v53 = vadd.f32 %v6900_v8, %v1720_v46 }
  0x6d   : > { %6241 = vtanh.f32 %v6937_v36  ;;  %v1737_v54 = vadd.f32 %v6900_v8, %v1721_v47  ;;  %v848_v55 = vmul.f32 %v6895_v7, %v826_v44  ;;  %v849_v58 = vmul.f32 %v6895_v7, %v827_v48 }
  0x6e   : > { %2381 = vmatpush1.bf16.msra.mxu0 %v6216_v4  ;;  %6175 = vmatpush1.bf16.msra.mxu1 %v6216_v4  ;;  %6243 = vtanh.f32 %v6939_v37  ;;  %v1590_v56 = vadd.f32 %v6900_v8, %v1574_v50  ;;  %v1591_v57 = vadd.f32 %v6900_v8, %v1575_v51  ;;  %v6980_v61 = vmul.f32 0.5, %v1736_v53 }
  0x6f   : > { %2382 = vmatprep.subr.bf16.mxu0 %v9074_v1  ;;  %6160 = vmatprep.subr.bf16.mxu1 %v9074_v1  ;;  %6245 = vtanh.f32 %v6947_v41  ;;  %v6982_v62 = vmul.f32 0.5, %v1737_v54  ;;  %v870_v63 = vadd.f32 %v6900_v8, %v848_v55  ;;  %v1722_v11 = vmul.f32 %v5241_v59, %v6895_v7  ;;  %v5243_v55 = vld [vmem:[%s6902_s13 + $0x330] sm:$0xff] }
  0x70   : > { %6247 = vtanh.f32 %v6949_v42  ;;  %v6988_v3 = vmul.f32 0.5, %v1590_v56  ;;  %v6990_v4 = vmul.f32 0.5, %v1591_v57  ;;  %v1723_v12 = vmul.f32 %v5242_v60, %v6895_v7  ;;  %v5244_v56 = vld [vmem:[%s6902_s13 + $0x338] sm:$0xff] }
  0x71   : > { %6249 = vtanh.f32 %v6954_v45  ;;  %v6998_v10 = vmul.f32 0.5, %v870_v63  ;;  %v1576_v15 = vmul.f32 %v5225_v0, %v6895_v7  ;;  %v1577_v16 = vmul.f32 %v5226_v2, %v6895_v7 }
  0x72   : > { %2383 = vmatpush1.bf16.msra.mxu0 %v6217_v5  ;;  %6176 = vmatpush1.bf16.msra.mxu1 %v6217_v5  ;;  %v871_v5 = vadd.f32 %v6900_v8, %v849_v58  ;;  %6251 = vtanh.f32 %v6960_v49  ;;  %v1738_v17 = vadd.f32 %v6900_v8, %v1722_v11  ;;  %v1739_v18 = vadd.f32 %v6900_v8, %v1723_v12 }
  0x73   : > { %2384 = vmatprep.subr.bf16.mxu0 %v9074_v1  ;;  %6161 = vmatprep.subr.bf16.mxu1 %v9074_v1  ;;  %6253 = vtanh.f32 %v6980_v61  ;;  %v1592_v21 = vadd.f32 %v6900_v8, %v1576_v15  ;;  %v1593_v22 = vadd.f32 %v6900_v8, %v1577_v16  ;;  %v851_v23 = vmul.f32 %v6895_v7, %v829_v13  ;;  %v5228_v16 = vld [vmem:[%s6902_s13 + $0x2b8] sm:$0xff] }
  0x74   : > { %v7006_v14 = vmul.f32 0.5, %v871_v5  ;;  %6255 = vtanh.f32 %v6982_v62  ;;  %v7022_v27 = vmul.f32 0.5, %v1738_v17  ;;  %v7024_v29 = vmul.f32 0.5, %v1739_v18  ;;  %v6224_v5 = vld [vmem:[%s9070_s3 + $0x58] sm:$0xff]  }
  0x75   : > { %v6238_v20 = vpop.eup %6237  ;;  %6257 = vtanh.f32 %v6988_v3  ;;  %v7029_v32 = vmul.f32 0.5, %v1592_v21  ;;  %v7031_v33 = vmul.f32 0.5, %v1593_v22  ;;  %v873_v47 = vadd.f32 %v6900_v8, %v851_v23 }
  0x76   : > { %2385 = vmatpush1.bf16.msra.mxu0 %v6218_v6  ;;  %6177 = vmatpush1.bf16.msra.mxu1 %v6218_v6  ;;  %v828_v6 = vld [vmem:[%s6902_s13 + $0x30] sm:$0xff]  ;;  %v6240_v24 = vpop.eup %6239  ;;  %v914_v26 = vadd.f32 1.0, %v6238_v20  ;;  %6259 = vtanh.f32 %v6990_v4  ;;  %v1725_v15 = vmul.f32 %v5244_v56, %v6895_v7 }
  0x77   : > { %2386 = vmatprep.subr.bf16.mxu0 %v9074_v1  ;;  %6162 = vmatprep.subr.bf16.mxu1 %v9074_v1  ;;  %v850_v19 = vmul.f32 %v6895_v7, %v828_v6  ;;  %v6242_v30 = vpop.eup %6241  ;;  %v915_v31 = vadd.f32 1.0, %v6240_v24  ;;  %6261 = vtanh.f32 %v6998_v10  ;;  %v7055_v58 = vmul.f32 0.5, %v873_v47 }
  0x78   : > { %v930_v38 = vmul.f32 %v914_v26, %v6925_v28  ;;  %v1782_v39 = vadd.f32 1.0, %v6242_v30  ;;  %6263 = vtanh.f32 %v7006_v14  ;;  %v6223_v28 = vld [vmem:[%s9070_s3 + $0x50] sm:$0xff]  }
  0x79   : > { %v872_v40 = vadd.f32 %v6900_v8, %v850_v19  ;;  %v931_v44 = vmul.f32 %v915_v31, %v6935_v35  ;;  %6265 = vtanh.f32 %v7022_v27 }
  0x7a   : > { %2387 = vmatpush1.bf16.msra.mxu0 %v6219_v34  ;;  %6178 = vmatpush1.bf16.msra.mxu1 %v6219_v34  ;;  %v6244_v34 = vpop.eup %6243  ;;  %v1798_v50 = vmul.f32 %v1782_v39, %v6937_v36  ;;  %6267 = vtanh.f32 %v7024_v29 }
  0x7b   : > { %2388 = vmatprep.subr.bf16.mxu0 %v9074_v1  ;;  %6163 = vmatprep.subr.bf16.mxu1 %v9074_v1  ;;  %v6246_v43 = vpop.eup %6245  ;;  %v1783_v46 = vadd.f32 1.0, %v6244_v34  ;;  %v7044_v51 = vmul.f32 0.5, %v872_v40  ;;  %6269 = vtanh.f32 %v7029_v32 }
  0x7c   : > { %v6248_v48 = vpop.eup %6247  ;;  %v1636_v54 = vadd.f32 1.0, %v6246_v43  ;;  %6271 = vtanh.f32 %v7031_v33 }
  0x7d   : > { %v6250_v35 = vpop.eup %6249  ;;  %v1799_v53 = vmul.f32 %v1783_v46, %v6939_v37  ;;  %v1637_v57 = vadd.f32 1.0, %v6248_v48  ;;  %6273 = vtanh.f32 %v7044_v51  ;;  %v5227_v37 = vld [vmem:[%s6902_s13 + $0x2b0] sm:$0xff]  ;;  %v830_v48 = vld [vmem:[%s6902_s13 + $0x40] sm:$0xff] }
  0x7e   : > { %2389 = vmatpush1.bf16.msra.mxu0 %v6220_v52  ;;  %6179 = vmatpush1.bf16.msra.mxu1 %v6220_v52  ;;  %v7048_v52 = vpack.c.bf16 %v931_v44, %v930_v38  ;;  %v6252_v36 = vpop.eup %6251  ;;  %v916_v63 = vadd.f32 1.0, %v6250_v35  ;;  %6275 = vtanh.f32 %v7055_v58  ;;  %v1652_v12 = vmul.f32 %v1636_v54, %v6947_v41 }
  0x7f   : > { %2390 = vmatprep.subr.bf16.mxu0 %v9074_v1  ;;  %6164 = vmatprep.subr.bf16.mxu1 %v9074_v1  ;;  %v6254_v59 = vpop.eup %6253  ;;  %v7058_v60 = vpack.c.bf16 %v1799_v53, %v1798_v50  ;;  %v917_v0 = vadd.f32 1.0, %v6252_v36  ;;  %v1653_v18 = vmul.f32 %v1637_v57, %v6949_v42  ;;  %v1578_v21 = vmul.f32 %v5227_v37, %v6895_v7  ;;  %v6225_v42 = vld [vmem:[%s9070_s3 + $0x60] sm:$0xff]  }
  0x80   : > { %2406 = vmatprep.mubr.bf16.mxu0 %v7048_v52  ;;  %v6256_v2 = vpop.eup %6255  ;;  %v1784_v6 = vadd.f32 1.0, %v6254_v59  ;;  %v932_v23 = vmul.f32 %v916_v63, %v6954_v45  ;;  %v1579_v45 = vmul.f32 %v5228_v16, %v6895_v7  ;;  %v852_v63 = vmul.f32 %v6895_v7, %v830_v48  ;;  %v5247_v48 = vld [vmem:[%s6902_s13 + $0x350] sm:$0xff] }
  0x81   : > { %v6258_v11 = vpop.eup %6257  ;;  %v1785_v13 = vadd.f32 1.0, %v6256_v2  ;;  %2790 = vmatprep.mubr.bf16.mxu1 %v7058_v60  ;;  %v933_v24 = vmul.f32 %v917_v0, %v6960_v49  ;;  %v1594_v47 = vadd.f32 %v6900_v8, %v1578_v21  ;;  %v7103_v54 = vpack.c.bf16 %v1653_v18, %v1652_v12  ;;  %v5245_v0 = vld [vmem:[%s6902_s13 + $0x340] sm:$0xff]  ;;  %v5246_v12 = vld [vmem:[%s6902_s13 + $0x348] sm:$0xff] }
  0x82   : > { %2391 = vmatpush1.bf16.msra.mxu0 %v6221_v9  ;;  %6180 = vmatpush1.bf16.msra.mxu1 %v6221_v9  ;;  %v1724_v9 = vmul.f32 %v5243_v55, %v6895_v7  ;;  %v6260_v17 = vpop.eup %6259  ;;  %v1638_v19 = vadd.f32 1.0, %v6258_v11  ;;  %v1800_v30 = vmul.f32 %v1784_v6, %v6980_v61  ;;  %v1595_v56 = vadd.f32 %v6900_v8, %v1579_v45 }
  0x83   : > { %2392 = vmatprep.subr.bf16.mxu0 %v9074_v1  ;;  %6165 = vmatprep.subr.bf16.mxu1 %v9074_v1  ;;  %v6262_v22 = vpop.eup %6261  ;;  %v1639_v41 = vadd.f32 1.0, %v6260_v17  ;;  %v1801_v49 = vmul.f32 %v1785_v13, %v6982_v62  ;;  %v6226_v62 = vld [vmem:[%s9070_s3 + $0x68] sm:$0xff]   ;;  %v7106_v36 = vmul.f32 0.5, %v1594_v47  ;;  %v7114_v2 = vpack.c.bf16 %v933_v24, %v932_v23  ;;  %v5229_v13 = vld [vmem:[%s6902_s13 + $0x2c0] sm:$0xff] }
  0x84   : > { %v1740_v20 = vadd.f32 %v6900_v8, %v1724_v9  ;;  %v6264_v26 = vpop.eup %6263  ;;  %v918_v31 = vadd.f32 1.0, %v6262_v22  ;;  %v1654_v39 = vmul.f32 %v1638_v19, %v6988_v3  ;;  %v7118_v6 = vmul.f32 0.5, %v1595_v56  ;;  %v5230_v19 = vld [vmem:[%s6902_s13 + $0x2c8] sm:$0xff] }
  0x85   : > { %v6266_v38 = vpop.eup %6265  ;;  %v919_v40 = vadd.f32 1.0, %v6264_v26  ;;  %v1655_v44 = vmul.f32 %v1639_v41, %v6990_v4  ;;  %v831_v4 = vld [vmem:[%s6902_s13 + $0x48] sm:$0xff]  ;;  %v874_v17 = vadd.f32 %v6900_v8, %v852_v63  ;;  %v1726_v18 = vmul.f32 %v5245_v0, %v6895_v7 }
  0x86   : > { %2393 = vmatpush1.bf16.msra.mxu0 %v6222_v25  ;;  %6181 = vmatpush1.bf16.msra.mxu1 %v6222_v25  ;;  %v1741_v25 = vadd.f32 %v6900_v8, %v1725_v15  ;;  %v7083_v34 = vmul.f32 0.5, %v1740_v20  ;;  %v6268_v61 = vpop.eup %6267  ;;  %v1786_v46 = vadd.f32 1.0, %v6266_v38  ;;  %v934_v50 = vmul.f32 %v918_v31, %v6998_v10  ;;  %v6227_v15 = vld [vmem:[%s9070_s3 + $0x70] sm:$0xff]  }
  0x87   : > { %2394 = vmatprep.subr.bf16.mxu0 %v9074_v1  ;;  %6166 = vmatprep.subr.bf16.mxu1 %v9074_v1  ;;  %v935_v3 = vmul.f32 %v919_v40, %v7006_v14  ;;  %v1787_v35 = vadd.f32 1.0, %v6268_v61  ;;  %v7121_v9 = vpack.c.bf16 %v1655_v44, %v1654_v39  ;;  %v853_v11 = vmul.f32 %v6895_v7, %v831_v4  ;;  %v832_v20 = vld [vmem:[%s6902_s13 + $0x50] sm:$0xff] }
  0x88   : > { %v7090_v43 = vmul.f32 0.5, %v1741_v25  ;;  %6277 = vtanh.f32 %v7083_v34  ;;  %v1802_v10 = vmul.f32 %v1786_v46, %v7022_v27  ;;  %v7143_v24 = vmul.f32 0.5, %v874_v17  ;;  %v835_v17 = vld [vmem:[%s6902_s13 + $0x68] sm:$0xff] }
  0x89   : > { %v1803_v14 = vmul.f32 %v1787_v35, %v7024_v29  ;;  %v7123_v27 = vpack.c.bf16 %v935_v3, %v934_v50  ;;  %v1727_v41 = vmul.f32 %v5246_v12, %v6895_v7  ;;  %v1742_v25 = vadd.f32 %v6900_v8, %v1726_v18  ;;  %v6230_v18 = vld [vmem:[%s9070_s3 + $0x88] sm:$0xff]  }
  0x8a   : > { %2395 = vmatpush1.bf16.msra.mxu0 %v6223_v28  ;;  %6182 = vmatpush1.bf16.msra.mxu1 %v6223_v28  ;;  %v6270_v28 = vpop.eup %6269  ;;  %6279 = vtanh.f32 %v7090_v43  ;;  %v1580_v26 = vmul.f32 %v5229_v13, %v6895_v7  ;;  %v1581_v45 = vmul.f32 %v5230_v19, %v6895_v7 }
  0x8b   : > { %2396 = vmatprep.subr.bf16.mxu0 %v9074_v1  ;;  %6167 = vmatprep.subr.bf16.mxu1 %v9074_v1  ;;  %v6272_v53 = vpop.eup %6271  ;;  %v1640_v55 = vadd.f32 1.0, %v6270_v28  ;;  %6281 = vtanh.f32 %v7106_v36  ;;  %v7139_v21 = vpack.c.bf16 %v1803_v14, %v1802_v10  ;;  %v1743_v39 = vadd.f32 %v6900_v8, %v1727_v41  ;;  %v5248_v28 = vld [vmem:[%s6902_s13 + $0x358] sm:$0xff] }
  0x8c   : > { %v6274_v57 = vpop.eup %6273  ;;  %v1641_v59 = vadd.f32 1.0, %v6272_v53  ;;  %6283 = vtanh.f32 %v7118_v6  ;;  %v1596_v40 = vadd.f32 %v6900_v8, %v1580_v26  ;;  %v1597_v46 = vadd.f32 %v6900_v8, %v1581_v45 }
  0x8d   : > { %v6276_v37 = vpop.eup %6275  ;;  %v920_v29 = vadd.f32 1.0, %v6274_v57  ;;  %v1656_v16 = vmul.f32 %v1640_v55, %v7029_v32  ;;  %v875_v32 = vadd.f32 %v6900_v8, %v853_v11  ;;  %6285 = vtanh.f32 %v7143_v24 }
  0x8e   : > { %2397 = vmatpush1.bf16.msra.mxu0 %v6224_v5  ;;  %6183 = vmatpush1.bf16.msra.mxu1 %v6224_v5  ;;  %v7116_v5 = vpack.c.bf16 %v1801_v49, %v1800_v30  ;;  %v1657_v22 = vmul.f32 %v1641_v59, %v7031_v33  ;;  %v921_v23 = vadd.f32 1.0, %v6276_v37  ;;  %v854_v33 = vmul.f32 %v6895_v7, %v832_v20  ;;  %v6228_v49 = vld [vmem:[%s9070_s3 + $0x78] sm:$0xff]   ;;  %v5231_v59 = vld [vmem:[%s6902_s13 + $0x2d0] sm:$0xff] }
  0x8f   : > { %2398 = vmatprep.subr.bf16.mxu0 %v9074_v1  ;;  %6168 = vmatprep.subr.bf16.mxu1 %v9074_v1  ;;  %v936_v30 = vmul.f32 %v920_v29, %v7044_v51  ;;  %v7150_v31 = vmul.f32 0.5, %v875_v32  ;;  %v7159_v51 = vmul.f32 0.5, %v1742_v25  ;;  %v7173_v3 = vmul.f32 0.5, %v1743_v39  ;;  %v5232_v29 = vld [vmem:[%s6902_s13 + $0x2d8] sm:$0xff]  ;;  %v5250_v25 = vld [vmem:[%s6902_s13 + $0x368] sm:$0xff]  ;;  %v6231_v39 = vld [vmem:[%s9070_s3 + $0x90] sm:$0xff]  }
  0x90   : > { %v937_v44 = vmul.f32 %v921_v23, %v7055_v58  ;;  %v7176_v35 = vmul.f32 0.5, %v1596_v40  ;;  %v7178_v4 = vmul.f32 0.5, %v1597_v46  ;;  %v876_v53 = vadd.f32 %v6900_v8, %v854_v33  ;;  %v5249_v23 = vld [vmem:[%s6902_s13 + $0x360] sm:$0xff] }
  0x91   : > { %6287 = vtanh.f32 %v7150_v31  ;;  %v7182_v57 = vpack.c.bf16 %v1657_v22, %v1656_v16  ;;  %v1728_v10 = vmul.f32 %v5247_v48, %v6895_v7  ;;  %v1729_v14 = vmul.f32 %v5248_v28, %v6895_v7  ;;  %v834_v16 = vld [vmem:[%s6902_s13 + $0x60] sm:$0xff] }
  0x92   : > { %2399 = vmatpush1.bf16.msra.mxu0 %v6225_v42  ;;  %6184 = vmatpush1.bf16.msra.mxu1 %v6225_v42  ;;  %v833_v42 = vld [vmem:[%s6902_s13 + $0x58] sm:$0xff]  ;;  %v6278_v38 = vpop.eup %6277  ;;  %6289 = vtanh.f32 %v7159_v51  ;;  %v7188_v63 = vpack.c.bf16 %v937_v44, %v936_v30  ;;  %v7191_v0 = vmul.f32 0.5, %v876_v53  ;;  %v1582_v22 = vmul.f32 %v5231_v59, %v6895_v7 }
  0x93   : > { %2400 = vmatprep.subr.bf16.mxu0 %v9074_v1  ;;  %6169 = vmatprep.subr.bf16.mxu1 %v9074_v1  ;;  %v855_v47 = vmul.f32 %v6895_v7, %v833_v42  ;;  %v1788_v50 = vadd.f32 1.0, %v6278_v38  ;;  %6291 = vtanh.f32 %v7173_v3  ;;  %v1744_v13 = vadd.f32 %v6900_v8, %v1728_v10 }
  0x94   : > { %v6280_v61 = vpop.eup %6279  ;;  %6293 = vtanh.f32 %v7176_v35  ;;  %v1598_v26 = vadd.f32 %v6900_v8, %v1582_v22  ;;  %v856_v42 = vmul.f32 %v6895_v7, %v834_v16  ;;  %v857_v30 = vmul.f32 %v6895_v7, %v835_v17 }
  0x95   : > { %v1789_v58 = vadd.f32 1.0, %v6280_v61  ;;  %v877_v55 = vadd.f32 %v6900_v8, %v855_v47  ;;  %v6282_v56 = vpop.eup %6281  ;;  %6295 = vtanh.f32 %v7178_v4  ;;  %v7207_v19 = vmul.f32 %v1788_v50, %v7083_v34 }
  0x96   : > { %2401 = vmatpush1.bf16.msra.mxu0 %v6226_v62  ;;  %6185 = vmatpush1.bf16.msra.mxu1 %v6226_v62  ;;  %v6229_v62 = vld [vmem:[%s9070_s3 + $0x80] sm:$0xff]   ;;  %v6284_v11 = vpop.eup %6283  ;;  %v1642_v12 = vadd.f32 1.0, %v6282_v56  ;;  %6297 = vtanh.f32 %v7191_v0  ;;  %v7218_v32 = vmul.f32 0.5, %v1744_v13  ;;  %v1583_v34 = vmul.f32 %v5232_v29, %v6895_v7 }
  0x97   : > { %2402 = vmatprep.subr.bf16.mxu0 %v9074_v1  ;;  %6170 = vmatprep.subr.bf16.mxu1 %v9074_v1  ;;  %v7193_v37 = vmul.f32 0.5, %v877_v55  ;;  %v7210_v20 = vmul.f32 %v1789_v58, %v7090_v43  ;;  %v1643_v43 = vadd.f32 1.0, %v6284_v11  ;;  %v6286_v45 = vpop.eup %6285  ;;  %v7235_v44 = vmul.f32 0.5, %v1598_v26  ;;  %v5233_v55 = vld [vmem:[%s6902_s13 + $0x2e0] sm:$0xff] }
  0x98   : > { %v1658_v33 = vmul.f32 %v1642_v12, %v7106_v36  ;;  %v1599_v38 = vadd.f32 %v6900_v8, %v1583_v34  ;;  %v922_v61 = vadd.f32 1.0, %v6286_v45  ;;  %v1731_v36 = vmul.f32 %v5250_v25, %v6895_v7  ;;  %v837_v45 = vld [vmem:[%s6902_s13 + $0x78] sm:$0xff] }
  0x99   : > { %6299 = vtanh.f32 %v7193_v37  ;;  %v878_v28 = vadd.f32 %v6900_v8, %v856_v42  ;;  %v1659_v50 = vmul.f32 %v1643_v43, %v7118_v6  ;;  %v6232_v6 = vld [vmem:[%s9070_s3 + $0x98] sm:$0xff]   ;;  %v836_v43 = vld [vmem:[%s6902_s13 + $0x70] sm:$0xff] }
  0x9a   : > { %2403 = vmatpush1.bf16.msra.mxu0 %v6227_v15  ;;  %6186 = vmatpush1.bf16.msra.mxu1 %v6227_v15  ;;  %v1745_v15 = vadd.f32 %v6900_v8, %v1729_v14  ;;  %6301 = vtanh.f32 %v7218_v32  ;;  %v7238_v48 = vmul.f32 0.5, %v1599_v38  ;;  %v938_v10 = vmul.f32 %v922_v61, %v7143_v24 }
  0x9b   : > { %2404 = vmatprep.subr.bf16.mxu0 %v9074_v1  ;;  %6171 = vmatprep.subr.bf16.mxu1 %v9074_v1  ;;  %v6288_v40 = vpop.eup %6287  ;;  %v7248_v14 = vmul.f32 0.5, %v878_v28  ;;  %v1747_v24 = vadd.f32 %v6900_v8, %v1731_v36  ;;  %v7276_v42 = vpack.c.bf16 %v1659_v50, %v1658_v33  ;;  %v858_v61 = vmul.f32 %v6895_v7, %v836_v43 }
  0x9c   : > { %v7220_v41 = vmul.f32 0.5, %v1745_v15  ;;  %v6290_v46 = vpop.eup %6289  ;;  %v923_v47 = vadd.f32 1.0, %v6288_v40  ;;  %v5234_v15 = vld [vmem:[%s6902_s13 + $0x2e8] sm:$0xff] }
  0x9d   : > { %v1790_v58 = vadd.f32 1.0, %v6290_v46  ;;  %v6292_v56 = vpop.eup %6291  ;;  %v7269_v25 = vmul.f32 0.5, %v1747_v24 }
  0x9e   : > { %2405 = vmatpush1.bf16.msra.mxu0 %v6228_v49  ;;  %6187 = vmatpush1.bf16.msra.mxu1 %v6228_v49  ;;  %v1730_v49 = vmul.f32 %v5249_v23, %v6895_v7  ;;  %6303 = vtanh.f32 %v7220_v41  ;;  %v6294_v29 = vpop.eup %6293  ;;  %v939_v11 = vmul.f32 %v923_v47, %v7150_v31  ;;  %v1791_v12 = vadd.f32 1.0, %v6292_v56  ;;  %v6234_v56 = vld [vmem:[%s9070_s3 + $0xa8] sm:$0xff]  }
  0x9f   : > { %6012 = vmatprep.subr.bf16.mxu1 %v6229_v62  ;;  %6305 = vtanh.f32 %v7235_v44  ;;  %v6296_v16 = vpop.eup %6295  ;;  %v1806_v17 = vmul.f32 %v1790_v58, %v7159_v51  ;;  %v1584_v31 = vmul.f32 %v5233_v55, %v6895_v7  ;;  %v7274_v51 = vpack.c.bf16 %v7210_v20, %v7207_v19  ;;  %v5251_v55 = vld [vmem:[%s6902_s13 + $0x370] sm:$0xff] }
  0xa0   : > { %v1746_v53 = vadd.f32 %v6900_v8, %v1730_v49  ;;  %6307 = vtanh.f32 %v7238_v48  ;;  %v6298_v22 = vpop.eup %6297  ;;  %v1807_v23 = vmul.f32 %v1791_v12, %v7173_v3  ;;  %v1645_v34 = vadd.f32 1.0, %v6296_v16  ;;  %v6233_v3 = vld [vmem:[%s9070_s3 + $0xa0] sm:$0xff]  }
  0xa1   : > { %2407 = vmatmul.mubr.bf16.vlgmr.msra.gmra.mrb[0].mxu0 %v9074_v1  ;;  %2791 = vmatmul.mubr.bf16.vlgmr.msra.gmra.mrb[0].mxu1 %v7103_v54  ;;  %6309 = vtanh.f32 %v7248_v14  ;;  %v7284_v38 = vpack.c.bf16 %v939_v11, %v938_v10  ;;  %v924_v49 = vadd.f32 1.0, %v6298_v22  ;;  %v1600_v33 = vadd.f32 %v6900_v8, %v1584_v31  ;;  %v5252_v11 = vld [vmem:[%s6902_s13 + $0x378] sm:$0xff] }
  0xa2   : > { %2414 = vmatprep.mubr.bf16.mxu0 %v7114_v2  ;;  %2798 = vmatprep.mubr.bf16.mxu1 %v7116_v5  ;;  %v7259_v13 = vmul.f32 0.5, %v1746_v53  ;;  %v7291_v46 = vpack.c.bf16 %v1807_v23, %v1806_v17  ;;  %v1661_v47 = vmul.f32 %v1645_v34, %v7178_v4  ;;  %v880_v53 = vadd.f32 %v6900_v8, %v858_v61  ;;  %v5236_v31 = vld [vmem:[%s6902_s13 + $0x2f8] sm:$0xff]  ;;  %v6235_v34 = vld [vmem:[%s9070_s3 + $0xb0] sm:$0xff]  }
  0xa3   : > { %6013 = vmatpush3.bf16.msra.mxu1 %v6229_v62  ;;  %v879_v62 = vadd.f32 %v6900_v8, %v857_v30  ;;  %v6300_v26 = vpop.eup %6299  ;;  %v1585_v30 = vmul.f32 %v5234_v15, %v6895_v7  ;;  %v7295_v58 = vmul.f32 0.5, %v1600_v33  ;;  %v940_v4 = vmul.f32 %v924_v49, %v7191_v0  ;;  %v5157_v33 = vld [vmem:[%s6902_s13 + $0x80] sm:$0xff] }
  0xa4   : > { %6014 = vmatprep.subr.bf16.mxu1 %v6230_v18  ;;  %v6302_v19 = vpop.eup %6301  ;;  %v7315_v16 = vmul.f32 0.5, %v880_v53  ;;  %v1732_v17 = vmul.f32 %v5251_v55, %v6895_v7 }
  0xa5   : > { %v7250_v59 = vmul.f32 0.5, %v879_v62  ;;  %v1601_v40 = vadd.f32 %v6900_v8, %v1585_v30  ;;  %v1792_v28 = vadd.f32 1.0, %v6302_v19  ;;  %v859_v62 = vmul.f32 %v6895_v7, %v837_v45 }
  0xa6   : > { %v1748_v45 = vadd.f32 %v6900_v8, %v1732_v17 }
  0xa7   : > { %6015 = vmatpush3.bf16.msra.mxu1 %v6230_v18  ;;  %v1644_v18 = vadd.f32 1.0, %v6294_v29  ;;  %6311 = vtanh.f32 %v7250_v59  ;;  %v881_v29 = vadd.f32 %v6900_v8, %v859_v62  ;;  %v1808_v24 = vmul.f32 %v1792_v28, %v7218_v32 }
  0xa8   : > { %6016 = vmatprep.subr.bf16.mxu1 %v6231_v39  ;;  %6313 = vtanh.f32 %v7259_v13  ;;  %v6304_v36 = vpop.eup %6303  ;;  %v7341_v28 = vmul.f32 0.5, %v1748_v45 }
  0xa9   : > { %2415 = vmatmul.mubr.bf16.gmra.mrb[4].mxu0 %v9074_v1  ;;  %2799 = vmatmul.mubr.bf16.gmra.mrb[4].mxu1 %v7121_v9  ;;  %6315 = vtanh.f32 %v7269_v25  ;;  %v1660_v20 = vmul.f32 %v1644_v18, %v7176_v35  ;;  %v1793_v50 = vadd.f32 1.0, %v6304_v36  ;;  %v7297_v35 = vmul.f32 0.5, %v1601_v40  ;;  %v6306_v10 = vpop.eup %6305  ;;  %v5235_v18 = vld [vmem:[%s6902_s13 + $0x2f0] sm:$0xff] }
  0xaa   : > { %2422 = vmatprep.mubr.bf16.mxu0 %v7123_v27  ;;  %2806 = vmatprep.mubr.bf16.mxu1 %v7139_v21  ;;  %v6308_v12 = vpop.eup %6307  ;;  %6317 = vtanh.f32 %v7295_v58  ;;  %v1646_v0 = vadd.f32 1.0, %v6306_v10  ;;  %v1586_v19 = vmul.f32 %v5235_v18, %v6895_v7  ;;  %v5158_v10 = vld [vmem:[%s6902_s13 + $0x88] sm:$0xff] }
  0xab   : > { %6017 = vmatpush3.bf16.msra.mxu1 %v6231_v39  ;;  %v925_v39 = vadd.f32 1.0, %v6300_v26  ;;  %v1809_v15 = vmul.f32 %v1793_v50, %v7220_v41  ;;  %6319 = vtanh.f32 %v7297_v35  ;;  %v6310_v22 = vpop.eup %6309  ;;  %v7323_v23 = vpack.c.bf16 %v1661_v47, %v1660_v20 }
  0xac   : > { %6018 = vmatprep.subr.bf16.mxu1 %v6232_v6  ;;  %v1647_v32 = vadd.f32 1.0, %v6308_v12  ;;  %6321 = vtanh.f32 %v7315_v16  ;;  %v1733_v41 = vmul.f32 %v5252_v11, %v6895_v7  ;;  %v926_v30 = vadd.f32 1.0, %v6310_v22  ;;  %v5159_v11 = vld [vmem:[%s6902_s13 + $0x90] sm:$0xff] }
  0xad   : > { %v1587_v20 = vmul.f32 %v5236_v31, %v6895_v7  ;;  %v7338_v61 = vpack.c.bf16 %v1809_v15, %v1808_v24  ;;  %v1662_v36 = vmul.f32 %v1646_v0, %v7235_v44  ;;  %v1602_v55 = vadd.f32 %v6900_v8, %v1586_v19  ;;  %v6236_v44 = vld [vmem:[%s9070_s3 + $0xb8] sm:$0xff]  }
  0xae   : > { %v1663_v62 = vmul.f32 %v1647_v32, %v7238_v48  ;;  %v989_v0 = vmul.f32 %v5158_v10, %v6895_v7  ;;  %v5160_v31 = vld [vmem:[%s6902_s13 + $0x98] sm:$0xff] }
  0xaf   : > { %6019 = vmatpush3.bf16.msra.mxu1 %v6232_v6  ;;  %v941_v6 = vmul.f32 %v925_v39, %v7193_v37  ;;  %v7318_v37 = vmul.f32 0.5, %v881_v29  ;;  %v1749_v39 = vadd.f32 %v6900_v8, %v1733_v41  ;;  %v1603_v48 = vadd.f32 %v6900_v8, %v1587_v20  ;;  %v5254_v29 = vld [vmem:[%s6902_s13 + $0x388] sm:$0xff] }
  0xb0   : > { %6020 = vmatprep.subr.bf16.mxu1 %v6233_v3 }
  0xb1   : > { %2423 = vmatmul.mubr.bf16.gmra.mrb[8].mxu0 %v9074_v1  ;;  %2807 = vmatmul.mubr.bf16.gmra.mrb[8].mxu1 %v7182_v57  ;;  %v6312_v43 = vpop.eup %6311  ;;  %v7330_v26 = vpack.c.bf16 %v941_v6, %v940_v4  ;;  %6323 = vtanh.f32 %v7318_v37  ;;  %v7344_v53 = vmul.f32 0.5, %v1749_v39  ;;  %v5253_v4 = vld [vmem:[%s6902_s13 + $0x380] sm:$0xff]  ;;  %v988_v6 = vmul.f32 %v5157_v33, %v6895_v7 }
  0xb2   : > { %2430 = vmatprep.mubr.bf16.mxu0 %v7188_v63  ;;  %2814 = vmatprep.mubr.bf16.mxu1 %v7274_v51  ;;  %v927_v49 = vadd.f32 1.0, %v6312_v43  ;;  %6325 = vtanh.f32 %v7341_v28  ;;  %v7367_v15 = vmul.f32 0.5, %v1603_v48  ;;  %v1863_v18 = vmul.f32 %v5253_v4, %v6895_v7  ;;  %v7391_v39 = vld [vmem:[%s9068_s1] ss:$0 sm:$0xff]  ;;  %v5256_v48 = vld [vmem:[%s6902_s13 + $0x398] sm:$0xff] }
  0xb3   : > { %6021 = vmatpush3.bf16.msra.mxu1 %v6233_v3  ;;  %v6314_v3 = vpop.eup %6313  ;;  %6327 = vtanh.f32 %v7344_v53  ;;  %v1004_v17 = vadd.f32 %v6900_v8, %v988_v6  ;;  %v991_v19 = vmul.f32 %v7391_v39, %v5160_v31  ;;  %v7394_v33 = vpack.c.bf16 %v1663_v62, %v1662_v36 }
  0xb4   : > { %6022 = vmatprep.subr.bf16.mxu1 %v6234_v56  ;;  %v6316_v40 = vpop.eup %6315  ;;  %v1794_v47 = vadd.f32 1.0, %v6314_v3  ;;  %v943_v12 = vmul.f32 %v927_v49, %v7250_v59  ;;  %v1864_v59 = vmul.f32 %v5254_v29, %v6895_v7  ;;  %v7385_v49 = vld [vmem:[%s9069_s2] ss:$0 sm:$0xff] }
  0xb5   : > { %v1795_v50 = vadd.f32 1.0, %v6316_v40  ;;  %v6318_v22 = vpop.eup %6317  ;;  %v7379_v45 = vmul.f32 0.5, %v1004_v17  ;;  %v1866_v17 = vmul.f32 %v7391_v39, %v5256_v48  ;;  %v5163_v48 = vld [vmem:[%s6902_s13 + $0xb0] sm:$0xff] }
  0xb6   : > { %v1810_v24 = vmul.f32 %v1794_v47, %v7259_v13  ;;  %v990_v13 = vmul.f32 %v5159_v11, %v6895_v7  ;;  %v6320_v41 = vpop.eup %6319  ;;  %v1648_v43 = vadd.f32 1.0, %v6318_v22  ;;  %v1880_v7 = vadd.f32 %v7385_v49, %v1864_v59  ;;  %v5255_v47 = vld [vmem:[%s6902_s13 + $0x390] sm:$0xff] }
  0xb7   : > { %6023 = vmatpush3.bf16.msra.mxu1 %v6234_v56  ;;  %v942_v56 = vmul.f32 %v926_v30, %v7248_v14  ;;  %v7365_v14 = vmul.f32 0.5, %v1602_v55  ;;  %v1811_v32 = vmul.f32 %v1795_v50, %v7269_v25  ;;  %v1005_v30 = vadd.f32 %v6900_v8, %v989_v0 }
  0xb8   : > { %6024 = vmatprep.subr.bf16.mxu1 %v6235_v34  ;;  %v1649_v3 = vadd.f32 1.0, %v6320_v41  ;;  %v1879_v25 = vadd.f32 %v6900_v8, %v1863_v18  ;;  %v7406_v4 = vmul.f32 0.5, %v1880_v7  ;;  %v1664_v36 = vmul.f32 %v1648_v43, %v7295_v58  ;;  %v5162_v58 = vld [vmem:[%s6902_s13 + $0xa8] sm:$0xff]  ;;  %v5257_v43 = vld [vmem:[%s6902_s13 + $0x3a0] sm:$0xff] }
  0xb9   : > { %2431 = vmatmul.mubr.bf16.gmra.mrb[12].mxu0 %v9074_v1  ;;  %2815 = vmatmul.mubr.bf16.gmra.mrb[12].mxu1 %v7276_v42  ;;  %6329 = vtanh.f32 %v7365_v14  ;;  %v7396_v40 = vpack.c.bf16 %v943_v12, %v942_v56  ;;  %v7398_v8 = vmul.f32 0.5, %v1005_v30  ;;  %v7402_v50 = vpack.c.bf16 %v1811_v32, %v1810_v24  ;;  %v5161_v56 = vld [vmem:[%s6902_s13 + $0xa0] sm:$0xff] }
  0xba   : > { %2438 = vmatprep.mubr.bf16.mxu0 %v7284_v38  ;;  %2822 = vmatprep.mubr.bf16.mxu1 %v7291_v46  ;;  %6331 = vtanh.f32 %v7367_v15  ;;  %v7404_v10 = vmul.f32 0.5, %v1879_v25  ;;  %v1006_v62 = vadd.f32 %v7385_v49, %v990_v13  ;;  %v1665_v6 = vmul.f32 %v1649_v3, %v7297_v35 }
  0xbb   : > { %6025 = vmatpush3.bf16.msra.mxu1 %v6235_v34  ;;  %v6322_v34 = vpop.eup %6321  ;;  %6333 = vtanh.f32 %v7379_v45  ;;  %v1865_v11 = vmul.f32 %v7391_v39, %v5255_v47  ;;  %v992_v32 = vmul.f32 %v7391_v39, %v5161_v56  ;;  %v1882_v13 = vadd.f32 %v7385_v49, %v1866_v17 }
  0xbc   : > { %6026 = vmatprep.subr.bf16.mxu1 %v6236_v44  ;;  %v6324_v20 = vpop.eup %6323  ;;  %v928_v55 = vadd.f32 1.0, %v6322_v34  ;;  %6335 = vtanh.f32 %v7398_v8  ;;  %v7423_v24 = vmul.f32 0.5, %v1006_v62  ;;  %v993_v41 = vmul.f32 %v7391_v39, %v5162_v58  ;;  %v5164_v62 = vld [vmem:[%s6902_s13 + $0xb8] sm:$0xff] }
  0xbd   : > { %v929_v29 = vadd.f32 1.0, %v6324_v20  ;;  %6337 = vtanh.f32 %v7404_v10  ;;  %v6326_v12 = vpop.eup %6325  ;;  %v1881_v22 = vadd.f32 %v7385_v49, %v1865_v11  ;;  %v1008_v3 = vadd.f32 %v7385_v49, %v992_v32  ;;  %v5258_v20 = vld [vmem:[%s6902_s13 + $0x3a8] sm:$0xff] }
  0xbe   : > { %6339 = vtanh.f32 %v7406_v4  ;;  %v6328_v18 = vpop.eup %6327  ;;  %v944_v31 = vmul.f32 %v928_v55, %v7315_v16  ;;  %v1796_v35 = vadd.f32 1.0, %v6326_v12  ;;  %v7440_v7 = vmul.f32 0.5, %v1882_v13 }
  0xbf   : > { %6027 = vmatpush3.bf16.msra.mxu1 %v6236_v44  ;;  %v1007_v44 = vadd.f32 %v7385_v49, %v991_v19  ;;  %v1797_v59 = vadd.f32 1.0, %v6328_v18  ;;  %6341 = vtanh.f32 %v7423_v24  ;;  %v945_v34 = vmul.f32 %v929_v29, %v7318_v37 }
  0xc0   : > { %v7437_v16 = vmul.f32 0.5, %v1881_v22  ;;  %v1009_v19 = vadd.f32 %v7385_v49, %v993_v41  ;;  %v1812_v47 = vmul.f32 %v1796_v35, %v7341_v28  ;;  %v1867_v37 = vmul.f32 %v7391_v39, %v5257_v43  ;;  %v5259_v22 = vld [vmem:[%s6902_s13 + $0x3b0] sm:$0xff] }
  0xc1   : > { %2439 = vmatmul.mubr.bf16.gmra.mrb[16].mxu0 %v9074_v1  ;;  %2823 = vmatmul.mubr.bf16.gmra.mrb[16].mxu1 %v7323_v23  ;;  %v7425_v0 = vmul.f32 0.5, %v1007_v44  ;;  %v1813_v55 = vmul.f32 %v1797_v59, %v7344_v53  ;;  %v7453_v56 = vmul.f32 0.5, %v1008_v3  ;;  %v7457_v28 = vpack.c.bf16 %v1665_v6, %v1664_v36 }
  0xc2   : > { %2446 = vmatprep.mubr.bf16.mxu0 %v7330_v26  ;;  %2830 = vmatprep.mubr.bf16.mxu1 %v7338_v61  ;;  %v7459_v53 = vpack.c.bf16 %v945_v34, %v944_v31  ;;  %v1868_v11 = vmul.f32 %v7391_v39, %v5258_v20  ;;  %v7462_v12 = vmul.f32 0.5, %v1009_v19  ;;  %v1883_v17 = vadd.f32 %v7385_v49, %v1867_v37  ;;  %v5260_v20 = vld [vmem:[%s6902_s13 + $0x3b8] sm:$0xff]  ;;  %v5165_v37 = vld [vmem:[%s6902_s13 + $0xc0] sm:$0xff] }
  0xc3   : > { %v6330_v30 = vpop.eup %6329  ;;  %6343 = vtanh.f32 %v7425_v0  ;;  %v994_v18 = vmul.f32 %v7391_v39, %v5163_v48  ;;  %v995_v35 = vmul.f32 %v7391_v39, %v5164_v62  ;;  %v7468_v59 = vpack.c.bf16 %v1813_v55, %v1812_v47 }
  0xc4   : > { %v6332_v25 = vpop.eup %6331  ;;  %6345 = vtanh.f32 %v7437_v16  ;;  %v1650_v29 = vadd.f32 1.0, %v6330_v30  ;;  %v1884_v31 = vadd.f32 %v7385_v49, %v1868_v11  ;;  %v7472_v30 = vmul.f32 0.5, %v1883_v17 }
  0xc5   : > { %v6334_v44 = vpop.eup %6333  ;;  %6347 = vtanh.f32 %v7440_v7  ;;  %9086 = vst [vmem:[#allocation5_spill] sm:$0xff] %v7468_v59  ;;  %v1651_v36 = vadd.f32 1.0, %v6332_v25  ;;  %v1010_v19 = vadd.f32 %v7385_v49, %v994_v18  ;;  %v1869_v47 = vmul.f32 %v7391_v39, %v5259_v22 }
  0xc6   : > { %v6336_v58 = vpop.eup %6335  ;;  %v1052_v6 = vadd.f32 1.0, %v6334_v44  ;;  %6349 = vtanh.f32 %v7453_v56  ;;  %v7474_v3 = vmul.f32 0.5, %v1884_v31  ;;  %v1011_v55 = vadd.f32 %v7385_v49, %v995_v35  ;;  %v5166_v35 = vld [vmem:[%s6902_s13 + $0xc8] sm:$0xff] }
  0xc7   : > { %v6338_v32 = vpop.eup %6337  ;;  %v1053_v41 = vadd.f32 1.0, %v6336_v58  ;;  %6351 = vtanh.f32 %v7462_v12  ;;  %v1666_v62 = vmul.f32 %v1650_v29, %v7365_v14  ;;  %v1667_v44 = vmul.f32 %v1651_v36, %v7367_v15  ;;  %v5261_v14 = vld [vmem:[%s6902_s13 + $0x3c0] sm:$0xff] }
  0xc8   : > { %v6340_v13 = vpop.eup %6339  ;;  %v1927_v43 = vadd.f32 1.0, %v6338_v32  ;;  %v1068_v11 = vmul.f32 %v1052_v6, %v7379_v45  ;;  %6353 = vtanh.f32 %v7472_v30  ;;  %v1870_v17 = vmul.f32 %v7391_v39, %v5260_v20 }
  0xc9   : > { %2447 = vmatmul.mubr.bf16.gmra.mrb[20].mxu0 %v9074_v1  ;;  %2831 = vmatmul.mubr.bf16.gmra.mrb[20].mxu1 %v7394_v33  ;;  %v1928_v34 = vadd.f32 1.0, %v6340_v13  ;;  %v6342_v25 = vpop.eup %6341  ;;  %v1069_v58 = vmul.f32 %v1053_v41, %v7398_v8  ;;  %6355 = vtanh.f32 %v7474_v3  ;;  %v1885_v18 = vadd.f32 %v7385_v49, %v1869_v47 }
  0xca   : > { %2454 = vmatprep.mubr.bf16.mxu0 %v7396_v40  ;;  %2838 = vmatprep.mubr.bf16.mxu1 %v7402_v50  ;;  %v1943_v45 = vmul.f32 %v1927_v43, %v7404_v10  ;;  %v7498_v22 = vmul.f32 0.5, %v1010_v19  ;;  %v996_v8 = vmul.f32 %v7391_v39, %v5165_v37  ;;  %v1054_v36 = vadd.f32 1.0, %v6342_v25  ;;  %v5262_v10 = vld [vmem:[%s6902_s13 + $0x3c8] sm:$0xff] }
  0xcb   : > { %v1944_v29 = vmul.f32 %v1928_v34, %v7406_v4  ;;  %v7501_v31 = vmul.f32 0.5, %v1011_v55  ;;  %v1886_v13 = vadd.f32 %v7385_v49, %v1870_v17  ;;  %v7504_v20 = vmul.f32 0.5, %v1885_v18  ;;  %v5167_v18 = vld [vmem:[%s6902_s13 + $0xd0] sm:$0xff] }
  0xcc   : > { %v997_v47 = vmul.f32 %v7391_v39, %v5166_v35  ;;  %v1871_v4 = vmul.f32 %v7391_v39, %v5261_v14  ;;  %v7509_v43 = vpack.c.bf16 %v1667_v44, %v1666_v62  ;;  %v1012_v25 = vadd.f32 %v7385_v49, %v996_v8  ;;  %v5168_v14 = vld [vmem:[%s6902_s13 + $0xd8] sm:$0xff] }
  0xcd   : > { %v6344_v48 = vpop.eup %6343  ;;  %v7511_v19 = vmul.f32 0.5, %v1886_v13  ;;  %v7514_v55 = vpack.c.bf16 %v1069_v58, %v1068_v11  ;;  %v7516_v37 = vpack.c.bf16 %v1944_v29, %v1943_v45  ;;  %6357 = vtanh.f32 %v7498_v22 }
  0xce   : > { %v6346_v15 = vpop.eup %6345  ;;  %v1055_v6 = vadd.f32 1.0, %v6344_v48  ;;  %v1070_v17 = vmul.f32 %v1054_v36, %v7423_v24  ;;  %6359 = vtanh.f32 %v7501_v31  ;;  %v1013_v62 = vadd.f32 %v7385_v49, %v997_v47 }
  0xcf   : > { %v6348_v32 = vpop.eup %6347  ;;  %v1929_v41 = vadd.f32 1.0, %v6346_v15  ;;  %9087 = vst [vmem:[#allocation6_spill] sm:$0xff] %v7516_v37  ;;  %v1872_v44 = vmul.f32 %v7391_v39, %v5262_v10  ;;  %6361 = vtanh.f32 %v7504_v20  ;;  %v1887_v58 = vadd.f32 %v7385_v49, %v1871_v4 }
  0xd0   : > { %v1930_v34 = vadd.f32 1.0, %v6348_v32  ;;  %v6350_v48 = vpop.eup %6349  ;;  %v1071_v35 = vmul.f32 %v1055_v6, %v7425_v0  ;;  %6363 = vtanh.f32 %v7511_v19  ;;  %v7533_v45 = vmul.f32 0.5, %v1012_v25  ;;  %v5264_v6 = vld [vmem:[%s6902_s13 + $0x3d8] sm:$0xff] }
  0xd1   : > { %2455 = vmatmul.mubr.bf16.gmra.mrb[24].mxu0 %v9074_v1  ;;  %2839 = vmatmul.mubr.bf16.gmra.mrb[24].mxu1 %v7457_v28  ;;  %v1945_v11 = vmul.f32 %v1929_v41, %v7437_v16  ;;  %v6352_v15 = vpop.eup %6351  ;;  %v1888_v0 = vadd.f32 %v7385_v49, %v1872_v44  ;;  %v5263_v16 = vld [vmem:[%s6902_s13 + $0x3d0] sm:$0xff]  ;;  %v998_v8 = vmul.f32 %v7391_v39, %v5167_v18  ;;  %v7540_v36 = vmul.f32 0.5, %v1013_v62 }
  0xd2   : > { %2462 = vmatprep.mubr.bf16.mxu0 %v7459_v53  ;;  %2846 = vmatprep.mubr.bf16.mxu1 %v7468_v59  ;;  %v1946_v24 = vmul.f32 %v1930_v34, %v7440_v7  ;;  %v6354_v29 = vpop.eup %6353  ;;  %v999_v7 = vmul.f32 %v7391_v39, %v5168_v14  ;;  %v1056_v13 = vadd.f32 1.0, %v6350_v48  ;;  %v1057_v41 = vadd.f32 1.0, %v6352_v15 }
  0xd3   : > { %v6356_v32 = vpop.eup %6355  ;;  %v7544_v47 = vmul.f32 0.5, %v1887_v58  ;;  %v1873_v10 = vmul.f32 %v7391_v39, %v5263_v16  ;;  %v7547_v4 = vpack.c.bf16 %v1071_v35, %v1070_v17  ;;  %6365 = vtanh.f32 %v7533_v45  ;;  %v5169_v58 = vld [vmem:[%s6902_s13 + $0xe0] sm:$0xff] }
  0xd4   : > { %v7549_v34 = vpack.c.bf16 %v1946_v24, %v1945_v11  ;;  %v7552_v25 = vmul.f32 0.5, %v1888_v0  ;;  %v1931_v62 = vadd.f32 1.0, %v6354_v29  ;;  %v1932_v44 = vadd.f32 1.0, %v6356_v32  ;;  %v5170_v24 = vld [vmem:[%s6902_s13 + $0xe8] sm:$0xff] }
  0xd5   : > { %v1014_v18 = vadd.f32 %v7385_v49, %v998_v8  ;;  %v1874_v48 = vmul.f32 %v7391_v39, %v5264_v6  ;;  %6367 = vtanh.f32 %v7540_v36  ;;  %v1015_v17 = vadd.f32 %v7385_v49, %v999_v7 }
  0xd6   : > { %9088 = vst [vmem:[#allocation7_spill] sm:$0xff] %v7549_v34  ;;  %v1072_v11 = vmul.f32 %v1056_v13, %v7453_v56  ;;  %v1073_v14 = vmul.f32 %v1057_v41, %v7462_v12  ;;  %6369 = vtanh.f32 %v7544_v47  ;;  %v1889_v15 = vadd.f32 %v7385_v49, %v1873_v10  ;;  %v5265_v56 = vld [vmem:[%s6902_s13 + $0x3e0] sm:$0xff] }
  0xd7   : > { %v6358_v35 = vpop.eup %6357  ;;  %6371 = vtanh.f32 %v7552_v25  ;;  %v1890_v16 = vadd.f32 %v7385_v49, %v1874_v48  ;;  %v1000_v29 = vmul.f32 %v7391_v39, %v5169_v58  ;;  %v1947_v12 = vmul.f32 %v1931_v62, %v7472_v30 }
  0xd8   : > { %v6360_v0 = vpop.eup %6359  ;;  %v1948_v32 = vmul.f32 %v1932_v44, %v7474_v3  ;;  %v7574_v7 = vmul.f32 0.5, %v1014_v18  ;;  %v7577_v13 = vmul.f32 0.5, %v1015_v17  ;;  %v1001_v41 = vmul.f32 %v7391_v39, %v5170_v24 }
  0xd9   : > { %2463 = vmatmul.mubr.bf16.gmra.mrb[28].mxu0 %v9074_v1  ;;  %2847 = vmatmul.mubr.bf16.gmra.mrb[28].mxu1 %v7509_v43  ;;  %v6362_v8 = vpop.eup %6361  ;;  %v7580_v10 = vpack.c.bf16 %v1073_v14, %v1072_v11  ;;  %v1058_v48 = vadd.f32 1.0, %v6358_v35  ;;  %v7582_v58 = vmul.f32 0.5, %v1889_v15  ;;  %v1875_v1 = vmul.f32 %v7391_v39, %v5265_v56  ;;  %v5171_v14 = vld [vmem:[%s6902_s13 + $0xf0] sm:$0xff] }
  0xda   : > { %2470 = vmatprep.mubr.bf16.mxu0 %v7514_v55  ;;  %2854 = vmatprep.mubr.bf16.mxu1 %v7516_v37  ;;  %v6364_v6 = vpop.eup %6363  ;;  %v1059_v30 = vadd.f32 1.0, %v6360_v0  ;;  %v7585_v62 = vmul.f32 0.5, %v1890_v16  ;;  %v1016_v3 = vadd.f32 %v7385_v49, %v1000_v29  ;;  %v7589_v18 = vpack.c.bf16 %v1948_v32, %v1947_v12  ;;  %v5172_v16 = vld [vmem:[%s6902_s13 + $0xf8] sm:$0xff] }
  0xdb   : > { %v1933_v17 = vadd.f32 1.0, %v6362_v8  ;;  %v1934_v24 = vadd.f32 1.0, %v6364_v6  ;;  %6373 = vtanh.f32 %v7574_v7  ;;  %v1017_v11 = vadd.f32 %v7385_v49, %v1001_v41  ;;  %v5268_v6 = vld [vmem:[%s6902_s13 + $0x3f8] sm:$0xff] }
  0xdc   : > { %9089 = vst [vmem:[#allocation8_spill] sm:$0xff] %v7589_v18  ;;  %6375 = vtanh.f32 %v7577_v13  ;;  %v1074_v15 = vmul.f32 %v1058_v48, %v7498_v22  ;;  %v1891_v0 = vadd.f32 %v7385_v49, %v1875_v1  ;;  %v1075_v56 = vmul.f32 %v1059_v30, %v7501_v31  ;;  %v5267_v22 = vld [vmem:[%s6902_s13 + $0x3f0] sm:$0xff] }
  0xdd   : > { %v6366_v35 = vpop.eup %6365  ;;  %6377 = vtanh.f32 %v7582_v58  ;;  %v7603_v8 = vmul.f32 0.5, %v1016_v3  ;;  %v1949_v1 = vmul.f32 %v1933_v17, %v7504_v20  ;;  %v7613_v41 = vmul.f32 0.5, %v1017_v11 }
  0xde   : > { %6379 = vtanh.f32 %v7585_v62  ;;  %v1003_v48 = vmul.f32 %v7391_v39, %v5172_v16  ;;  %v1060_v30 = vadd.f32 1.0, %v6366_v35  ;;  %v7619_v37 = vpack.c.bf16 %v1075_v56, %v1074_v15 }
  0xdf   : > { %v6368_v29 = vpop.eup %6367  ;;  %6381 = vtanh.f32 %v7603_v8 }
  0xe0   : > { %v6370_v32 = vpop.eup %6369  ;;  %v1061_v3 = vadd.f32 1.0, %v6368_v29  ;;  %6383 = vtanh.f32 %v7613_v41  ;;  %v1076_v15 = vmul.f32 %v1060_v30, %v7533_v45 }
  0xe1   : > { %2471 = vmatmul.mubr.bf16.gmra.mrb[32].mxu0 %v7048_v52  ;;  %2855 = vmatmul.mubr.bf16.gmra.mrb[32].mxu1 %v7058_v60  ;;  %v5266_v52 = vld [vmem:[%s6902_s13 + $0x3e8] sm:$0xff]  ;;  %v6372_v31 = vpop.eup %6371 }
  0xe2   : > { %2478 = vmatprep.mubr.bf16.mxu0 %v7547_v4  ;;  %2862 = vmatprep.mubr.bf16.mxu1 %v7549_v34  ;;  %v1876_v44 = vmul.f32 %v7391_v39, %v5266_v52  ;;  %v1002_v52 = vmul.f32 %v7391_v39, %v5171_v14  ;;  %v1877_v34 = vmul.f32 %v7391_v39, %v5267_v22  ;;  %v1936_v11 = vadd.f32 1.0, %v6372_v31  ;;  %v5173_v22 = vld [vmem:[%s6902_s13 + $0x100] sm:$0xff] }
  0xe3   : > { %v1019_v14 = vadd.f32 %v7385_v49, %v1003_v48  ;;  %v1077_v16 = vmul.f32 %v1061_v3, %v7540_v36  ;;  %v1134_v31 = vmul.f32 %v7391_v39, %v5173_v22  ;;  %v5176_v22 = vld [vmem:[%s6902_s13 + $0x118] sm:$0xff] }
  0xe4   : > { %v1892_v12 = vadd.f32 %v7385_v49, %v1876_v44  ;;  %v7616_v44 = vmul.f32 0.5, %v1891_v0  ;;  %v1018_v35 = vadd.f32 %v7385_v49, %v1002_v52  ;;  %v1893_v29 = vadd.f32 %v7385_v49, %v1877_v34 }
  0xe5   : > { %v6374_v0 = vpop.eup %6373  ;;  %v1952_v36 = vmul.f32 %v1936_v11, %v7552_v25  ;;  %v7648_v52 = vpack.c.bf16 %v1077_v16, %v1076_v15  ;;  %v5175_v16 = vld [vmem:[%s6902_s13 + $0x110] sm:$0xff] }
  0xe6   : > { %v7622_v20 = vmul.f32 0.5, %v1892_v12  ;;  %6385 = vtanh.f32 %v7616_v44  ;;  %v6376_v56 = vpop.eup %6375  ;;  %v7643_v34 = vmul.f32 0.5, %v1018_v35  ;;  %v1062_v48 = vadd.f32 1.0, %v6374_v0 }
  0xe7   : > { %v1063_v30 = vadd.f32 1.0, %v6376_v56  ;;  %v1150_v35 = vadd.f32 %v7385_v49, %v1134_v31  ;;  %v1137_v31 = vmul.f32 %v7391_v39, %v5176_v22 }
  0xe8   : > { %6387 = vtanh.f32 %v7622_v20  ;;  %v1078_v0 = vmul.f32 %v1062_v48, %v7574_v7  ;;  %v1136_v7 = vmul.f32 %v7391_v39, %v5175_v16  ;;  %v5178_v16 = vld [vmem:[%s6902_s13 + $0x128] sm:$0xff] }
  0xe9   : > { %2479 = vmatmul.mubr.bf16.gmra.mrb[36].mxu0 %v7114_v2  ;;  %2863 = vmatmul.mubr.bf16.gmra.mrb[36].mxu1 %v7116_v5  ;;  %v1950_v2 = vmul.f32 %v1934_v24, %v7511_v19  ;;  %v1878_v19 = vmul.f32 %v7391_v39, %v5268_v6  ;;  %v1935_v24 = vadd.f32 1.0, %v6370_v32  ;;  %v6378_v32 = vpop.eup %6377  ;;  %v7650_v6 = vmul.f32 0.5, %v1893_v29 }
  0xea   : > { %2486 = vmatprep.mubr.bf16.mxu0 %v7580_v10  ;;  %2870 = vmatprep.mubr.bf16.mxu1 %v7589_v18  ;;  %6389 = vtanh.f32 %v7643_v34  ;;  %v1079_v56 = vmul.f32 %v1063_v30, %v7577_v13  ;;  %v1139_v22 = vmul.f32 %v7391_v39, %v5178_v16  ;;  %v5181_v16 = vld [vmem:[%s6902_s13 + $0x140] sm:$0xff] }
  0xeb   : > { %v7625_v17 = vpack.c.bf16 %v1950_v2, %v1949_v1  ;;  %v1894_v12 = vadd.f32 %v7385_v49, %v1878_v19  ;;  %v1951_v45 = vmul.f32 %v1935_v24, %v7544_v47  ;;  %v5174_v1 = vld [vmem:[%s6902_s13 + $0x108] sm:$0xff]  ;;  %v7646_v2 = vmul.f32 0.5, %v1019_v14 }
  0xec   : > { %v1135_v47 = vmul.f32 %v7391_v39, %v5174_v1  ;;  %v1937_v19 = vadd.f32 1.0, %v6378_v32  ;;  %v7680_v48 = vpack.c.bf16 %v1079_v56, %v1078_v0 }
  0xed   : > { %9090 = vst [vmem:[#allocation9_spill] sm:$0xff] %v7625_v17  ;;  %v7653_v3 = vmul.f32 0.5, %v1894_v12  ;;  %v7656_v25 = vpack.c.bf16 %v1952_v36, %v1951_v45  ;;  %6391 = vtanh.f32 %v7646_v2  ;;  %v7674_v45 = vmul.f32 0.5, %v1150_v35 }
  0xee   : > { %6393 = vtanh.f32 %v7650_v6  ;;  %v1151_v15 = vadd.f32 %v7385_v49, %v1135_v47  ;;  %v1953_v12 = vmul.f32 %v1937_v19, %v7582_v58  ;;  %v1152_v47 = vadd.f32 %v7385_v49, %v1136_v7 }
  0xef   : > { %9091 = vst [vmem:[#allocation10_spill] sm:$0xff] %v7656_v25  ;;  %6395 = vtanh.f32 %v7653_v3  ;;  %v1153_v35 = vadd.f32 %v7385_v49, %v1137_v31  ;;  %v1155_v31 = vadd.f32 %v7385_v49, %v1139_v22  ;;  %v5182_v22 = vld [vmem:[%s6902_s13 + $0x148] sm:$0xff] }
  0xf0   : > { %6397 = vtanh.f32 %v7674_v45  ;;  %v7698_v56 = vmul.f32 0.5, %v1152_v47 }
  0xf1   : > { %2487 = vmatmul.mubr.bf16.gmra.mrb[40].mxu0 %v7123_v27  ;;  %2871 = vmatmul.mubr.bf16.gmra.mrb[40].mxu1 %v7139_v21  ;;  %v6380_v27 = vpop.eup %6379 }
  0xf2   : > { %2494 = vmatprep.mubr.bf16.mxu0 %v7619_v37  ;;  %2878 = vmatprep.mubr.bf16.mxu1 %v7625_v17  ;;  %v1938_v24 = vadd.f32 1.0, %v6380_v27  ;;  %v6382_v11 = vpop.eup %6381  ;;  %v7677_v27 = vmul.f32 0.5, %v1151_v15 }
  0xf3   : > { %v6384_v14 = vpop.eup %6383  ;;  %v1064_v36 = vadd.f32 1.0, %v6382_v11 }
  0xf4   : > { %v6386_v29 = vpop.eup %6385  ;;  %v1065_v1 = vadd.f32 1.0, %v6384_v14  ;;  %6399 = vtanh.f32 %v7677_v27  ;;  %v5177_v14 = vld [vmem:[%s6902_s13 + $0x120] sm:$0xff] }
  0xf5   : > { %v6388_v32 = vpop.eup %6387  ;;  %v1939_v58 = vadd.f32 1.0, %v6386_v29  ;;  %6401 = vtanh.f32 %v7698_v56 }
  0xf6   : > { %v1940_v30 = vadd.f32 1.0, %v6388_v32  ;;  %v1081_v11 = vmul.f32 %v1065_v1, %v7613_v41 }
  0xf7   : > { %v1955_v15 = vmul.f32 %v1939_v58, %v7616_v44  ;;  %v5179_v58 = vld [vmem:[%s6902_s13 + $0x130] sm:$0xff] }
  0xf9   : > { %2495 = vmatmul.mubr.bf16.gmra.mrb[44].mxu0 %v7188_v63  ;;  %2879 = vmatmul.mubr.bf16.gmra.mrb[44].mxu1 %v7274_v51  ;;  %v1954_v63 = vmul.f32 %v1938_v24, %v7585_v62  ;;  %v6390_v62 = vpop.eup %6389  ;;  %v1080_v24 = vmul.f32 %v1064_v36, %v7603_v8  ;;  %v1138_v8 = vmul.f32 %v7391_v39, %v5177_v14 }
  0xfa   : > { %2502 = vmatprep.mubr.bf16.mxu0 %v7648_v52  ;;  %2886 = vmatprep.mubr.bf16.mxu1 %v7656_v25  ;;  %v6392_v19 = vpop.eup %6391 }
  0xfb   : > { %v7682_v13 = vpack.c.bf16 %v1954_v63, %v1953_v12  ;;  %v6394_v0 = vpop.eup %6393  ;;  %v7701_v41 = vpack.c.bf16 %v1081_v11, %v1080_v24  ;;  %v1066_v12 = vadd.f32 1.0, %v6390_v62  ;;  %v1169_v63 = vmul.f32 0.5, %v1153_v35 }
  0xfc   : > { %v6396_v29 = vpop.eup %6395  ;;  %v1067_v7 = vadd.f32 1.0, %v6392_v19  ;;  %v1941_v36 = vadd.f32 1.0, %v6394_v0  ;;  %v1171_v35 = vmul.f32 0.5, %v1155_v31 }
  0xfd   : > { %9092 = vst [vmem:[#allocation11_spill] sm:$0xff] %v7682_v13  ;;  %v1942_v44 = vadd.f32 1.0, %v6396_v29  ;;  %v1082_v1 = vmul.f32 %v1066_v12, %v7643_v34  ;;  %6403 = vtanh.f32 %v1169_v63  ;;  %v1140_v34 = vmul.f32 %v7391_v39, %v5179_v58 }
  0xfe   : > { %v1083_v62 = vmul.f32 %v1067_v7, %v7646_v2  ;;  %v1957_v47 = vmul.f32 %v1941_v36, %v7650_v6 }
  0xff   : > { %v1958_v19 = vmul.f32 %v1942_v44, %v7653_v3  ;;  %v1156_v6 = vadd.f32 %v7385_v49, %v1140_v34 }
 0x100   : > { %v7721_v0 = vpack.c.bf16 %v1083_v62, %v1082_v1 }
 0x101   : > { %2503 = vmatmul.mubr.bf16.gmra.mrb[48].mxu0 %v7284_v38  ;;  %2887 = vmatmul.mubr.bf16.gmra.mrb[48].mxu1 %v7291_v46  ;;  %v1956_v38 = vmul.f32 %v1940_v30, %v7622_v20  ;;  %v1154_v20 = vadd.f32 %v7385_v49, %v1138_v8  ;;  %v6398_v30 = vpop.eup %6397  ;;  %v1172_v36 = vmul.f32 0.5, %v1156_v6 }
 0x102   : > { %2510 = vmatprep.mubr.bf16.mxu0 %v7680_v48  ;;  %2894 = vmatprep.mubr.bf16.mxu1 %v7682_v13  ;;  %v6400_v24 = vpop.eup %6399 }
 0x103   : > { %v7704_v32 = vpack.c.bf16 %v1956_v38, %v1955_v15  ;;  %v1170_v11 = vmul.f32 0.5, %v1154_v20  ;;  %v7723_v15 = vpack.c.bf16 %v1958_v19, %v1957_v47  ;;  %v1198_v38 = vadd.f32 1.0, %v6398_v30  ;;  %v6402_v29 = vpop.eup %6401 }
 0x104   : > { %v1199_v2 = vadd.f32 1.0, %v6400_v24  ;;  %v1143_v20 = vmul.f32 %v7391_v39, %v5182_v22  ;;  %v1200_v31 = vadd.f32 1.0, %v6402_v29  ;;  %v5186_v22 = vld [vmem:[%s6902_s13 + $0x168] sm:$0xff] }
 0x105   : > { %9093 = vst [vmem:[#allocation12_spill] sm:$0xff] %v7704_v32  ;;  %9094 = vst [vmem:[#allocation13_spill] sm:$0xff] %v7723_v15  ;;  %6405 = vtanh.f32 %v1170_v11  ;;  %v1214_v8 = vmul.f32 %v1198_v38, %v7674_v45 }
 0x106   : > { %6407 = vtanh.f32 %v1171_v35  ;;  %v1215_v12 = vmul.f32 %v1199_v2, %v7677_v27  ;;  %v1159_v45 = vadd.f32 %v7385_v49, %v1143_v20  ;;  %v5183_v27 = vld [vmem:[%s6902_s13 + $0x150] sm:$0xff]  ;;  %v1216_v47 = vmul.f32 %v1200_v31, %v7698_v56 }
 0x107   : > { %v6404_v7 = vpop.eup %6403  ;;  %6409 = vtanh.f32 %v1172_v36  ;;  %v1147_v31 = vmul.f32 %v7391_v39, %v5186_v22  ;;  %v5190_v22 = vld [vmem:[%s6902_s13 + $0x188] sm:$0xff] }
 0x108   : > { %v7737_v1 = vpack.c.bf16 %v1215_v12, %v1214_v8  ;;  %v1201_v58 = vadd.f32 1.0, %v6404_v7 }
 0x109   : > { %2511 = vmatmul.mubr.bf16.gmra.mrb[52].mxu0 %v7330_v26  ;;  %2895 = vmatmul.mubr.bf16.gmra.mrb[52].mxu1 %v7338_v61  ;;  %v5180_v26 = vld [vmem:[%s6902_s13 + $0x138] sm:$0xff] }
 0x10a   : > { %2518 = vmatprep.mubr.bf16.mxu0 %v7701_v41  ;;  %2902 = vmatprep.mubr.bf16.mxu1 %v7704_v32  ;;  %v1141_v14 = vmul.f32 %v7391_v39, %v5180_v26  ;;  %v1217_v19 = vmul.f32 %v1201_v58, %v1169_v63  ;;  %v5184_v26 = vld [vmem:[%s6902_s13 + $0x158] sm:$0xff]  ;;  %v5185_v63 = vld [vmem:[%s6902_s13 + $0x160] sm:$0xff] }
 0x10b   : > { %v1145_v38 = vmul.f32 %v7391_v39, %v5184_v26  ;;  %v5188_v26 = vld [vmem:[%s6902_s13 + $0x178] sm:$0xff] }
 0x10c   : > { %v1157_v3 = vadd.f32 %v7385_v49, %v1141_v14  ;;  %v1175_v14 = vmul.f32 0.5, %v1159_v45  ;;  %v7750_v2 = vpack.c.bf16 %v1217_v19, %v1216_v47 }
 0x10d   : > { %v1161_v56 = vadd.f32 %v7385_v49, %v1145_v38 }
 0x10e   : > { %v1173_v44 = vmul.f32 0.5, %v1157_v3 }
 0x10f   : > { %v6406_v62 = vpop.eup %6405  ;;  %v7763_v20 = vmul.f32 0.5, %v1161_v56 }
 0x110   : > { %6411 = vtanh.f32 %v1173_v44  ;;  %v6408_v24 = vpop.eup %6407  ;;  %v1202_v6 = vadd.f32 1.0, %v6406_v62 }
 0x111   : > { %2519 = vmatmul.mubr.bf16.gmra.mrb[56].mxu0 %v7396_v40  ;;  %2903 = vmatmul.mubr.bf16.gmra.mrb[56].mxu1 %v7402_v50  ;;  %v1142_v40 = vmul.f32 %v7391_v39, %v5181_v16  ;;  %v1203_v3 = vadd.f32 1.0, %v6408_v24  ;;  %v6410_v29 = vpop.eup %6409 }
 0x112   : > { %2526 = vmatprep.mubr.bf16.mxu0 %v7721_v0  ;;  %2910 = vmatprep.mubr.bf16.mxu1 %v7723_v15  ;;  %v1218_v8 = vmul.f32 %v1202_v6, %v1170_v11  ;;  %v1149_v6 = vmul.f32 %v7391_v39, %v5188_v26 }
 0x113   : > { %v1158_v30 = vadd.f32 %v7385_v49, %v1142_v40  ;;  %v1219_v12 = vmul.f32 %v1203_v3, %v1171_v35  ;;  %v1163_v35 = vadd.f32 %v7385_v49, %v1147_v31 }
 0x115   : > { %v1174_v34 = vmul.f32 0.5, %v1158_v30  ;;  %v7766_v58 = vpack.c.bf16 %v1219_v12, %v1218_v8  ;;  %v1204_v30 = vadd.f32 1.0, %v6410_v29  ;;  %v7781_v38 = vmul.f32 0.5, %v1163_v35 }
 0x117   : > { %6413 = vtanh.f32 %v1174_v34  ;;  %v1220_v47 = vmul.f32 %v1204_v30, %v1172_v36  ;;  %v1281_v30 = vmul.f32 %v7391_v39, %v5190_v22 }
 0x118   : > { %6415 = vtanh.f32 %v1175_v14 }
 0x119   : > { %2527 = vmatmul.mubr.bf16.gmra.mrb[60].mxu0 %v7459_v53  ;;  %2911 = vmatmul.mubr.bf16.gmra.mrb[60].mxu1 %v7468_v59  ;;  %v1144_v53 = vmul.f32 %v7391_v39, %v5183_v27  ;;  %v5187_v27 = vld [vmem:[%s6902_s13 + $0x170] sm:$0xff] }
 0x11a   : > { %2534 = vmatprep.mubr.bf16.mxu0 %v7737_v1  ;;  %6028 = vmatprep.mubr.bf16.mxu1 %v7514_v55  ;;  %v6412_v7 = vpop.eup %6411 }
 0x11b   : > { %v1160_v16 = vadd.f32 %v7385_v49, %v1144_v53  ;;  %v1205_v45 = vadd.f32 1.0, %v6412_v7 }
 0x11d   : > { %v7760_v40 = vmul.f32 0.5, %v1160_v16  ;;  %v1221_v19 = vmul.f32 %v1205_v45, %v1173_v44  ;;  %v1165_v44 = vadd.f32 %v7385_v49, %v1149_v6  ;;  %v5191_v45 = vld [vmem:[%s6902_s13 + $0x190] sm:$0xff] }
 0x11f   : > { %6417 = vtanh.f32 %v7760_v40  ;;  %v7784_v3 = vpack.c.bf16 %v1221_v19, %v1220_v47  ;;  %v7799_v31 = vmul.f32 0.5, %v1165_v44  ;;  %v5193_v47 = vld [vmem:[%s6902_s13 + $0x1a0] sm:$0xff]  ;;  %v1297_v19 = vadd.f32 %v7385_v49, %v1281_v30 }
 0x120   : > { %6419 = vtanh.f32 %v7763_v20 }
 0x121   : > { %2535 = vmatmul.mubr.bf16.gmra.mrb[64].mxu0 %v7514_v55  ;;  %6029 = vmatmul.mubr.bf16.vlgmr.msra.gmra.mrb[64].mxu1 %v7547_v4  ;;  %v1146_v55 = vmul.f32 %v7391_v39, %v5185_v63  ;;  %v6414_v62 = vpop.eup %6413  ;;  %v5189_v63 = vld [vmem:[%s6902_s13 + $0x180] sm:$0xff] }
 0x122   : > { %2542 = vmatprep.mubr.bf16.mxu0 %v7750_v2  ;;  %6032 = vmatprep.mubr.bf16.mxu1 %v7580_v10  ;;  %v6416_v24 = vpop.eup %6415  ;;  %v1206_v16 = vadd.f32 1.0, %v6414_v62  ;;  %v5192_v62 = vld [vmem:[%s6902_s13 + $0x198] sm:$0xff] }
 0x123   : > { %v1162_v11 = vadd.f32 %v7385_v49, %v1146_v55  ;;  %v1207_v56 = vadd.f32 1.0, %v6416_v24  ;;  %v1280_v55 = vmul.f32 %v7391_v39, %v5189_v63  ;;  %v1283_v26 = vmul.f32 %v7391_v39, %v5192_v62  ;;  %v5194_v24 = vld [vmem:[%s6902_s13 + $0x1a8] sm:$0xff]  ;;  %v5197_v62 = vld [vmem:[%s6902_s13 + $0x1c0] sm:$0xff] }
 0x124   : > { %v1222_v8 = vmul.f32 %v1206_v16, %v1174_v34  ;;  %v1285_v63 = vmul.f32 %v7391_v39, %v5194_v24 }
 0x125   : > { %v7778_v53 = vmul.f32 0.5, %v1162_v11  ;;  %v1223_v12 = vmul.f32 %v1207_v56, %v1175_v14  ;;  %v1296_v34 = vadd.f32 %v7385_v49, %v1280_v55  ;;  %v1282_v14 = vmul.f32 %v7391_v39, %v5191_v45  ;;  %v5196_v55 = vld [vmem:[%s6902_s13 + $0x1b8] sm:$0xff] }
 0x126   : > { %v1284_v56 = vmul.f32 %v7391_v39, %v5193_v47  ;;  %v1301_v45 = vadd.f32 %v7385_v49, %v1285_v63  ;;  %v5198_v47 = vld [vmem:[%s6902_s13 + $0x1c8] sm:$0xff]  ;;  %v5199_v63 = vld [vmem:[%s6902_s13 + $0x1d0] sm:$0xff] }
 0x127   : > { %6421 = vtanh.f32 %v7778_v53  ;;  %v7803_v11 = vpack.c.bf16 %v1223_v12, %v1222_v8  ;;  %v1298_v44 = vadd.f32 %v7385_v49, %v1282_v14  ;;  %v1299_v8 = vadd.f32 %v7385_v49, %v1283_v26 }
 0x128   : > { %6423 = vtanh.f32 %v7781_v38  ;;  %v7853_v24 = vmul.f32 0.5, %v1301_v45  ;;  %v5202_v45 = vld [vmem:[%s6902_s13 + $0x1e8] sm:$0xff] }
 0x129   : > { %2543 = vmatmul.mubr.bf16.gmra.mrb[68].mxu0 %v7547_v4  ;;  %6033 = vmatmul.mubr.bf16.gmra.mrb[68].mxu1 %v7619_v37  ;;  %v1148_v4 = vmul.f32 %v7391_v39, %v5187_v27  ;;  %v6418_v29 = vpop.eup %6417  ;;  %v7834_v30 = vmul.f32 0.5, %v1298_v44 }
 0x12a   : > { %2550 = vmatprep.mubr.bf16.mxu0 %v7766_v58  ;;  %6036 = vmatprep.mubr.bf16.mxu1 %v7648_v52  ;;  %v6420_v7 = vpop.eup %6419  ;;  %v1208_v35 = vadd.f32 1.0, %v6418_v29  ;;  %v7825_v29 = vmul.f32 0.5, %v1297_v19 }
 0x12b   : > { %v1164_v36 = vadd.f32 %v7385_v49, %v1148_v4  ;;  %v1209_v27 = vadd.f32 1.0, %v6420_v7  ;;  %v5195_v7 = vld [vmem:[%s6902_s13 + $0x1b0] sm:$0xff] }
 0x12c   : > { %v1224_v6 = vmul.f32 %v1208_v35, %v7760_v40  ;;  %v7840_v35 = vmul.f32 0.5, %v1299_v8  ;;  %v5200_v8 = vld [vmem:[%s6902_s13 + $0x1d8] sm:$0xff] }
 0x131   : > { %2551 = vmatmul.mubr.bf16.gmra.mrb[72].mxu0 %v7580_v10  ;;  %6037 = vmatmul.mubr.bf16.gmra.mrb[72].mxu1 %v7680_v48  ;;  %v7796_v10 = vmul.f32 0.5, %v1164_v36  ;;  %v6422_v4 = vpop.eup %6421  ;;  %v7821_v36 = vmul.f32 0.5, %v1296_v34 }
 0x132   : > { %2558 = vmatprep.mubr.bf16.mxu0 %v7784_v3  ;;  %6040 = vmatprep.mubr.bf16.mxu1 %v7701_v41  ;;  %v6424_v16 = vpop.eup %6423  ;;  %v1210_v22 = vadd.f32 1.0, %v6422_v4  ;;  %v7858_v4 = vld [vmem:[%s9068_s1] ss:$0 sm:$0xff] }
 0x133   : > { %6425 = vtanh.f32 %v7796_v10  ;;  %v1211_v40 = vadd.f32 1.0, %v6424_v16 }
 0x134   : > { %6427 = vtanh.f32 %v7799_v31  ;;  %v1226_v14 = vmul.f32 %v1210_v22, %v7778_v53  ;;  %v1288_v53 = vmul.f32 %v7858_v4, %v5197_v62 }
 0x135   : > { %6429 = vtanh.f32 %v7821_v36 }
 0x136   : > { %6431 = vtanh.f32 %v7825_v29 }
 0x137   : > { %6433 = vtanh.f32 %v7834_v30 }
 0x138   : > { %6435 = vtanh.f32 %v7840_v35 }
 0x139   : > { %2559 = vmatmul.mubr.bf16.gmra.mrb[76].mxu0 %v7619_v37  ;;  %6041 = vmatmul.mubr.bf16.gmra.mrb[76].mxu1 %v7721_v0  ;;  %v1225_v37 = vmul.f32 %v1209_v27, %v7763_v20  ;;  %v1300_v20 = vadd.f32 %v7385_v49, %v1284_v56  ;;  %v1286_v27 = vmul.f32 %v7391_v39, %v5195_v7 }
 0x13a   : > { %2566 = vmatprep.mubr.bf16.mxu0 %v7803_v11  ;;  %6044 = vmatprep.mubr.bf16.mxu1 %v7737_v1  ;;  %v1227_v49 = vmul.f32 %v1211_v40, %v7781_v38  ;;  %v5201_v40 = vld [vmem:[%s6902_s13 + $0x1e0] sm:$0xff] }
 0x13b   : > { %v7828_v12 = vpack.c.bf16 %v1225_v37, %v1224_v6  ;;  %v7850_v26 = vmul.f32 0.5, %v1300_v20  ;;  %v1289_v6 = vmul.f32 %v7858_v4, %v5198_v47 }
 0x13c   : > { %v7869_v37 = vpack.c.bf16 %v1227_v49, %v1226_v14 }
 0x13d   : > { %v6426_v34 = vpop.eup %6425  ;;  %6437 = vtanh.f32 %v7850_v26 }
 0x13e   : > { %v6428_v19 = vpop.eup %6427  ;;  %v1212_v16 = vadd.f32 1.0, %v6426_v34  ;;  %6439 = vtanh.f32 %v7853_v24 }
 0x13f   : > { %v1213_v56 = vadd.f32 1.0, %v6428_v19  ;;  %v1293_v19 = vmul.f32 %v7858_v4, %v5202_v45  ;;  %v5205_v45 = vld [vmem:[%s6902_s13 + $0x200] sm:$0xff] }
 0x140   : > { %v1228_v62 = vmul.f32 %v1212_v16, %v7796_v10  ;;  %v1426_v13 = vmul.f32 %v7858_v4, %v5205_v45 }
 0x141   : > { %2567 = vmatmul.mubr.bf16.gmra.mrb[80].mxu0 %v7648_v52  ;;  %6045 = vmatmul.mubr.bf16.gmra.mrb[80].mxu1 %v7750_v2  ;;  %v1287_v52 = vmul.f32 %v7391_v39, %v5196_v55  ;;  %v7865_v39 = vld [vmem:[%s9069_s2] ss:$0 sm:$0xff]  ;;  %v1290_v55 = vmul.f32 %v7858_v4, %v5199_v63  ;;  %v1229_v34 = vmul.f32 %v1213_v56, %v7799_v31 }
 0x142   : > { %2574 = vmatprep.mubr.bf16.mxu0 %v7828_v12  ;;  %6048 = vmatprep.mubr.bf16.mxu1 %v7766_v58  ;;  %v1302_v38 = vadd.f32 %v7865_v39, %v1286_v27  ;;  %v1304_v22 = vadd.f32 %v7865_v39, %v1288_v53  ;;  %v1305_v20 = vadd.f32 %v7865_v39, %v1289_v6  ;;  %v6430_v27 = vpop.eup %6429 }
 0x143   : > { %v1303_v44 = vadd.f32 %v7865_v39, %v1287_v52  ;;  %v6432_v49 = vpop.eup %6431  ;;  %v1292_v52 = vmul.f32 %v7858_v4, %v5201_v40  ;;  %v1344_v53 = vadd.f32 1.0, %v6430_v27  ;;  %v1306_v10 = vadd.f32 %v7865_v39, %v1290_v55  ;;  %v5204_v40 = vld [vmem:[%s6902_s13 + $0x1f8] sm:$0xff] }
 0x144   : > { %v7880_v7 = vmul.f32 0.5, %v1302_v38  ;;  %v7893_v47 = vmul.f32 0.5, %v1304_v22  ;;  %v7897_v38 = vmul.f32 0.5, %v1305_v20  ;;  %v6434_v31 = vpop.eup %6433  ;;  %v7900_v6 = vpack.c.bf16 %v1229_v34, %v1228_v62 }
 0x145   : > { %v7889_v14 = vmul.f32 0.5, %v1303_v44  ;;  %v1345_v16 = vadd.f32 1.0, %v6432_v49  ;;  %v6436_v44 = vpop.eup %6435  ;;  %v1308_v63 = vadd.f32 %v7865_v39, %v1292_v52  ;;  %v1309_v22 = vadd.f32 %v7865_v39, %v1293_v19  ;;  %v5206_v49 = vld [vmem:[%s6902_s13 + $0x208] sm:$0xff] }
 0x146   : > { %6441 = vtanh.f32 %v7880_v7  ;;  %v7912_v55 = vmul.f32 0.5, %v1306_v10  ;;  %v1360_v62 = vmul.f32 %v1344_v53, %v7821_v36  ;;  %v1295_v19 = vmul.f32 %v7858_v4, %v5204_v40 }
 0x147   : > { %6443 = vtanh.f32 %v7889_v14  ;;  %v6438_v20 = vpop.eup %6437  ;;  %v1361_v34 = vmul.f32 %v1345_v16, %v7825_v29  ;;  %v7923_v52 = vmul.f32 0.5, %v1308_v63  ;;  %v1346_v10 = vadd.f32 1.0, %v6434_v31 }
 0x148   : > { %6445 = vtanh.f32 %v7893_v47  ;;  %v6440_v27 = vpop.eup %6439  ;;  %v1347_v15 = vadd.f32 1.0, %v6436_v44  ;;  %v7926_v32 = vmul.f32 0.5, %v1309_v22  ;;  %v1348_v25 = vadd.f32 1.0, %v6438_v20  ;;  %v5207_v44 = vld [vmem:[%s6902_s13 + $0x210] sm:$0xff]  ;;  %v5208_v20 = vld [vmem:[%s6902_s13 + $0x218] sm:$0xff] }
 0x149   : > { %2575 = vmatmul.mubr.bf16.gmra.mrb[84].mxu0 %v7680_v48  ;;  %6049 = vmatmul.mubr.bf16.gmra.mrb[84].mxu1 %v7784_v3  ;;  %v1291_v48 = vmul.f32 %v7858_v4, %v5200_v8  ;;  %v5203_v8 = vld [vmem:[%s6902_s13 + $0x1f0] sm:$0xff]  ;;  %6447 = vtanh.f32 %v7897_v38  ;;  %v1349_v36 = vadd.f32 1.0, %v6440_v27  ;;  %v1427_v29 = vmul.f32 %v7858_v4, %v5206_v49 }
 0x14a   : > { %2582 = vmatprep.mubr.bf16.mxu0 %v7869_v37  ;;  %6052 = vmatprep.mubr.bf16.mxu1 %v7803_v11  ;;  %6449 = vtanh.f32 %v7912_v55  ;;  %v7931_v53 = vpack.c.bf16 %v1361_v34, %v1360_v62  ;;  %v1363_v22 = vmul.f32 %v1347_v15, %v7840_v35  ;;  %v1442_v40 = vadd.f32 %v7865_v39, %v1426_v13  ;;  %v5209_v34 = vld [vmem:[%s6902_s13 + $0x220] sm:$0xff]  ;;  %v5210_v35 = vld [vmem:[%s6902_s13 + $0x228] sm:$0xff] }
 0x14b   : > { %v1307_v56 = vadd.f32 %v7865_v39, %v1291_v48  ;;  %v1364_v45 = vmul.f32 %v1348_v25, %v7850_v26  ;;  %v1365_v27 = vmul.f32 %v1349_v36, %v7853_v24  ;;  %v1443_v62 = vadd.f32 %v7865_v39, %v1427_v29 }
 0x14c   : > { %v1428_v13 = vmul.f32 %v7858_v4, %v5207_v44  ;;  %v1429_v25 = vmul.f32 %v7858_v4, %v5208_v20  ;;  %v7958_v26 = vmul.f32 0.5, %v1442_v40  ;;  %v1430_v24 = vmul.f32 %v7858_v4, %v5209_v34  ;;  %v5211_v20 = vld [vmem:[%s6902_s13 + $0x230] sm:$0xff] }
 0x14d   : > { %v7919_v48 = vmul.f32 0.5, %v1307_v56  ;;  %v1311_v56 = vadd.f32 %v7865_v39, %v1295_v19  ;;  %v7963_v36 = vpack.c.bf16 %v1365_v27, %v1364_v45  ;;  %v7965_v29 = vmul.f32 0.5, %v1443_v62  ;;  %v5212_v62 = vld [vmem:[%s6902_s13 + $0x238] sm:$0xff] }
 0x14e   : > { %v1446_v27 = vadd.f32 %v7865_v39, %v1430_v24  ;;  %v1433_v24 = vmul.f32 %v7858_v4, %v5212_v62 }
 0x14f   : > { %6451 = vtanh.f32 %v7919_v48  ;;  %v7955_v19 = vmul.f32 0.5, %v1311_v56  ;;  %v1444_v56 = vadd.f32 %v7865_v39, %v1428_v13 }
 0x150   : > { %v6442_v31 = vpop.eup %6441  ;;  %6453 = vtanh.f32 %v7923_v52  ;;  %v7996_v18 = vmul.f32 0.5, %v1446_v27 }
 0x151   : > { %2583 = vmatmul.mubr.bf16.gmra.mrb[88].mxu0 %v7701_v41  ;;  %6053 = vmatmul.mubr.bf16.gmra.mrb[88].mxu1 %v7828_v12  ;;  %v1294_v41 = vmul.f32 %v7858_v4, %v5203_v8  ;;  %v6444_v63 = vpop.eup %6443  ;;  %v1362_v8 = vmul.f32 %v1346_v10, %v7834_v30  ;;  %6455 = vtanh.f32 %v7926_v32 }
 0x152   : > { %2590 = vmatprep.mubr.bf16.mxu0 %v7900_v6  ;;  %6056 = vmatprep.mubr.bf16.mxu1 %v7869_v37  ;;  %v6446_v30 = vpop.eup %6445  ;;  %v1351_v49 = vadd.f32 1.0, %v6444_v63 }
 0x153   : > { %v1310_v16 = vadd.f32 %v7865_v39, %v1294_v41  ;;  %v1350_v41 = vadd.f32 1.0, %v6442_v31  ;;  %v7961_v10 = vpack.c.bf16 %v1363_v22, %v1362_v8  ;;  %v1352_v31 = vadd.f32 1.0, %v6446_v30 }
 0x154   : > { %v1367_v8 = vmul.f32 %v1351_v49, %v7889_v14  ;;  %v1445_v22 = vadd.f32 %v7865_v39, %v1429_v25  ;;  %v5213_v14 = vld [vmem:[%s6902_s13 + $0x240] sm:$0xff] }
 0x155   : > { %v7951_v15 = vmul.f32 0.5, %v1310_v16  ;;  %v1431_v16 = vmul.f32 %v7858_v4, %v5210_v35  ;;  %v1366_v40 = vmul.f32 %v1350_v41, %v7880_v7  ;;  %v1368_v13 = vmul.f32 %v1352_v31, %v7893_v47  ;;  %v5214_v41 = vld [vmem:[%s6902_s13 + $0x248] sm:$0xff] }
 0x156   : > { %v7993_v25 = vmul.f32 0.5, %v1445_v22  ;;  %v1434_v47 = vmul.f32 %v7858_v4, %v5213_v14  ;;  %v5215_v22 = vld [vmem:[%s6902_s13 + $0x250] sm:$0xff] }
 0x157   : > { %6457 = vtanh.f32 %v7951_v15  ;;  %v1447_v7 = vadd.f32 %v7865_v39, %v1431_v16  ;;  %v7991_v49 = vpack.c.bf16 %v1367_v8, %v1366_v40 }
 0x158   : > { %6459 = vtanh.f32 %v7955_v19  ;;  %v1450_v62 = vadd.f32 %v7865_v39, %v1434_v47 }
 0x159   : > { %2591 = vmatmul.mubr.bf16.gmra.mrb[92].mxu0 %v7721_v0  ;;  %6057 = vmatmul.mubr.bf16.gmra.mrb[92].mxu1 %v7900_v6  ;;  %v6448_v0 = vpop.eup %6447  ;;  %6461 = vtanh.f32 %v7958_v26 }
 0x15a   : > { %2598 = vmatprep.mubr.bf16.mxu0 %v7931_v53  ;;  %6060 = vmatprep.mubr.bf16.mxu1 %v7931_v53  ;;  %v1353_v44 = vadd.f32 1.0, %v6448_v0  ;;  %v6450_v63 = vpop.eup %6449  ;;  %6463 = vtanh.f32 %v7965_v29  ;;  %v7987_v0 = vmul.f32 0.5, %v1444_v56  ;;  %v1435_v56 = vmul.f32 %v7858_v4, %v5214_v41 }
 0x15b   : > { %v6452_v45 = vpop.eup %6451  ;;  %v1354_v16 = vadd.f32 1.0, %v6450_v63  ;;  %v1449_v63 = vadd.f32 %v7865_v39, %v1433_v24 }
 0x15c   : > { %v6454_v34 = vpop.eup %6453  ;;  %v1369_v35 = vmul.f32 %v1353_v44, %v7897_v38  ;;  %v1355_v17 = vadd.f32 1.0, %v6452_v45  ;;  %v7999_v44 = vmul.f32 0.5, %v1447_v7  ;;  %6465 = vtanh.f32 %v7987_v0 }
 0x15d   : > { %v6456_v30 = vpop.eup %6455  ;;  %v1356_v38 = vadd.f32 1.0, %v6454_v34  ;;  %6467 = vtanh.f32 %v7993_v25  ;;  %v1370_v45 = vmul.f32 %v1354_v16, %v7912_v55  ;;  %v5216_v34 = vld [vmem:[%s6902_s13 + $0x258] sm:$0xff]  ;;  %v1451_v55 = vadd.f32 %v7865_v39, %v1435_v56 }
 0x15e   : > { %v1357_v31 = vadd.f32 1.0, %v6456_v30  ;;  %v8002_v40 = vpack.c.bf16 %v1369_v35, %v1368_v13  ;;  %v1371_v27 = vmul.f32 %v1355_v17, %v7919_v48  ;;  %6469 = vtanh.f32 %v7996_v18  ;;  %v5217_v17 = vld [vmem:[%s6902_s13 + $0x260] sm:$0xff]  ;;  %v5218_v35 = vld [vmem:[%s6902_s13 + $0x268] sm:$0xff] }
 0x15f   : > { %v1372_v14 = vmul.f32 %v1356_v38, %v7923_v52  ;;  %6471 = vtanh.f32 %v7999_v44  ;;  %v8027_v41 = vmul.f32 0.5, %v1449_v63  ;;  %v8032_v16 = vmul.f32 0.5, %v1450_v62 }
 0x160   : > { %v1373_v30 = vmul.f32 %v1357_v31, %v7926_v32  ;;  %v1437_v32 = vmul.f32 %v7858_v4, %v5216_v34  ;;  %v8030_v52 = vpack.c.bf16 %v1371_v27, %v1370_v45  ;;  %v1438_v47 = vmul.f32 %v7858_v4, %v5217_v17  ;;  %v5219_v34 = vld [vmem:[%s6902_s13 + $0x270] sm:$0xff]  ;;  %v5220_v17 = vld [vmem:[%s6902_s13 + $0x278] sm:$0xff] }
 0x161   : > { %2599 = vmatmul.mubr.bf16.gmra.mrb[96].mxu0 %v7737_v1  ;;  %6061 = vmatmul.mubr.bf16.gmra.mrb[96].mxu1 %v7961_v10  ;;  %v1432_v1 = vmul.f32 %v7858_v4, %v5211_v20  ;;  %v6458_v20 = vpop.eup %6457  ;;  %v8037_v56 = vmul.f32 0.5, %v1451_v55 }
 0x162   : > { %2606 = vmatprep.mubr.bf16.mxu0 %v7961_v10  ;;  %6064 = vmatprep.mubr.bf16.mxu1 %v7963_v36  ;;  %v6460_v7 = vpop.eup %6459  ;;  %v1358_v24 = vadd.f32 1.0, %v6458_v20  ;;  %v8035_v38 = vpack.c.bf16 %v1373_v30, %v1372_v14  ;;  %v1453_v20 = vadd.f32 %v7865_v39, %v1437_v32  ;;  %v1454_v62 = vadd.f32 %v7865_v39, %v1438_v47 }
 0x163   : > { %v1448_v8 = vadd.f32 %v7865_v39, %v1432_v1  ;;  %v6462_v48 = vpop.eup %6461  ;;  %v1359_v31 = vadd.f32 1.0, %v6460_v7  ;;  %v1441_v47 = vmul.f32 %v7858_v4, %v5220_v17 }
 0x164   : > { %v6464_v1 = vpop.eup %6463  ;;  %v1374_v14 = vmul.f32 %v1358_v24, %v7951_v15  ;;  %v8060_v15 = vmul.f32 0.5, %v1453_v20  ;;  %v8065_v24 = vmul.f32 0.5, %v1454_v62 }
 0x165   : > { %v8023_v13 = vmul.f32 0.5, %v1448_v8  ;;  %v1439_v8 = vmul.f32 %v7858_v4, %v5218_v35  ;;  %v1491_v63 = vadd.f32 1.0, %v6464_v1  ;;  %v1375_v30 = vmul.f32 %v1359_v31, %v7955_v19 }
 0x166   : > { %v6466_v27 = vpop.eup %6465  ;;  %v1440_v19 = vmul.f32 %v7858_v4, %v5219_v34 }
 0x167   : > { %6473 = vtanh.f32 %v8023_v13  ;;  %v6468_v7 = vpop.eup %6467  ;;  %v1455_v55 = vadd.f32 %v7865_v39, %v1439_v8  ;;  %v8070_v59 = vpack.c.bf16 %v1375_v30, %v1374_v14  ;;  %v1457_v30 = vadd.f32 %v7865_v39, %v1441_v47 }
 0x168   : > { %6475 = vtanh.f32 %v8027_v41  ;;  %v1456_v14 = vadd.f32 %v7865_v39, %v1440_v19 }
 0x169   : > { %2607 = vmatmul.mubr.bf16.gmra.mrb[100].mxu0 %v7750_v2  ;;  %6065 = vmatmul.mubr.bf16.gmra.mrb[100].mxu1 %v7991_v49  ;;  %v1436_v2 = vmul.f32 %v7858_v4, %v5215_v22  ;;  %v1490_v22 = vadd.f32 1.0, %v6462_v48  ;;  %6477 = vtanh.f32 %v8032_v16  ;;  %v6470_v48 = vpop.eup %6469  ;;  %v8098_v47 = vmul.f32 0.5, %v1457_v30 }
 0x16a   : > { %2614 = vmatprep.mubr.bf16.mxu0 %v7963_v36  ;;  %6068 = vmatprep.mubr.bf16.mxu1 %v8002_v40  ;;  %6479 = vtanh.f32 %v8037_v56  ;;  %v6472_v1 = vpop.eup %6471  ;;  %v1494_v34 = vadd.f32 1.0, %v6470_v48  ;;  %v8094_v19 = vmul.f32 0.5, %v1456_v14 }
 0x16b   : > { %v1452_v45 = vadd.f32 %v7865_v39, %v1436_v2  ;;  %v1506_v2 = vmul.f32 %v1490_v22, %v7958_v26  ;;  %v1492_v26 = vadd.f32 1.0, %v6466_v27  ;;  %v8072_v22 = vmul.f32 0.5, %v1455_v55 }
 0x16d   : > { %v8058_v35 = vmul.f32 0.5, %v1452_v45  ;;  %v1508_v17 = vmul.f32 %v1492_v26, %v7987_v0 }
 0x16f   : > { %6481 = vtanh.f32 %v8058_v35 }
 0x170   : > { %6483 = vtanh.f32 %v8060_v15 }
 0x171   : > { %2615 = vmatmul.mubr.bf16.gmra.mrb[104].mxu0 %v7766_v58  ;;  %6069 = vmatmul.mubr.bf16.gmra.mrb[104].mxu1 %v8030_v52  ;;  %v1507_v58 = vmul.f32 %v1491_v63, %v7965_v29  ;;  %v1493_v29 = vadd.f32 1.0, %v6468_v7  ;;  %v6474_v7 = vpop.eup %6473  ;;  %6485 = vtanh.f32 %v8065_v24 }
 0x172   : > { %2622 = vmatprep.mubr.bf16.mxu0 %v7991_v49  ;;  %6072 = vmatprep.mubr.bf16.mxu1 %v8035_v38  ;;  %v6476_v55 = vpop.eup %6475  ;;  %6487 = vtanh.f32 %v8072_v22  ;;  %v1496_v26 = vadd.f32 1.0, %v6474_v7 }
 0x173   : > { %v8076_v20 = vpack.c.bf16 %v1507_v58, %v1506_v2  ;;  %v1509_v48 = vmul.f32 %v1493_v29, %v7993_v25  ;;  %v6478_v2 = vpop.eup %6477  ;;  %v1510_v58 = vmul.f32 %v1494_v34, %v7996_v18  ;;  %v1497_v29 = vadd.f32 1.0, %v6476_v55 }
 0x174   : > { %v8063_v32 = vpop.f32.mrb[0].mxu0  ;;  %v8068_v31 = vpop.f32.mrb[0].mxu1  ;;  %6489 = vtanh.f32 %v8094_v19  ;;  %v1512_v7 = vmul.f32 %v1496_v26, %v8023_v13 }
 0x175   : > { %9095 = vst [vmem:[#allocation14_spill] sm:$0xff] %v8063_v32  ;;  %v2410_v8 = vpop.f32.mrb[1].mxu0  ;;  %v2794_v63 = vpop.f32.mrb[1].mxu1  ;;  %v1495_v32 = vadd.f32 1.0, %v6472_v1  ;;  %6491 = vtanh.f32 %v8098_v47  ;;  %v1513_v55 = vmul.f32 %v1497_v29, %v8027_v41 }
 0x176   : > { %v8074_v45 = vpop.f32.mrb[2].mxu0  ;;  %v8079_v62 = vpop.f32.mrb[2].mxu1  ;;  %v8102_v8 = vpack.c.bf16 %v1509_v48, %v1508_v17 }
 0x177   : > { %9096 = vst [vmem:[#allocation15_spill] sm:$0xff] %v8079_v62  ;;  %v2413_v4 = vpop.f32.mrb[3].mxu0  ;;  %v2797_v27 = vpop.f32.mrb[3].mxu1  ;;  %v1511_v39 = vmul.f32 %v1495_v32, %v7999_v44  ;;  %v1498_v44 = vadd.f32 1.0, %v6478_v2 }
 0x178   : > { %v6480_v1 = vpop.eup %6479 }
 0x179   : > { %2623 = vmatmul.mubr.bf16.gmra.mrb[108].mxu0 %v7784_v3  ;;  %6073 = vmatmul.mubr.bf16.gmra.mrb[108].mxu1 %v8070_v59  ;;  %v8106_v18 = vpack.c.bf16 %v1511_v39, %v1510_v58  ;;  %v1499_v32 = vadd.f32 1.0, %v6480_v1  ;;  %v6482_v30 = vpop.eup %6481  ;;  %v1514_v2 = vmul.f32 %v1498_v44, %v8032_v16 }
 0x17a   : > { %2630 = vmatprep.mubr.bf16.mxu0 %v8002_v40  ;;  %6076 = vmatprep.mubr.bf16.mxu1 %v8076_v20  ;;  %v6484_v17 = vpop.eup %6483  ;;  %v1500_v13 = vadd.f32 1.0, %v6482_v30 }
 0x17b   : > { %v6486_v48 = vpop.eup %6485  ;;  %v1515_v58 = vmul.f32 %v1499_v32, %v8037_v56  ;;  %v1501_v26 = vadd.f32 1.0, %v6484_v17 }
 0x17c   : > { %v8096_v3 = vpop.f32.mrb[4].mxu0  ;;  %v8100_v0 = vpop.f32.mrb[4].mxu1 }
 0x17d   : > { %v2418_v25 = vpop.f32.mrb[5].mxu0  ;;  %v2802_v63 = vpop.f32.mrb[5].mxu1  ;;  %v1517_v30 = vmul.f32 %v1501_v26, %v8060_v15 }
 0x17e   : > { %v8104_v4 = vpop.f32.mrb[6].mxu0  ;;  %v8108_v34 = vpop.f32.mrb[6].mxu1  ;;  %v8124_v63 = vpack.c.bf16 %v1513_v55, %v1512_v7  ;;  %v1516_v7 = vmul.f32 %v1500_v13, %v8058_v35 }
 0x17f   : > { %9097 = vst [vmem:[#allocation16_spill] sm:$0xff] %v8108_v34  ;;  %v2421_v14 = vpop.f32.mrb[7].mxu0  ;;  %v2805_v27 = vpop.f32.mrb[7].mxu1 }
 0x180   : > { %v6488_v39 = vpop.eup %6487  ;;  %v8128_v14 = vpack.c.bf16 %v1515_v58, %v1514_v2  ;;  %v1502_v27 = vadd.f32 1.0, %v6486_v48 }
 0x181   : > { %2631 = vmatmul.mubr.bf16.gmra.mrb[112].mxu0 %v7803_v11  ;;  %6077 = vmatmul.mubr.bf16.gmra.mrb[112].mxu1 %v8102_v8  ;;  %v1503_v62 = vadd.f32 1.0, %v6488_v39  ;;  %v6490_v32 = vpop.eup %6489  ;;  %v8144_v39 = vpack.c.bf16 %v1517_v30, %v1516_v7 }
 0x182   : > { %2638 = vmatprep.mubr.bf16.mxu0 %v8030_v52  ;;  %6080 = vmatprep.mubr.bf16.mxu1 %v8106_v18  ;;  %v6492_v17 = vpop.eup %6491  ;;  %v1518_v55 = vmul.f32 %v1502_v27, %v8065_v24 }
 0x183   : > { %v1519_v48 = vmul.f32 %v1503_v62, %v8072_v22  ;;  %v1505_v35 = vadd.f32 1.0, %v6492_v17 }
 0x184   : > { %v8120_v1 = vpop.f32.mrb[8].mxu0  ;;  %v8122_v25 = vpop.f32.mrb[8].mxu1 }
 0x185   : > { %9098 = vst [vmem:[#allocation17_spill] sm:$0xff] %v8122_v25  ;;  %v2426_v11 = vpop.f32.mrb[9].mxu0  ;;  %v2810_v41 = vpop.f32.mrb[9].mxu1  ;;  %v8148_v26 = vpack.c.bf16 %v1519_v48, %v1518_v55  ;;  %v1521_v62 = vmul.f32 %v1505_v35, %v8098_v47 }
 0x186   : > { %v8126_v29 = vpop.f32.mrb[10].mxu0  ;;  %v8130_v16 = vpop.f32.mrb[10].mxu1  ;;  %v1504_v11 = vadd.f32 1.0, %v6490_v32 }
 0x187   : > { %9099 = vst [vmem:[#allocation18_spill] sm:$0xff] %v8130_v16  ;;  %v2429_v56 = vpop.f32.mrb[11].mxu0  ;;  %v2813_v44 = vpop.f32.mrb[11].mxu1 }
 0x188   : > { %v1520_v22 = vmul.f32 %v1504_v11, %v8094_v19 }
 0x189   : > { %2639 = vmatmul.mubr.bf16.gmra.mrb[116].mxu0 %v7828_v12  ;;  %6081 = vmatmul.mubr.bf16.gmra.mrb[116].mxu1 %v8124_v63 }
 0x18a   : > { %2646 = vmatprep.mubr.bf16.mxu0 %v8035_v38  ;;  %6084 = vmatprep.mubr.bf16.mxu1 %v8128_v14  ;;  %v8162_v7 = vpack.c.bf16 %v1521_v62, %v1520_v22 }
 0x18c   : > { %v8140_v2 = vpop.f32.mrb[12].mxu0  ;;  %v8142_v58 = vpop.f32.mrb[12].mxu1 }
 0x18d   : > { %9100 = vst [vmem:[#allocation19_spill] sm:$0xff] %v8142_v58  ;;  %v2434_v12 = vpop.f32.mrb[13].mxu0  ;;  %v2818_v13 = vpop.f32.mrb[13].mxu1 }
 0x18e   : > { %v8146_v15 = vpop.f32.mrb[14].mxu0  ;;  %v8150_v41 = vpop.f32.mrb[14].mxu1 }
 0x18f   : > { %9101 = vst [vmem:[#allocation20_spill] sm:$0xff] %v8150_v41  ;;  %v2437_v56 = vpop.f32.mrb[15].mxu0  ;;  %v2821_v24 = vpop.f32.mrb[15].mxu1 }
 0x191   : > { %2647 = vmatmul.mubr.bf16.gmra.mrb[120].mxu0 %v7869_v37  ;;  %6085 = vmatmul.mubr.bf16.gmra.mrb[120].mxu1 %v8144_v39 }
 0x192   : > { %2654 = vmatprep.mubr.bf16.mxu0 %v8070_v59  ;;  %6088 = vmatprep.mubr.bf16.mxu1 %v8148_v26 }
 0x194   : > { %v8158_v27 = vpop.f32.mrb[16].mxu0  ;;  %v8160_v44 = vpop.f32.mrb[16].mxu1 }
 0x195   : > { %9102 = vst [vmem:[#allocation21_spill] sm:$0xff] %v8160_v44  ;;  %v2442_v32 = vpop.f32.mrb[17].mxu0  ;;  %v2826_v30 = vpop.f32.mrb[17].mxu1 }
 0x196   : > { %v8164_v17 = vpop.f32.mrb[18].mxu0  ;;  %v8166_v37 = vpop.f32.mrb[18].mxu1 }
 0x197   : > { %9103 = vst [vmem:[#allocation22_spill] sm:$0xff] %v8166_v37  ;;  %v2445_v55 = vpop.f32.mrb[19].mxu0  ;;  %v2829_v19 = vpop.f32.mrb[19].mxu1 }
 0x199   : > { %2655 = vmatmul.mubr.bf16.gmra.mrb[124].mxu0 %v7900_v6  ;;  %6089 = vmatmul.mubr.bf16.gmra.mrb[124].mxu1 %v8162_v7 }
 0x19a   : > { %2662 = vmatprep.mubr.bf16.mxu0 %v8076_v20  ;;  %6092 = vmatprep.mubr.bf16.mxu1 %v7103_v54 }
 0x19c   : > { %v8172_v47 = vpop.f32.mrb[20].mxu0  ;;  %v8174_v48 = vpop.f32.mrb[20].mxu1 }
 0x19d   : > { %9104 = vst [vmem:[#allocation23_spill] sm:$0xff] %v8174_v48  ;;  %v2450_v12 = vpop.f32.mrb[21].mxu0  ;;  %v2834_v11 = vpop.f32.mrb[21].mxu1 }
 0x19e   : > { %v8176_v35 = vpop.f32.mrb[22].mxu0  ;;  %v8178_v13 = vpop.f32.mrb[22].mxu1 }
 0x19f   : > { %9105 = vst [vmem:[#allocation24_spill] sm:$0xff] %v8178_v13  ;;  %v2453_v56 = vpop.f32.mrb[23].mxu0  ;;  %v2837_v24 = vpop.f32.mrb[23].mxu1 }
 0x1a1   : > { %2663 = vmatmul.mubr.bf16.gmra.mrb[128].mxu0 %v7931_v53  ;;  %6093 = vmatmul.mubr.bf16.gmra.mrb[128].mxu1 %v7121_v9 }
 0x1a2   : > { %2670 = vmatprep.mubr.bf16.mxu0 %v8102_v8  ;;  %6096 = vmatprep.mubr.bf16.mxu1 %v7182_v57 }
 0x1a4   : > { %v8184_v6 = vpop.f32.mrb[24].mxu0  ;;  %v8186_v22 = vpop.f32.mrb[24].mxu1 }
 0x1a5   : > { %9106 = vst [vmem:[#allocation25_spill] sm:$0xff] %v8186_v22  ;;  %v2458_v62 = vpop.f32.mrb[25].mxu0  ;;  %v2842_v32 = vpop.f32.mrb[25].mxu1 }
 0x1a6   : > { %v8188_v30 = vpop.f32.mrb[26].mxu0  ;;  %v8190_v55 = vpop.f32.mrb[26].mxu1 }
 0x1a7   : > { %9107 = vst [vmem:[#allocation26_spill] sm:$0xff] %v8190_v55  ;;  %v2461_v19 = vpop.f32.mrb[27].mxu0  ;;  %v2845_v12 = vpop.f32.mrb[27].mxu1 }
 0x1a9   : > { %2671 = vmatmul.mubr.bf16.gmra.mrb[132].mxu0 %v7961_v10  ;;  %6097 = vmatmul.mubr.bf16.gmra.mrb[132].mxu1 %v7276_v42 }
 0x1aa   : > { %2678 = vmatprep.mubr.bf16.mxu0 %v8106_v18  ;;  %6100 = vmatprep.mubr.bf16.mxu1 %v7323_v23 }
 0x1ac   : > { %v8196_v53 = vpop.f32.mrb[28].mxu0  ;;  %v8198_v11 = vpop.f32.mrb[28].mxu1 }
 0x1ad   : > { %9108 = vst [vmem:[#allocation27_spill] sm:$0xff] %v8198_v11  ;;  %v2466_v56 = vpop.f32.mrb[29].mxu0  ;;  %v2850_v24 = vpop.f32.mrb[29].mxu1 }
 0x1ae   : > { %v8200_v62 = vpop.f32.mrb[30].mxu0  ;;  %v8202_v32 = vpop.f32.mrb[30].mxu1 }
 0x1af   : > { %9109 = vst [vmem:[#allocation28_spill] sm:$0xff] %v8202_v32  ;;  %v2469_v19 = vpop.f32.mrb[31].mxu0  ;;  %v2853_v12 = vpop.f32.mrb[31].mxu1 }
 0x1b1   : > { %2679 = vmatmul.mubr.bf16.gmra.mrb[136].mxu0 %v7963_v36  ;;  %6101 = vmatmul.mubr.bf16.gmra.mrb[136].mxu1 %v7394_v33 }
 0x1b2   : > { %2686 = vmatprep.mubr.bf16.mxu0 %v8124_v63  ;;  %6104 = vmatprep.mubr.bf16.mxu1 %v7457_v28 }
 0x1b4   : > { %v8208_v10 = vpop.f32.mrb[32].mxu0  ;;  %v8210_v55 = vpop.f32.mrb[32].mxu1 }
 0x1b5   : > { %9110 = vst [vmem:[#allocation29_spill] sm:$0xff] %v8210_v55  ;;  %v2474_v56 = vpop.f32.mrb[33].mxu0  ;;  %v2858_v24 = vpop.f32.mrb[33].mxu1 }
 0x1b6   : > { %v8212_v22 = vpop.f32.mrb[34].mxu0  ;;  %v8214_v11 = vpop.f32.mrb[34].mxu1 }
 0x1b7   : > { %9111 = vst [vmem:[#allocation30_spill] sm:$0xff] %v8214_v11  ;;  %v2477_v19 = vpop.f32.mrb[35].mxu0  ;;  %v2861_v12 = vpop.f32.mrb[35].mxu1 }
 0x1b9   : > { %2687 = vmatmul.mubr.bf16.gmra.mrb[140].mxu0 %v7991_v49  ;;  %6105 = vmatmul.mubr.bf16.gmra.mrb[140].mxu1 %v7509_v43 }
 0x1ba   : > { %2694 = vmatprep.mubr.bf16.mxu0 %v8128_v14  ;;  %6108 = vmatprep.mubr.bf16.mxu1 %v7058_v60 }
 0x1bc   : > { %v8220_v36 = vpop.f32.mrb[36].mxu0  ;;  %v8222_v32 = vpop.f32.mrb[36].mxu1 }
 0x1bd   : > { %9112 = vst [vmem:[#allocation31_spill] sm:$0xff] %v8222_v32  ;;  %v2482_v56 = vpop.f32.mrb[37].mxu0  ;;  %v2866_v24 = vpop.f32.mrb[37].mxu1 }
 0x1be   : > { %v8224_v55 = vpop.f32.mrb[38].mxu0  ;;  %v8226_v37 = vpop.f32.mrb[38].mxu1 }
 0x1bf   : > { %9113 = vst [vmem:[#allocation32_spill] sm:$0xff] %v8226_v37  ;;  %v2485_v19 = vpop.f32.mrb[39].mxu0  ;;  %v2869_v12 = vpop.f32.mrb[39].mxu1 }
 0x1c1   : > { %2695 = vmatmul.mubr.bf16.gmra.mrb[144].mxu0 %v8002_v40  ;;  %6109 = vmatmul.mubr.bf16.gmra.mrb[144].mxu1 %v7116_v5 }
 0x1c2   : > { %2702 = vmatprep.mubr.bf16.mxu0 %v8144_v39  ;;  %6112 = vmatprep.mubr.bf16.mxu1 %v7139_v21 }
 0x1c4   : > { %v8232_v60 = vpop.f32.mrb[40].mxu0  ;;  %v8234_v49 = vpop.f32.mrb[40].mxu1 }
 0x1c5   : > { %9114 = vst [vmem:[#allocation33_spill] sm:$0xff] %v8234_v49  ;;  %v2490_v56 = vpop.f32.mrb[41].mxu0  ;;  %v2874_v24 = vpop.f32.mrb[41].mxu1 }
 0x1c6   : > { %v8236_v11 = vpop.f32.mrb[42].mxu0  ;;  %v8238_v32 = vpop.f32.mrb[42].mxu1 }
 0x1c7   : > { %9115 = vst [vmem:[#allocation34_spill] sm:$0xff] %v8238_v32  ;;  %v2493_v19 = vpop.f32.mrb[43].mxu0  ;;  %v2877_v12 = vpop.f32.mrb[43].mxu1 }
 0x1c9   : > { %2703 = vmatmul.mubr.bf16.gmra.mrb[148].mxu0 %v8030_v52  ;;  %6113 = vmatmul.mubr.bf16.gmra.mrb[148].mxu1 %v7274_v51 }
 0x1ca   : > { %2710 = vmatprep.mubr.bf16.mxu0 %v8148_v26  ;;  %6116 = vmatprep.mubr.bf16.mxu1 %v7291_v46 }
 0x1cc   : > { %v8244_v5 = vpop.f32.mrb[44].mxu0  ;;  %v8246_v21 = vpop.f32.mrb[44].mxu1 }
 0x1cd   : > { %9116 = vst [vmem:[#allocation35_spill] sm:$0xff] %v8246_v21  ;;  %v2498_v40 = vpop.f32.mrb[45].mxu0  ;;  %v2882_v56 = vpop.f32.mrb[45].mxu1 }
 0x1ce   : > { %v8248_v24 = vpop.f32.mrb[46].mxu0  ;;  %v8250_v49 = vpop.f32.mrb[46].mxu1 }
 0x1cf   : > { %9117 = vst [vmem:[#allocation36_spill] sm:$0xff] %v8250_v49  ;;  %v2501_v19 = vpop.f32.mrb[47].mxu0  ;;  %v2885_v12 = vpop.f32.mrb[47].mxu1 }
 0x1d1   : > { %2711 = vmatmul.mubr.bf16.gmra.mrb[152].mxu0 %v8035_v38  ;;  %6117 = vmatmul.mubr.bf16.gmra.mrb[152].mxu1 %v7338_v61  ;;  %v9120_v38 = vld [vmem:[#allocation5_spill] sm:$0xff]  ;;  %v9121_v61 = vld [vmem:[#allocation6_spill] sm:$0xff] }
 0x1d2   : > { %2718 = vmatprep.mubr.bf16.mxu0 %v8162_v7  ;;  %6120 = vmatprep.mubr.bf16.mxu1 %v7402_v50 }
 0x1d4   : > { %v8256_v51 = vpop.f32.mrb[48].mxu0  ;;  %v8258_v46 = vpop.f32.mrb[48].mxu1 }
 0x1d5   : > { %9118 = vst [vmem:[#allocation37_spill] sm:$0xff] %v8258_v46  ;;  %v2506_v52 = vpop.f32.mrb[49].mxu0  ;;  %v2890_v40 = vpop.f32.mrb[49].mxu1 }
 0x1d6   : > { %v8260_v56 = vpop.f32.mrb[50].mxu0  ;;  %v8262_v32 = vpop.f32.mrb[50].mxu1 }
 0x1d7   : > { %9119 = vst [vmem:[#allocation38_spill] sm:$0xff] %v8262_v32  ;;  %v2509_v19 = vpop.f32.mrb[51].mxu0  ;;  %v2893_v12 = vpop.f32.mrb[51].mxu1 }
 0x1d9   : > { %2719 = vmatmul.mubr.bf16.gmra.mrb[156].mxu0 %v8070_v59  ;;  %6121 = vmatmul.mubr.bf16.gmra.mrb[156].mxu1 %v9120_v38  ;;  %v9124_v59 = vld [vmem:[#allocation7_spill] sm:$0xff] }
 0x1da   : > { %2726 = vmatprep.mubr.bf16.mxu0 %v7103_v54  ;;  %6124 = vmatprep.mubr.bf16.mxu1 %v9121_v61  ;;  %v9125_v54 = vld [vmem:[#allocation8_spill] sm:$0xff] }
 0x1dc   : > { %v8268_v50 = vpop.f32.mrb[52].mxu0  ;;  %v8270_v49 = vpop.f32.mrb[52].mxu1 }
 0x1dd   : > { %9122 = vst [vmem:[#allocation5_spill] sm:$0xff] %v8270_v49  ;;  %v2514_v52 = vpop.f32.mrb[53].mxu0  ;;  %v2898_v40 = vpop.f32.mrb[53].mxu1 }
 0x1de   : > { %v8272_v46 = vpop.f32.mrb[54].mxu0  ;;  %v8274_v21 = vpop.f32.mrb[54].mxu1 }
 0x1df   : > { %9123 = vst [vmem:[#allocation6_spill] sm:$0xff] %v8274_v21  ;;  %v2517_v19 = vpop.f32.mrb[55].mxu0  ;;  %v2901_v12 = vpop.f32.mrb[55].mxu1 }
 0x1e1   : > { %2727 = vmatmul.mubr.bf16.gmra.mrb[160].mxu0 %v8076_v20  ;;  %6125 = vmatmul.mubr.bf16.gmra.mrb[160].mxu1 %v9124_v59  ;;  %v9128_v20 = vld [vmem:[#allocation9_spill] sm:$0xff] }
 0x1e2   : > { %2734 = vmatprep.mubr.bf16.mxu0 %v7121_v9  ;;  %6128 = vmatprep.mubr.bf16.mxu1 %v9125_v54  ;;  %v9129_v9 = vld [vmem:[#allocation10_spill] sm:$0xff] }
 0x1e4   : > { %v8280_v38 = vpop.f32.mrb[56].mxu0  ;;  %v8282_v61 = vpop.f32.mrb[56].mxu1 }
 0x1e5   : > { %9126 = vst [vmem:[#allocation7_spill] sm:$0xff] %v8282_v61  ;;  %v2522_v52 = vpop.f32.mrb[57].mxu0  ;;  %v2906_v40 = vpop.f32.mrb[57].mxu1 }
 0x1e6   : > { %v8284_v32 = vpop.f32.mrb[58].mxu0  ;;  %v8286_v49 = vpop.f32.mrb[58].mxu1 }
 0x1e7   : > { %9127 = vst [vmem:[#allocation8_spill] sm:$0xff] %v8286_v49  ;;  %v2525_v19 = vpop.f32.mrb[59].mxu0  ;;  %v2909_v12 = vpop.f32.mrb[59].mxu1 }
 0x1e9   : > { %2735 = vmatmul.mubr.bf16.gmra.mrb[164].mxu0 %v8102_v8  ;;  %6129 = vmatmul.mubr.bf16.gmra.mrb[164].mxu1 %v9128_v20  ;;  %v8303_v8 = vld [vmem:[%s9071_s4] ss:$0 sm:$0xff]  ;;  %v9133_v20 = vld [vmem:[#allocation12_spill] sm:$0xff] }
 0x1ea   : > { %2742 = vmatprep.mubr.bf16.mxu0 %v7182_v57  ;;  %6132 = vmatprep.mubr.bf16.mxu1 %v9129_v9  ;;  %v9132_v57 = vld [vmem:[#allocation11_spill] sm:$0xff]  ;;  %v2417_v9 = vadd.f32 %v8303_v8, %v8096_v3  ;;  %v2420_v49 = vadd.f32 %v8303_v8, %v8104_v4  ;;  %v9135_v4 = vld [vmem:[#allocation13_spill] sm:$0xff] }
 0x1ec   : > { %v8292_v59 = vpop.f32.mrb[60].mxu0  ;;  %v8294_v54 = vpop.f32.mrb[60].mxu1 }
 0x1ed   : > { %9130 = vst [vmem:[#allocation9_spill] sm:$0xff] %v8294_v54  ;;  %v2530_v52 = vpop.f32.mrb[61].mxu0  ;;  %v2914_v40 = vpop.f32.mrb[61].mxu1 }
 0x1ee   : > { %v8296_v61 = vpop.f32.mrb[62].mxu0  ;;  %v8298_v21 = vpop.f32.mrb[62].mxu1  ;;  %v9134_v52 = vld [vmem:[#allocation14_spill] sm:$0xff] }
 0x1ef   : > { %9131 = vst [vmem:[#allocation10_spill] sm:$0xff] %v8298_v21  ;;  %v2533_v19 = vpop.f32.mrb[63].mxu0  ;;  %v2917_v12 = vpop.f32.mrb[63].mxu1  ;;  %v2409_v40 = vadd.f32 %v8303_v8, %v9134_v52 }
 0x1f1   : > { %2743 = vmatmul.mubr.bf16.gmra.mrb[168].mxu0 %v8106_v18  ;;  %6133 = vmatmul.mubr.bf16.gmra.mrb[168].mxu1 %v9132_v57 }
 0x1f2   : > { %2750 = vmatprep.mubr.bf16.mxu0 %v7276_v42  ;;  %6136 = vmatprep.mubr.bf16.mxu1 %v9133_v20  ;;  %v2412_v42 = vadd.f32 %v8303_v8, %v8074_v45  ;;  %v9136_v45 = vmov 0  }
 0x1f4   : > { %v8313_v19 = vpop.f32.mrb[64].mxu0  ;;  %v6030_v12 = vpop.f32.mrb[64].mxu1 }
 0x1f5   : > { %v2962_v21 = vadd.f32 %v6030_v12, %v2417_v9  ;;  %v2538_v18 = vpop.f32.mrb[65].mxu0  ;;  %v2953_v54 = vpop.f32.mrb[65].mxu1 }
 0x1f6   : > { %v2954_v57 = vadd.f32 %v2953_v54, %v2409_v40  ;;  %v8321_v20 = vpop.f32.mrb[66].mxu0  ;;  %v6031_v3 = vpop.f32.mrb[66].mxu1  ;;  %v2433_v54 = vadd.f32 %v8303_v8, %v8140_v2  ;;  %v2436_v2 = vadd.f32 %v8303_v8, %v8146_v15 }
 0x1f7   : > { %v2965_v37 = vadd.f32 %v6031_v3, %v2420_v49  ;;  %v2541_v52 = vpop.f32.mrb[67].mxu0  ;;  %v2956_v13 = vpop.f32.mrb[67].mxu1 }
 0x1f8   : > { %v2957_v44 = vadd.f32 %v2956_v13, %v2412_v42  ;;  %v4238_v48 = vmul.f32 %v2954_v57, %v2954_v57  ;;  %v4240_v13 = vmul.f32 %v2962_v21, %v2962_v21  ;;  %v2428_v42 = vadd.f32 %v8303_v8, %v8126_v29 }
 0x1f9   : > { %v5565_v16 = vpack.c.bf16 %v2965_v37, %v2962_v21  ;;  %2751 = vmatmul.mubr.bf16.gmra.mrb[172].mxu0 %v8124_v63  ;;  %6137 = vmatmul.mubr.bf16.gmra.mrb[172].mxu1 %v9135_v4  ;;  %v2425_v63 = vadd.f32 %v8303_v8, %v8120_v1 }
 0x1fa   : > { %v5560_v9 = vpack.c.bf16 %v2957_v44, %v2954_v57  ;;  %v4104_v12 = vadd.f32 %v2957_v44, %v2954_v57  ;;  %v4239_v18 = vmul.f32 %v2957_v44, %v2957_v44  ;;  %2758 = vmatprep.mubr.bf16.mxu0 %v7323_v23  ;;  %6140 = vmatprep.mubr.bf16.mxu1 %v9136_v45 }
 0x1fb   : > { %5877 = vst [vmem:[%s8329_s21 + $0x8] sm:$0xff] %v5565_v16   ;;  %v4241_v16 = vmul.f32 %v2965_v37, %v2965_v37 }
 0x1fc   : > { %5561 = vst [vmem:[%s8329_s21] sm:$0xff] %v5560_v9   ;;  %v4105_v49 = vadd.f32 %v4104_v12, %v2962_v21  ;;  %v4366_v40 = vadd.f32 %v4239_v18, %v4238_v48  ;;  %v8335_v44 = vpop.f32.mrb[68].mxu0  ;;  %v6034_v23 = vpop.f32.mrb[68].mxu1 }
 0x1fd   : > { %v2978_v57 = vadd.f32 %v6034_v23, %v2433_v54  ;;  %v2546_v3 = vpop.f32.mrb[69].mxu0  ;;  %v2969_v52 = vpop.f32.mrb[69].mxu1 }
 0x1fe   : > { %v4106_v4 = vadd.f32 %v4105_v49, %v2965_v37  ;;  %v4367_v41 = vadd.f32 %v4366_v40, %v4240_v13  ;;  %v2970_v1 = vadd.f32 %v2969_v52, %v2425_v63  ;;  %v8341_v25 = vpop.f32.mrb[70].mxu0  ;;  %v6035_v21 = vpop.f32.mrb[70].mxu1  ;;  %v2449_v49 = vadd.f32 %v8303_v8, %v8172_v47 }
 0x1ff   : > { %v2981_v48 = vadd.f32 %v6035_v21, %v2436_v2  ;;  %v2549_v9 = vpop.f32.mrb[71].mxu0  ;;  %v2972_v12 = vpop.f32.mrb[71].mxu1  ;;  %v4244_v40 = vmul.f32 %v2978_v57, %v2978_v57 }
 0x200   : > { %v4368_v18 = vadd.f32 %v4367_v41, %v4241_v16  ;;  %v4107_v58 = vadd.f32 %v4106_v4, %v2970_v1  ;;  %v4242_v29 = vmul.f32 %v2970_v1, %v2970_v1  ;;  %v2973_v34 = vadd.f32 %v2972_v12, %v2428_v42 }
 0x201   : > { %v5575_v15 = vpack.c.bf16 %v2981_v48, %v2978_v57  ;;  %2759 = vmatmul.mubr.bf16.gmra.mrb[176].mxu0 %v8128_v14  ;;  %6141 = vmatmul.mubr.bf16.gmra.mrb[176].mxu1 %v9136_v45  ;;  %v2441_v41 = vadd.f32 %v8303_v8, %v8158_v27  ;;  %v4245_v52 = vmul.f32 %v2981_v48, %v2981_v48 }
 0x202   : > { %v4369_v37 = vadd.f32 %v4368_v18, %v4242_v29  ;;  %v5570_v54 = vpack.c.bf16 %v2973_v34, %v2970_v1  ;;  %v4108_v63 = vadd.f32 %v4107_v58, %v2973_v34  ;;  %v4243_v13 = vmul.f32 %v2973_v34, %v2973_v34  ;;  %2766 = vmatprep.mubr.bf16.mxu0 %v7394_v33 }
 0x203   : > { %5879 = vst [vmem:[%s8329_s21 + $0x18] sm:$0xff] %v5575_v15   ;;  %6144 = vmatprep.mubr.bf16.mxu1 %v9136_v45  ;;  %v2444_v34 = vadd.f32 %v8303_v8, %v8164_v17  ;;  %v2452_v33 = vadd.f32 %v8303_v8, %v8176_v35 }
 0x204   : > { %5878 = vst [vmem:[%s8329_s21 + $0x10] sm:$0xff] %v5570_v54   ;;  %v4109_v14 = vadd.f32 %v4108_v63, %v2978_v57  ;;  %v4370_v23 = vadd.f32 %v4369_v37, %v4243_v13  ;;  %v8353_v42 = vpop.f32.mrb[72].mxu0  ;;  %v6038_v2 = vpop.f32.mrb[72].mxu1  ;;  %v2465_v13 = vadd.f32 %v8303_v8, %v8196_v53 }
 0x205   : > { %v2994_v58 = vadd.f32 %v6038_v2, %v2449_v49  ;;  %v2554_v47 = vpop.f32.mrb[73].mxu0  ;;  %v2985_v3 = vpop.f32.mrb[73].mxu1  ;;  %v2457_v49 = vadd.f32 %v8303_v8, %v8184_v6  ;;  %v2460_v2 = vadd.f32 %v8303_v8, %v8188_v30 }
 0x206   : > { %v4110_v16 = vadd.f32 %v4109_v14, %v2981_v48  ;;  %v4371_v4 = vadd.f32 %v4370_v23, %v4244_v40  ;;  %v2986_v27 = vadd.f32 %v2985_v3, %v2441_v41  ;;  %v8359_v1 = vpop.f32.mrb[74].mxu0  ;;  %v6039_v57 = vpop.f32.mrb[74].mxu1 }
 0x207   : > { %v2997_v21 = vadd.f32 %v6039_v57, %v2452_v33  ;;  %v2557_v9 = vpop.f32.mrb[75].mxu0  ;;  %v2988_v12 = vpop.f32.mrb[75].mxu1  ;;  %v4248_v41 = vmul.f32 %v2994_v58, %v2994_v58 }
 0x208   : > { %v4372_v18 = vadd.f32 %v4371_v4, %v4245_v52  ;;  %v4111_v29 = vadd.f32 %v4110_v16, %v2986_v27  ;;  %v4246_v17 = vmul.f32 %v2986_v27, %v2986_v27  ;;  %v2989_v15 = vadd.f32 %v2988_v12, %v2444_v34 }
 0x209   : > { %v5585_v35 = vpack.c.bf16 %v2997_v21, %v2994_v58  ;;  %2767 = vmatmul.mubr.bf16.gmra.mrb[180].mxu0 %v8144_v39  ;;  %6145 = vmatmul.mubr.bf16.gmra.mrb[180].mxu1 %v9136_v45  ;;  %v4249_v47 = vmul.f32 %v2997_v21, %v2997_v21 }
 0x20a   : > { %v4373_v48 = vadd.f32 %v4372_v18, %v4246_v17  ;;  %v5580_v37 = vpack.c.bf16 %v2989_v15, %v2986_v27  ;;  %v4112_v54 = vadd.f32 %v4111_v29, %v2989_v15  ;;  %v4247_v63 = vmul.f32 %v2989_v15, %v2989_v15  ;;  %2774 = vmatprep.mubr.bf16.mxu0 %v7457_v28 }
 0x20b   : > { %5881 = vst [vmem:[%s8329_s21 + $0x28] sm:$0xff] %v5585_v35   ;;  %6148 = vmatprep.mubr.bf16.mxu1 %v9136_v45  ;;  %v2468_v28 = vadd.f32 %v8303_v8, %v8200_v62  ;;  %v2481_v35 = vadd.f32 %v8303_v8, %v8220_v36 }
 0x20c   : > { %5880 = vst [vmem:[%s8329_s21 + $0x20] sm:$0xff] %v5580_v37   ;;  %v4113_v39 = vadd.f32 %v4112_v54, %v2994_v58  ;;  %v4374_v40 = vadd.f32 %v4373_v48, %v4247_v63  ;;  %v8371_v14 = vpop.f32.mrb[76].mxu0  ;;  %v6042_v23 = vpop.f32.mrb[76].mxu1  ;;  %v2473_v48 = vadd.f32 %v8303_v8, %v8208_v10 }
 0x20d   : > { %v3010_v53 = vadd.f32 %v6042_v23, %v2465_v13  ;;  %v2562_v34 = vpop.f32.mrb[77].mxu0  ;;  %v3001_v33 = vpop.f32.mrb[77].mxu1 }
 0x20e   : > { %v4114_v3 = vadd.f32 %v4113_v39, %v2997_v21  ;;  %v4375_v52 = vadd.f32 %v4374_v40, %v4248_v41  ;;  %v3002_v6 = vadd.f32 %v3001_v33, %v2457_v49  ;;  %v8377_v16 = vpop.f32.mrb[78].mxu0  ;;  %v6043_v58 = vpop.f32.mrb[78].mxu1  ;;  %v2476_v49 = vadd.f32 %v8303_v8, %v8212_v22 }
 0x20f   : > { %v3013_v4 = vadd.f32 %v6043_v58, %v2468_v28  ;;  %v2565_v27 = vpop.f32.mrb[79].mxu0  ;;  %v3004_v57 = vpop.f32.mrb[79].mxu1  ;;  %v4252_v37 = vmul.f32 %v3010_v53, %v3010_v53 }
 0x210   : > { %v4376_v9 = vadd.f32 %v4375_v52, %v4249_v47  ;;  %v4115_v12 = vadd.f32 %v4114_v3, %v3002_v6  ;;  %v4250_v30 = vmul.f32 %v3002_v6, %v3002_v6  ;;  %v3005_v18 = vadd.f32 %v3004_v57, %v2460_v2 }
 0x211   : > { %v5595_v62 = vpack.c.bf16 %v3013_v4, %v3010_v53  ;;  %2775 = vmatmul.mubr.bf16.gmra.mrb[184].mxu0 %v8148_v26  ;;  %6149 = vmatmul.mubr.bf16.gmra.mrb[184].mxu1 %v9136_v45  ;;  %v4253_v40 = vmul.f32 %v3013_v4, %v3013_v4 }
 0x212   : > { %v4377_v21 = vadd.f32 %v4376_v9, %v4250_v30  ;;  %v5590_v29 = vpack.c.bf16 %v3005_v18, %v3002_v6  ;;  %v4116_v17 = vadd.f32 %v4115_v12, %v3005_v18  ;;  %v4251_v15 = vmul.f32 %v3005_v18, %v3005_v18  ;;  %2782 = vmatprep.mubr.bf16.mxu0 %v7509_v43 }
 0x213   : > { %5883 = vst [vmem:[%s8329_s21 + $0x38] sm:$0xff] %v5595_v62   ;;  %6152 = vmatprep.mubr.bf16.mxu1 %v9136_v45  ;;  %v2484_v43 = vadd.f32 %v8303_v8, %v8224_v55  ;;  %v2497_v9 = vadd.f32 %v8303_v8, %v8244_v5  ;;  %v2489_v12 = vadd.f32 %v8303_v8, %v8232_v60 }
 0x214   : > { %5882 = vst [vmem:[%s8329_s21 + $0x30] sm:$0xff] %v5590_v29   ;;  %v4117_v26 = vadd.f32 %v4116_v17, %v3010_v53  ;;  %v4378_v54 = vadd.f32 %v4377_v21, %v4251_v15  ;;  %v8389_v63 = vpop.f32.mrb[80].mxu0  ;;  %v6046_v13 = vpop.f32.mrb[80].mxu1  ;;  %v2500_v29 = vadd.f32 %v8303_v8, %v8248_v24 }
 0x215   : > { %v3026_v36 = vadd.f32 %v6046_v13, %v2481_v35  ;;  %v2570_v41 = vpop.f32.mrb[81].mxu0  ;;  %v3017_v39 = vpop.f32.mrb[81].mxu1 }
 0x216   : > { %v4379_v23 = vadd.f32 %v4378_v54, %v4252_v37  ;;  %v3018_v2 = vadd.f32 %v3017_v39, %v2473_v48  ;;  %v4118_v10 = vadd.f32 %v4117_v26, %v3013_v4  ;;  %v8395_v28 = vpop.f32.mrb[82].mxu0  ;;  %v6047_v53 = vpop.f32.mrb[82].mxu1 }
 0x217   : > { %v3029_v34 = vadd.f32 %v6047_v53, %v2484_v43  ;;  %v2573_v33 = vpop.f32.mrb[83].mxu0  ;;  %v3020_v47 = vpop.f32.mrb[83].mxu1  ;;  %v4256_v30 = vmul.f32 %v3026_v36, %v3026_v36  ;;  %v2513_v53 = vadd.f32 %v8303_v8, %v8268_v50 }
 0x218   : > { %v4119_v3 = vadd.f32 %v4118_v10, %v3018_v2  ;;  %v4254_v22 = vmul.f32 %v3018_v2, %v3018_v2  ;;  %v4380_v52 = vadd.f32 %v4379_v23, %v4253_v40  ;;  %v3021_v6 = vadd.f32 %v3020_v47, %v2476_v49 }
 0x219   : > { %v5605_v55 = vpack.c.bf16 %v3029_v34, %v3026_v36  ;;  %2783 = vmatmul.mubr.bf16.gmra.mrb[188].mxu0 %v8162_v7  ;;  %6153 = vmatmul.mubr.bf16.gmra.mrb[188].mxu1 %v9136_v45  ;;  %v2492_v45 = vadd.f32 %v8303_v8, %v8236_v11  ;;  %v4257_v35 = vmul.f32 %v3029_v34, %v3029_v34 }
 0x21a   : > { %v4381_v58 = vadd.f32 %v4380_v52, %v4254_v22  ;;  %v5600_v27 = vpack.c.bf16 %v3021_v6, %v3018_v2  ;;  %v4120_v4 = vadd.f32 %v4119_v3, %v3021_v6  ;;  %v4255_v57 = vmul.f32 %v3021_v6, %v3021_v6 }
 0x21b   : > { %5885 = vst [vmem:[%s8329_s21 + $0x48] sm:$0xff] %v5605_v55   ;;  %v2508_v6 = vadd.f32 %v8303_v8, %v8260_v56  ;;  %v2516_v55 = vadd.f32 %v8303_v8, %v8272_v46 }
 0x21c   : > { %5884 = vst [vmem:[%s8329_s21 + $0x40] sm:$0xff] %v5600_v27   ;;  %v4121_v18 = vadd.f32 %v4120_v4, %v3026_v36  ;;  %v4382_v62 = vadd.f32 %v4381_v58, %v4255_v57  ;;  %v8405_v21 = vpop.f32.mrb[84].mxu0  ;;  %v6050_v7 = vpop.f32.mrb[84].mxu1 }
 0x21d   : > { %v3042_v17 = vadd.f32 %v6050_v7, %v2497_v9  ;;  %v2578_v15 = vpop.f32.mrb[85].mxu0  ;;  %v3033_v5 = vpop.f32.mrb[85].mxu1 }
 0x21e   : > { %v4383_v48 = vadd.f32 %v4382_v62, %v4256_v30  ;;  %v3034_v37 = vadd.f32 %v3033_v5, %v2489_v12  ;;  %v4122_v60 = vadd.f32 %v4121_v18, %v3029_v34  ;;  %v8411_v26 = vpop.f32.mrb[86].mxu0  ;;  %v6051_v54 = vpop.f32.mrb[86].mxu1  ;;  %v2505_v34 = vadd.f32 %v8303_v8, %v8256_v51 }
 0x21f   : > { %v3045_v13 = vadd.f32 %v6051_v54, %v2500_v29  ;;  %v2581_v49 = vpop.f32.mrb[87].mxu0  ;;  %v3036_v43 = vpop.f32.mrb[87].mxu1  ;;  %v4260_v33 = vmul.f32 %v3042_v17, %v3042_v17 }
 0x220   : > { %v4123_v36 = vadd.f32 %v4122_v60, %v3034_v37  ;;  %v4258_v11 = vmul.f32 %v3034_v37, %v3034_v37  ;;  %v4384_v41 = vadd.f32 %v4383_v48, %v4257_v35  ;;  %v3037_v39 = vadd.f32 %v3036_v43, %v2492_v45 }
 0x221   : > { %v5615_v24 = vpack.c.bf16 %v3045_v13, %v3042_v17  ;;  %v4261_v4 = vmul.f32 %v3045_v13, %v3045_v13  ;;  %v2521_v60 = vadd.f32 %v8303_v8, %v8280_v38 }
 0x222   : > { %v4385_v40 = vadd.f32 %v4384_v41, %v4258_v11  ;;  %v5610_v23 = vpack.c.bf16 %v3037_v39, %v3034_v37  ;;  %v4124_v2 = vadd.f32 %v4123_v36, %v3037_v39  ;;  %v4259_v10 = vmul.f32 %v3037_v39, %v3037_v39 }
 0x223   : > { %5887 = vst [vmem:[%s8329_s21 + $0x58] sm:$0xff] %v5615_v24   ;;  %v2529_v37 = vadd.f32 %v8303_v8, %v8292_v59  ;;  %v2524_v11 = vadd.f32 %v8303_v8, %v8284_v32  ;;  %v2532_v41 = vadd.f32 %v8303_v8, %v8296_v61 }
 0x224   : > { %5886 = vst [vmem:[%s8329_s21 + $0x50] sm:$0xff] %v5610_v23   ;;  %v4125_v47 = vadd.f32 %v4124_v2, %v3042_v17  ;;  %v4386_v3 = vadd.f32 %v4385_v40, %v4259_v10  ;;  %v8419_v22 = vpop.f32.mrb[88].mxu0  ;;  %v6054_v52 = vpop.f32.mrb[88].mxu1 }
 0x225   : > { %v3058_v58 = vadd.f32 %v6054_v52, %v2513_v53  ;;  %v2586_v27 = vpop.f32.mrb[89].mxu0  ;;  %v3049_v50 = vpop.f32.mrb[89].mxu1 }
 0x226   : > { %v4387_v57 = vadd.f32 %v4386_v3, %v4260_v33  ;;  %v3050_v9 = vadd.f32 %v3049_v50, %v2505_v34  ;;  %v4126_v51 = vadd.f32 %v4125_v47, %v3045_v13  ;;  %v8425_v12 = vpop.f32.mrb[90].mxu0  ;;  %v6055_v30 = vpop.f32.mrb[90].mxu1 }
 0x227   : > { %v3061_v18 = vadd.f32 %v6055_v30, %v2516_v55  ;;  %v2589_v62 = vpop.f32.mrb[91].mxu0  ;;  %v3052_v7 = vpop.f32.mrb[91].mxu1  ;;  %v4264_v54 = vmul.f32 %v3058_v58, %v3058_v58 }
 0x228   : > { %v4127_v45 = vadd.f32 %v4126_v51, %v3050_v9  ;;  %v4262_v56 = vmul.f32 %v3050_v9, %v3050_v9  ;;  %v4388_v29 = vadd.f32 %v4387_v57, %v4261_v4  ;;  %v3053_v17 = vadd.f32 %v3052_v7, %v2508_v6 }
 0x229   : > { %v5625_v46 = vpack.c.bf16 %v3061_v18, %v3058_v58  ;;  %v4265_v40 = vmul.f32 %v3061_v18, %v3061_v18  ;;  %v2545_v4 = vadd.f32 %v8303_v8, %v8335_v44  ;;  %v2537_v57 = vadd.f32 %v8303_v8, %v8313_v19 }
 0x22a   : > { %v4389_v15 = vadd.f32 %v4388_v29, %v4262_v56  ;;  %v5620_v5 = vpack.c.bf16 %v3053_v17, %v3050_v9  ;;  %v4128_v35 = vadd.f32 %v4127_v45, %v3053_v17  ;;  %v4263_v48 = vmul.f32 %v3053_v17, %v3053_v17 }
 0x22b   : > { %5889 = vst [vmem:[%s8329_s21 + $0x68] sm:$0xff] %v5625_v46   ;;  %v2540_v7 = vadd.f32 %v8303_v8, %v8321_v20  ;;  %v2548_v45 = vadd.f32 %v8303_v8, %v8341_v25 }
 0x22c   : > { %5888 = vst [vmem:[%s8329_s21 + $0x60] sm:$0xff] %v5620_v5   ;;  %v4129_v13 = vadd.f32 %v4128_v35, %v3058_v58  ;;  %v4390_v49 = vadd.f32 %v4389_v15, %v4263_v48  ;;  %v8433_v43 = vpop.f32.mrb[92].mxu0  ;;  %v6058_v36 = vpop.f32.mrb[92].mxu1 }
 0x22d   : > { %v3074_v39 = vadd.f32 %v6058_v36, %v2529_v37  ;;  %v2594_v24 = vpop.f32.mrb[93].mxu0  ;;  %v3065_v59 = vpop.f32.mrb[93].mxu1 }
 0x22e   : > { %v4391_v23 = vadd.f32 %v4390_v49, %v4264_v54  ;;  %v3066_v2 = vadd.f32 %v3065_v59, %v2521_v60  ;;  %v4130_v38 = vadd.f32 %v4129_v13, %v3061_v18  ;;  %v8439_v10 = vpop.f32.mrb[94].mxu0  ;;  %v6059_v53 = vpop.f32.mrb[94].mxu1  ;;  %v2561_v24 = vadd.f32 %v8303_v8, %v8371_v14 }
 0x22f   : > { %v3077_v34 = vadd.f32 %v6059_v53, %v2532_v41  ;;  %v2597_v33 = vpop.f32.mrb[95].mxu0  ;;  %v3068_v47 = vpop.f32.mrb[95].mxu1  ;;  %v4268_v9 = vmul.f32 %v3074_v39, %v3074_v39  ;;  %v2553_v59 = vadd.f32 %v8303_v8, %v8353_v42 }
 0x230   : > { %v4131_v3 = vadd.f32 %v4130_v38, %v3066_v2  ;;  %v4266_v32 = vmul.f32 %v3066_v2, %v3066_v2  ;;  %v4392_v52 = vadd.f32 %v4391_v23, %v4265_v40  ;;  %v3069_v6 = vadd.f32 %v3068_v47, %v2524_v11 }
 0x231   : > { %v5635_v61 = vpack.c.bf16 %v3077_v34, %v3074_v39  ;;  %v4269_v17 = vmul.f32 %v3077_v34, %v3077_v34  ;;  %v2564_v33 = vadd.f32 %v8303_v8, %v8377_v16 }
 0x232   : > { %v4393_v55 = vadd.f32 %v4392_v52, %v4266_v32  ;;  %v5630_v58 = vpack.c.bf16 %v3069_v6, %v3066_v2  ;;  %v4132_v27 = vadd.f32 %v4131_v3, %v3069_v6  ;;  %v4267_v50 = vmul.f32 %v3069_v6, %v3069_v6 }
 0x233   : > { %5891 = vst [vmem:[%s8329_s21 + $0x78] sm:$0xff] %v5635_v61  }
 0x234   : > { %5890 = vst [vmem:[%s8329_s21 + $0x70] sm:$0xff] %v5630_v58   ;;  %v4133_v51 = vadd.f32 %v4132_v27, %v3074_v39  ;;  %v4394_v30 = vadd.f32 %v4393_v55, %v4267_v50  ;;  %v8447_v18 = vpop.f32.mrb[96].mxu0  ;;  %v6062_v62 = vpop.f32.mrb[96].mxu1 }
 0x235   : > { %v3090_v56 = vadd.f32 %v6062_v62, %v2545_v4  ;;  %v2602_v29 = vpop.f32.mrb[97].mxu0  ;;  %v3081_v44 = vpop.f32.mrb[97].mxu1 }
 0x236   : > { %v4395_v46 = vadd.f32 %v4394_v30, %v4268_v9  ;;  %v3082_v15 = vadd.f32 %v3081_v44, %v2537_v57  ;;  %v4134_v19 = vadd.f32 %v4133_v51, %v3077_v34  ;;  %v8453_v5 = vpop.f32.mrb[98].mxu0  ;;  %v6063_v35 = vpop.f32.mrb[98].mxu1  ;;  %v2556_v34 = vadd.f32 %v8303_v8, %v8359_v1 }
 0x237   : > { %v3093_v48 = vadd.f32 %v6063_v35, %v2548_v45  ;;  %v2605_v37 = vpop.f32.mrb[99].mxu0  ;;  %v3084_v60 = vpop.f32.mrb[99].mxu1  ;;  %v4272_v40 = vmul.f32 %v3090_v56, %v3090_v56  ;;  %v2577_v45 = vadd.f32 %v8303_v8, %v8405_v21  ;;  %v2580_v35 = vadd.f32 %v8303_v8, %v8411_v26 }
 0x238   : > { %v4135_v54 = vadd.f32 %v4134_v19, %v3082_v15  ;;  %v4270_v20 = vmul.f32 %v3082_v15, %v3082_v15  ;;  %v4396_v13 = vadd.f32 %v4395_v46, %v4269_v17  ;;  %v3085_v49 = vadd.f32 %v3084_v60, %v2540_v7 }
 0x239   : > { %v5645_v25 = vpack.c.bf16 %v3093_v48, %v3090_v56  ;;  %v4273_v32 = vmul.f32 %v3093_v48, %v3093_v48  ;;  %v2572_v19 = vadd.f32 %v8303_v8, %v8395_v28 }
 0x23a   : > { %v4397_v36 = vadd.f32 %v4396_v13, %v4270_v20  ;;  %v5640_v11 = vpack.c.bf16 %v3085_v49, %v3082_v15  ;;  %v4136_v41 = vadd.f32 %v4135_v54, %v3085_v49  ;;  %v4271_v39 = vmul.f32 %v3085_v49, %v3085_v49 }
 0x23b   : > { %5893 = vst [vmem:[%s8329_s21 + $0x88] sm:$0xff] %v5645_v25  }
 0x23c   : > { %5892 = vst [vmem:[%s8329_s21 + $0x80] sm:$0xff] %v5640_v11   ;;  %v4137_v23 = vadd.f32 %v4136_v41, %v3090_v56  ;;  %v4398_v2 = vadd.f32 %v4397_v36, %v4271_v39  ;;  %v8461_v38 = vpop.f32.mrb[100].mxu0  ;;  %v6066_v53 = vpop.f32.mrb[100].mxu1  ;;  %v2569_v56 = vadd.f32 %v8303_v8, %v8389_v63 }
 0x23d   : > { %v3106_v47 = vadd.f32 %v6066_v53, %v2561_v24  ;;  %v2610_v3 = vpop.f32.mrb[101].mxu0  ;;  %v3097_v14 = vpop.f32.mrb[101].mxu1  ;;  %v2593_v53 = vadd.f32 %v8303_v8, %v8433_v43 }
 0x23e   : > { %v4399_v52 = vadd.f32 %v4398_v2, %v4272_v40  ;;  %v3098_v6 = vadd.f32 %v3097_v14, %v2553_v59  ;;  %v4138_v42 = vadd.f32 %v4137_v23, %v3093_v48  ;;  %v8467_v61 = vpop.f32.mrb[102].mxu0  ;;  %v6067_v55 = vpop.f32.mrb[102].mxu1 }
 0x23f   : > { %v3109_v58 = vadd.f32 %v6067_v55, %v2564_v33  ;;  %v2613_v27 = vpop.f32.mrb[103].mxu0  ;;  %v3100_v50 = vpop.f32.mrb[103].mxu1  ;;  %v4276_v29 = vmul.f32 %v3106_v47, %v3106_v47 }
 0x240   : > { %v4139_v4 = vadd.f32 %v4138_v42, %v3098_v6  ;;  %v4274_v1 = vmul.f32 %v3098_v6, %v3098_v6  ;;  %v4400_v57 = vadd.f32 %v4399_v52, %v4273_v32  ;;  %v3101_v9 = vadd.f32 %v3100_v50, %v2556_v34 }
 0x241   : > { %v5655_v16 = vpack.c.bf16 %v3109_v58, %v3106_v47  ;;  %v4277_v60 = vmul.f32 %v3109_v58, %v3109_v58  ;;  %v2585_v34 = vadd.f32 %v8303_v8, %v8419_v22  ;;  %v2588_v52 = vadd.f32 %v8303_v8, %v8425_v12 }
 0x242   : > { %v4401_v51 = vadd.f32 %v4400_v57, %v4274_v1  ;;  %v5650_v30 = vpack.c.bf16 %v3101_v9, %v3098_v6  ;;  %v4140_v62 = vadd.f32 %v4139_v4, %v3101_v9  ;;  %v4275_v7 = vmul.f32 %v3101_v9, %v3101_v9 }
 0x243   : > { %5895 = vst [vmem:[%s8329_s21 + $0x98] sm:$0xff] %v5655_v16   ;;  %v2596_v6 = vadd.f32 %v8303_v8, %v8439_v10 }
 0x244   : > { %5894 = vst [vmem:[%s8329_s21 + $0x90] sm:$0xff] %v5650_v30   ;;  %v4141_v44 = vadd.f32 %v4140_v62, %v3106_v47  ;;  %v4402_v17 = vadd.f32 %v4401_v51, %v4275_v7  ;;  %v8475_v46 = vpop.f32.mrb[104].mxu0  ;;  %v6070_v15 = vpop.f32.mrb[104].mxu1 }
 0x245   : > { %v3122_v48 = vadd.f32 %v6070_v15, %v2577_v45  ;;  %v2618_v37 = vpop.f32.mrb[105].mxu0  ;;  %v3113_v21 = vpop.f32.mrb[105].mxu1 }
 0x246   : > { %v4403_v54 = vadd.f32 %v4402_v17, %v4276_v29  ;;  %v3114_v20 = vadd.f32 %v3113_v21, %v2569_v56  ;;  %v4142_v63 = vadd.f32 %v4141_v44, %v3109_v58  ;;  %v8481_v13 = vpop.f32.mrb[106].mxu0  ;;  %v6071_v49 = vpop.f32.mrb[106].mxu1  ;;  %v2609_v44 = vadd.f32 %v8303_v8, %v8461_v38 }
 0x247   : > { %v3125_v25 = vadd.f32 %v6071_v49, %v2580_v35  ;;  %v2621_v36 = vpop.f32.mrb[107].mxu0  ;;  %v3116_v11 = vpop.f32.mrb[107].mxu1  ;;  %v4280_v33 = vmul.f32 %v3122_v48, %v3122_v48  ;;  %v2601_v17 = vadd.f32 %v8303_v8, %v8447_v18  ;;  %v2604_v21 = vadd.f32 %v8303_v8, %v8453_v5 }
 0x248   : > { %v4143_v41 = vadd.f32 %v4142_v63, %v3114_v20  ;;  %v4278_v28 = vmul.f32 %v3114_v20, %v3114_v20  ;;  %v4404_v39 = vadd.f32 %v4403_v54, %v4277_v60  ;;  %v3117_v24 = vadd.f32 %v3116_v11, %v2572_v19 }
 0x249   : > { %v5665_v26 = vpack.c.bf16 %v3125_v25, %v3122_v48  ;;  %v4281_v43 = vmul.f32 %v3125_v25, %v3125_v25  ;;  %v2612_v60 = vadd.f32 %v8303_v8, %v8467_v61 }
 0x24a   : > { %v4405_v59 = vadd.f32 %v4404_v39, %v4278_v28  ;;  %v5660_v40 = vpack.c.bf16 %v3117_v24, %v3114_v20  ;;  %v4144_v23 = vadd.f32 %v4143_v41, %v3117_v24  ;;  %v4279_v2 = vmul.f32 %v3117_v24, %v3117_v24 }
 0x24b   : > { %5897 = vst [vmem:[%s8329_s21 + $0xa8] sm:$0xff] %v5665_v26  }
 0x24c   : > { %5896 = vst [vmem:[%s8329_s21 + $0xa0] sm:$0xff] %v5660_v40   ;;  %v4145_v47 = vadd.f32 %v4144_v23, %v3122_v48  ;;  %v4406_v3 = vadd.f32 %v4405_v59, %v4279_v2  ;;  %v2624_v14 = vpop.f32.mrb[108].mxu0  ;;  %v6074_v32 = vpop.f32.mrb[108].mxu1 }
 0x24d   : > { %v3138_v42 = vadd.f32 %v6074_v32, %v2593_v53  ;;  %v2626_v55 = vpop.f32.mrb[109].mxu0  ;;  %v3129_v58 = vpop.f32.mrb[109].mxu1 }
 0x24e   : > { %v4407_v27 = vadd.f32 %v4406_v3, %v4280_v33  ;;  %v3130_v50 = vadd.f32 %v3129_v58, %v2585_v34  ;;  %v4146_v4 = vadd.f32 %v4145_v47, %v3125_v25  ;;  %v2627_v22 = vpop.f32.mrb[110].mxu0  ;;  %v6075_v1 = vpop.f32.mrb[110].mxu1  ;;  %v2625_v34 = vadd.f32 %v8303_v8, %v2624_v14 }
 0x24f   : > { %v3141_v57 = vadd.f32 %v6075_v1, %v2596_v6  ;;  %v2629_v9 = vpop.f32.mrb[111].mxu0  ;;  %v3132_v16 = vpop.f32.mrb[111].mxu1  ;;  %v4284_v15 = vmul.f32 %v3138_v42, %v3138_v42  ;;  %v2617_v33 = vadd.f32 %v8303_v8, %v8475_v46  ;;  %v2628_v55 = vadd.f32 %v8303_v8, %v2627_v22 }
 0x250   : > { %v4147_v51 = vadd.f32 %v4146_v4, %v3130_v50  ;;  %v4282_v30 = vmul.f32 %v3130_v50, %v3130_v50  ;;  %v4408_v12 = vadd.f32 %v4407_v27, %v4281_v43  ;;  %v3133_v62 = vadd.f32 %v3132_v16, %v2588_v52 }
 0x251   : > { %v5675_v7 = vpack.c.bf16 %v3141_v57, %v3138_v42  ;;  %v4285_v38 = vmul.f32 %v3141_v57, %v3141_v57 }
 0x252   : > { %v4409_v10 = vadd.f32 %v4408_v12, %v4282_v30  ;;  %v5670_v45 = vpack.c.bf16 %v3133_v62, %v3130_v50  ;;  %v4148_v56 = vadd.f32 %v4147_v51, %v3133_v62  ;;  %v4283_v29 = vmul.f32 %v3133_v62, %v3133_v62 }
 0x253   : > { %5899 = vst [vmem:[%s8329_s21 + $0xb8] sm:$0xff] %v5675_v7  }
 0x254   : > { %5898 = vst [vmem:[%s8329_s21 + $0xb0] sm:$0xff] %v5670_v45   ;;  %v4149_v19 = vadd.f32 %v4148_v56, %v3138_v42  ;;  %v4410_v35 = vadd.f32 %v4409_v10, %v4283_v29  ;;  %v2632_v48 = vpop.f32.mrb[112].mxu0  ;;  %v6078_v37 = vpop.f32.mrb[112].mxu1  ;;  %v2620_v42 = vadd.f32 %v8303_v8, %v8481_v13 }
 0x255   : > { %v3154_v54 = vadd.f32 %v6078_v37, %v2609_v44  ;;  %v2634_v20 = vpop.f32.mrb[113].mxu0  ;;  %v3145_v63 = vpop.f32.mrb[113].mxu1  ;;  %v2633_v44 = vadd.f32 %v8303_v8, %v2632_v48 }
 0x256   : > { %v4411_v49 = vadd.f32 %v4410_v35, %v4284_v15  ;;  %v3146_v25 = vadd.f32 %v3145_v63, %v2601_v17  ;;  %v4150_v36 = vadd.f32 %v4149_v19, %v3141_v57  ;;  %v2635_v18 = vpop.f32.mrb[114].mxu0  ;;  %v6079_v11 = vpop.f32.mrb[114].mxu1 }
 0x257   : > { %v3157_v41 = vadd.f32 %v6079_v11, %v2612_v60  ;;  %v2637_v28 = vpop.f32.mrb[115].mxu0  ;;  %v3148_v39 = vpop.f32.mrb[115].mxu1  ;;  %v4288_v47 = vmul.f32 %v3154_v54, %v3154_v54 }
 0x258   : > { %v4151_v24 = vadd.f32 %v4150_v36, %v3146_v25  ;;  %v4286_v26 = vmul.f32 %v3146_v25, %v3146_v25  ;;  %v4412_v5 = vadd.f32 %v4411_v49, %v4285_v38  ;;  %v3149_v59 = vadd.f32 %v3148_v39, %v2604_v21 }
 0x259   : > { %v5685_v40 = vpack.c.bf16 %v3157_v41, %v3154_v54  ;;  %v4289_v50 = vmul.f32 %v3157_v41, %v3157_v41  ;;  %v2636_v21 = vadd.f32 %v8303_v8, %v2635_v18 }
 0x25a   : > { %v4413_v61 = vadd.f32 %v4412_v5, %v4286_v26  ;;  %v5680_v23 = vpack.c.bf16 %v3149_v59, %v3146_v25  ;;  %v4152_v2 = vadd.f32 %v4151_v24, %v3149_v59  ;;  %v4287_v53 = vmul.f32 %v3149_v59, %v3149_v59 }
 0x25b   : > { %5901 = vst [vmem:[%s8329_s21 + $0xc8] sm:$0xff] %v5685_v40  }
 0x25c   : > { %5900 = vst [vmem:[%s8329_s21 + $0xc0] sm:$0xff] %v5680_v23   ;;  %v4153_v3 = vadd.f32 %v4152_v2, %v3154_v54  ;;  %v4414_v32 = vadd.f32 %v4413_v61, %v4287_v53  ;;  %v2640_v52 = vpop.f32.mrb[116].mxu0  ;;  %v6082_v6 = vpop.f32.mrb[116].mxu1 }
 0x25d   : > { %v3170_v58 = vadd.f32 %v6082_v6, %v2625_v34  ;;  %v2642_v43 = vpop.f32.mrb[117].mxu0  ;;  %v3161_v27 = vpop.f32.mrb[117].mxu1  ;;  %v2641_v29 = vadd.f32 %v8303_v8, %v2640_v52 }
 0x25e   : > { %v4415_v14 = vadd.f32 %v4414_v32, %v4288_v47  ;;  %v3162_v4 = vadd.f32 %v3161_v27, %v2617_v33  ;;  %v4154_v1 = vadd.f32 %v4153_v3, %v3157_v41  ;;  %v2643_v46 = vpop.f32.mrb[118].mxu0  ;;  %v6083_v57 = vpop.f32.mrb[118].mxu1 }
 0x25f   : > { %v3173_v9 = vadd.f32 %v6083_v57, %v2628_v55  ;;  %v2645_v16 = vpop.f32.mrb[119].mxu0  ;;  %v3164_v51 = vpop.f32.mrb[119].mxu1  ;;  %v4292_v17 = vmul.f32 %v3170_v58, %v3170_v58  ;;  %v2644_v60 = vadd.f32 %v8303_v8, %v2643_v46  ;;  %v8525_v46 = vld [vmem:[%s9071_s4] ss:$0 sm:$0xff] }
 0x260   : > { %v4155_v30 = vadd.f32 %v4154_v1, %v3162_v4  ;;  %v4290_v12 = vmul.f32 %v3162_v4, %v3162_v4  ;;  %v4416_v62 = vadd.f32 %v4415_v14, %v4289_v50  ;;  %v3165_v13 = vadd.f32 %v3164_v51, %v2620_v42 }
 0x261   : > { %v5695_v7 = vpack.c.bf16 %v3173_v9, %v3170_v58  ;;  %v4293_v38 = vmul.f32 %v3173_v9, %v3173_v9 }
 0x262   : > { %v4417_v22 = vadd.f32 %v4416_v62, %v4290_v12  ;;  %v5690_v10 = vpack.c.bf16 %v3165_v13, %v3162_v4  ;;  %v4156_v45 = vadd.f32 %v4155_v30, %v3165_v13  ;;  %v4291_v56 = vmul.f32 %v3165_v13, %v3165_v13 }
 0x263   : > { %5903 = vst [vmem:[%s8329_s21 + $0xd8] sm:$0xff] %v5695_v7  }
 0x264   : > { %5902 = vst [vmem:[%s8329_s21 + $0xd0] sm:$0xff] %v5690_v10   ;;  %v4157_v15 = vadd.f32 %v4156_v45, %v3170_v58  ;;  %v4418_v19 = vadd.f32 %v4417_v22, %v4291_v56  ;;  %v2648_v35 = vpop.f32.mrb[120].mxu0  ;;  %v6086_v37 = vpop.f32.mrb[120].mxu1 }
 0x265   : > { %v3186_v54 = vadd.f32 %v6086_v37, %v2641_v29  ;;  %v2650_v20 = vpop.f32.mrb[121].mxu0  ;;  %v3177_v63 = vpop.f32.mrb[121].mxu1  ;;  %v2649_v53 = vadd.f32 %v8303_v8, %v2648_v35 }
 0x266   : > { %v4419_v49 = vadd.f32 %v4418_v19, %v4292_v17  ;;  %v3178_v25 = vadd.f32 %v3177_v63, %v2633_v44  ;;  %v4158_v36 = vadd.f32 %v4157_v15, %v3173_v9  ;;  %v2651_v11 = vpop.f32.mrb[122].mxu0  ;;  %v6087_v48 = vpop.f32.mrb[122].mxu1 }
 0x267   : > { %v3189_v41 = vadd.f32 %v6087_v48, %v2644_v60  ;;  %v2653_v28 = vpop.f32.mrb[123].mxu0  ;;  %v3180_v39 = vpop.f32.mrb[123].mxu1  ;;  %v4296_v34 = vmul.f32 %v3186_v54, %v3186_v54  ;;  %v2652_v52 = vadd.f32 %v8303_v8, %v2651_v11 }
 0x268   : > { %v4159_v24 = vadd.f32 %v4158_v36, %v3178_v25  ;;  %v4294_v26 = vmul.f32 %v3178_v25, %v3178_v25  ;;  %v4420_v5 = vadd.f32 %v4419_v49, %v4293_v38  ;;  %v3181_v18 = vadd.f32 %v3180_v39, %v2636_v21 }
 0x269   : > { %v5705_v59 = vpack.c.bf16 %v3189_v41, %v3186_v54  ;;  %v4297_v58 = vmul.f32 %v3189_v41, %v3189_v41 }
 0x26a   : > { %v4421_v40 = vadd.f32 %v4420_v5, %v4294_v26  ;;  %v5700_v61 = vpack.c.bf16 %v3181_v18, %v3178_v25  ;;  %v4160_v23 = vadd.f32 %v4159_v24, %v3181_v18  ;;  %v4295_v2 = vmul.f32 %v3181_v18, %v3181_v18 }
 0x26b   : > { %5905 = vst [vmem:[%s8329_s21 + $0xe8] sm:$0xff] %v5705_v59  }
 0x26c   : > { %5904 = vst [vmem:[%s8329_s21 + $0xe0] sm:$0xff] %v5700_v61   ;;  %v4161_v33 = vadd.f32 %v4160_v23, %v3186_v54  ;;  %v4422_v47 = vadd.f32 %v4421_v40, %v4295_v2  ;;  %v2656_v3 = vpop.f32.mrb[124].mxu0  ;;  %v6090_v32 = vpop.f32.mrb[124].mxu1 }
 0x26d   : > { %v2657_v6 = vadd.f32 %v8303_v8, %v2656_v3  ;;  %v2658_v42 = vpop.f32.mrb[125].mxu0  ;;  %v3193_v55 = vpop.f32.mrb[125].mxu1 }
 0x26e   : > { %v4423_v43 = vadd.f32 %v4422_v47, %v4296_v34  ;;  %v3194_v27 = vadd.f32 %v3193_v55, %v2649_v53  ;;  %v4162_v50 = vadd.f32 %v4161_v33, %v3189_v41  ;;  %v2659_v14 = vpop.f32.mrb[126].mxu0  ;;  %v6091_v4 = vpop.f32.mrb[126].mxu1 }
 0x26f   : > { %v3202_v1 = vadd.f32 %v6090_v32, %v2657_v6  ;;  %v2660_v57 = vadd.f32 %v8525_v46, %v2659_v14  ;;  %v2661_v9 = vpop.f32.mrb[127].mxu0  ;;  %v3196_v16 = vpop.f32.mrb[127].mxu1 }
 0x270   : > { %v4163_v8 = vadd.f32 %v4162_v50, %v3194_v27  ;;  %v4298_v51 = vmul.f32 %v3194_v27, %v3194_v27  ;;  %v4424_v30 = vadd.f32 %v4423_v43, %v4297_v58  ;;  %v3197_v12 = vadd.f32 %v3196_v16, %v2652_v52 }
 0x271   : > { %v3205_v62 = vadd.f32 %v6091_v4, %v2660_v57  ;;  %v4300_v56 = vmul.f32 %v3202_v1, %v3202_v1 }
 0x272   : > { %v4425_v13 = vadd.f32 %v4424_v30, %v4298_v51  ;;  %v5710_v7 = vpack.c.bf16 %v3197_v12, %v3194_v27  ;;  %v4164_v22 = vadd.f32 %v4163_v8, %v3197_v12  ;;  %v4299_v10 = vmul.f32 %v3197_v12, %v3197_v12 }
 0x273   : > { %v5715_v45 = vpack.c.bf16 %v3205_v62, %v3202_v1  ;;  %v4301_v21 = vmul.f32 %v3205_v62, %v3205_v62 }
 0x274   : > { %5906 = vst [vmem:[%s8329_s21 + $0xf0] sm:$0xff] %v5710_v7   ;;  %v4165_v29 = vadd.f32 %v4164_v22, %v3202_v1  ;;  %v4426_v44 = vadd.f32 %v4425_v13, %v4299_v10  ;;  %v2664_v17 = vpop.f32.mrb[128].mxu0  ;;  %v6094_v15 = vpop.f32.mrb[128].mxu1 }
 0x275   : > { %5907 = vst [vmem:[%s8329_s21 + $0xf8] sm:$0xff] %v5715_v45   ;;  %v2665_v19 = vadd.f32 %v8525_v46, %v2664_v17  ;;  %v2666_v35 = vpop.f32.mrb[129].mxu0  ;;  %v3209_v37 = vpop.f32.mrb[129].mxu1 }
 0x276   : > { %v4427_v60 = vadd.f32 %v4426_v44, %v4300_v56  ;;  %v2667_v54 = vpop.f32.mrb[130].mxu0  ;;  %v4166_v20 = vadd.f32 %v4165_v29, %v3205_v62  ;;  %v6095_v63 = vpop.f32.mrb[130].mxu1 }
 0x277   : > { %v2668_v38 = vadd.f32 %v8525_v46, %v2667_v54  ;;  %v3210_v49 = vadd.f32 %v3209_v37, %v2665_v19  ;;  %v2669_v25 = vpop.f32.mrb[131].mxu0  ;;  %v3212_v36 = vpop.f32.mrb[131].mxu1 }
 0x278   : > { %v4428_v11 = vadd.f32 %v4427_v60, %v4301_v21 }
 0x279   : > { %v4167_v48 = vadd.f32 %v4166_v20, %v3210_v49  ;;  %v4302_v41 = vmul.f32 %v3210_v49, %v3210_v49  ;;  %v3213_v28 = vadd.f32 %v3212_v36, %v2668_v38 }
 0x27b   : > { %v4429_v39 = vadd.f32 %v4428_v11, %v4302_v41  ;;  %v5720_v24 = vpack.c.bf16 %v3213_v28, %v3210_v49  ;;  %v4168_v26 = vadd.f32 %v4167_v48, %v3213_v28  ;;  %v4303_v5 = vmul.f32 %v3213_v28, %v3213_v28 }
 0x27c   : > { %v2672_v18 = vpop.f32.mrb[132].mxu0  ;;  %v6098_v59 = vpop.f32.mrb[132].mxu1 }
 0x27d   : > { %5908 = vst [vmem:[%s8329_s21 + $0x100] sm:$0xff] %v5720_v24   ;;  %v4430_v40 = vadd.f32 %v4429_v39, %v4303_v5  ;;  %v2673_v61 = vadd.f32 %v8525_v46, %v2672_v18  ;;  %v2674_v23 = vpop.f32.mrb[133].mxu0  ;;  %v3225_v2 = vpop.f32.mrb[133].mxu1 }
 0x27e   : > { %v2675_v53 = vpop.f32.mrb[134].mxu0  ;;  %v6099_v34 = vpop.f32.mrb[134].mxu1 }
 0x27f   : > { %v3218_v33 = vadd.f32 %v6094_v15, %v2673_v61  ;;  %v2676_v47 = vadd.f32 %v8525_v46, %v2675_v53  ;;  %v2677_v3 = vpop.f32.mrb[135].mxu0  ;;  %v3228_v32 = vpop.f32.mrb[135].mxu1 }
 0x281   : > { %v4169_v52 = vadd.f32 %v4168_v26, %v3218_v33  ;;  %v4304_v6 = vmul.f32 %v3218_v33, %v3218_v33  ;;  %v3221_v42 = vadd.f32 %v6095_v63, %v2676_v47 }
 0x283   : > { %v4431_v55 = vadd.f32 %v4430_v40, %v4304_v6  ;;  %v5725_v58 = vpack.c.bf16 %v3221_v42, %v3218_v33  ;;  %v4305_v43 = vmul.f32 %v3221_v42, %v3221_v42  ;;  %v4170_v27 = vadd.f32 %v4169_v52, %v3221_v42 }
 0x284   : > { %v2680_v50 = vpop.f32.mrb[136].mxu0  ;;  %v8535_v14 = vpop.f32.mrb[136].mxu1 }
 0x285   : > { %5909 = vst [vmem:[%s8329_s21 + $0x108] sm:$0xff] %v5725_v58   ;;  %v2681_v4 = vadd.f32 %v8525_v46, %v2680_v50  ;;  %v2682_v1 = vpop.f32.mrb[137].mxu0  ;;  %v4432_v57 = vadd.f32 %v4431_v55, %v4305_v43  ;;  %v3241_v9 = vpop.f32.mrb[137].mxu1 }
 0x286   : > { %v2683_v16 = vpop.f32.mrb[138].mxu0  ;;  %v8539_v8 = vpop.f32.mrb[138].mxu1 }
 0x287   : > { %v2684_v51 = vadd.f32 %v8525_v46, %v2683_v16  ;;  %v3226_v30 = vadd.f32 %v3225_v2, %v2681_v4  ;;  %v2685_v12 = vpop.f32.mrb[139].mxu0  ;;  %v3244_v62 = vpop.f32.mrb[139].mxu1 }
 0x289   : > { %v4171_v13 = vadd.f32 %v4170_v27, %v3226_v30  ;;  %v4306_v7 = vmul.f32 %v3226_v30, %v3226_v30  ;;  %v3229_v22 = vadd.f32 %v3228_v32, %v2684_v51 }
 0x28b   : > { %v4433_v10 = vadd.f32 %v4432_v57, %v4306_v7  ;;  %v5730_v45 = vpack.c.bf16 %v3229_v22, %v3226_v30  ;;  %v4172_v56 = vadd.f32 %v4171_v13, %v3229_v22  ;;  %v4307_v29 = vmul.f32 %v3229_v22, %v3229_v22 }
 0x28c   : > { %v2688_v44 = vpop.f32.mrb[140].mxu0  ;;  %v8542_v17 = vpop.f32.mrb[140].mxu1 }
 0x28d   : > { %5910 = vst [vmem:[%s8329_s21 + $0x110] sm:$0xff] %v5730_v45   ;;  %v4434_v15 = vadd.f32 %v4433_v10, %v4307_v29  ;;  %v2689_v19 = vadd.f32 %v8525_v46, %v2688_v44  ;;  %v2690_v35 = vpop.f32.mrb[141].mxu0  ;;  %v8546_v37 = vpop.f32.mrb[141].mxu1 }
 0x28e   : > { %v2691_v21 = vpop.f32.mrb[142].mxu0  ;;  %v8548_v60 = vpop.f32.mrb[142].mxu1 }
 0x28f   : > { %v3234_v54 = vadd.f32 %v6098_v59, %v2689_v19  ;;  %v2692_v20 = vadd.f32 %v8525_v46, %v2691_v21  ;;  %v2693_v63 = vpop.f32.mrb[143].mxu0  ;;  %v8551_v38 = vpop.f32.mrb[143].mxu1 }
 0x291   : > { %v4173_v49 = vadd.f32 %v4172_v56, %v3234_v54  ;;  %v4308_v25 = vmul.f32 %v3234_v54, %v3234_v54  ;;  %v3237_v36 = vadd.f32 %v6099_v34, %v2692_v20 }
 0x293   : > { %v4435_v11 = vadd.f32 %v4434_v15, %v4308_v25  ;;  %v5735_v48 = vpack.c.bf16 %v3237_v36, %v3234_v54  ;;  %v4309_v41 = vmul.f32 %v3237_v36, %v3237_v36  ;;  %v4174_v28 = vadd.f32 %v4173_v49, %v3237_v36 }
 0x294   : > { %v2696_v39 = vpop.f32.mrb[144].mxu0  ;;  %v8553_v24 = vpop.f32.mrb[144].mxu1 }
 0x295   : > { %5911 = vst [vmem:[%s8329_s21 + $0x118] sm:$0xff] %v5735_v48   ;;  %v2697_v26 = vadd.f32 %v8525_v46, %v2696_v39  ;;  %v2698_v5 = vpop.f32.mrb[145].mxu0  ;;  %v4436_v18 = vadd.f32 %v4435_v11, %v4309_v41  ;;  %v8557_v59 = vpop.f32.mrb[145].mxu1 }
 0x296   : > { %v2699_v40 = vpop.f32.mrb[146].mxu0  ;;  %v8559_v61 = vpop.f32.mrb[146].mxu1 }
 0x297   : > { %v2700_v23 = vadd.f32 %v8525_v46, %v2699_v40  ;;  %v3242_v2 = vadd.f32 %v3241_v9, %v2697_v26  ;;  %v2701_v53 = vpop.f32.mrb[147].mxu0  ;;  %v8562_v34 = vpop.f32.mrb[147].mxu1 }
 0x299   : > { %v4175_v33 = vadd.f32 %v4174_v28, %v3242_v2  ;;  %v4310_v47 = vmul.f32 %v3242_v2, %v3242_v2  ;;  %v3245_v3 = vadd.f32 %v3244_v62, %v2700_v23 }
 0x29b   : > { %v4437_v32 = vadd.f32 %v4436_v18, %v4310_v47  ;;  %v5740_v52 = vpack.c.bf16 %v3245_v3, %v3242_v2  ;;  %v4176_v6 = vadd.f32 %v4175_v33, %v3245_v3  ;;  %v4311_v42 = vmul.f32 %v3245_v3, %v3245_v3 }
 0x29c   : > { %v2704_v55 = vpop.f32.mrb[148].mxu0  ;;  %v8564_v58 = vpop.f32.mrb[148].mxu1 }
 0x29d   : > { %5912 = vst [vmem:[%s8329_s21 + $0x120] sm:$0xff] %v5740_v52   ;;  %v4438_v43 = vadd.f32 %v4437_v32, %v4311_v42  ;;  %v2705_v27 = vadd.f32 %v8525_v46, %v2704_v55  ;;  %v2706_v50 = vpop.f32.mrb[149].mxu0  ;;  %v8568_v4 = vpop.f32.mrb[149].mxu1 }
 0x29e   : > { %v2707_v1 = vpop.f32.mrb[150].mxu0  ;;  %v8570_v57 = vpop.f32.mrb[150].mxu1 }
 0x29f   : > { %v3250_v9 = vadd.f32 %v8535_v14, %v2705_v27  ;;  %v2708_v16 = vadd.f32 %v8525_v46, %v2707_v1  ;;  %v2709_v51 = vpop.f32.mrb[151].mxu0  ;;  %v8574_v30 = vpop.f32.mrb[151].mxu1 }
 0x2a1   : > { %v4177_v12 = vadd.f32 %v4176_v6, %v3250_v9  ;;  %v4312_v62 = vmul.f32 %v3250_v9, %v3250_v9  ;;  %v3253_v13 = vadd.f32 %v8539_v8, %v2708_v16  ;;  %v2801_v6 = vadd.f32 %v8525_v46, %v8100_v0 }
 0x2a3   : > { %v4439_v7 = vadd.f32 %v4438_v43, %v4312_v62  ;;  %v5745_v22 = vpack.c.bf16 %v3253_v13, %v3250_v9  ;;  %v4178_v10 = vadd.f32 %v4177_v12, %v3253_v13  ;;  %v4313_v45 = vmul.f32 %v3253_v13, %v3253_v13  ;;  %v9137_v9 = vld [vmem:[#allocation16_spill] sm:$0xff]  ;;  %v9138_v13 = vld [vmem:[#allocation15_spill] sm:$0xff] }
 0x2a4   : > { %v2712_v56 = vpop.f32.mrb[152].mxu0  ;;  %v8577_v29 = vpop.f32.mrb[152].mxu1  ;;  %v2804_v16 = vadd.f32 %v8525_v46, %v9137_v9 }
 0x2a5   : > { %5913 = vst [vmem:[%s8329_s21 + $0x128] sm:$0xff] %v5745_v22   ;;  %v4440_v44 = vadd.f32 %v4439_v7, %v4313_v45  ;;  %v2713_v14 = vadd.f32 %v8525_v46, %v2712_v56  ;;  %v2714_v15 = vpop.f32.mrb[153].mxu0  ;;  %v8581_v19 = vpop.f32.mrb[153].mxu1  ;;  %v2796_v7 = vadd.f32 %v8525_v46, %v9138_v13  ;;  %v9143_v13 = vld [vmem:[#allocation23_spill] sm:$0xff] }
 0x2a6   : > { %v2715_v35 = vpop.f32.mrb[154].mxu0  ;;  %v8583_v21 = vpop.f32.mrb[154].mxu1 }
 0x2a7   : > { %v3258_v8 = vadd.f32 %v8546_v37, %v2713_v14  ;;  %v2716_v54 = vadd.f32 %v8525_v46, %v2715_v35  ;;  %v2717_v20 = vpop.f32.mrb[155].mxu0  ;;  %v8587_v63 = vpop.f32.mrb[155].mxu1 }
 0x2a9   : > { %v4179_v49 = vadd.f32 %v4178_v10, %v3258_v8  ;;  %v4314_v25 = vmul.f32 %v3258_v8, %v3258_v8  ;;  %v3261_v36 = vadd.f32 %v8551_v38, %v2716_v54 }
 0x2ab   : > { %v4441_v11 = vadd.f32 %v4440_v44, %v4314_v25  ;;  %v5750_v48 = vpack.c.bf16 %v3261_v36, %v3258_v8  ;;  %v4180_v41 = vadd.f32 %v4179_v49, %v3261_v36  ;;  %v4315_v28 = vmul.f32 %v3261_v36, %v3261_v36  ;;  %v9139_v25 = vld [vmem:[#allocation19_spill] sm:$0xff] }
 0x2ac   : > { %v2720_v39 = vpop.f32.mrb[156].mxu0  ;;  %v8590_v26 = vpop.f32.mrb[156].mxu1 }
 0x2ad   : > { %5914 = vst [vmem:[%s8329_s21 + $0x130] sm:$0xff] %v5750_v48   ;;  %v4442_v5 = vadd.f32 %v4441_v11, %v4315_v28  ;;  %v2721_v37 = vadd.f32 %v8525_v46, %v2720_v39  ;;  %v2722_v18 = vpop.f32.mrb[157].mxu0  ;;  %v8594_v40 = vpop.f32.mrb[157].mxu1  ;;  %v9140_v39 = vld [vmem:[#allocation17_spill] sm:$0xff] }
 0x2ae   : > { %v2723_v23 = vpop.f32.mrb[158].mxu0  ;;  %v8596_v2 = vpop.f32.mrb[158].mxu1  ;;  %v9141_v18 = vld [vmem:[#allocation20_spill] sm:$0xff] }
 0x2af   : > { %v3266_v53 = vadd.f32 %v8542_v17, %v2721_v37  ;;  %v2724_v38 = vadd.f32 %v8525_v46, %v2723_v23  ;;  %v2725_v33 = vpop.f32.mrb[159].mxu0  ;;  %v8600_v47 = vpop.f32.mrb[159].mxu1  ;;  %v2793_v17 = vadd.f32 %v8525_v46, %v8068_v31  ;;  %v2820_v23 = vadd.f32 %v8525_v46, %v9141_v18 }
 0x2b1   : > { %v4181_v3 = vadd.f32 %v4180_v41, %v3266_v53  ;;  %v4316_v32 = vmul.f32 %v3266_v53, %v3266_v53  ;;  %v3269_v52 = vadd.f32 %v8548_v60, %v2724_v38 }
 0x2b3   : > { %v4443_v42 = vadd.f32 %v4442_v5, %v4316_v32  ;;  %v5755_v55 = vpack.c.bf16 %v3269_v52, %v3266_v53  ;;  %v4182_v43 = vadd.f32 %v4181_v3, %v3269_v52  ;;  %v4317_v27 = vmul.f32 %v3269_v52, %v3269_v52  ;;  %v9142_v52 = vld [vmem:[#allocation18_spill] sm:$0xff] }
 0x2b4   : > { %v2728_v50 = vpop.f32.mrb[160].mxu0  ;;  %v6126_v1 = vpop.f32.mrb[160].mxu1  ;;  %v2809_v5 = vadd.f32 %v8525_v46, %v9140_v39 }
 0x2b5   : > { %5915 = vst [vmem:[%s8329_s21 + $0x138] sm:$0xff] %v5755_v55   ;;  %v4444_v51 = vadd.f32 %v4443_v42, %v4317_v27  ;;  %v2729_v12 = vadd.f32 %v8525_v46, %v2728_v50  ;;  %v8611_v60 = vadd.f32 %v6126_v1, %v2801_v6  ;;  %v2730_v62 = vpop.f32.mrb[161].mxu0  ;;  %v3337_v0 = vpop.f32.mrb[161].mxu1  ;;  %v2812_v6 = vadd.f32 %v8525_v46, %v9142_v52 }
 0x2b6   : > { %v8615_v22 = vadd.f32 %v3337_v0, %v2793_v17  ;;  %v2731_v10 = vpop.f32.mrb[162].mxu0  ;;  %v6127_v31 = vpop.f32.mrb[162].mxu1 }
 0x2b7   : > { %v3274_v45 = vadd.f32 %v8557_v59, %v2729_v12  ;;  %v2732_v56 = vadd.f32 %v8525_v46, %v2731_v10  ;;  %v8619_v44 = vadd.f32 %v6127_v31, %v2804_v16  ;;  %v2733_v14 = vpop.f32.mrb[163].mxu0  ;;  %v3340_v15 = vpop.f32.mrb[163].mxu1  ;;  %v2817_v59 = vadd.f32 %v8525_v46, %v9139_v25 }
 0x2b8   : > { %v8621_v35 = vadd.f32 %v3340_v15, %v2796_v7  ;;  %v9144_v14 = vld [vmem:[#allocation21_spill] sm:$0xff] }
 0x2b9   : > { %v4183_v8 = vadd.f32 %v4182_v43, %v3274_v45  ;;  %v4318_v54 = vmul.f32 %v3274_v45, %v3274_v45  ;;  %v3277_v20 = vadd.f32 %v8562_v34, %v2732_v56  ;;  %v5805_v49 = vpack.c.bf16 %v8619_v44, %v8611_v60 }
 0x2ba   : > { %v5800_v36 = vpack.c.bf16 %v8621_v35, %v8615_v22  ;;  %v2825_v15 = vadd.f32 %v8525_v46, %v9144_v14 }
 0x2bb   : > { %v4445_v11 = vadd.f32 %v4444_v51, %v4318_v54  ;;  %v5760_v48 = vpack.c.bf16 %v3277_v20, %v3274_v45  ;;  %v4184_v41 = vadd.f32 %v4183_v8, %v3277_v20  ;;  %v4319_v28 = vmul.f32 %v3277_v20, %v3277_v20  ;;  %5925 = vst [vmem:[%s8329_s21 + $0x188] sm:$0xff] %v5805_v49   ;;  %v9145_v54 = vld [vmem:[#allocation24_spill] sm:$0xff] }
 0x2bc   : > { %5924 = vst [vmem:[%s8329_s21 + $0x180] sm:$0xff] %v5800_v36   ;;  %v2736_v37 = vpop.f32.mrb[164].mxu0  ;;  %v6130_v34 = vpop.f32.mrb[164].mxu1  ;;  %v2836_v20 = vadd.f32 %v8525_v46, %v9145_v54 }
 0x2bd   : > { %5916 = vst [vmem:[%s8329_s21 + $0x140] sm:$0xff] %v5760_v48   ;;  %v4446_v53 = vadd.f32 %v4445_v11, %v4319_v28  ;;  %v2737_v38 = vadd.f32 %v8525_v46, %v2736_v37  ;;  %v8638_v33 = vadd.f32 %v6130_v34, %v2817_v59  ;;  %v2738_v3 = vpop.f32.mrb[165].mxu0  ;;  %v3353_v32 = vpop.f32.mrb[165].mxu1  ;;  %v9146_v48 = vld [vmem:[#allocation22_spill] sm:$0xff] }
 0x2be   : > { %v8642_v42 = vadd.f32 %v3353_v32, %v2809_v5  ;;  %v2739_v55 = vpop.f32.mrb[166].mxu0  ;;  %v6131_v43 = vpop.f32.mrb[166].mxu1 }
 0x2bf   : > { %v3282_v27 = vadd.f32 %v8553_v24, %v2737_v38  ;;  %v2740_v17 = vadd.f32 %v8525_v46, %v2739_v55  ;;  %v8646_v50 = vadd.f32 %v6131_v43, %v2820_v23  ;;  %v2741_v1 = vpop.f32.mrb[167].mxu0  ;;  %v3356_v9 = vpop.f32.mrb[167].mxu1  ;;  %v2833_v24 = vadd.f32 %v8525_v46, %v9143_v13  ;;  %v9147_v55 = vld [vmem:[#allocation27_spill] sm:$0xff] }
 0x2c0   : > { %v8648_v16 = vadd.f32 %v3356_v9, %v2812_v6 }
 0x2c1   : > { %v4185_v51 = vadd.f32 %v4184_v41, %v3282_v27  ;;  %v4320_v12 = vmul.f32 %v3282_v27, %v3282_v27  ;;  %v3285_v62 = vadd.f32 %v8559_v61, %v2740_v17  ;;  %v5815_v0 = vpack.c.bf16 %v8646_v50, %v8638_v33 }
 0x2c2   : > { %v5810_v7 = vpack.c.bf16 %v8648_v16, %v8642_v42  ;;  %v2828_v41 = vadd.f32 %v8525_v46, %v9146_v48 }
 0x2c3   : > { %v4447_v10 = vadd.f32 %v4446_v53, %v4320_v12  ;;  %v5765_v31 = vpack.c.bf16 %v3285_v62, %v3282_v27  ;;  %v4186_v45 = vadd.f32 %v4185_v51, %v3285_v62  ;;  %v4321_v56 = vmul.f32 %v3285_v62, %v3285_v62  ;;  %5927 = vst [vmem:[%s8329_s21 + $0x198] sm:$0xff] %v5815_v0   ;;  %v9148_v51 = vld [vmem:[#allocation25_spill] sm:$0xff]  ;;  %v9149_v0 = vld [vmem:[#allocation28_spill] sm:$0xff] }
 0x2c4   : > { %5926 = vst [vmem:[%s8329_s21 + $0x190] sm:$0xff] %v5810_v7   ;;  %v2744_v8 = vpop.f32.mrb[168].mxu0  ;;  %v6134_v61 = vpop.f32.mrb[168].mxu1  ;;  %v2841_v12 = vadd.f32 %v8525_v46, %v9148_v51  ;;  %v2852_v13 = vadd.f32 %v8525_v46, %v9149_v0 }
 0x2c5   : > { %5917 = vst [vmem:[%s8329_s21 + $0x148] sm:$0xff] %v5765_v31   ;;  %v4448_v49 = vadd.f32 %v4447_v10, %v4321_v56  ;;  %v2745_v25 = vadd.f32 %v8525_v46, %v2744_v8  ;;  %v8665_v59 = vadd.f32 %v6134_v61, %v2833_v24  ;;  %v2746_v36 = vpop.f32.mrb[169].mxu0  ;;  %v3369_v11 = vpop.f32.mrb[169].mxu1  ;;  %v9150_v56 = vld [vmem:[#allocation26_spill] sm:$0xff] }
 0x2c6   : > { %v8669_v28 = vadd.f32 %v3369_v11, %v2825_v15  ;;  %v2747_v39 = vpop.f32.mrb[170].mxu0  ;;  %v6135_v5 = vpop.f32.mrb[170].mxu1  ;;  %v2844_v14 = vadd.f32 %v8525_v46, %v9150_v56 }
 0x2c7   : > { %v3290_v37 = vadd.f32 %v8568_v4, %v2745_v25  ;;  %v2748_v34 = vadd.f32 %v8525_v46, %v2747_v39  ;;  %v8673_v18 = vadd.f32 %v6135_v5, %v2836_v20  ;;  %v2749_v23 = vpop.f32.mrb[171].mxu0  ;;  %v3372_v53 = vpop.f32.mrb[171].mxu1  ;;  %v2849_v4 = vadd.f32 %v8525_v46, %v9147_v55 }
 0x2c8   : > { %v8675_v38 = vadd.f32 %v3372_v53, %v2828_v41 }
 0x2c9   : > { %v4187_v3 = vadd.f32 %v4186_v45, %v3290_v37  ;;  %v4322_v32 = vmul.f32 %v3290_v37, %v3290_v37  ;;  %v3293_v52 = vadd.f32 %v8574_v30, %v2748_v34  ;;  %v5825_v6 = vpack.c.bf16 %v8673_v18, %v8665_v59 }
 0x2ca   : > { %v5820_v43 = vpack.c.bf16 %v8675_v38, %v8669_v28 }
 0x2cb   : > { %v4449_v27 = vadd.f32 %v4448_v49, %v4322_v32  ;;  %v5770_v17 = vpack.c.bf16 %v3293_v52, %v3290_v37  ;;  %v4188_v1 = vadd.f32 %v4187_v3, %v3293_v52  ;;  %v4323_v9 = vmul.f32 %v3293_v52, %v3293_v52  ;;  %5929 = vst [vmem:[%s8329_s21 + $0x1a8] sm:$0xff] %v5825_v6   ;;  %v9151_v37 = vld [vmem:[#allocation31_spill] sm:$0xff]  ;;  %v9152_v52 = vld [vmem:[#allocation29_spill] sm:$0xff] }
 0x2cc   : > { %5928 = vst [vmem:[%s8329_s21 + $0x1a0] sm:$0xff] %v5820_v43   ;;  %v2752_v62 = vpop.f32.mrb[172].mxu0  ;;  %v6138_v30 = vpop.f32.mrb[172].mxu1  ;;  %v2857_v6 = vadd.f32 %v8525_v46, %v9152_v52 }
 0x2cd   : > { %5918 = vst [vmem:[%s8329_s21 + $0x150] sm:$0xff] %v5770_v17   ;;  %v4450_v24 = vadd.f32 %v4449_v27, %v4323_v9  ;;  %v2753_v7 = vadd.f32 %v8525_v46, %v2752_v62  ;;  %v8692_v10 = vadd.f32 %v6138_v30, %v2849_v4  ;;  %v2754_v31 = vpop.f32.mrb[173].mxu0  ;;  %v3385_v45 = vpop.f32.mrb[173].mxu1  ;;  %v9153_v4 = vld [vmem:[#allocation32_spill] sm:$0xff] }
 0x2ce   : > { %v8696_v15 = vadd.f32 %v3385_v45, %v2841_v12  ;;  %v2755_v8 = vpop.f32.mrb[174].mxu0  ;;  %v6139_v61 = vpop.f32.mrb[174].mxu1  ;;  %v2868_v43 = vadd.f32 %v8525_v46, %v9153_v4  ;;  %v9154_v12 = vld [vmem:[#allocation30_spill] sm:$0xff] }
 0x2cf   : > { %v3298_v54 = vadd.f32 %v8564_v58, %v2753_v7  ;;  %v2756_v20 = vadd.f32 %v8525_v46, %v2755_v8  ;;  %v8700_v49 = vadd.f32 %v6139_v61, %v2852_v13  ;;  %v2757_v25 = vpop.f32.mrb[175].mxu0  ;;  %v3388_v36 = vpop.f32.mrb[175].mxu1  ;;  %v2865_v58 = vadd.f32 %v8525_v46, %v9151_v37  ;;  %v9156_v37 = vld [vmem:[#allocation33_spill] sm:$0xff] }
 0x2d0   : > { %v8702_v11 = vadd.f32 %v3388_v36, %v2844_v14  ;;  %v2860_v62 = vadd.f32 %v8525_v46, %v9154_v12  ;;  %v9155_v25 = vld [vmem:[#allocation35_spill] sm:$0xff] }
 0x2d1   : > { %v4189_v48 = vadd.f32 %v4188_v1, %v3298_v54  ;;  %v4324_v41 = vmul.f32 %v3298_v54, %v3298_v54  ;;  %v3301_v39 = vadd.f32 %v8570_v57, %v2756_v20  ;;  %v5835_v5 = vpack.c.bf16 %v8700_v49, %v8692_v10 }
 0x2d2   : > { %v5830_v34 = vpack.c.bf16 %v8702_v11, %v8696_v15 }
 0x2d3   : > { %v4451_v23 = vadd.f32 %v4450_v24, %v4324_v41  ;;  %v5775_v53 = vpack.c.bf16 %v3301_v39, %v3298_v54  ;;  %v4190_v3 = vadd.f32 %v4189_v48, %v3301_v39  ;;  %v4325_v32 = vmul.f32 %v3301_v39, %v3301_v39  ;;  %5931 = vst [vmem:[%s8329_s21 + $0x1b8] sm:$0xff] %v5835_v5  }
 0x2d4   : > { %5930 = vst [vmem:[%s8329_s21 + $0x1b0] sm:$0xff] %v5830_v34   ;;  %v2760_v55 = vpop.f32.mrb[176].mxu0  ;;  %v6142_v57 = vpop.f32.mrb[176].mxu1 }
 0x2d5   : > { %5919 = vst [vmem:[%s8329_s21 + $0x158] sm:$0xff] %v5775_v53   ;;  %v4452_v27 = vadd.f32 %v4451_v23, %v4325_v32  ;;  %v2761_v17 = vadd.f32 %v8525_v46, %v2760_v55  ;;  %v8719_v1 = vadd.f32 %v6142_v57, %v2865_v58  ;;  %v2762_v9 = vpop.f32.mrb[177].mxu0  ;;  %v3401_v51 = vpop.f32.mrb[177].mxu1  ;;  %v2873_v58 = vadd.f32 %v8525_v46, %v9156_v37  ;;  %v9157_v23 = vld [vmem:[#allocation36_spill] sm:$0xff]  ;;  %v9158_v57 = vld [vmem:[#allocation34_spill] sm:$0xff] }
 0x2d6   : > { %v8723_v30 = vadd.f32 %v3401_v51, %v2857_v6  ;;  %v2763_v0 = vpop.f32.mrb[178].mxu0  ;;  %v6143_v13 = vpop.f32.mrb[178].mxu1  ;;  %v2884_v53 = vadd.f32 %v8525_v46, %v9157_v23  ;;  %v2876_v4 = vadd.f32 %v8525_v46, %v9158_v57 }
 0x2d7   : > { %v3306_v24 = vadd.f32 %v8581_v19, %v2761_v17  ;;  %v2764_v7 = vadd.f32 %v8525_v46, %v2763_v0  ;;  %v8727_v31 = vadd.f32 %v6143_v13, %v2868_v43  ;;  %v2765_v45 = vpop.f32.mrb[179].mxu0  ;;  %v3404_v56 = vpop.f32.mrb[179].mxu1  ;;  %v2881_v19 = vadd.f32 %v8525_v46, %v9155_v25 }
 0x2d8   : > { %v8729_v14 = vadd.f32 %v3404_v56, %v2860_v62 }
 0x2d9   : > { %v4191_v8 = vadd.f32 %v4190_v3, %v3306_v24  ;;  %v4326_v61 = vmul.f32 %v3306_v24, %v3306_v24  ;;  %v3309_v54 = vadd.f32 %v8587_v63, %v2764_v7  ;;  %v5845_v20 = vpack.c.bf16 %v8727_v31, %v8719_v1 }
 0x2da   : > { %v5840_v36 = vpack.c.bf16 %v8729_v14, %v8723_v30 }
 0x2db   : > { %v4453_v48 = vadd.f32 %v4452_v27, %v4326_v61  ;;  %v5780_v41 = vpack.c.bf16 %v3309_v54, %v3306_v24  ;;  %v4192_v39 = vadd.f32 %v4191_v8, %v3309_v54  ;;  %v4327_v5 = vmul.f32 %v3309_v54, %v3309_v54  ;;  %5933 = vst [vmem:[%s8329_s21 + $0x1c8] sm:$0xff] %v5845_v20   ;;  %v9159_v8 = vld [vmem:[#allocation5_spill] sm:$0xff] }
 0x2dc   : > { %5932 = vst [vmem:[%s8329_s21 + $0x1c0] sm:$0xff] %v5840_v36   ;;  %v2768_v34 = vpop.f32.mrb[180].mxu0  ;;  %v6146_v63 = vpop.f32.mrb[180].mxu1  ;;  %v9160_v36 = vld [vmem:[#allocation37_spill] sm:$0xff] }
 0x2dd   : > { %5920 = vst [vmem:[%s8329_s21 + $0x160] sm:$0xff] %v5780_v41   ;;  %v4454_v3 = vadd.f32 %v4453_v48, %v4327_v5  ;;  %v2769_v32 = vadd.f32 %v8525_v46, %v2768_v34  ;;  %v8746_v52 = vadd.f32 %v6146_v63, %v2881_v19  ;;  %v2770_v6 = vpop.f32.mrb[181].mxu0  ;;  %v3417_v55 = vpop.f32.mrb[181].mxu1  ;;  %v2889_v48 = vadd.f32 %v8525_v46, %v9160_v36  ;;  %v9165_v36 = vld [vmem:[#allocation10_spill] sm:$0xff] }
 0x2de   : > { %v8750_v43 = vadd.f32 %v3417_v55, %v2873_v58  ;;  %v2771_v27 = vpop.f32.mrb[182].mxu0  ;;  %v6147_v17 = vpop.f32.mrb[182].mxu1 }
 0x2df   : > { %v3314_v9 = vadd.f32 %v8577_v29, %v2769_v32  ;;  %v2772_v51 = vadd.f32 %v8525_v46, %v2771_v27  ;;  %v8754_v12 = vadd.f32 %v6147_v17, %v2884_v53  ;;  %v2773_v62 = vpop.f32.mrb[183].mxu0  ;;  %v3420_v0 = vpop.f32.mrb[183].mxu1  ;;  %v2897_v29 = vadd.f32 %v8525_v46, %v9159_v8  ;;  %v9162_v53 = vld [vmem:[#allocation38_spill] sm:$0xff] }
 0x2e0   : > { %v8756_v13 = vadd.f32 %v3420_v0, %v2876_v4 }
 0x2e1   : > { %v4193_v24 = vadd.f32 %v4192_v39, %v3314_v9  ;;  %v4328_v7 = vmul.f32 %v3314_v9, %v3314_v9  ;;  %v3317_v45 = vadd.f32 %v8583_v21, %v2772_v51  ;;  %v5855_v56 = vpack.c.bf16 %v8754_v12, %v8746_v52  ;;  %v9161_v39 = vld [vmem:[#allocation6_spill] sm:$0xff] }
 0x2e2   : > { %v5850_v61 = vpack.c.bf16 %v8756_v13, %v8750_v43  ;;  %v2900_v5 = vadd.f32 %v8525_v46, %v9161_v39 }
 0x2e3   : > { %v4455_v54 = vadd.f32 %v4454_v3, %v4328_v7  ;;  %v5785_v20 = vpack.c.bf16 %v3317_v45, %v3314_v9  ;;  %v4194_v25 = vadd.f32 %v4193_v24, %v3317_v45  ;;  %v4329_v19 = vmul.f32 %v3317_v45, %v3317_v45  ;;  %5935 = vst [vmem:[%s8329_s21 + $0x1d8] sm:$0xff] %v5855_v56   ;;  %v9163_v45 = vld [vmem:[#allocation9_spill] sm:$0xff] }
 0x2e4   : > { %5934 = vst [vmem:[%s8329_s21 + $0x1d0] sm:$0xff] %v5850_v61   ;;  %v2776_v41 = vpop.f32.mrb[184].mxu0  ;;  %v6150_v21 = vpop.f32.mrb[184].mxu1  ;;  %v2892_v3 = vadd.f32 %v8525_v46, %v9162_v53 }
 0x2e5   : > { %5921 = vst [vmem:[%s8329_s21 + $0x168] sm:$0xff] %v5785_v20   ;;  %v4456_v37 = vadd.f32 %v4455_v54, %v4329_v19  ;;  %v2777_v58 = vadd.f32 %v8525_v46, %v2776_v41  ;;  %v8773_v34 = vadd.f32 %v6150_v21, %v2897_v29  ;;  %v2778_v63 = vpop.f32.mrb[185].mxu0  ;;  %v3433_v23 = vpop.f32.mrb[185].mxu1  ;;  %v9164_v20 = vld [vmem:[#allocation7_spill] sm:$0xff] }
 0x2e6   : > { %v8777_v32 = vadd.f32 %v3433_v23, %v2889_v48  ;;  %v2779_v6 = vpop.f32.mrb[186].mxu0  ;;  %v6151_v55 = vpop.f32.mrb[186].mxu1  ;;  %v2916_v48 = vadd.f32 %v8525_v46, %v9165_v36  ;;  %v4337_v36 = vmul.f32 %v8619_v44, %v8619_v44 }
 0x2e7   : > { %v3322_v57 = vadd.f32 %v8594_v40, %v2777_v58  ;;  %v2780_v4 = vadd.f32 %v8525_v46, %v2779_v6  ;;  %v8781_v27 = vadd.f32 %v6151_v55, %v2900_v5  ;;  %v2781_v17 = vpop.f32.mrb[187].mxu0  ;;  %v3436_v9 = vpop.f32.mrb[187].mxu1  ;;  %v2913_v40 = vadd.f32 %v8525_v46, %v9163_v45  ;;  %v9166_v58 = vld [vmem:[#allocation8_spill] sm:$0xff] }
 0x2e8   : > { %v8783_v51 = vadd.f32 %v3436_v9, %v2892_v3  ;;  %v2908_v63 = vadd.f32 %v8525_v46, %v9166_v58 }
 0x2e9   : > { %v4195_v62 = vadd.f32 %v4194_v25, %v3322_v57  ;;  %v4330_v0 = vmul.f32 %v3322_v57, %v3322_v57  ;;  %v3325_v24 = vadd.f32 %v8600_v47, %v2780_v4  ;;  %v5865_v7 = vpack.c.bf16 %v8781_v27, %v8773_v34 }
 0x2ea   : > { %v5860_v56 = vpack.c.bf16 %v8783_v51, %v8777_v32  ;;  %v2905_v25 = vadd.f32 %v8525_v46, %v9164_v20 }
 0x2eb   : > { %v4457_v8 = vadd.f32 %v4456_v37, %v4330_v0  ;;  %v5790_v29 = vpack.c.bf16 %v3325_v24, %v3322_v57  ;;  %v4196_v61 = vadd.f32 %v4195_v62, %v3325_v24  ;;  %v4331_v54 = vmul.f32 %v3325_v24, %v3325_v24  ;;  %5937 = vst [vmem:[%s8329_s21 + $0x1e8] sm:$0xff] %v5865_v7  }
 0x2ec   : > { %5936 = vst [vmem:[%s8329_s21 + $0x1e0] sm:$0xff] %v5860_v56   ;;  %v2784_v19 = vpop.f32.mrb[188].mxu0  ;;  %v6154_v47 = vpop.f32.mrb[188].mxu1 }
 0x2ed   : > { %5922 = vst [vmem:[%s8329_s21 + $0x170] sm:$0xff] %v5790_v29   ;;  %v4458_v41 = vadd.f32 %v4457_v8, %v4331_v54  ;;  %v2785_v21 = vadd.f32 %v8525_v46, %v2784_v19  ;;  %v8800_v39 = vadd.f32 %v6154_v47, %v2913_v40  ;;  %v2786_v5 = vpop.f32.mrb[189].mxu0  ;;  %v3449_v37 = vpop.f32.mrb[189].mxu1  ;;  %v4334_v8 = vmul.f32 %v8615_v22, %v8615_v22 }
 0x2ee   : > { %v8804_v23 = vadd.f32 %v3449_v37, %v2905_v25  ;;  %v2787_v53 = vpop.f32.mrb[190].mxu0  ;;  %v6155_v3 = vpop.f32.mrb[190].mxu1  ;;  %v4336_v25 = vmul.f32 %v8611_v60, %v8611_v60 }
 0x2ef   : > { %v3330_v6 = vadd.f32 %v8590_v26, %v2785_v21  ;;  %v2788_v55 = vadd.f32 %v8525_v46, %v2787_v53  ;;  %v8808_v57 = vadd.f32 %v6155_v3, %v2916_v48  ;;  %v2789_v4 = vpop.f32.mrb[191].mxu0  ;;  %v3452_v17 = vpop.f32.mrb[191].mxu1 }
 0x2f0   : > { %v8810_v9 = vadd.f32 %v3452_v17, %v2908_v63 }
 0x2f1   : > { %v4197_v62 = vadd.f32 %v4196_v61, %v3330_v6  ;;  %v4332_v0 = vmul.f32 %v3330_v6, %v3330_v6  ;;  %v3333_v24 = vadd.f32 %v8596_v2, %v2788_v55  ;;  %v5875_v7 = vpack.c.bf16 %v8808_v57, %v8800_v39 }
 0x2f2   : > { %v5870_v26 = vpack.c.bf16 %v8810_v9, %v8804_v23  ;;  %v4335_v2 = vmul.f32 %v8621_v35, %v8621_v35 }
 0x2f3   : > { %v4459_v45 = vadd.f32 %v4458_v41, %v4332_v0  ;;  %v5795_v40 = vpack.c.bf16 %v3333_v24, %v3330_v6  ;;  %v4198_v46 = vadd.f32 %v4197_v62, %v3333_v24  ;;  %v4333_v56 = vmul.f32 %v3333_v24, %v3333_v24  ;;  %5939 = vst [vmem:[%s8329_s21 + $0x1f8] sm:$0xff] %v5875_v7  }
 0x2f4   : > { %5938 = vst [vmem:[%s8329_s21 + $0x1f0] sm:$0xff] %v5870_v26  }
 0x2f5   : > { %5923 = vst [vmem:[%s8329_s21 + $0x178] sm:$0xff] %v5795_v40   ;;  %v4199_v29 = vadd.f32 %v4198_v46, %v8615_v22  ;;  %v4460_v61 = vadd.f32 %v4459_v45, %v4333_v56  ;;  %v4338_v22 = vmul.f32 %v8642_v42, %v8642_v42 }
 0x2f7   : > { %v4200_v54 = vadd.f32 %v4199_v29, %v8621_v35  ;;  %v4461_v20 = vadd.f32 %v4460_v61, %v4334_v8  ;;  %v4339_v35 = vmul.f32 %v8648_v16, %v8648_v16 }
 0x2f9   : > { %v4201_v19 = vadd.f32 %v4200_v54, %v8611_v60  ;;  %v4462_v47 = vadd.f32 %v4461_v20, %v4335_v2  ;;  %v4340_v60 = vmul.f32 %v8638_v33, %v8638_v33 }
 0x2fb   : > { %v4202_v48 = vadd.f32 %v4201_v19, %v8619_v44  ;;  %v4463_v41 = vadd.f32 %v4462_v47, %v4336_v25  ;;  %v4341_v44 = vmul.f32 %v8646_v50, %v8646_v50 }
 0x2fd   : > { %v4203_v21 = vadd.f32 %v4202_v48, %v8642_v42  ;;  %v4464_v5 = vadd.f32 %v4463_v41, %v4337_v36  ;;  %v4342_v42 = vmul.f32 %v8669_v28, %v8669_v28 }
 0x2ff   : > { %v4204_v37 = vadd.f32 %v4203_v21, %v8648_v16  ;;  %v4465_v58 = vadd.f32 %v4464_v5, %v4338_v22  ;;  %v4343_v16 = vmul.f32 %v8675_v38, %v8675_v38 }
 0x301   : > { %v4205_v63 = vadd.f32 %v4204_v37, %v8638_v33  ;;  %v4466_v53 = vadd.f32 %v4465_v58, %v4339_v35  ;;  %v4344_v33 = vmul.f32 %v8665_v59, %v8665_v59 }
 0x303   : > { %v4206_v3 = vadd.f32 %v4205_v63, %v8646_v50  ;;  %v4467_v6 = vadd.f32 %v4466_v53, %v4340_v60  ;;  %v4345_v50 = vmul.f32 %v8673_v18, %v8673_v18 }
 0x305   : > { %v4207_v55 = vadd.f32 %v4206_v3, %v8669_v28  ;;  %v4468_v4 = vadd.f32 %v4467_v6, %v4341_v44  ;;  %v4346_v28 = vmul.f32 %v8696_v15, %v8696_v15 }
 0x307   : > { %v4208_v17 = vadd.f32 %v4207_v55, %v8675_v38  ;;  %v4469_v62 = vadd.f32 %v4468_v4, %v4342_v42  ;;  %v4347_v38 = vmul.f32 %v8702_v11, %v8702_v11  ;;  %v4361_v55 = vmul.f32 %v8781_v27, %v8781_v27 }
 0x309   : > { %v4209_v0 = vadd.f32 %v4208_v17, %v8665_v59  ;;  %v4470_v24 = vadd.f32 %v4469_v62, %v4343_v16  ;;  %v4348_v59 = vmul.f32 %v8692_v10, %v8692_v10  ;;  %v4362_v16 = vmul.f32 %v8804_v23, %v8804_v23 }
 0x30b   : > { %v4210_v7 = vadd.f32 %v4209_v0, %v8673_v18  ;;  %v4471_v26 = vadd.f32 %v4470_v24, %v4344_v33  ;;  %v4349_v18 = vmul.f32 %v8700_v49, %v8700_v49  ;;  %v4363_v33 = vmul.f32 %v8810_v9, %v8810_v9 }
 0x30c   : > { %v4364_v0 = vmul.f32 %v8800_v39, %v8800_v39 }
 0x30d   : > { %v4211_v45 = vadd.f32 %v4210_v7, %v8696_v15  ;;  %v4472_v40 = vadd.f32 %v4471_v26, %v4345_v50  ;;  %v4350_v15 = vmul.f32 %v8723_v30, %v8723_v30  ;;  %v4365_v50 = vmul.f32 %v8808_v57, %v8808_v57 }
 0x30f   : > { %v4212_v46 = vadd.f32 %v4211_v45, %v8702_v11  ;;  %v4473_v56 = vadd.f32 %v4472_v40, %v4346_v28  ;;  %v4351_v11 = vmul.f32 %v8729_v14, %v8729_v14 }
 0x311   : > { %v4474_v8 = vadd.f32 %v4473_v56, %v4347_v38  ;;  %v4213_v29 = vadd.f32 %v4212_v46, %v8692_v10  ;;  %v4352_v10 = vmul.f32 %v8719_v1, %v8719_v1 }
 0x313   : > { %v4214_v61 = vadd.f32 %v4213_v29, %v8700_v49  ;;  %v4475_v2 = vadd.f32 %v4474_v8, %v4348_v59  ;;  %v4353_v49 = vmul.f32 %v8727_v31, %v8727_v31 }
 0x315   : > { %v4215_v54 = vadd.f32 %v4214_v61, %v8723_v30  ;;  %v4476_v20 = vadd.f32 %v4475_v2, %v4349_v18  ;;  %v4354_v30 = vmul.f32 %v8750_v43, %v8750_v43  ;;  %v4529_v18 = vld [vmem:[%s8329_s21] sm:$0xff] (%p6589_p5)   ;;  %v4533_v61 = vld [vmem:[%s8329_s21 + $0x8] sm:$0xff] (%p6589_p5)   ;;  %v4537_v2 = vld [vmem:[%s8329_s21 + $0x10] sm:$0xff] (%p6589_p5)  }
 0x316   : > { %4530 = vst [vmem:[%s8930_s26] sm:$0xff] (%p6589_p5), %v4529_v18   ;;  %4534 = vst [vmem:[%s8930_s26 + $0x8] sm:$0xff] (%p6589_p5), %v4533_v61  }
 0x317   : > { %v4216_v25 = vadd.f32 %v4215_v54, %v8729_v14  ;;  %v4477_v19 = vadd.f32 %v4476_v20, %v4350_v15  ;;  %v4355_v14 = vmul.f32 %v8756_v13, %v8756_v13  ;;  %v4541_v15 = vld [vmem:[%s8329_s21 + $0x18] sm:$0xff] (%p6589_p5)   ;;  %v4545_v54 = vld [vmem:[%s8329_s21 + $0x20] sm:$0xff] (%p6589_p5)   ;;  %v4549_v20 = vld [vmem:[%s8329_s21 + $0x28] sm:$0xff] (%p6589_p5)   ;;  %4538 = vst [vmem:[%s8930_s26 + $0x10] sm:$0xff] (%p6589_p5), %v4537_v2  }
 0x318   : > { %4542 = vst [vmem:[%s8930_s26 + $0x18] sm:$0xff] (%p6589_p5), %v4541_v15   ;;  %4546 = vst [vmem:[%s8930_s26 + $0x20] sm:$0xff] (%p6589_p5), %v4545_v54  }
 0x319   : > { %v4217_v47 = vadd.f32 %v4216_v25, %v8719_v1  ;;  %v4478_v36 = vadd.f32 %v4477_v19, %v4351_v11  ;;  %v4356_v1 = vmul.f32 %v8746_v52, %v8746_v52  ;;  %4550 = vst [vmem:[%s8930_s26 + $0x28] sm:$0xff] (%p6589_p5), %v4549_v20   ;;  %v4553_v11 = vld [vmem:[%s8329_s21 + $0x30] sm:$0xff] (%p6589_p5)   ;;  %v4557_v25 = vld [vmem:[%s8329_s21 + $0x38] sm:$0xff] (%p6589_p5)   ;;  %v4561_v19 = vld [vmem:[%s8329_s21 + $0x40] sm:$0xff] (%p6589_p5)  }
 0x31a   : > { %4554 = vst [vmem:[%s8930_s26 + $0x30] sm:$0xff] (%p6589_p5), %v4553_v11   ;;  %4558 = vst [vmem:[%s8930_s26 + $0x38] sm:$0xff] (%p6589_p5), %v4557_v25  }
 0x31b   : > { %v4218_v48 = vadd.f32 %v4217_v47, %v8727_v31  ;;  %v4479_v41 = vadd.f32 %v4478_v36, %v4352_v10  ;;  %v4357_v31 = vmul.f32 %v8754_v12, %v8754_v12  ;;  %4562 = vst [vmem:[%s8930_s26 + $0x80] sm:$0xff] (%p6589_p5), %v4561_v19   ;;  %v4565_v10 = vld [vmem:[%s8329_s21 + $0x48] sm:$0xff] (%p6589_p5)   ;;  %v4569_v47 = vld [vmem:[%s8329_s21 + $0x50] sm:$0xff] (%p6589_p5)   ;;  %v4573_v36 = vld [vmem:[%s8329_s21 + $0x58] sm:$0xff] (%p6589_p5)  }
 0x31c   : > { %4566 = vst [vmem:[%s8930_s26 + $0x88] sm:$0xff] (%p6589_p5), %v4565_v10   ;;  %4570 = vst [vmem:[%s8930_s26 + $0x90] sm:$0xff] (%p6589_p5), %v4569_v47  }
 0x31d   : > { %v4219_v22 = vadd.f32 %v4218_v48, %v8750_v43  ;;  %v4480_v21 = vadd.f32 %v4479_v41, %v4353_v49  ;;  %v4358_v43 = vmul.f32 %v8777_v32, %v8777_v32  ;;  %4574 = vst [vmem:[%s8930_s26 + $0x98] sm:$0xff] (%p6589_p5), %v4573_v36   ;;  %v4577_v49 = vld [vmem:[%s8329_s21 + $0x60] sm:$0xff] (%p6589_p5)   ;;  %v4581_v48 = vld [vmem:[%s8329_s21 + $0x68] sm:$0xff] (%p6589_p5)   ;;  %v4585_v41 = vld [vmem:[%s8329_s21 + $0x70] sm:$0xff] (%p6589_p5)  }
 0x31e   : > { %4578 = vst [vmem:[%s8930_s26 + $0xa0] sm:$0xff] (%p6589_p5), %v4577_v49   ;;  %4582 = vst [vmem:[%s8930_s26 + $0xa8] sm:$0xff] (%p6589_p5), %v4581_v48  }
 0x31f   : > { %v4220_v5 = vadd.f32 %v4219_v22, %v8756_v13  ;;  %v4481_v35 = vadd.f32 %v4480_v21, %v4354_v30  ;;  %v4359_v13 = vmul.f32 %v8783_v51, %v8783_v51  ;;  %4586 = vst [vmem:[%s8930_s26 + $0xb0] sm:$0xff] (%p6589_p5), %v4585_v41   ;;  %v4589_v30 = vld [vmem:[%s8329_s21 + $0x78] sm:$0xff] (%p6589_p5)   ;;  %v4593_v22 = vld [vmem:[%s8329_s21 + $0x80] sm:$0xff] (%p6589_p5)   ;;  %v4597_v21 = vld [vmem:[%s8329_s21 + $0x88] sm:$0xff] (%p6589_p5)  }
 0x320   : > { %4590 = vst [vmem:[%s8930_s26 + $0xb8] sm:$0xff] (%p6589_p5), %v4589_v30   ;;  %4594 = vst [vmem:[%s8930_s26 + $0x100] sm:$0xff] (%p6589_p5), %v4593_v22  }
 0x321   : > { %v4221_v37 = vadd.f32 %v4220_v5, %v8746_v52  ;;  %v4482_v58 = vadd.f32 %v4481_v35, %v4355_v14  ;;  %v4360_v52 = vmul.f32 %v8773_v34, %v8773_v34  ;;  %4598 = vst [vmem:[%s8930_s26 + $0x108] sm:$0xff] (%p6589_p5), %v4597_v21   ;;  %v4601_v14 = vld [vmem:[%s8329_s21 + $0x90] sm:$0xff] (%p6589_p5)   ;;  %v4605_v5 = vld [vmem:[%s8329_s21 + $0x98] sm:$0xff] (%p6589_p5)   ;;  %v4609_v35 = vld [vmem:[%s8329_s21 + $0xa0] sm:$0xff] (%p6589_p5)  }
 0x322   : > { %4602 = vst [vmem:[%s8930_s26 + $0x110] sm:$0xff] (%p6589_p5), %v4601_v14   ;;  %4606 = vst [vmem:[%s8930_s26 + $0x118] sm:$0xff] (%p6589_p5), %v4605_v5  }
 0x323   : > { %v4222_v60 = vadd.f32 %v4221_v37, %v8754_v12  ;;  %v4483_v63 = vadd.f32 %v4482_v58, %v4356_v1  ;;  %4610 = vst [vmem:[%s8930_s26 + $0x120] sm:$0xff] (%p6589_p5), %v4609_v35   ;;  %v4613_v1 = vld [vmem:[%s8329_s21 + $0xa8] sm:$0xff] (%p6589_p5)   ;;  %v4617_v37 = vld [vmem:[%s8329_s21 + $0xb0] sm:$0xff] (%p6589_p5)   ;;  %v4621_v58 = vld [vmem:[%s8329_s21 + $0xb8] sm:$0xff] (%p6589_p5)  }
 0x324   : > { %4614 = vst [vmem:[%s8930_s26 + $0x128] sm:$0xff] (%p6589_p5), %v4613_v1   ;;  %4618 = vst [vmem:[%s8930_s26 + $0x130] sm:$0xff] (%p6589_p5), %v4617_v37  }
 0x325   : > { %v4223_v53 = vadd.f32 %v4222_v60, %v8777_v32  ;;  %v4484_v44 = vadd.f32 %v4483_v63, %v4357_v31  ;;  %4622 = vst [vmem:[%s8930_s26 + $0x138] sm:$0xff] (%p6589_p5), %v4621_v58   ;;  %v4625_v31 = vld [vmem:[%s8329_s21 + $0xc0] sm:$0xff] (%p6589_p5)   ;;  %v4629_v60 = vld [vmem:[%s8329_s21 + $0xc8] sm:$0xff] (%p6589_p5)   ;;  %v4633_v63 = vld [vmem:[%s8329_s21 + $0xd0] sm:$0xff] (%p6589_p5)  }
 0x326   : > { %4626 = vst [vmem:[%s8930_s26 + $0x180] sm:$0xff] (%p6589_p5), %v4625_v31   ;;  %4630 = vst [vmem:[%s8930_s26 + $0x188] sm:$0xff] (%p6589_p5), %v4629_v60  }
 0x327   : > { %v4224_v3 = vadd.f32 %v4223_v53, %v8783_v51  ;;  %v4485_v6 = vadd.f32 %v4484_v44, %v4358_v43  ;;  %4634 = vst [vmem:[%s8930_s26 + $0x190] sm:$0xff] (%p6589_p5), %v4633_v63   ;;  %v4637_v43 = vld [vmem:[%s8329_s21 + $0xd8] sm:$0xff] (%p6589_p5)   ;;  %v4641_v53 = vld [vmem:[%s8329_s21 + $0xe0] sm:$0xff] (%p6589_p5)   ;;  %v4645_v44 = vld [vmem:[%s8329_s21 + $0xe8] sm:$0xff] (%p6589_p5)  }
 0x328   : > { %4638 = vst [vmem:[%s8930_s26 + $0x198] sm:$0xff] (%p6589_p5), %v4637_v43   ;;  %4642 = vst [vmem:[%s8930_s26 + $0x1a0] sm:$0xff] (%p6589_p5), %v4641_v53  }
 0x329   : > { %v4225_v42 = vadd.f32 %v4224_v3, %v8773_v34  ;;  %v4486_v12 = vadd.f32 %v4485_v6, %v4359_v13  ;;  %4646 = vst [vmem:[%s8930_s26 + $0x1a8] sm:$0xff] (%p6589_p5), %v4645_v44   ;;  %v4649_v13 = vld [vmem:[%s8329_s21 + $0xf0] sm:$0xff] (%p6589_p5)   ;;  %v4653_v3 = vld [vmem:[%s8329_s21 + $0xf8] sm:$0xff] (%p6589_p5)   ;;  %v4657_v6 = vld [vmem:[%s8329_s21 + $0x100] sm:$0xff] (%p6589_p5)  }
 0x32a   : > { %4650 = vst [vmem:[%s8930_s26 + $0x1b0] sm:$0xff] (%p6589_p5), %v4649_v13   ;;  %4654 = vst [vmem:[%s8930_s26 + $0x1b8] sm:$0xff] (%p6589_p5), %v4653_v3  }
 0x32b   : > { %v4226_v4 = vadd.f32 %v4225_v42, %v8781_v27  ;;  %v4487_v32 = vadd.f32 %v4486_v12, %v4360_v52  ;;  %4658 = vst [vmem:[%s8930_s26 + $0x200] sm:$0xff] (%p6589_p5), %v4657_v6   ;;  %v4661_v52 = vld [vmem:[%s8329_s21 + $0x108] sm:$0xff] (%p6589_p5)   ;;  %v4665_v42 = vld [vmem:[%s8329_s21 + $0x110] sm:$0xff] (%p6589_p5)   ;;  %v4669_v12 = vld [vmem:[%s8329_s21 + $0x118] sm:$0xff] (%p6589_p5)  }
 0x32c   : > { %4662 = vst [vmem:[%s8930_s26 + $0x208] sm:$0xff] (%p6589_p5), %v4661_v52   ;;  %4666 = vst [vmem:[%s8930_s26 + $0x210] sm:$0xff] (%p6589_p5), %v4665_v42  }
 0x32d   : > { %v4227_v51 = vadd.f32 %v4226_v4, %v8804_v23  ;;  %v4488_v17 = vadd.f32 %v4487_v32, %v4361_v55  ;;  %4670 = vst [vmem:[%s8930_s26 + $0x218] sm:$0xff] (%p6589_p5), %v4669_v12   ;;  %v4673_v55 = vld [vmem:[%s8329_s21 + $0x120] sm:$0xff] (%p6589_p5)   ;;  %v4677_v4 = vld [vmem:[%s8329_s21 + $0x128] sm:$0xff] (%p6589_p5)   ;;  %v4681_v32 = vld [vmem:[%s8329_s21 + $0x130] sm:$0xff] (%p6589_p5)  }
 0x32e   : > { %4674 = vst [vmem:[%s8930_s26 + $0x220] sm:$0xff] (%p6589_p5), %v4673_v55   ;;  %4678 = vst [vmem:[%s8930_s26 + $0x228] sm:$0xff] (%p6589_p5), %v4677_v4  }
 0x32f   : > { %v4228_v62 = vadd.f32 %v4227_v51, %v8810_v9  ;;  %v4489_v34 = vadd.f32 %v4488_v17, %v4362_v16  ;;  %4682 = vst [vmem:[%s8930_s26 + $0x230] sm:$0xff] (%p6589_p5), %v4681_v32   ;;  %v4685_v16 = vld [vmem:[%s8329_s21 + $0x138] sm:$0xff] (%p6589_p5)   ;;  %v4689_v51 = vld [vmem:[%s8329_s21 + $0x140] sm:$0xff] (%p6589_p5)   ;;  %v4693_v17 = vld [vmem:[%s8329_s21 + $0x148] sm:$0xff] (%p6589_p5)  }
 0x330   : > { %4686 = vst [vmem:[%s8930_s26 + $0x238] sm:$0xff] (%p6589_p5), %v4685_v16   ;;  %4690 = vst [vmem:[%s8930_s26 + $0x280] sm:$0xff] (%p6589_p5), %v4689_v51  }
 0x331   : > { %v4229_v24 = vadd.f32 %v4228_v62, %v8800_v39  ;;  %v4490_v27 = vadd.f32 %v4489_v34, %v4363_v33  ;;  %4694 = vst [vmem:[%s8930_s26 + $0x288] sm:$0xff] (%p6589_p5), %v4693_v17   ;;  %v4697_v62 = vld [vmem:[%s8329_s21 + $0x150] sm:$0xff] (%p6589_p5)   ;;  %v4701_v33 = vld [vmem:[%s8329_s21 + $0x158] sm:$0xff] (%p6589_p5)   ;;  %v4705_v34 = vld [vmem:[%s8329_s21 + $0x160] sm:$0xff] (%p6589_p5)  }
 0x332   : > { %4698 = vst [vmem:[%s8930_s26 + $0x290] sm:$0xff] (%p6589_p5), %v4697_v62   ;;  %4702 = vst [vmem:[%s8930_s26 + $0x298] sm:$0xff] (%p6589_p5), %v4701_v33  }
 0x333   : > { %v4230_v7 = vadd.f32 %v4229_v24, %v8808_v57  ;;  %v4491_v23 = vadd.f32 %v4490_v27, %v4364_v0  ;;  %4706 = vst [vmem:[%s8930_s26 + $0x2a0] sm:$0xff] (%p6589_p5), %v4705_v34   ;;  %v4709_v0 = vld [vmem:[%s8329_s21 + $0x168] sm:$0xff] (%p6589_p5)   ;;  %v4713_v24 = vld [vmem:[%s8329_s21 + $0x170] sm:$0xff] (%p6589_p5)   ;;  %v4717_v27 = vld [vmem:[%s8329_s21 + $0x178] sm:$0xff] (%p6589_p5)  }
 0x334   : > { %4710 = vst [vmem:[%s8930_s26 + $0x2a8] sm:$0xff] (%p6589_p5), %v4709_v0   ;;  %4714 = vst [vmem:[%s8930_s26 + $0x2b0] sm:$0xff] (%p6589_p5), %v4713_v24  }
 0x335   : > { %v4231_v26 = vrot.slane %v4230_v7, 4  ;;  %v4492_v28 = vadd.f32 %v4491_v23, %v4365_v50  ;;  %4718 = vst [vmem:[%s8930_s26 + $0x2b8] sm:$0xff] (%p6589_p5), %v4717_v27   ;;  %v4721_v50 = vld [vmem:[%s8329_s21 + $0x180] sm:$0xff] (%p6589_p5)   ;;  %v4729_v23 = vld [vmem:[%s8329_s21 + $0x190] sm:$0xff] (%p6589_p5)  }
 0x336   : > { %4722 = vst [vmem:[%s8930_s26 + $0x300] sm:$0xff] (%p6589_p5), %v4721_v50   ;;  %4730 = vst [vmem:[%s8930_s26 + $0x310] sm:$0xff] (%p6589_p5), %v4729_v23  }
 0x337   : > { %v4232_v45 = vadd.f32 %v4231_v26, %v4230_v7  ;;  %v4493_v40 = vrot.slane %v4492_v28, 4  ;;  %v4725_v7 = vld [vmem:[%s8329_s21 + $0x188] sm:$0xff] (%p6589_p5)   ;;  %v4733_v26 = vld [vmem:[%s8329_s21 + $0x198] sm:$0xff] (%p6589_p5)  }
 0x338   : > { %4726 = vst [vmem:[%s8930_s26 + $0x308] sm:$0xff] (%p6589_p5), %v4725_v7   ;;  %4734 = vst [vmem:[%s8930_s26 + $0x318] sm:$0xff] (%p6589_p5), %v4733_v26  }
 0x339   : > { %v4233_v9 = vrot.slane %v4232_v45, 2  ;;  %v4494_v38 = vadd.f32 %v4493_v40, %v4492_v28  ;;  %v4737_v28 = vld [vmem:[%s8329_s21 + $0x1a0] sm:$0xff] (%p6589_p5)   ;;  %v4745_v40 = vld [vmem:[%s8329_s21 + $0x1b0] sm:$0xff] (%p6589_p5)  }
 0x33a   : > { %4738 = vst [vmem:[%s8930_s26 + $0x320] sm:$0xff] (%p6589_p5), %v4737_v28   ;;  %4746 = vst [vmem:[%s8930_s26 + $0x330] sm:$0xff] (%p6589_p5), %v4745_v40  }
 0x33b   : > { %v4234_v46 = vadd.f32 %v4233_v9, %v4232_v45  ;;  %v4495_v56 = vrot.slane %v4494_v38, 2  ;;  %v4741_v45 = vld [vmem:[%s8329_s21 + $0x1a8] sm:$0xff] (%p6589_p5)   ;;  %v4749_v9 = vld [vmem:[%s8329_s21 + $0x1b8] sm:$0xff] (%p6589_p5)  }
 0x33c   : > { %4742 = vst [vmem:[%s8930_s26 + $0x328] sm:$0xff] (%p6589_p5), %v4741_v45   ;;  %4750 = vst [vmem:[%s8930_s26 + $0x338] sm:$0xff] (%p6589_p5), %v4749_v9  }
 0x33d   : > { %v4235_v59 = vrot.slane %v4234_v46, 1  ;;  %v4496_v39 = vadd.f32 %v4495_v56, %v4494_v38  ;;  %4510 = sbr.rel (!%p6589_p5) target bundleno = 837 (0x345), region = 82  ;;  %v4753_v38 = vld [vmem:[%s8329_s21 + $0x1c0] sm:$0xff] (%p6589_p5)   ;;  %v4761_v56 = vld [vmem:[%s8329_s21 + $0x1d0] sm:$0xff] (%p6589_p5)  }
 0x33e   : > { %4754 = vst [vmem:[%s8930_s26 + $0x380] sm:$0xff] (%p6589_p5), %v4753_v38   ;;  %4762 = vst [vmem:[%s8930_s26 + $0x390] sm:$0xff] (%p6589_p5), %v4761_v56  }
 0x33f   : > { %v4236_v8 = vadd.f32 %v4235_v59, %v4234_v46  ;;  %v4497_v29 = vrot.slane %v4496_v39, 1  ;;  %v4757_v46 = vld [vmem:[%s8329_s21 + $0x1c8] sm:$0xff] (%p6589_p5)   ;;  %v4765_v59 = vld [vmem:[%s8329_s21 + $0x1d8] sm:$0xff] (%p6589_p5)  }
 0x340   : > { %4758 = vst [vmem:[%s8930_s26 + $0x388] sm:$0xff] (%p6589_p5), %v4757_v46   ;;  %4766 = vst [vmem:[%s8930_s26 + $0x398] sm:$0xff] (%p6589_p5), %v4765_v59  }
 0x341   : > { %4237 = vst [vmem:[%s801_s17] sm:$0x1] %v4236_v8  ;;  %v4498_v57 = vadd.f32 %v4497_v29, %v4496_v39  ;;  %v4769_v39 = vld [vmem:[%s8329_s21 + $0x1e0] sm:$0xff] (%p6589_p5)   ;;  %v4773_v8 = vld [vmem:[%s8329_s21 + $0x1e8] sm:$0xff] (%p6589_p5)   ;;  %v4777_v29 = vld [vmem:[%s8329_s21 + $0x1f0] sm:$0xff] (%p6589_p5)  }
 0x342   : > { %4770 = vst [vmem:[%s8930_s26 + $0x3a0] sm:$0xff] (%p6589_p5), %v4769_v39   ;;  %4774 = vst [vmem:[%s8930_s26 + $0x3a8] sm:$0xff] (%p6589_p5), %v4773_v8  }
 0x343   : > { %4499 = vst [vmem:[%s801_s17 + $0x1] sm:$0x1] %v4498_v57  ;;  %4778 = vst [vmem:[%s8930_s26 + $0x3b0] sm:$0xff] (%p6589_p5), %v4777_v29   ;;  %v4781_v57 = vld [vmem:[%s8329_s21 + $0x1f8] sm:$0xff] (%p6589_p5)  }
 0x344   : > { %4782 = vst [vmem:[%s8930_s26 + $0x3b8] sm:$0xff] %v4781_v57  }
 0x345 PF: > { %p14_p11 = scmp.ge.s32.totalorder %s6577_s25, 4   ;;  %s9167_s21 = smov %s6516_s22 }
 0x346   : > { %s9168_s22 = smov %s6587_s28  ;;  %s9169_s23 = smov %s6577_s25 }
 0x347   :  { %16 = sbr.rel (!%p14_p11) target bundleno = 2 (0x2), region = 180 }

// kernel: temporal_resnet_block_pallas.3
= control target key start
LH: loop header
LB: loop body
LE: loop exit
PB: predicated region body
PF: predicated region fallthrough
CT: control target
= control target key end

     0   :  { %s6258_s21 = smov 0   ;;  %s6260_s22 = smov 0   ;;  %s8975_s0 = inlined_call_operand.vmem [shape: bf16[8,256,128], index: 0, kind: input, shape index: {}]   ;;  %s8976_s1 = inlined_call_operand.vmem [shape: f32[8,256,128], index: 1, kind: input, shape index: {}, may-alias: {1,6}]   ;;  %s8977_s2 = inlined_call_operand.vmem [shape: f32[1,128], index: 2, kind: input, shape index: {}]   ;;  %s8978_s3 = inlined_call_operand.vmem [shape: f32[1,128], index: 3, kind: input, shape index: {}]   ;;  %s8979_s4 = inlined_call_operand.vmem [shape: bf16[384,128], index: 4, kind: input, shape index: {}]   ;;  %s8980_s5 = inlined_call_operand.vmem [shape: f32[1,128], index: 5, kind: input, shape index: {}]   ;;  %s8981_s6 = inlined_call_operand.vmem [shape: f32[8,256,128], index: 6, kind: output, shape index: {}, may-alias: {1,6}]  }
   0x1   :  { %s6262_s23 = smov 0  }
   0x2 LB: > { %s5160_s24 = sadd.s32 4294967295, %s6220_s23   ;;  %s6275_s25 = sadd.s32 1, %s6220_s23   ;;  %s6220_s23 = sphi %s6262_s23, %s9079_s23   ;;  %s6216_s22 = sphi %s6260_s22, %s9078_s22   ;;  %s6212_s21 = sphi %s6258_s21, %s9077_s21  }
   0x3   : > { %s20_s26 = ssub.s32 %s6220_s23, %s6275_s25  ;;  %s23_s27 = sadd.s32 1, %s6216_s22 }
   0x4   : > { %p21_p0 = scmp.eq.s32.totalorder %s20_s26, 0  ;;  %p30_p1 = scmp.ne.s32.totalorder %s6216_s22, %s6212_s21 }
   0x5   : > { %p31_p2 = scmp.eq.s32.totalorder %s6220_s23, 0  ;;  %p170_p3 = scmp.eq.s32.totalorder %s5160_s24, 1 }
   0x6   : > { %s6286_s28 = scalar_select %p21_p0, %s6216_s22, %s23_s27  }
   0x7   : > { %p6288_p4 = por %p31_p2, %p30_p1  ;;  %p6292_p5 = por %p170_p3, %p30_p1 }
   0x8   : > { %p5163_p6 = scmp.ge.s32.totalorder %s6220_s23, 2 }
   0xa   : > { %204 = sbr.rel (%p5163_p6) target bundleno = 121 (0x79), region = 32 }
  0x11   : > { %207 = sbr.rel (!%p6288_p4) target bundleno = 53 (0x35), region = 36  ;;  %s209_s7 = sand.u32 (%p6288_p4), 1, %s6216_s22  }
  0x12   : > { %s5318_s8 = sshll.u32 (%p6288_p4), %s6220_s23, 6  ;;  %s5164_s9 = sshll.u32 (%p6288_p4), %s209_s7, 9 }
  0x13   : > { %s6304_s12 = scalar_lea.vmem (%p6288_p4), %s8975_s0, %s5318_s8  ;;  %s6309_s13 = scalar_lea.vmem (%p6288_p4), [#allocation3], %s5164_s9 }
  0x14   : > { %v230_v0 = vld [vmem:[%s6304_s12] sm:$0xff] (%p6288_p4)   ;;  %v234_v1 = vld [vmem:[%s6304_s12 + $0x8] sm:$0xff] (%p6288_p4)   ;;  %v238_v2 = vld [vmem:[%s6304_s12 + $0x10] sm:$0xff] (%p6288_p4)  }
  0x15   : > { %231 = vst [vmem:[%s6309_s13] sm:$0xff] (%p6288_p4), %v230_v0   ;;  %235 = vst [vmem:[%s6309_s13 + $0x8] sm:$0xff] (%p6288_p4), %v234_v1   ;;  %v242_v3 = vld [vmem:[%s6304_s12 + $0x18] sm:$0xff] (%p6288_p4)   ;;  %v246_v4 = vld [vmem:[%s6304_s12 + $0x20] sm:$0xff] (%p6288_p4)  }
  0x16   : > { %239 = vst [vmem:[%s6309_s13 + $0x10] sm:$0xff] (%p6288_p4), %v238_v2   ;;  %v250_v5 = vld [vmem:[%s6304_s12 + $0x28] sm:$0xff] (%p6288_p4)   ;;  %243 = vst [vmem:[%s6309_s13 + $0x18] sm:$0xff] (%p6288_p4), %v242_v3   ;;  %v254_v6 = vld [vmem:[%s6304_s12 + $0x30] sm:$0xff] (%p6288_p4)  }
  0x17   : > { %247 = vst [vmem:[%s6309_s13 + $0x20] sm:$0xff] (%p6288_p4), %v246_v4   ;;  %251 = vst [vmem:[%s6309_s13 + $0x28] sm:$0xff] (%p6288_p4), %v250_v5   ;;  %v258_v7 = vld [vmem:[%s6304_s12 + $0x38] sm:$0xff] (%p6288_p4)   ;;  %v262_v8 = vld [vmem:[%s6304_s12 + $0x80] sm:$0xff] (%p6288_p4)  }
  0x18   : > { %255 = vst [vmem:[%s6309_s13 + $0x30] sm:$0xff] %v254_v6   ;;  %259 = vst [vmem:[%s6309_s13 + $0x38] sm:$0xff] %v258_v7   ;;  %v266_v9 = vld [vmem:[%s6304_s12 + $0x88] sm:$0xff]   ;;  %v270_v10 = vld [vmem:[%s6304_s12 + $0x90] sm:$0xff]  }
  0x19   : > { %263 = vst [vmem:[%s6309_s13 + $0x40] sm:$0xff] %v262_v8   ;;  %v274_v11 = vld [vmem:[%s6304_s12 + $0x98] sm:$0xff]   ;;  %267 = vst [vmem:[%s6309_s13 + $0x48] sm:$0xff] %v266_v9   ;;  %v278_v12 = vld [vmem:[%s6304_s12 + $0xa0] sm:$0xff]  }
  0x1a   : > { %271 = vst [vmem:[%s6309_s13 + $0x50] sm:$0xff] %v270_v10   ;;  %275 = vst [vmem:[%s6309_s13 + $0x58] sm:$0xff] %v274_v11   ;;  %v282_v13 = vld [vmem:[%s6304_s12 + $0xa8] sm:$0xff]   ;;  %v286_v14 = vld [vmem:[%s6304_s12 + $0xb0] sm:$0xff]  }
  0x1b   : > { %279 = vst [vmem:[%s6309_s13 + $0x60] sm:$0xff] %v278_v12   ;;  %283 = vst [vmem:[%s6309_s13 + $0x68] sm:$0xff] %v282_v13   ;;  %v290_v15 = vld [vmem:[%s6304_s12 + $0xb8] sm:$0xff]   ;;  %v294_v16 = vld [vmem:[%s6304_s12 + $0x100] sm:$0xff]  }
  0x1c   : > { %287 = vst [vmem:[%s6309_s13 + $0x70] sm:$0xff] %v286_v14   ;;  %v298_v17 = vld [vmem:[%s6304_s12 + $0x108] sm:$0xff]   ;;  %291 = vst [vmem:[%s6309_s13 + $0x78] sm:$0xff] %v290_v15   ;;  %v302_v18 = vld [vmem:[%s6304_s12 + $0x110] sm:$0xff]  }
  0x1d   : > { %295 = vst [vmem:[%s6309_s13 + $0x80] sm:$0xff] %v294_v16   ;;  %299 = vst [vmem:[%s6309_s13 + $0x88] sm:$0xff] %v298_v17   ;;  %v306_v19 = vld [vmem:[%s6304_s12 + $0x118] sm:$0xff]   ;;  %v310_v20 = vld [vmem:[%s6304_s12 + $0x120] sm:$0xff]  }
  0x1e   : > { %303 = vst [vmem:[%s6309_s13 + $0x90] sm:$0xff] %v302_v18   ;;  %307 = vst [vmem:[%s6309_s13 + $0x98] sm:$0xff] %v306_v19   ;;  %v314_v21 = vld [vmem:[%s6304_s12 + $0x128] sm:$0xff]   ;;  %v318_v22 = vld [vmem:[%s6304_s12 + $0x130] sm:$0xff]  }
  0x1f   : > { %311 = vst [vmem:[%s6309_s13 + $0xa0] sm:$0xff] %v310_v20   ;;  %v322_v23 = vld [vmem:[%s6304_s12 + $0x138] sm:$0xff]   ;;  %315 = vst [vmem:[%s6309_s13 + $0xa8] sm:$0xff] %v314_v21   ;;  %v326_v24 = vld [vmem:[%s6304_s12 + $0x180] sm:$0xff]  }
  0x20   : > { %319 = vst [vmem:[%s6309_s13 + $0xb0] sm:$0xff] %v318_v22   ;;  %323 = vst [vmem:[%s6309_s13 + $0xb8] sm:$0xff] %v322_v23   ;;  %v330_v25 = vld [vmem:[%s6304_s12 + $0x188] sm:$0xff]   ;;  %v334_v26 = vld [vmem:[%s6304_s12 + $0x190] sm:$0xff]  }
  0x21   : > { %327 = vst [vmem:[%s6309_s13 + $0xc0] sm:$0xff] %v326_v24   ;;  %331 = vst [vmem:[%s6309_s13 + $0xc8] sm:$0xff] %v330_v25   ;;  %v338_v27 = vld [vmem:[%s6304_s12 + $0x198] sm:$0xff]   ;;  %v342_v28 = vld [vmem:[%s6304_s12 + $0x1a0] sm:$0xff]  }
  0x22   : > { %335 = vst [vmem:[%s6309_s13 + $0xd0] sm:$0xff] %v334_v26   ;;  %v346_v29 = vld [vmem:[%s6304_s12 + $0x1a8] sm:$0xff]   ;;  %339 = vst [vmem:[%s6309_s13 + $0xd8] sm:$0xff] %v338_v27   ;;  %v350_v30 = vld [vmem:[%s6304_s12 + $0x1b0] sm:$0xff]  }
  0x23   : > { %343 = vst [vmem:[%s6309_s13 + $0xe0] sm:$0xff] %v342_v28   ;;  %347 = vst [vmem:[%s6309_s13 + $0xe8] sm:$0xff] %v346_v29   ;;  %v354_v31 = vld [vmem:[%s6304_s12 + $0x1b8] sm:$0xff]   ;;  %v358_v32 = vld [vmem:[%s6304_s12 + $0x200] sm:$0xff]  }
  0x24   : > { %351 = vst [vmem:[%s6309_s13 + $0xf0] sm:$0xff] %v350_v30   ;;  %355 = vst [vmem:[%s6309_s13 + $0xf8] sm:$0xff] %v354_v31   ;;  %v362_v33 = vld [vmem:[%s6304_s12 + $0x208] sm:$0xff]   ;;  %v366_v34 = vld [vmem:[%s6304_s12 + $0x210] sm:$0xff]  }
  0x25   : > { %359 = vst [vmem:[%s6309_s13 + $0x100] sm:$0xff] %v358_v32   ;;  %v370_v35 = vld [vmem:[%s6304_s12 + $0x218] sm:$0xff]   ;;  %363 = vst [vmem:[%s6309_s13 + $0x108] sm:$0xff] %v362_v33   ;;  %v374_v36 = vld [vmem:[%s6304_s12 + $0x220] sm:$0xff]  }
  0x26   : > { %367 = vst [vmem:[%s6309_s13 + $0x110] sm:$0xff] %v366_v34   ;;  %371 = vst [vmem:[%s6309_s13 + $0x118] sm:$0xff] %v370_v35   ;;  %v378_v37 = vld [vmem:[%s6304_s12 + $0x228] sm:$0xff]   ;;  %v382_v38 = vld [vmem:[%s6304_s12 + $0x230] sm:$0xff]  }
  0x27   : > { %375 = vst [vmem:[%s6309_s13 + $0x120] sm:$0xff] %v374_v36   ;;  %379 = vst [vmem:[%s6309_s13 + $0x128] sm:$0xff] %v378_v37   ;;  %v386_v39 = vld [vmem:[%s6304_s12 + $0x238] sm:$0xff]   ;;  %v390_v40 = vld [vmem:[%s6304_s12 + $0x280] sm:$0xff]  }
  0x28   : > { %383 = vst [vmem:[%s6309_s13 + $0x130] sm:$0xff] %v382_v38   ;;  %v394_v41 = vld [vmem:[%s6304_s12 + $0x288] sm:$0xff]   ;;  %387 = vst [vmem:[%s6309_s13 + $0x138] sm:$0xff] %v386_v39   ;;  %v398_v42 = vld [vmem:[%s6304_s12 + $0x290] sm:$0xff]  }
  0x29   : > { %391 = vst [vmem:[%s6309_s13 + $0x140] sm:$0xff] %v390_v40   ;;  %395 = vst [vmem:[%s6309_s13 + $0x148] sm:$0xff] %v394_v41   ;;  %v402_v43 = vld [vmem:[%s6304_s12 + $0x298] sm:$0xff]   ;;  %v406_v44 = vld [vmem:[%s6304_s12 + $0x2a0] sm:$0xff]  }
  0x2a   : > { %399 = vst [vmem:[%s6309_s13 + $0x150] sm:$0xff] %v398_v42   ;;  %403 = vst [vmem:[%s6309_s13 + $0x158] sm:$0xff] %v402_v43   ;;  %v410_v45 = vld [vmem:[%s6304_s12 + $0x2a8] sm:$0xff]   ;;  %v414_v46 = vld [vmem:[%s6304_s12 + $0x2b0] sm:$0xff]  }
  0x2b   : > { %407 = vst [vmem:[%s6309_s13 + $0x160] sm:$0xff] %v406_v44   ;;  %v418_v47 = vld [vmem:[%s6304_s12 + $0x2b8] sm:$0xff]   ;;  %411 = vst [vmem:[%s6309_s13 + $0x168] sm:$0xff] %v410_v45   ;;  %v422_v48 = vld [vmem:[%s6304_s12 + $0x300] sm:$0xff]  }
  0x2c   : > { %415 = vst [vmem:[%s6309_s13 + $0x170] sm:$0xff] %v414_v46   ;;  %419 = vst [vmem:[%s6309_s13 + $0x178] sm:$0xff] %v418_v47   ;;  %v426_v49 = vld [vmem:[%s6304_s12 + $0x308] sm:$0xff]   ;;  %v430_v50 = vld [vmem:[%s6304_s12 + $0x310] sm:$0xff]  }
  0x2d   : > { %423 = vst [vmem:[%s6309_s13 + $0x180] sm:$0xff] %v422_v48   ;;  %427 = vst [vmem:[%s6309_s13 + $0x188] sm:$0xff] %v426_v49   ;;  %v434_v51 = vld [vmem:[%s6304_s12 + $0x318] sm:$0xff]   ;;  %v438_v52 = vld [vmem:[%s6304_s12 + $0x320] sm:$0xff]  }
  0x2e   : > { %431 = vst [vmem:[%s6309_s13 + $0x190] sm:$0xff] %v430_v50   ;;  %v442_v53 = vld [vmem:[%s6304_s12 + $0x328] sm:$0xff]   ;;  %435 = vst [vmem:[%s6309_s13 + $0x198] sm:$0xff] %v434_v51   ;;  %v446_v54 = vld [vmem:[%s6304_s12 + $0x330] sm:$0xff]  }
  0x2f   : > { %439 = vst [vmem:[%s6309_s13 + $0x1a0] sm:$0xff] %v438_v52   ;;  %443 = vst [vmem:[%s6309_s13 + $0x1a8] sm:$0xff] %v442_v53   ;;  %v450_v55 = vld [vmem:[%s6304_s12 + $0x338] sm:$0xff]   ;;  %v454_v56 = vld [vmem:[%s6304_s12 + $0x380] sm:$0xff]  }
  0x30   : > { %447 = vst [vmem:[%s6309_s13 + $0x1b0] sm:$0xff] %v446_v54   ;;  %451 = vst [vmem:[%s6309_s13 + $0x1b8] sm:$0xff] %v450_v55   ;;  %v458_v57 = vld [vmem:[%s6304_s12 + $0x388] sm:$0xff]   ;;  %v462_v58 = vld [vmem:[%s6304_s12 + $0x390] sm:$0xff]  }
  0x31   : > { %455 = vst [vmem:[%s6309_s13 + $0x1c0] sm:$0xff] %v454_v56   ;;  %v466_v59 = vld [vmem:[%s6304_s12 + $0x398] sm:$0xff]   ;;  %459 = vst [vmem:[%s6309_s13 + $0x1c8] sm:$0xff] %v458_v57   ;;  %v470_v60 = vld [vmem:[%s6304_s12 + $0x3a0] sm:$0xff]  }
  0x32   : > { %463 = vst [vmem:[%s6309_s13 + $0x1d0] sm:$0xff] %v462_v58   ;;  %467 = vst [vmem:[%s6309_s13 + $0x1d8] sm:$0xff] %v466_v59   ;;  %v474_v61 = vld [vmem:[%s6304_s12 + $0x3a8] sm:$0xff]   ;;  %v478_v62 = vld [vmem:[%s6304_s12 + $0x3b0] sm:$0xff]  }
  0x33   : > { %471 = vst [vmem:[%s6309_s13 + $0x1e0] sm:$0xff] %v470_v60   ;;  %475 = vst [vmem:[%s6309_s13 + $0x1e8] sm:$0xff] %v474_v61   ;;  %v482_v63 = vld [vmem:[%s6304_s12 + $0x3b8] sm:$0xff]  }
  0x34   : > { %479 = vst [vmem:[%s6309_s13 + $0x1f0] sm:$0xff] %v478_v62   ;;  %483 = vst [vmem:[%s6309_s13 + $0x1f8] sm:$0xff] %v482_v63  }
  0x35 PF: > { %764 = sbr.rel (!%p6288_p4) target bundleno = 121 (0x79), region = 77  ;;  %s766_s14 = sand.u32 (%p6288_p4), 1, %s6216_s22  }
  0x36   : > { %s5319_s15 = sshll.u32 (%p6288_p4), %s6220_s23, 7  ;;  %s5167_s16 = sshll.u32 (%p6288_p4), %s766_s14, 10 }
  0x37   : > { %s6443_s19 = scalar_lea.vmem (%p6288_p4), %s8976_s1, %s5319_s15  ;;  %s6448_s20 = scalar_lea.vmem (%p6288_p4), [#allocation4], %s5167_s16 }
  0x38   : > { %v1053_v0 = vld [vmem:[%s6443_s19] sm:$0xff] (%p6288_p4)  ;;  %v1055_v1 = vld [vmem:[%s6443_s19 + $0x8] sm:$0xff] (%p6288_p4)  ;;  %v1057_v2 = vld [vmem:[%s6443_s19 + $0x10] sm:$0xff] (%p6288_p4) }
  0x39   : > { %1054 = vst [vmem:[%s6448_s20] sm:$0xff] (%p6288_p4), %v1053_v0  ;;  %1056 = vst [vmem:[%s6448_s20 + $0x8] sm:$0xff] (%p6288_p4), %v1055_v1  ;;  %v1059_v3 = vld [vmem:[%s6443_s19 + $0x18] sm:$0xff] (%p6288_p4)  ;;  %v1061_v4 = vld [vmem:[%s6443_s19 + $0x20] sm:$0xff] (%p6288_p4) }
  0x3a   : > { %1058 = vst [vmem:[%s6448_s20 + $0x10] sm:$0xff] (%p6288_p4), %v1057_v2  ;;  %v1063_v5 = vld [vmem:[%s6443_s19 + $0x28] sm:$0xff] (%p6288_p4)  ;;  %1060 = vst [vmem:[%s6448_s20 + $0x18] sm:$0xff] (%p6288_p4), %v1059_v3  ;;  %v1065_v6 = vld [vmem:[%s6443_s19 + $0x30] sm:$0xff] (%p6288_p4) }
  0x3b   : > { %1062 = vst [vmem:[%s6448_s20 + $0x20] sm:$0xff] (%p6288_p4), %v1061_v4  ;;  %1064 = vst [vmem:[%s6448_s20 + $0x28] sm:$0xff] (%p6288_p4), %v1063_v5  ;;  %v1067_v7 = vld [vmem:[%s6443_s19 + $0x38] sm:$0xff] (%p6288_p4)  ;;  %v1069_v8 = vld [vmem:[%s6443_s19 + $0x40] sm:$0xff] (%p6288_p4) }
  0x3c   : > { %1066 = vst [vmem:[%s6448_s20 + $0x30] sm:$0xff] %v1065_v6  ;;  %1068 = vst [vmem:[%s6448_s20 + $0x38] sm:$0xff] %v1067_v7  ;;  %v1071_v9 = vld [vmem:[%s6443_s19 + $0x48] sm:$0xff]  ;;  %v1073_v10 = vld [vmem:[%s6443_s19 + $0x50] sm:$0xff] }
  0x3d   : > { %1070 = vst [vmem:[%s6448_s20 + $0x40] sm:$0xff] %v1069_v8  ;;  %v1075_v11 = vld [vmem:[%s6443_s19 + $0x58] sm:$0xff]  ;;  %1072 = vst [vmem:[%s6448_s20 + $0x48] sm:$0xff] %v1071_v9  ;;  %v1077_v12 = vld [vmem:[%s6443_s19 + $0x60] sm:$0xff] }
  0x3e   : > { %1074 = vst [vmem:[%s6448_s20 + $0x50] sm:$0xff] %v1073_v10  ;;  %1076 = vst [vmem:[%s6448_s20 + $0x58] sm:$0xff] %v1075_v11  ;;  %v1079_v13 = vld [vmem:[%s6443_s19 + $0x68] sm:$0xff]  ;;  %v1081_v14 = vld [vmem:[%s6443_s19 + $0x70] sm:$0xff] }
  0x3f   : > { %1078 = vst [vmem:[%s6448_s20 + $0x60] sm:$0xff] %v1077_v12  ;;  %1080 = vst [vmem:[%s6448_s20 + $0x68] sm:$0xff] %v1079_v13  ;;  %v1083_v15 = vld [vmem:[%s6443_s19 + $0x78] sm:$0xff]  ;;  %v1085_v16 = vld [vmem:[%s6443_s19 + $0x100] sm:$0xff] }
  0x40   : > { %1082 = vst [vmem:[%s6448_s20 + $0x70] sm:$0xff] %v1081_v14  ;;  %v1087_v17 = vld [vmem:[%s6443_s19 + $0x108] sm:$0xff]  ;;  %1084 = vst [vmem:[%s6448_s20 + $0x78] sm:$0xff] %v1083_v15  ;;  %v1089_v18 = vld [vmem:[%s6443_s19 + $0x110] sm:$0xff] }
  0x41   : > { %1086 = vst [vmem:[%s6448_s20 + $0x80] sm:$0xff] %v1085_v16  ;;  %1088 = vst [vmem:[%s6448_s20 + $0x88] sm:$0xff] %v1087_v17  ;;  %v1091_v19 = vld [vmem:[%s6443_s19 + $0x118] sm:$0xff]  ;;  %v1093_v20 = vld [vmem:[%s6443_s19 + $0x120] sm:$0xff] }
  0x42   : > { %1090 = vst [vmem:[%s6448_s20 + $0x90] sm:$0xff] %v1089_v18  ;;  %1092 = vst [vmem:[%s6448_s20 + $0x98] sm:$0xff] %v1091_v19  ;;  %v1095_v21 = vld [vmem:[%s6443_s19 + $0x128] sm:$0xff]  ;;  %v1097_v22 = vld [vmem:[%s6443_s19 + $0x130] sm:$0xff] }
  0x43   : > { %1094 = vst [vmem:[%s6448_s20 + $0xa0] sm:$0xff] %v1093_v20  ;;  %v1099_v23 = vld [vmem:[%s6443_s19 + $0x138] sm:$0xff]  ;;  %1096 = vst [vmem:[%s6448_s20 + $0xa8] sm:$0xff] %v1095_v21  ;;  %v1101_v24 = vld [vmem:[%s6443_s19 + $0x140] sm:$0xff] }
  0x44   : > { %1098 = vst [vmem:[%s6448_s20 + $0xb0] sm:$0xff] %v1097_v22  ;;  %1100 = vst [vmem:[%s6448_s20 + $0xb8] sm:$0xff] %v1099_v23  ;;  %v1103_v25 = vld [vmem:[%s6443_s19 + $0x148] sm:$0xff]  ;;  %v1105_v26 = vld [vmem:[%s6443_s19 + $0x150] sm:$0xff] }
  0x45   : > { %1102 = vst [vmem:[%s6448_s20 + $0xc0] sm:$0xff] %v1101_v24  ;;  %1104 = vst [vmem:[%s6448_s20 + $0xc8] sm:$0xff] %v1103_v25  ;;  %v1107_v27 = vld [vmem:[%s6443_s19 + $0x158] sm:$0xff]  ;;  %v1109_v28 = vld [vmem:[%s6443_s19 + $0x160] sm:$0xff] }
  0x46   : > { %1106 = vst [vmem:[%s6448_s20 + $0xd0] sm:$0xff] %v1105_v26  ;;  %v1111_v29 = vld [vmem:[%s6443_s19 + $0x168] sm:$0xff]  ;;  %1108 = vst [vmem:[%s6448_s20 + $0xd8] sm:$0xff] %v1107_v27  ;;  %v1113_v30 = vld [vmem:[%s6443_s19 + $0x170] sm:$0xff] }
  0x47   : > { %1110 = vst [vmem:[%s6448_s20 + $0xe0] sm:$0xff] %v1109_v28  ;;  %1112 = vst [vmem:[%s6448_s20 + $0xe8] sm:$0xff] %v1111_v29  ;;  %v1115_v31 = vld [vmem:[%s6443_s19 + $0x178] sm:$0xff]  ;;  %v1117_v32 = vld [vmem:[%s6443_s19 + $0x200] sm:$0xff] }
  0x48   : > { %1114 = vst [vmem:[%s6448_s20 + $0xf0] sm:$0xff] %v1113_v30  ;;  %1116 = vst [vmem:[%s6448_s20 + $0xf8] sm:$0xff] %v1115_v31  ;;  %v1119_v33 = vld [vmem:[%s6443_s19 + $0x208] sm:$0xff]  ;;  %v1121_v34 = vld [vmem:[%s6443_s19 + $0x210] sm:$0xff] }
  0x49   : > { %1118 = vst [vmem:[%s6448_s20 + $0x100] sm:$0xff] %v1117_v32  ;;  %v1123_v35 = vld [vmem:[%s6443_s19 + $0x218] sm:$0xff]  ;;  %1120 = vst [vmem:[%s6448_s20 + $0x108] sm:$0xff] %v1119_v33  ;;  %v1125_v36 = vld [vmem:[%s6443_s19 + $0x220] sm:$0xff] }
  0x4a   : > { %1122 = vst [vmem:[%s6448_s20 + $0x110] sm:$0xff] %v1121_v34  ;;  %1124 = vst [vmem:[%s6448_s20 + $0x118] sm:$0xff] %v1123_v35  ;;  %v1127_v37 = vld [vmem:[%s6443_s19 + $0x228] sm:$0xff]  ;;  %v1129_v38 = vld [vmem:[%s6443_s19 + $0x230] sm:$0xff] }
  0x4b   : > { %1126 = vst [vmem:[%s6448_s20 + $0x120] sm:$0xff] %v1125_v36  ;;  %1128 = vst [vmem:[%s6448_s20 + $0x128] sm:$0xff] %v1127_v37  ;;  %v1131_v39 = vld [vmem:[%s6443_s19 + $0x238] sm:$0xff]  ;;  %v1133_v40 = vld [vmem:[%s6443_s19 + $0x240] sm:$0xff] }
  0x4c   : > { %1130 = vst [vmem:[%s6448_s20 + $0x130] sm:$0xff] %v1129_v38  ;;  %v1135_v41 = vld [vmem:[%s6443_s19 + $0x248] sm:$0xff]  ;;  %1132 = vst [vmem:[%s6448_s20 + $0x138] sm:$0xff] %v1131_v39  ;;  %v1137_v42 = vld [vmem:[%s6443_s19 + $0x250] sm:$0xff] }
  0x4d   : > { %1134 = vst [vmem:[%s6448_s20 + $0x140] sm:$0xff] %v1133_v40  ;;  %1136 = vst [vmem:[%s6448_s20 + $0x148] sm:$0xff] %v1135_v41  ;;  %v1139_v43 = vld [vmem:[%s6443_s19 + $0x258] sm:$0xff]  ;;  %v1141_v44 = vld [vmem:[%s6443_s19 + $0x260] sm:$0xff] }
  0x4e   : > { %1138 = vst [vmem:[%s6448_s20 + $0x150] sm:$0xff] %v1137_v42  ;;  %1140 = vst [vmem:[%s6448_s20 + $0x158] sm:$0xff] %v1139_v43  ;;  %v1143_v45 = vld [vmem:[%s6443_s19 + $0x268] sm:$0xff]  ;;  %v1145_v46 = vld [vmem:[%s6443_s19 + $0x270] sm:$0xff] }
  0x4f   : > { %1142 = vst [vmem:[%s6448_s20 + $0x160] sm:$0xff] %v1141_v44  ;;  %v1147_v47 = vld [vmem:[%s6443_s19 + $0x278] sm:$0xff]  ;;  %1144 = vst [vmem:[%s6448_s20 + $0x168] sm:$0xff] %v1143_v45  ;;  %v1149_v48 = vld [vmem:[%s6443_s19 + $0x300] sm:$0xff] }
  0x50   : > { %1146 = vst [vmem:[%s6448_s20 + $0x170] sm:$0xff] %v1145_v46  ;;  %1148 = vst [vmem:[%s6448_s20 + $0x178] sm:$0xff] %v1147_v47  ;;  %v1151_v49 = vld [vmem:[%s6443_s19 + $0x308] sm:$0xff]  ;;  %v1153_v50 = vld [vmem:[%s6443_s19 + $0x310] sm:$0xff] }
  0x51   : > { %1150 = vst [vmem:[%s6448_s20 + $0x180] sm:$0xff] %v1149_v48  ;;  %1152 = vst [vmem:[%s6448_s20 + $0x188] sm:$0xff] %v1151_v49  ;;  %v1155_v51 = vld [vmem:[%s6443_s19 + $0x318] sm:$0xff]  ;;  %v1157_v52 = vld [vmem:[%s6443_s19 + $0x320] sm:$0xff] }
  0x52   : > { %1154 = vst [vmem:[%s6448_s20 + $0x190] sm:$0xff] %v1153_v50  ;;  %v1159_v53 = vld [vmem:[%s6443_s19 + $0x328] sm:$0xff]  ;;  %1156 = vst [vmem:[%s6448_s20 + $0x198] sm:$0xff] %v1155_v51  ;;  %v1161_v54 = vld [vmem:[%s6443_s19 + $0x330] sm:$0xff] }
  0x53   : > { %1158 = vst [vmem:[%s6448_s20 + $0x1a0] sm:$0xff] %v1157_v52  ;;  %1160 = vst [vmem:[%s6448_s20 + $0x1a8] sm:$0xff] %v1159_v53  ;;  %v1163_v55 = vld [vmem:[%s6443_s19 + $0x338] sm:$0xff]  ;;  %v1165_v56 = vld [vmem:[%s6443_s19 + $0x340] sm:$0xff] }
  0x54   : > { %1162 = vst [vmem:[%s6448_s20 + $0x1b0] sm:$0xff] %v1161_v54  ;;  %1164 = vst [vmem:[%s6448_s20 + $0x1b8] sm:$0xff] %v1163_v55  ;;  %v1167_v57 = vld [vmem:[%s6443_s19 + $0x348] sm:$0xff]  ;;  %v1169_v58 = vld [vmem:[%s6443_s19 + $0x350] sm:$0xff] }
  0x55   : > { %1166 = vst [vmem:[%s6448_s20 + $0x1c0] sm:$0xff] %v1165_v56  ;;  %v1171_v59 = vld [vmem:[%s6443_s19 + $0x358] sm:$0xff]  ;;  %1168 = vst [vmem:[%s6448_s20 + $0x1c8] sm:$0xff] %v1167_v57  ;;  %v1173_v60 = vld [vmem:[%s6443_s19 + $0x360] sm:$0xff] }
  0x56   : > { %1170 = vst [vmem:[%s6448_s20 + $0x1d0] sm:$0xff] %v1169_v58  ;;  %1172 = vst [vmem:[%s6448_s20 + $0x1d8] sm:$0xff] %v1171_v59  ;;  %v1175_v61 = vld [vmem:[%s6443_s19 + $0x368] sm:$0xff]  ;;  %v1177_v62 = vld [vmem:[%s6443_s19 + $0x370] sm:$0xff] }
  0x57   : > { %1174 = vst [vmem:[%s6448_s20 + $0x1e0] sm:$0xff] %v1173_v60  ;;  %1176 = vst [vmem:[%s6448_s20 + $0x1e8] sm:$0xff] %v1175_v61  ;;  %v1179_v63 = vld [vmem:[%s6443_s19 + $0x378] sm:$0xff]  ;;  %v1181_v0 = vld [vmem:[%s6443_s19 + $0x400] sm:$0xff] }
  0x58   : > { %1178 = vst [vmem:[%s6448_s20 + $0x1f0] sm:$0xff] %v1177_v62  ;;  %v1183_v1 = vld [vmem:[%s6443_s19 + $0x408] sm:$0xff]  ;;  %1180 = vst [vmem:[%s6448_s20 + $0x1f8] sm:$0xff] %v1179_v63  ;;  %v1185_v2 = vld [vmem:[%s6443_s19 + $0x410] sm:$0xff] }
  0x59   : > { %1182 = vst [vmem:[%s6448_s20 + $0x200] sm:$0xff] %v1181_v0  ;;  %1184 = vst [vmem:[%s6448_s20 + $0x208] sm:$0xff] %v1183_v1  ;;  %v1187_v3 = vld [vmem:[%s6443_s19 + $0x418] sm:$0xff]  ;;  %v1189_v4 = vld [vmem:[%s6443_s19 + $0x420] sm:$0xff] }
  0x5a   : > { %1186 = vst [vmem:[%s6448_s20 + $0x210] sm:$0xff] %v1185_v2  ;;  %1188 = vst [vmem:[%s6448_s20 + $0x218] sm:$0xff] %v1187_v3  ;;  %v1191_v5 = vld [vmem:[%s6443_s19 + $0x428] sm:$0xff]  ;;  %v1193_v6 = vld [vmem:[%s6443_s19 + $0x430] sm:$0xff] }
  0x5b   : > { %1190 = vst [vmem:[%s6448_s20 + $0x220] sm:$0xff] %v1189_v4  ;;  %v1195_v7 = vld [vmem:[%s6443_s19 + $0x438] sm:$0xff]  ;;  %1192 = vst [vmem:[%s6448_s20 + $0x228] sm:$0xff] %v1191_v5  ;;  %v1197_v8 = vld [vmem:[%s6443_s19 + $0x440] sm:$0xff] }
  0x5c   : > { %1194 = vst [vmem:[%s6448_s20 + $0x230] sm:$0xff] %v1193_v6  ;;  %1196 = vst [vmem:[%s6448_s20 + $0x238] sm:$0xff] %v1195_v7  ;;  %v1199_v9 = vld [vmem:[%s6443_s19 + $0x448] sm:$0xff]  ;;  %v1201_v10 = vld [vmem:[%s6443_s19 + $0x450] sm:$0xff] }
  0x5d   : > { %1198 = vst [vmem:[%s6448_s20 + $0x240] sm:$0xff] %v1197_v8  ;;  %1200 = vst [vmem:[%s6448_s20 + $0x248] sm:$0xff] %v1199_v9  ;;  %v1203_v11 = vld [vmem:[%s6443_s19 + $0x458] sm:$0xff]  ;;  %v1205_v12 = vld [vmem:[%s6443_s19 + $0x460] sm:$0xff] }
  0x5e   : > { %1202 = vst [vmem:[%s6448_s20 + $0x250] sm:$0xff] %v1201_v10  ;;  %v1207_v13 = vld [vmem:[%s6443_s19 + $0x468] sm:$0xff]  ;;  %1204 = vst [vmem:[%s6448_s20 + $0x258] sm:$0xff] %v1203_v11  ;;  %v1209_v14 = vld [vmem:[%s6443_s19 + $0x470] sm:$0xff] }
  0x5f   : > { %1206 = vst [vmem:[%s6448_s20 + $0x260] sm:$0xff] %v1205_v12  ;;  %1208 = vst [vmem:[%s6448_s20 + $0x268] sm:$0xff] %v1207_v13  ;;  %v1211_v15 = vld [vmem:[%s6443_s19 + $0x478] sm:$0xff]  ;;  %v1213_v16 = vld [vmem:[%s6443_s19 + $0x500] sm:$0xff] }
  0x60   : > { %1210 = vst [vmem:[%s6448_s20 + $0x270] sm:$0xff] %v1209_v14  ;;  %1212 = vst [vmem:[%s6448_s20 + $0x278] sm:$0xff] %v1211_v15  ;;  %v1215_v17 = vld [vmem:[%s6443_s19 + $0x508] sm:$0xff]  ;;  %v1217_v18 = vld [vmem:[%s6443_s19 + $0x510] sm:$0xff] }
  0x61   : > { %1214 = vst [vmem:[%s6448_s20 + $0x280] sm:$0xff] %v1213_v16  ;;  %v1219_v19 = vld [vmem:[%s6443_s19 + $0x518] sm:$0xff]  ;;  %1216 = vst [vmem:[%s6448_s20 + $0x288] sm:$0xff] %v1215_v17  ;;  %v1221_v20 = vld [vmem:[%s6443_s19 + $0x520] sm:$0xff] }
  0x62   : > { %1218 = vst [vmem:[%s6448_s20 + $0x290] sm:$0xff] %v1217_v18  ;;  %1220 = vst [vmem:[%s6448_s20 + $0x298] sm:$0xff] %v1219_v19  ;;  %v1223_v21 = vld [vmem:[%s6443_s19 + $0x528] sm:$0xff]  ;;  %v1225_v22 = vld [vmem:[%s6443_s19 + $0x530] sm:$0xff] }
  0x63   : > { %1222 = vst [vmem:[%s6448_s20 + $0x2a0] sm:$0xff] %v1221_v20  ;;  %1224 = vst [vmem:[%s6448_s20 + $0x2a8] sm:$0xff] %v1223_v21  ;;  %v1227_v23 = vld [vmem:[%s6443_s19 + $0x538] sm:$0xff]  ;;  %v1229_v24 = vld [vmem:[%s6443_s19 + $0x540] sm:$0xff] }
  0x64   : > { %1226 = vst [vmem:[%s6448_s20 + $0x2b0] sm:$0xff] %v1225_v22  ;;  %v1231_v25 = vld [vmem:[%s6443_s19 + $0x548] sm:$0xff]  ;;  %1228 = vst [vmem:[%s6448_s20 + $0x2b8] sm:$0xff] %v1227_v23  ;;  %v1233_v26 = vld [vmem:[%s6443_s19 + $0x550] sm:$0xff] }
  0x65   : > { %1230 = vst [vmem:[%s6448_s20 + $0x2c0] sm:$0xff] %v1229_v24  ;;  %1232 = vst [vmem:[%s6448_s20 + $0x2c8] sm:$0xff] %v1231_v25  ;;  %v1235_v27 = vld [vmem:[%s6443_s19 + $0x558] sm:$0xff]  ;;  %v1237_v28 = vld [vmem:[%s6443_s19 + $0x560] sm:$0xff] }
  0x66   : > { %1234 = vst [vmem:[%s6448_s20 + $0x2d0] sm:$0xff] %v1233_v26  ;;  %1236 = vst [vmem:[%s6448_s20 + $0x2d8] sm:$0xff] %v1235_v27  ;;  %v1239_v29 = vld [vmem:[%s6443_s19 + $0x568] sm:$0xff]  ;;  %v1241_v30 = vld [vmem:[%s6443_s19 + $0x570] sm:$0xff] }
  0x67   : > { %1238 = vst [vmem:[%s6448_s20 + $0x2e0] sm:$0xff] %v1237_v28  ;;  %v1243_v31 = vld [vmem:[%s6443_s19 + $0x578] sm:$0xff]  ;;  %1240 = vst [vmem:[%s6448_s20 + $0x2e8] sm:$0xff] %v1239_v29  ;;  %v1245_v32 = vld [vmem:[%s6443_s19 + $0x600] sm:$0xff] }
  0x68   : > { %1242 = vst [vmem:[%s6448_s20 + $0x2f0] sm:$0xff] %v1241_v30  ;;  %1244 = vst [vmem:[%s6448_s20 + $0x2f8] sm:$0xff] %v1243_v31  ;;  %v1247_v33 = vld [vmem:[%s6443_s19 + $0x608] sm:$0xff]  ;;  %v1249_v34 = vld [vmem:[%s6443_s19 + $0x610] sm:$0xff] }
  0x69   : > { %1246 = vst [vmem:[%s6448_s20 + $0x300] sm:$0xff] %v1245_v32  ;;  %1248 = vst [vmem:[%s6448_s20 + $0x308] sm:$0xff] %v1247_v33  ;;  %v1251_v35 = vld [vmem:[%s6443_s19 + $0x618] sm:$0xff]  ;;  %v1253_v36 = vld [vmem:[%s6443_s19 + $0x620] sm:$0xff] }
  0x6a   : > { %1250 = vst [vmem:[%s6448_s20 + $0x310] sm:$0xff] %v1249_v34  ;;  %v1255_v37 = vld [vmem:[%s6443_s19 + $0x628] sm:$0xff]  ;;  %1252 = vst [vmem:[%s6448_s20 + $0x318] sm:$0xff] %v1251_v35  ;;  %v1257_v38 = vld [vmem:[%s6443_s19 + $0x630] sm:$0xff] }
  0x6b   : > { %1254 = vst [vmem:[%s6448_s20 + $0x320] sm:$0xff] %v1253_v36  ;;  %1256 = vst [vmem:[%s6448_s20 + $0x328] sm:$0xff] %v1255_v37  ;;  %v1259_v39 = vld [vmem:[%s6443_s19 + $0x638] sm:$0xff]  ;;  %v1261_v40 = vld [vmem:[%s6443_s19 + $0x640] sm:$0xff] }
  0x6c   : > { %1258 = vst [vmem:[%s6448_s20 + $0x330] sm:$0xff] %v1257_v38  ;;  %1260 = vst [vmem:[%s6448_s20 + $0x338] sm:$0xff] %v1259_v39  ;;  %v1263_v41 = vld [vmem:[%s6443_s19 + $0x648] sm:$0xff]  ;;  %v1265_v42 = vld [vmem:[%s6443_s19 + $0x650] sm:$0xff] }
  0x6d   : > { %1262 = vst [vmem:[%s6448_s20 + $0x340] sm:$0xff] %v1261_v40  ;;  %v1267_v43 = vld [vmem:[%s6443_s19 + $0x658] sm:$0xff]  ;;  %1264 = vst [vmem:[%s6448_s20 + $0x348] sm:$0xff] %v1263_v41  ;;  %v1269_v44 = vld [vmem:[%s6443_s19 + $0x660] sm:$0xff] }
  0x6e   : > { %1266 = vst [vmem:[%s6448_s20 + $0x350] sm:$0xff] %v1265_v42  ;;  %1268 = vst [vmem:[%s6448_s20 + $0x358] sm:$0xff] %v1267_v43  ;;  %v1271_v45 = vld [vmem:[%s6443_s19 + $0x668] sm:$0xff]  ;;  %v1273_v46 = vld [vmem:[%s6443_s19 + $0x670] sm:$0xff] }
  0x6f   : > { %1270 = vst [vmem:[%s6448_s20 + $0x360] sm:$0xff] %v1269_v44  ;;  %1272 = vst [vmem:[%s6448_s20 + $0x368] sm:$0xff] %v1271_v45  ;;  %v1275_v47 = vld [vmem:[%s6443_s19 + $0x678] sm:$0xff]  ;;  %v1277_v48 = vld [vmem:[%s6443_s19 + $0x700] sm:$0xff] }
  0x70   : > { %1274 = vst [vmem:[%s6448_s20 + $0x370] sm:$0xff] %v1273_v46  ;;  %v1279_v49 = vld [vmem:[%s6443_s19 + $0x708] sm:$0xff]  ;;  %1276 = vst [vmem:[%s6448_s20 + $0x378] sm:$0xff] %v1275_v47  ;;  %v1281_v50 = vld [vmem:[%s6443_s19 + $0x710] sm:$0xff] }
  0x71   : > { %1278 = vst [vmem:[%s6448_s20 + $0x380] sm:$0xff] %v1277_v48  ;;  %1280 = vst [vmem:[%s6448_s20 + $0x388] sm:$0xff] %v1279_v49  ;;  %v1283_v51 = vld [vmem:[%s6443_s19 + $0x718] sm:$0xff]  ;;  %v1285_v52 = vld [vmem:[%s6443_s19 + $0x720] sm:$0xff] }
  0x72   : > { %1282 = vst [vmem:[%s6448_s20 + $0x390] sm:$0xff] %v1281_v50  ;;  %1284 = vst [vmem:[%s6448_s20 + $0x398] sm:$0xff] %v1283_v51  ;;  %v1287_v53 = vld [vmem:[%s6443_s19 + $0x728] sm:$0xff]  ;;  %v1289_v54 = vld [vmem:[%s6443_s19 + $0x730] sm:$0xff] }
  0x73   : > { %1286 = vst [vmem:[%s6448_s20 + $0x3a0] sm:$0xff] %v1285_v52  ;;  %v1291_v55 = vld [vmem:[%s6443_s19 + $0x738] sm:$0xff]  ;;  %1288 = vst [vmem:[%s6448_s20 + $0x3a8] sm:$0xff] %v1287_v53  ;;  %v1293_v56 = vld [vmem:[%s6443_s19 + $0x740] sm:$0xff] }
  0x74   : > { %1290 = vst [vmem:[%s6448_s20 + $0x3b0] sm:$0xff] %v1289_v54  ;;  %1292 = vst [vmem:[%s6448_s20 + $0x3b8] sm:$0xff] %v1291_v55  ;;  %v1295_v57 = vld [vmem:[%s6443_s19 + $0x748] sm:$0xff]  ;;  %v1297_v58 = vld [vmem:[%s6443_s19 + $0x750] sm:$0xff] }
  0x75   : > { %1294 = vst [vmem:[%s6448_s20 + $0x3c0] sm:$0xff] %v1293_v56  ;;  %1296 = vst [vmem:[%s6448_s20 + $0x3c8] sm:$0xff] %v1295_v57  ;;  %v1299_v59 = vld [vmem:[%s6443_s19 + $0x758] sm:$0xff]  ;;  %v1301_v60 = vld [vmem:[%s6443_s19 + $0x760] sm:$0xff] }
  0x76   : > { %1298 = vst [vmem:[%s6448_s20 + $0x3d0] sm:$0xff] %v1297_v58  ;;  %v1303_v61 = vld [vmem:[%s6443_s19 + $0x768] sm:$0xff]  ;;  %1300 = vst [vmem:[%s6448_s20 + $0x3d8] sm:$0xff] %v1299_v59  ;;  %v1305_v62 = vld [vmem:[%s6443_s19 + $0x770] sm:$0xff] }
  0x77   : > { %1302 = vst [vmem:[%s6448_s20 + $0x3e0] sm:$0xff] %v1301_v60  ;;  %1304 = vst [vmem:[%s6448_s20 + $0x3e8] sm:$0xff] %v1303_v61  ;;  %v1307_v63 = vld [vmem:[%s6443_s19 + $0x778] sm:$0xff] }
  0x78   : > { %1306 = vst [vmem:[%s6448_s20 + $0x3f0] sm:$0xff] %v1305_v62  ;;  %1308 = vst [vmem:[%s6448_s20 + $0x3f8] sm:$0xff] %v1307_v63 }
  0x79 PF: > { %p5170_p7 = scmp.ge.s32.totalorder %s6220_s23, 1  ;;  %p1313_p8 = scmp.lt.s32.totalorder %s6220_s23, 3 }
  0x7b   : > { %p1314_p9 = pnand %p5170_p7, %p1313_p8 }
  0x7d   : > { %1317 = sbr.rel (%p1314_p9) target bundleno = 846 (0x34e), region = 115 }
  0x84   : > { %v5913_v0 = vld [vmem:[%s8979_s4] sm:$0xff]   ;;  %v8982_v1 = vmov 0   ;;  %v5914_v2 = vld [vmem:[%s8979_s4 + $0x8] sm:$0xff]   ;;  %v5915_v3 = vld [vmem:[%s8979_s4 + $0x10] sm:$0xff]   ;;  %s1320_s10 = sand.u32 1, %s6212_s21   ;;  %s5320_s9 = sshll.u32 (%p6292_p5), %s5160_s24, 7 }
  0x85   : > { %3062 = vmatprep.subr.bf16.mxu0 %v8982_v1  ;;  %5856 = vmatprep.subr.bf16.mxu1 %v8982_v1  ;;  %v5916_v4 = vld [vmem:[%s8979_s4 + $0x18] sm:$0xff]   ;;  %s5171_s13 = sshll.u32 %s1320_s10, 9  ;;  %v5917_v5 = vld [vmem:[%s8979_s4 + $0x20] sm:$0xff]   ;;  %v5918_v6 = vld [vmem:[%s8979_s4 + $0x28] sm:$0xff]   ;;  %s8710_s30 = scalar_lea.vmem (%p6292_p5), %s8981_s6, %s5320_s9 }
  0x86   : > { %3063 = vmatpush1.bf16.msra.mxu0 %v5913_v0  ;;  %5872 = vmatpush1.bf16.msra.mxu1 %v5913_v0  ;;  %v6739_v7 = vld [vmem:[%s8977_s2] ss:$0 sm:$0xff]  ;;  %s6741_s20 = scalar_lea.vmem [#allocation3], %s5171_s13  ;;  %v5919_v32 = vld [vmem:[%s8979_s4 + $0x30] sm:$0xff]   ;;  %v5920_v50 = vld [vmem:[%s8979_s4 + $0x38] sm:$0xff]  }
  0x87   : > { %3064 = vmatprep.subr.bf16.mxu0 %v8982_v1  ;;  %5857 = vmatprep.subr.bf16.mxu1 %v8982_v1  ;;  %v5322_v8 = vld [vmem:[%s6741_s20] sm:$0xff]   ;;  %v5577_v18 = vld [vmem:[%s6741_s20 + $0x8] sm:$0xff]   ;;  %v5578_v46 = vld [vmem:[%s6741_s20 + $0x10] sm:$0xff]  }
  0x88   : > { %v5323_v9 = vunpack.c.l.bf16 %v5322_v8  ;;  %v5324_v10 = vunpack.c.h.bf16 %v5322_v8  ;;  %v5624_v11 = vld [vmem:[%s6741_s20 + $0x180] sm:$0xff]   ;;  %v5327_v21 = vunpack.c.l.bf16 %v5577_v18  ;;  %v5328_v22 = vunpack.c.h.bf16 %v5577_v18  ;;  %v5625_v23 = vld [vmem:[%s6741_s20 + $0x188] sm:$0xff]   ;;  %v5626_v63 = vld [vmem:[%s6741_s20 + $0x190] sm:$0xff]  }
  0x89   : > { %v5616_v12 = vld [vmem:[%s6741_s20 + $0x140] sm:$0xff]   ;;  %v5515_v14 = vunpack.c.l.bf16 %v5624_v11  ;;  %v5516_v15 = vunpack.c.h.bf16 %v5624_v11  ;;  %v5519_v36 = vunpack.c.l.bf16 %v5625_v23  ;;  %v5617_v41 = vld [vmem:[%s6741_s20 + $0x148] sm:$0xff]   ;;  %v5520_v49 = vunpack.c.h.bf16 %v5625_v23 }
  0x8a   : > { %3065 = vmatpush1.bf16.msra.mxu0 %v5914_v2  ;;  %5873 = vmatpush1.bf16.msra.mxu1 %v5914_v2  ;;  %v6749_v13 = vld [vmem:[%s8978_s3] ss:$0 sm:$0xff]  ;;  %v5483_v16 = vunpack.c.l.bf16 %v5616_v12  ;;  %v5484_v17 = vunpack.c.h.bf16 %v5616_v12  ;;  %v1420_v19 = vmul.f32 %v5323_v9, %v6739_v7  ;;  %v1421_v20 = vmul.f32 %v5324_v10, %v6739_v7  ;;  %v5618_v9 = vld [vmem:[%s6741_s20 + $0x150] sm:$0xff]   ;;  %v5922_v18 = vld [vmem:[%s8979_s4 + $0x48] sm:$0xff]  }
  0x8b   : > { %3066 = vmatprep.subr.bf16.mxu0 %v8982_v1  ;;  %5858 = vmatprep.subr.bf16.mxu1 %v8982_v1  ;;  %v2390_v24 = vmul.f32 %v5515_v14, %v6739_v7  ;;  %v2391_v25 = vmul.f32 %v5516_v15, %v6739_v7  ;;  %v1422_v30 = vmul.f32 %v5327_v21, %v6739_v7  ;;  %v5487_v53 = vunpack.c.l.bf16 %v5617_v41  ;;  %v5921_v0 = vld [vmem:[%s8979_s4 + $0x40] sm:$0xff]   ;;  %v6833_v14 = vld [vmem:[%s6741_s20 + $0x18] sm:$0xff]  }
  0x8c   : > { %v2228_v26 = vmul.f32 %v5483_v16, %v6739_v7  ;;  %v2229_v27 = vmul.f32 %v5484_v17, %v6739_v7  ;;  %v1442_v28 = vadd.f32 %v6749_v13, %v1420_v19  ;;  %v1443_v29 = vadd.f32 %v6749_v13, %v1421_v20 }
  0x8d   : > { %v1423_v31 = vmul.f32 %v5328_v22, %v6739_v7  ;;  %v2406_v33 = vadd.f32 %v6749_v13, %v2390_v24  ;;  %v2407_v34 = vadd.f32 %v6749_v13, %v2391_v25  ;;  %v1444_v40 = vadd.f32 %v6749_v13, %v1422_v30 }
  0x8e   : > { %3067 = vmatpush1.bf16.msra.mxu0 %v5915_v3  ;;  %5874 = vmatpush1.bf16.msra.mxu1 %v5915_v3  ;;  %v2244_v35 = vadd.f32 %v6749_v13, %v2228_v26  ;;  %v6773_v37 = vmul.f32 0.5, %v1442_v28  ;;  %v6775_v38 = vmul.f32 0.5, %v1443_v29  ;;  %v2245_v39 = vadd.f32 %v6749_v13, %v2229_v27 }
  0x8f   : > { %3068 = vmatprep.subr.bf16.mxu0 %v8982_v1  ;;  %5859 = vmatprep.subr.bf16.mxu1 %v8982_v1  ;;  %v6780_v42 = vmul.f32 0.5, %v2406_v33  ;;  %v6782_v43 = vmul.f32 0.5, %v2407_v34  ;;  %v1445_v45 = vadd.f32 %v6749_v13, %v1423_v31  ;;  %v6791_v48 = vmul.f32 0.5, %v1444_v40 }
  0x90   : > { %v6784_v44 = vmul.f32 0.5, %v2244_v35  ;;  %5937 = vtanh.f32 %v6773_v37  ;;  %v6789_v47 = vmul.f32 0.5, %v2245_v39  ;;  %v2392_v52 = vmul.f32 %v5519_v36, %v6739_v7  ;;  %v5923_v35 = vld [vmem:[%s8979_s4 + $0x50] sm:$0xff]  }
  0x91   : > { %5939 = vtanh.f32 %v6775_v38  ;;  %v6797_v51 = vmul.f32 0.5, %v1445_v45  ;;  %v2393_v54 = vmul.f32 %v5520_v49, %v6739_v7  ;;  %v5488_v55 = vunpack.c.h.bf16 %v5617_v41 }
  0x92   : > { %3069 = vmatpush1.bf16.msra.mxu0 %v5916_v4  ;;  %5875 = vmatpush1.bf16.msra.mxu1 %v5916_v4  ;;  %5941 = vtanh.f32 %v6780_v42  ;;  %v5331_v56 = vunpack.c.l.bf16 %v5578_v46  ;;  %v2408_v57 = vadd.f32 %v6749_v13, %v2392_v52  ;;  %v2230_v58 = vmul.f32 %v5487_v53, %v6739_v7 }
  0x93   : > { %3070 = vmatprep.subr.bf16.mxu0 %v8982_v1  ;;  %5860 = vmatprep.subr.bf16.mxu1 %v8982_v1  ;;  %5943 = vtanh.f32 %v6782_v43  ;;  %v5332_v59 = vunpack.c.h.bf16 %v5578_v46  ;;  %v2409_v60 = vadd.f32 %v6749_v13, %v2393_v54  ;;  %v2231_v61 = vmul.f32 %v5488_v55, %v6739_v7 }
  0x94   : > { %5945 = vtanh.f32 %v6784_v44  ;;  %v1424_v62 = vmul.f32 %v5331_v56, %v6739_v7  ;;  %v6816_v2 = vmul.f32 0.5, %v2408_v57  ;;  %v2246_v3 = vadd.f32 %v6749_v13, %v2230_v58 }
  0x95   : > { %5947 = vtanh.f32 %v6789_v47  ;;  %v1425_v4 = vmul.f32 %v5332_v59, %v6739_v7  ;;  %v5523_v12 = vunpack.c.l.bf16 %v5626_v63  ;;  %v5524_v17 = vunpack.c.h.bf16 %v5626_v63 }
  0x96   : > { %3071 = vmatpush1.bf16.msra.mxu0 %v5917_v5  ;;  %5876 = vmatpush1.bf16.msra.mxu1 %v5917_v5  ;;  %5949 = vtanh.f32 %v6791_v48  ;;  %v6823_v5 = vmul.f32 0.5, %v2409_v60  ;;  %v1446_v8 = vadd.f32 %v6749_v13, %v1424_v62  ;;  %v6829_v10 = vmul.f32 0.5, %v2246_v3 }
  0x97   : > { %3072 = vmatprep.subr.bf16.mxu0 %v8982_v1  ;;  %5861 = vmatprep.subr.bf16.mxu1 %v8982_v1  ;;  %5951 = vtanh.f32 %v6797_v51  ;;  %v1447_v11 = vadd.f32 %v6749_v13, %v1425_v4  ;;  %v2394_v20 = vmul.f32 %v5523_v12, %v6739_v7  ;;  %v5491_v21 = vunpack.c.l.bf16 %v5618_v9 }
  0x98   : > { %5953 = vtanh.f32 %v6816_v2  ;;  %v6838_v16 = vmul.f32 0.5, %v1446_v8  ;;  %v2395_v23 = vmul.f32 %v5524_v17, %v6739_v7  ;;  %v5492_v24 = vunpack.c.h.bf16 %v5618_v9 }
  0x99   : > { %5955 = vtanh.f32 %v6823_v5  ;;  %v6844_v19 = vmul.f32 0.5, %v1447_v11  ;;  %v5335_v25 = vunpack.c.l.bf16 %v6833_v14  ;;  %v2410_v28 = vadd.f32 %v6749_v13, %v2394_v20  ;;  %v5627_v11 = vld [vmem:[%s6741_s20 + $0x198] sm:$0xff]  }
  0x9a   : > { %3073 = vmatpush1.bf16.msra.mxu0 %v5918_v6  ;;  %5877 = vmatpush1.bf16.msra.mxu1 %v5918_v6  ;;  %v2247_v6 = vadd.f32 %v6749_v13, %v2231_v61  ;;  %v5938_v22 = vpop.eup %5937  ;;  %5957 = vtanh.f32 %v6829_v10  ;;  %v2232_v29 = vmul.f32 %v5491_v21, %v6739_v7  ;;  %v2233_v33 = vmul.f32 %v5492_v24, %v6739_v7 }
  0x9b   : > { %3074 = vmatprep.subr.bf16.mxu0 %v8982_v1  ;;  %5862 = vmatprep.subr.bf16.mxu1 %v8982_v1  ;;  %v5940_v26 = vpop.eup %5939  ;;  %v1490_v27 = vadd.f32 1.0, %v5938_v22  ;;  %v6863_v40 = vmul.f32 0.5, %v2410_v28  ;;  %v5336_v4 = vunpack.c.h.bf16 %v6833_v14  ;;  %v1426_v9 = vmul.f32 %v5335_v25, %v6739_v7 }
  0x9c   : > { %v6836_v15 = vmul.f32 0.5, %v2247_v6  ;;  %v5942_v30 = vpop.eup %5941  ;;  %v1491_v31 = vadd.f32 1.0, %v5940_v26  ;;  %v2249_v54 = vadd.f32 %v6749_v13, %v2233_v33 }
  0x9d   : > { %v5944_v34 = vpop.eup %5943  ;;  %v1506_v36 = vmul.f32 %v1490_v27, %v6773_v37  ;;  %v2454_v39 = vadd.f32 1.0, %v5942_v30  ;;  %v1427_v22 = vmul.f32 %v5336_v4, %v6739_v7  ;;  %v5527_v27 = vunpack.c.l.bf16 %v5627_v11 }
  0x9e   : > { %3075 = vmatpush1.bf16.msra.mxu0 %v5919_v32  ;;  %5878 = vmatpush1.bf16.msra.mxu1 %v5919_v32  ;;  %5959 = vtanh.f32 %v6836_v15  ;;  %v2411_v32 = vadd.f32 %v6749_v13, %v2395_v23  ;;  %v5946_v41 = vpop.eup %5945  ;;  %v1507_v45 = vmul.f32 %v1491_v31, %v6775_v38  ;;  %v2455_v46 = vadd.f32 1.0, %v5944_v34 }
  0x9f   : > { %3076 = vmatprep.subr.bf16.mxu0 %v8982_v1  ;;  %5863 = vmatprep.subr.bf16.mxu1 %v8982_v1  ;;  %5961 = vtanh.f32 %v6838_v16  ;;  %v5948_v52 = vpop.eup %5947  ;;  %v2470_v37 = vmul.f32 %v2454_v39, %v6780_v42  ;;  %v2292_v53 = vadd.f32 1.0, %v5946_v41  ;;  %v5924_v42 = vld [vmem:[%s8979_s4 + $0x58] sm:$0xff]   ;;  %v6884_v62 = vmul.f32 0.5, %v2249_v54 }
  0xa0   : > { %5963 = vtanh.f32 %v6844_v19  ;;  %v6868_v49 = vmul.f32 0.5, %v2411_v32  ;;  %v5950_v55 = vpop.eup %5949  ;;  %v6874_v56 = vpack.c.bf16 %v1507_v45, %v1506_v36  ;;  %v2471_v57 = vmul.f32 %v2455_v46, %v6782_v43  ;;  %v5619_v36 = vld [vmem:[%s6741_s20 + $0x158] sm:$0xff]  }
  0xa1   : > { %5965 = vtanh.f32 %v6863_v40  ;;  %v2293_v58 = vadd.f32 1.0, %v5948_v52  ;;  %v5952_v38 = vpop.eup %5951  ;;  %v2308_v59 = vmul.f32 %v2292_v53, %v6784_v44  ;;  %v1492_v60 = vadd.f32 1.0, %v5950_v55  ;;  %v5580_v53 = vld [vmem:[%s6741_s20 + $0x20] sm:$0xff]  }
  0xa2   : > { %3077 = vmatpush1.bf16.msra.mxu0 %v5920_v50  ;;  %5879 = vmatpush1.bf16.msra.mxu1 %v5920_v50  ;;  %v2248_v50 = vadd.f32 %v6749_v13, %v2232_v29  ;;  %5967 = vtanh.f32 %v6868_v49  ;;  %v5954_v63 = vpop.eup %5953  ;;  %v6888_v43 = vpack.c.bf16 %v2471_v57, %v2470_v37  ;;  %v1493_v3 = vadd.f32 1.0, %v5952_v38 }
  0xa3   : > { %3078 = vmatprep.subr.bf16.mxu0 %v8982_v1  ;;  %5864 = vmatprep.subr.bf16.mxu1 %v8982_v1  ;;  %v5956_v6 = vpop.eup %5955  ;;  %v1508_v44 = vmul.f32 %v1492_v60, %v6791_v48  ;;  %v2456_v8 = vadd.f32 1.0, %v5954_v63  ;;  %v5925_v48 = vld [vmem:[%s8979_s4 + $0x60] sm:$0xff]   ;;  %v1448_v23 = vadd.f32 %v6749_v13, %v1426_v9  ;;  %v1449_v30 = vadd.f32 %v6749_v13, %v1427_v22 }
  0xa4   : > { %v6882_v61 = vmul.f32 0.5, %v2248_v50  ;;  %3094 = vmatprep.mubr.bf16.mxu0 %v6874_v56  ;;  %v5958_v12 = vpop.eup %5957  ;;  %3478 = vmatprep.mubr.bf16.mxu1 %v6888_v43  ;;  %v2396_v45 = vmul.f32 %v5527_v27, %v6739_v7  ;;  %v5495_v55 = vunpack.c.l.bf16 %v5619_v36  ;;  %v5628_v9 = vld [vmem:[%s6741_s20 + $0x1a0] sm:$0xff]  }
  0xa5   : > { %v2472_v20 = vmul.f32 %v2456_v8, %v6816_v2  ;;  %v2294_v21 = vadd.f32 1.0, %v5958_v12  ;;  %v6915_v31 = vmul.f32 0.5, %v1448_v23  ;;  %v6925_v41 = vmul.f32 0.5, %v1449_v30 }
  0xa6   : > { %3079 = vmatpush1.bf16.msra.mxu0 %v5921_v0  ;;  %5880 = vmatpush1.bf16.msra.mxu1 %v5921_v0  ;;  %v2309_v0 = vmul.f32 %v2293_v58, %v6789_v47  ;;  %5969 = vtanh.f32 %v6882_v61  ;;  %v1509_v47 = vmul.f32 %v1493_v3, %v6797_v51  ;;  %v2412_v54 = vadd.f32 %v6749_v13, %v2396_v45 }
  0xa7   : > { %3080 = vmatprep.subr.bf16.mxu0 %v8982_v1  ;;  %5865 = vmatprep.subr.bf16.mxu1 %v8982_v1  ;;  %5971 = vtanh.f32 %v6884_v62  ;;  %v2310_v2 = vmul.f32 %v2294_v21, %v6829_v10  ;;  %v5339_v3 = vunpack.c.l.bf16 %v5580_v53  ;;  %v5340_v8 = vunpack.c.h.bf16 %v5580_v53 }
  0xa8   : > { %v6898_v17 = vpack.c.bf16 %v2309_v0, %v2308_v59  ;;  %v5960_v14 = vpop.eup %5959  ;;  %v6910_v51 = vpack.c.bf16 %v1509_v47, %v1508_v44  ;;  %5973 = vtanh.f32 %v6915_v31  ;;  %v6946_v63 = vmul.f32 0.5, %v2412_v54  ;;  %v5620_v47 = vld [vmem:[%s6741_s20 + $0x160] sm:$0xff]  }
  0xa9   : > { %v5962_v24 = vpop.eup %5961  ;;  %v2295_v26 = vadd.f32 1.0, %v5960_v14  ;;  %5975 = vtanh.f32 %v6925_v41  ;;  %v2234_v0 = vmul.f32 %v5495_v55, %v6739_v7  ;;  %v1429_v23 = vmul.f32 %v5340_v8, %v6739_v7 }
  0xaa   : > { %3081 = vmatpush1.bf16.msra.mxu0 %v5922_v18  ;;  %5881 = vmatpush1.bf16.msra.mxu1 %v5922_v18  ;;  %v2457_v18 = vadd.f32 1.0, %v5956_v6  ;;  %v5964_v28 = vpop.eup %5963  ;;  %v1494_v29 = vadd.f32 1.0, %v5962_v24  ;;  %5977 = vtanh.f32 %v6946_v63  ;;  %v5531_v24 = vunpack.c.l.bf16 %v5628_v9 }
  0xab   : > { %3082 = vmatprep.subr.bf16.mxu0 %v8982_v1  ;;  %5866 = vmatprep.subr.bf16.mxu1 %v8982_v1  ;;  %v2311_v33 = vmul.f32 %v2295_v26, %v6836_v15  ;;  %v1495_v34 = vadd.f32 1.0, %v5964_v28  ;;  %v5966_v39 = vpop.eup %5965  ;;  %v2250_v12 = vadd.f32 %v6749_v13, %v2234_v0  ;;  %v5532_v27 = vunpack.c.h.bf16 %v5628_v9  ;;  %v5621_v9 = vld [vmem:[%s6741_s20 + $0x168] sm:$0xff]  }
  0xac   : > { %v2473_v25 = vmul.f32 %v2457_v18, %v6823_v5  ;;  %v5926_v5 = vld [vmem:[%s8979_s4 + $0x68] sm:$0xff]   ;;  %v1510_v10 = vmul.f32 %v1494_v29, %v6838_v16  ;;  %v5968_v15 = vpop.eup %5967  ;;  %v2458_v52 = vadd.f32 1.0, %v5966_v39  ;;  %v5499_v28 = vunpack.c.l.bf16 %v5620_v47 }
  0xad   : > { %v6931_v46 = vpack.c.bf16 %v2311_v33, %v2310_v2  ;;  %v1511_v50 = vmul.f32 %v1495_v34, %v6844_v19  ;;  %v2459_v16 = vadd.f32 1.0, %v5968_v15  ;;  %v5927_v19 = vld [vmem:[%s8979_s4 + $0x70] sm:$0xff]   ;;  %v6968_v22 = vmul.f32 0.5, %v2250_v12  ;;  %v5581_v15 = vld [vmem:[%s6741_s20 + $0x28] sm:$0xff]  }
  0xae   : > { %3083 = vmatpush1.bf16.msra.mxu0 %v5923_v35  ;;  %5882 = vmatpush1.bf16.msra.mxu1 %v5923_v35  ;;  %v6917_v32 = vpack.c.bf16 %v2473_v25, %v2472_v20  ;;  %v5528_v35 = vunpack.c.h.bf16 %v5627_v11  ;;  %v2474_v58 = vmul.f32 %v2458_v52, %v6863_v40  ;;  %v5928_v20 = vld [vmem:[%s8979_s4 + $0x78] sm:$0xff]   ;;  %v1451_v29 = vadd.f32 %v6749_v13, %v1429_v23 }
  0xaf   : > { %3084 = vmatprep.subr.bf16.mxu0 %v8982_v1  ;;  %5867 = vmatprep.subr.bf16.mxu1 %v8982_v1  ;;  %v6938_v57 = vpack.c.bf16 %v1511_v50, %v1510_v10  ;;  %v2475_v60 = vmul.f32 %v2459_v16, %v6868_v49  ;;  %v2398_v30 = vmul.f32 %v5531_v24, %v6739_v7  ;;  %v5500_v10 = vunpack.c.h.bf16 %v5620_v47  ;;  %v5930_v50 = vld [vmem:[%s8979_s4 + $0x88] sm:$0xff]  }
  0xb0   : > { %v2397_v37 = vmul.f32 %v5528_v35, %v6739_v7  ;;  %v5970_v59 = vpop.eup %5969  ;;  %v2399_v35 = vmul.f32 %v5532_v27, %v6739_v7  ;;  %v6988_v39 = vmul.f32 0.5, %v1451_v29  ;;  %v2236_v45 = vmul.f32 %v5499_v28, %v6739_v7  ;;  %v5629_v16 = vld [vmem:[%s6741_s20 + $0x1a8] sm:$0xff]  }
  0xb1   : > { %v5972_v40 = vpop.eup %5971  ;;  %v2296_v4 = vadd.f32 1.0, %v5970_v59  ;;  %v6955_v11 = vpack.c.bf16 %v2475_v60, %v2474_v58  ;;  %v2237_v55 = vmul.f32 %v5500_v10, %v6739_v7  ;;  %v5344_v59 = vunpack.c.h.bf16 %v5581_v15 }
  0xb2   : > { %3085 = vmatpush1.bf16.msra.mxu0 %v5924_v42  ;;  %5883 = vmatpush1.bf16.msra.mxu1 %v5924_v42  ;;  %v2413_v38 = vadd.f32 %v6749_v13, %v2397_v37  ;;  %v5496_v42 = vunpack.c.h.bf16 %v5619_v36  ;;  %v2297_v49 = vadd.f32 1.0, %v5972_v40  ;;  %v2415_v53 = vadd.f32 %v6749_v13, %v2399_v35  ;;  %v5932_v35 = vld [vmem:[%s8979_s4 + $0x98] sm:$0xff]  }
  0xb3   : > { %3086 = vmatprep.subr.bf16.mxu0 %v8982_v1  ;;  %5868 = vmatprep.subr.bf16.mxu1 %v8982_v1  ;;  %v2312_v18 = vmul.f32 %v2296_v4, %v6882_v61  ;;  %v5929_v61 = vld [vmem:[%s8979_s4 + $0x80] sm:$0xff]   ;;  %v2252_v58 = vadd.f32 %v6749_v13, %v2236_v45  ;;  %v2253_v60 = vadd.f32 %v6749_v13, %v2237_v55 }
  0xb4   : > { %v6951_v6 = vmul.f32 0.5, %v2413_v38  ;;  %v2235_v44 = vmul.f32 %v5496_v42, %v6739_v7  ;;  %v2313_v21 = vmul.f32 %v2297_v49, %v6884_v62  ;;  %v5974_v62 = vpop.eup %5973  ;;  %v5343_v42 = vunpack.c.l.bf16 %v5581_v15  ;;  %v5582_v15 = vld [vmem:[%s6741_s20 + $0x30] sm:$0xff]  }
  0xb5   : > { %v1496_v33 = vadd.f32 1.0, %v5974_v62  ;;  %v5976_v36 = vpop.eup %5975  ;;  %v7013_v0 = vmul.f32 0.5, %v2252_v58  ;;  %v7024_v12 = vmul.f32 0.5, %v2253_v60  ;;  %v1431_v47 = vmul.f32 %v5344_v59, %v6739_v7 }
  0xb6   : > { %3087 = vmatpush1.bf16.msra.mxu0 %v5925_v48  ;;  %5884 = vmatpush1.bf16.msra.mxu1 %v5925_v48  ;;  %5979 = vtanh.f32 %v6951_v6  ;;  %v2251_v14 = vadd.f32 %v6749_v13, %v2235_v44  ;;  %v1428_v48 = vmul.f32 %v5339_v3, %v6739_v7  ;;  %v6979_v2 = vpack.c.bf16 %v2313_v21, %v2312_v18  ;;  %v5931_v44 = vld [vmem:[%s8979_s4 + $0x90] sm:$0xff]  }
  0xb7   : > { %3088 = vmatprep.subr.bf16.mxu0 %v8982_v1  ;;  %5869 = vmatprep.subr.bf16.mxu1 %v8982_v1  ;;  %5981 = vtanh.f32 %v6968_v22  ;;  %v1497_v52 = vadd.f32 1.0, %v5976_v36  ;;  %v1512_v37 = vmul.f32 %v1496_v33, %v6915_v31  ;;  %v7008_v31 = vmul.f32 0.5, %v2415_v53 }
  0xb8   : > { %v6976_v25 = vmul.f32 0.5, %v2251_v14  ;;  %v1450_v26 = vadd.f32 %v6749_v13, %v1428_v48  ;;  %v5535_v3 = vunpack.c.l.bf16 %v5629_v16  ;;  %v1430_v8 = vmul.f32 %v5343_v42, %v6739_v7 }
  0xb9   : > { %v1513_v38 = vmul.f32 %v1497_v52, %v6925_v41  ;;  %v5536_v48 = vunpack.c.h.bf16 %v5629_v16  ;;  %v1453_v24 = vadd.f32 %v6749_v13, %v1431_v47  ;;  %v5347_v59 = vunpack.c.l.bf16 %v5582_v15  ;;  %v5630_v47 = vld [vmem:[%s6741_s20 + $0x1b0] sm:$0xff]  }
  0xba   : > { %3089 = vmatpush1.bf16.msra.mxu0 %v5926_v5  ;;  %5885 = vmatpush1.bf16.msra.mxu1 %v5926_v5  ;;  %5983 = vtanh.f32 %v6976_v25  ;;  %v6985_v34 = vmul.f32 0.5, %v1450_v26  ;;  %v2414_v5 = vadd.f32 %v6749_v13, %v2398_v30  ;;  %v1452_v14 = vadd.f32 %v6749_v13, %v1430_v8 }
  0xbb   : > { %3090 = vmatprep.subr.bf16.mxu0 %v8982_v1  ;;  %5870 = vmatprep.subr.bf16.mxu1 %v8982_v1  ;;  %v7016_v41 = vpack.c.bf16 %v1513_v38, %v1512_v37  ;;  %v7040_v33 = vmul.f32 0.5, %v1453_v24 }
  0xbc   : > { %5985 = vtanh.f32 %v6985_v34  ;;  %v7001_v54 = vmul.f32 0.5, %v2414_v5  ;;  %v7034_v28 = vmul.f32 0.5, %v1452_v14 }
  0xbd   : > { %5987 = vtanh.f32 %v6988_v39 }
  0xbe   : > { %3091 = vmatpush1.bf16.msra.mxu0 %v5927_v19  ;;  %5886 = vmatpush1.bf16.msra.mxu1 %v5927_v19  ;;  %v5978_v19 = vpop.eup %5977  ;;  %5989 = vtanh.f32 %v7001_v54 }
  0xbf   : > { %3092 = vmatprep.subr.bf16.mxu0 %v8982_v1  ;;  %5871 = vmatprep.subr.bf16.mxu1 %v8982_v1  ;;  %v2460_v4 = vadd.f32 1.0, %v5978_v19  ;;  %5991 = vtanh.f32 %v7008_v31  ;;  %v5933_v19 = vld [vmem:[%s8979_s4 + $0xa0] sm:$0xff]  }
  0xc0   : > { %v5980_v40 = vpop.eup %5979  ;;  %5993 = vtanh.f32 %v7013_v0 }
  0xc1   : > { %v2461_v49 = vadd.f32 1.0, %v5980_v40  ;;  %v2476_v18 = vmul.f32 %v2460_v4, %v6946_v63  ;;  %v5982_v21 = vpop.eup %5981  ;;  %5995 = vtanh.f32 %v7024_v12  ;;  %v2401_v63 = vmul.f32 %v5536_v48, %v6739_v7 }
  0xc2   : > { %3093 = vmatpush1.bf16.msra.mxu0 %v5928_v20  ;;  %5887 = vmatpush1.bf16.msra.mxu1 %v5928_v20  ;;  %v2400_v20 = vmul.f32 %v5535_v3, %v6739_v7  ;;  %v2298_v27 = vadd.f32 1.0, %v5982_v21  ;;  %5997 = vtanh.f32 %v7034_v28 }
  0xc3   : > { %5712 = vmatprep.subr.bf16.mxu1 %v5929_v61  ;;  %v2477_v23 = vmul.f32 %v2461_v49, %v6951_v6  ;;  %v5504_v6 = vunpack.c.h.bf16 %v5621_v9  ;;  %v2417_v10 = vadd.f32 %v6749_v13, %v2401_v63  ;;  %5999 = vtanh.f32 %v7040_v33 }
  0xc4   : > { %v5984_v26 = vpop.eup %5983  ;;  %v2416_v62 = vadd.f32 %v6749_v13, %v2400_v20  ;;  %v2314_v5 = vmul.f32 %v2298_v27, %v6968_v22  ;;  %v1432_v49 = vmul.f32 %v5347_v59, %v6739_v7 }
  0xc5   : > { %3095 = vmatmul.mubr.bf16.vlgmr.msra.gmra.mrb[0].mxu0 %v8982_v1  ;;  %3479 = vmatmul.mubr.bf16.vlgmr.msra.gmra.mrb[0].mxu1 %v6898_v17  ;;  %v7038_v29 = vpack.c.bf16 %v2477_v23, %v2476_v18  ;;  %v2299_v30 = vadd.f32 1.0, %v5984_v26  ;;  %v7058_v16 = vmul.f32 0.5, %v2417_v10  ;;  %v2239_v55 = vmul.f32 %v5504_v6, %v6739_v7  ;;  %v5934_v26 = vld [vmem:[%s8979_s4 + $0xa8] sm:$0xff]  }
  0xc6   : > { %5713 = vmatpush3.bf16.msra.mxu1 %v5929_v61  ;;  %3102 = vmatprep.mubr.bf16.mxu0 %v6910_v51  ;;  %v5503_v61 = vunpack.c.l.bf16 %v5621_v9  ;;  %v5986_v36 = vpop.eup %5985  ;;  %v7050_v45 = vmul.f32 0.5, %v2416_v62  ;;  %v5348_v9 = vunpack.c.h.bf16 %v5582_v15  ;;  %v1454_v24 = vadd.f32 %v6749_v13, %v1432_v49 }
  0xc7   : > { %3486 = vmatprep.mubr.bf16.mxu1 %v6917_v32  ;;  %5714 = vmatprep.subr.bf16.mxu1 %v5930_v50  ;;  %v2315_v52 = vmul.f32 %v2299_v30, %v6976_v25  ;;  %v1498_v37 = vadd.f32 1.0, %v5986_v36  ;;  %v2255_v4 = vadd.f32 %v6749_v13, %v2239_v55  ;;  %v5540_v6 = vunpack.c.h.bf16 %v5630_v47 }
  0xc8   : > { %v2238_v53 = vmul.f32 %v5503_v61, %v6739_v7  ;;  %6001 = vtanh.f32 %v7050_v45  ;;  %v1433_v23 = vmul.f32 %v5348_v9, %v6739_v7  ;;  %v5622_v61 = vld [vmem:[%s6741_s20 + $0x170] sm:$0xff]   ;;  %v7098_v30 = vmul.f32 0.5, %v1454_v24 }
  0xc9   : > { %v7062_v38 = vpack.c.bf16 %v2315_v52, %v2314_v5  ;;  %v1514_v42 = vmul.f32 %v1498_v37, %v6985_v34  ;;  %6003 = vtanh.f32 %v7058_v16  ;;  %v5508_v10 = vunpack.c.h.bf16 %v5622_v61 }
  0xca   : > { %5715 = vmatpush3.bf16.msra.mxu1 %v5930_v50  ;;  %v5988_v50 = vpop.eup %5987  ;;  %v2254_v25 = vadd.f32 %v6749_v13, %v2238_v53  ;;  %v1455_v62 = vadd.f32 %v6749_v13, %v1433_v23  ;;  %v2403_v37 = vmul.f32 %v5540_v6, %v6739_v7  ;;  %v5935_v53 = vld [vmem:[%s8979_s4 + $0xb0] sm:$0xff]  }
  0xcb   : > { %5716 = vmatprep.subr.bf16.mxu1 %v5931_v44  ;;  %v1499_v22 = vadd.f32 1.0, %v5988_v50  ;;  %v5990_v58 = vpop.eup %5989 }
  0xcc   : > { %v5992_v60 = vpop.eup %5991  ;;  %v2462_v40 = vadd.f32 1.0, %v5990_v58  ;;  %v7072_v34 = vmul.f32 0.5, %v2254_v25  ;;  %v7102_v52 = vmul.f32 0.5, %v1455_v62  ;;  %v5583_v25 = vld [vmem:[%s6741_s20 + $0x38] sm:$0xff]  }
  0xcd   : > { %3103 = vmatmul.mubr.bf16.gmra.mrb[4].mxu0 %v8982_v1  ;;  %3487 = vmatmul.mubr.bf16.gmra.mrb[4].mxu1 %v6931_v46  ;;  %v1515_v3 = vmul.f32 %v1499_v22, %v6988_v39  ;;  %v2463_v8 = vadd.f32 1.0, %v5992_v60  ;;  %v7079_v39 = vmul.f32 0.5, %v2255_v4  ;;  %v2419_v60 = vadd.f32 %v6749_v13, %v2403_v37  ;;  %v5623_v62 = vld [vmem:[%s6741_s20 + $0x178] sm:$0xff]  }
  0xce   : > { %3110 = vmatprep.mubr.bf16.mxu0 %v6938_v57  ;;  %3494 = vmatprep.mubr.bf16.mxu1 %v6955_v11  ;;  %v2478_v14 = vmul.f32 %v2462_v40, %v7001_v54  ;;  %6005 = vtanh.f32 %v7072_v34  ;;  %v5352_v24 = vunpack.c.h.bf16 %v5583_v25 }
  0xcf   : > { %5717 = vmatpush3.bf16.msra.mxu1 %v5931_v44  ;;  %v5994_v44 = vpop.eup %5993  ;;  %v7076_v18 = vpack.c.bf16 %v1515_v3, %v1514_v42  ;;  %v2479_v21 = vmul.f32 %v2463_v8, %v7008_v31  ;;  %6007 = vtanh.f32 %v7079_v39  ;;  %v5539_v31 = vunpack.c.l.bf16 %v5630_v47 }
  0xd0   : > { %5718 = vmatprep.subr.bf16.mxu1 %v5932_v35  ;;  %v2300_v48 = vadd.f32 1.0, %v5994_v44  ;;  %v5996_v20 = vpop.eup %5995  ;;  %6009 = vtanh.f32 %v7098_v30  ;;  %v2241_v44 = vmul.f32 %v5508_v10, %v6739_v7  ;;  %v7123_v47 = vmul.f32 0.5, %v2419_v60 }
  0xd1   : > { %v2301_v54 = vadd.f32 1.0, %v5996_v20  ;;  %v7095_v63 = vpack.c.bf16 %v2479_v21, %v2478_v14  ;;  %v2402_v5 = vmul.f32 %v5539_v31, %v6739_v7  ;;  %6011 = vtanh.f32 %v7102_v52  ;;  %v5631_v14 = vld [vmem:[%s6741_s20 + $0x1b8] sm:$0xff]  }
  0xd2   : > { %v2316_v27 = vmul.f32 %v2300_v48, %v7013_v0  ;;  %v5507_v0 = vunpack.c.l.bf16 %v5622_v61  ;;  %v5936_v48 = vld [vmem:[%s8979_s4 + $0xb8] sm:$0xff]   ;;  %v5543_v31 = vunpack.c.l.bf16 %v5631_v14 }
  0xd3   : > { %5719 = vmatpush3.bf16.msra.mxu1 %v5932_v35  ;;  %v5998_v35 = vpop.eup %5997  ;;  %v2317_v36 = vmul.f32 %v2301_v54, %v7024_v12  ;;  %v2418_v58 = vadd.f32 %v6749_v13, %v2402_v5 }
  0xd4   : > { %5720 = vmatprep.subr.bf16.mxu1 %v5933_v19  ;;  %v6000_v15 = vpop.eup %5999  ;;  %v1500_v50 = vadd.f32 1.0, %v5998_v35  ;;  %v2240_v42 = vmul.f32 %v5507_v0, %v6739_v7  ;;  %v5544_v0 = vunpack.c.h.bf16 %v5631_v14  ;;  %v2404_v10 = vmul.f32 %v5543_v31, %v6739_v7 }
  0xd5   : > { %3111 = vmatmul.mubr.bf16.gmra.mrb[8].mxu0 %v8982_v1  ;;  %3495 = vmatmul.mubr.bf16.gmra.mrb[8].mxu1 %v6979_v2  ;;  %v6002_v12 = vpop.eup %6001  ;;  %v7109_v22 = vpack.c.bf16 %v2317_v36, %v2316_v27  ;;  %v1501_v55 = vadd.f32 1.0, %v6000_v15  ;;  %v7118_v4 = vmul.f32 0.5, %v2418_v58  ;;  %v1435_v36 = vmul.f32 %v5352_v24, %v6739_v7 }
  0xd6   : > { %3118 = vmatprep.mubr.bf16.mxu0 %v7016_v41  ;;  %3502 = vmatprep.mubr.bf16.mxu1 %v7038_v29  ;;  %v1516_v59 = vmul.f32 %v1500_v50, %v7034_v28  ;;  %v6004_v3 = vpop.eup %6003  ;;  %v2256_v8 = vadd.f32 %v6749_v13, %v2240_v42  ;;  %v5351_v28 = vunpack.c.l.bf16 %v5583_v25  ;;  %v2405_v58 = vmul.f32 %v5544_v0, %v6739_v7 }
  0xd7   : > { %5721 = vmatpush3.bf16.msra.mxu1 %v5933_v19  ;;  %v2464_v19 = vadd.f32 1.0, %v6002_v12  ;;  %v1517_v40 = vmul.f32 %v1501_v55, %v7040_v33  ;;  %v2465_v9 = vadd.f32 1.0, %v6004_v3  ;;  %6013 = vtanh.f32 %v7118_v4 }
  0xd8   : > { %5722 = vmatprep.subr.bf16.mxu1 %v5934_v26  ;;  %v7135_v20 = vmul.f32 0.5, %v2256_v8  ;;  %v6006_v21 = vpop.eup %6005  ;;  %6015 = vtanh.f32 %v7123_v47  ;;  %v1434_v61 = vmul.f32 %v5351_v28, %v6739_v7  ;;  %v1457_v37 = vadd.f32 %v6749_v13, %v1435_v36 }
  0xd9   : > { %v2480_v49 = vmul.f32 %v2464_v19, %v7050_v45  ;;  %v7131_v33 = vpack.c.bf16 %v1517_v40, %v1516_v59  ;;  %v2257_v45 = vadd.f32 %v6749_v13, %v2241_v44  ;;  %v2481_v23 = vmul.f32 %v2465_v9, %v7058_v16 }
  0xda   : > { %v2302_v54 = vadd.f32 1.0, %v6006_v21  ;;  %6017 = vtanh.f32 %v7135_v20  ;;  %v1456_v16 = vadd.f32 %v6749_v13, %v1434_v61  ;;  %v5511_v12 = vunpack.c.l.bf16 %v5623_v62 }
  0xdb   : > { %5723 = vmatpush3.bf16.msra.mxu1 %v5934_v26  ;;  %v6008_v26 = vpop.eup %6007  ;;  %v7142_v27 = vmul.f32 0.5, %v2257_v45  ;;  %v7146_v6 = vpack.c.bf16 %v2481_v23, %v2480_v49  ;;  %v2420_v42 = vadd.f32 %v6749_v13, %v2404_v10  ;;  %v5512_v25 = vunpack.c.h.bf16 %v5623_v62  ;;  %v7203_v10 = vld [vmem:[%s8978_s3] ss:$0 sm:$0xff] }
  0xdc   : > { %5724 = vmatprep.subr.bf16.mxu1 %v5935_v53  ;;  %v2303_v35 = vadd.f32 1.0, %v6008_v26  ;;  %v2318_v5 = vmul.f32 %v2302_v54, %v7072_v34  ;;  %v6010_v15 = vpop.eup %6009  ;;  %v5584_v34 = vld [vmem:[%s6741_s20 + $0x40] sm:$0xff]   ;;  %v7162_v60 = vmul.f32 0.5, %v1457_v37  ;;  %v2421_v44 = vadd.f32 %v6749_v13, %v2405_v58 }
  0xdd   : > { %3119 = vmatmul.mubr.bf16.gmra.mrb[12].mxu0 %v8982_v1  ;;  %3503 = vmatmul.mubr.bf16.gmra.mrb[12].mxu1 %v7062_v38  ;;  %6019 = vtanh.f32 %v7142_v27  ;;  %v1502_v55 = vadd.f32 1.0, %v6010_v15  ;;  %v6012_v59 = vpop.eup %6011  ;;  %v7170_v8 = vmul.f32 0.5, %v2420_v42  ;;  %v2243_v9 = vmul.f32 %v5512_v25, %v6739_v7  ;;  %v5632_v54 = vld [vmem:[%s6741_s20 + $0x1c0] sm:$0xff]   ;;  %v5633_v42 = vld [vmem:[%s6741_s20 + $0x1c8] sm:$0xff]  }
  0xde   : > { %3126 = vmatprep.mubr.bf16.mxu0 %v7076_v18  ;;  %3510 = vmatprep.mubr.bf16.mxu1 %v7095_v63  ;;  %v2319_v50 = vmul.f32 %v2303_v35, %v7079_v39  ;;  %v2242_v39 = vmul.f32 %v5511_v12, %v6739_v7  ;;  %v1503_v3 = vadd.f32 1.0, %v6012_v59  ;;  %v5355_v28 = vunpack.c.l.bf16 %v5584_v34  ;;  %v7187_v7 = vld [vmem:[%s8977_s2] ss:$0 sm:$0xff]  ;;  %v5585_v12 = vld [vmem:[%s6741_s20 + $0x48] sm:$0xff]  }
  0xdf   : > { %5725 = vmatpush3.bf16.msra.mxu1 %v5935_v53  ;;  %v7155_v53 = vmul.f32 0.5, %v1456_v16  ;;  %v1518_v40 = vmul.f32 %v1502_v55, %v7098_v30  ;;  %v7178_v30 = vmul.f32 0.5, %v2421_v44  ;;  %v5356_v45 = vunpack.c.h.bf16 %v5584_v34 }
  0xe0   : > { %5726 = vmatprep.subr.bf16.mxu1 %v5936_v48  ;;  %v7160_v19 = vpack.c.bf16 %v2319_v50, %v2318_v5  ;;  %v2258_v49 = vadd.f32 %v6749_v13, %v2242_v39  ;;  %v2259_v24 = vadd.f32 %v6749_v13, %v2243_v9  ;;  %v1580_v26 = vmul.f32 %v7187_v7, %v5355_v28 }
  0xe1   : > { %6021 = vtanh.f32 %v7155_v53  ;;  %v6014_v14 = vpop.eup %6013  ;;  %v1581_v35 = vmul.f32 %v7187_v7, %v5356_v45  ;;  %v5547_v37 = vunpack.c.l.bf16 %v5632_v54  ;;  %v5548_v58 = vunpack.c.h.bf16 %v5632_v54 }
  0xe2   : > { %6023 = vtanh.f32 %v7162_v60  ;;  %v6016_v21 = vpop.eup %6015  ;;  %v2466_v23 = vadd.f32 1.0, %v6014_v14  ;;  %v7182_v61 = vmul.f32 0.5, %v2258_v49  ;;  %v7196_v16 = vmul.f32 0.5, %v2259_v24 }
  0xe3   : > { %5727 = vmatpush3.bf16.msra.mxu1 %v5936_v48  ;;  %v1519_v48 = vmul.f32 %v1503_v3, %v7102_v52  ;;  %6025 = vtanh.f32 %v7170_v8  ;;  %v2467_v62 = vadd.f32 1.0, %v6016_v21  ;;  %v1596_v15 = vadd.f32 %v7203_v10, %v1580_v26 }
  0xe4   : > { %v6018_v52 = vpop.eup %6017  ;;  %6027 = vtanh.f32 %v7178_v30  ;;  %v2482_v13 = vmul.f32 %v2466_v23, %v7118_v4  ;;  %v1597_v50 = vadd.f32 %v7203_v10, %v1581_v35  ;;  %v2551_v59 = vmul.f32 %v7187_v7, %v5547_v37 }
  0xe5   : > { %3127 = vmatmul.mubr.bf16.gmra.mrb[16].mxu0 %v8982_v1  ;;  %3511 = vmatmul.mubr.bf16.gmra.mrb[16].mxu1 %v7109_v22  ;;  %v7191_v31 = vpack.c.bf16 %v1519_v48, %v1518_v40  ;;  %v2304_v36 = vadd.f32 1.0, %v6018_v52  ;;  %6029 = vtanh.f32 %v7182_v61  ;;  %v2483_v0 = vmul.f32 %v2467_v62, %v7123_v47 }
  0xe6   : > { %3134 = vmatprep.mubr.bf16.mxu0 %v7131_v33  ;;  %3518 = vmatprep.mubr.bf16.mxu1 %v7146_v6  ;;  %6031 = vtanh.f32 %v7196_v16  ;;  %v7215_v25 = vmul.f32 0.5, %v1596_v15  ;;  %v7217_v34 = vmul.f32 0.5, %v1597_v50  ;;  %v2552_v3 = vmul.f32 %v7187_v7, %v5548_v58 }
  0xe7   : > { %v6020_v5 = vpop.eup %6019  ;;  %v2320_v55 = vmul.f32 %v2304_v36, %v7135_v20  ;;  %v7213_v47 = vpack.c.bf16 %v2483_v0, %v2482_v13  ;;  %v5359_v40 = vunpack.c.l.bf16 %v5585_v12  ;;  %v5360_v44 = vunpack.c.h.bf16 %v5585_v12 }
  0xe8   : > { %v2305_v4 = vadd.f32 1.0, %v6020_v5  ;;  %6033 = vtanh.f32 %v7215_v25  ;;  %v2567_v49 = vadd.f32 %v7203_v10, %v2551_v59  ;;  %v5551_v28 = vunpack.c.l.bf16 %v5633_v42 }
  0xe9   : > { %8996 = vst [vmem:[#allocation6_spill] sm:$0xff] %v7213_v47  ;;  %6035 = vtanh.f32 %v7217_v34  ;;  %v2568_v45 = vadd.f32 %v7203_v10, %v2552_v3  ;;  %v1583_v54 = vmul.f32 %v7187_v7, %v5360_v44  ;;  %v5552_v13 = vunpack.c.h.bf16 %v5633_v42  ;;  %v5634_v3 = vld [vmem:[%s6741_s20 + $0x1d0] sm:$0xff]  }
  0xea   : > { %v2321_v20 = vmul.f32 %v2305_v4, %v7142_v27  ;;  %v1582_v27 = vmul.f32 %v7187_v7, %v5359_v40  ;;  %v7232_v26 = vmul.f32 0.5, %v2567_v49  ;;  %v2553_v15 = vmul.f32 %v7187_v7, %v5551_v28 }
  0xeb   : > { %v6022_v39 = vpop.eup %6021  ;;  %v7235_v62 = vmul.f32 0.5, %v2568_v45  ;;  %v1599_v0 = vadd.f32 %v7203_v10, %v1583_v54  ;;  %v2554_v42 = vmul.f32 %v7187_v7, %v5552_v13  ;;  %v5587_v13 = vld [vmem:[%s6741_s20 + $0x58] sm:$0xff]  }
  0xec   : > { %v1504_v9 = vadd.f32 1.0, %v6022_v39  ;;  %v6024_v14 = vpop.eup %6023  ;;  %v7226_v48 = vpack.c.bf16 %v2321_v20, %v2320_v55  ;;  %v1598_v35 = vadd.f32 %v7203_v10, %v1582_v27  ;;  %6037 = vtanh.f32 %v7232_v26 }
  0xed   : > { %3135 = vmatmul.mubr.bf16.gmra.mrb[20].mxu0 %v8982_v1  ;;  %3519 = vmatmul.mubr.bf16.gmra.mrb[20].mxu1 %v7160_v19  ;;  %v6026_v21 = vpop.eup %6025  ;;  %v1505_v23 = vadd.f32 1.0, %v6024_v14  ;;  %6039 = vtanh.f32 %v7235_v62  ;;  %v7251_v58 = vmul.f32 0.5, %v1599_v0 }
  0xee   : > { %3142 = vmatprep.mubr.bf16.mxu0 %v7191_v31  ;;  %3526 = vmatprep.mubr.bf16.mxu1 %v7213_v47  ;;  %v1520_v24 = vmul.f32 %v1504_v9, %v7155_v53  ;;  %v2468_v52 = vadd.f32 1.0, %v6026_v21  ;;  %v6028_v36 = vpop.eup %6027  ;;  %v5586_v53 = vld [vmem:[%s6741_s20 + $0x50] sm:$0xff]   ;;  %v7245_v4 = vmul.f32 0.5, %v1598_v35  ;;  %v2570_v9 = vadd.f32 %v7203_v10, %v2554_v42 }
  0xef   : > { %v1521_v5 = vmul.f32 %v1505_v23, %v7162_v60  ;;  %v6030_v50 = vpop.eup %6029  ;;  %v2469_v37 = vadd.f32 1.0, %v6028_v36  ;;  %v5363_v20 = vunpack.c.l.bf16 %v5586_v53  ;;  %v5555_v23 = vunpack.c.l.bf16 %v5634_v3 }
  0xf0   : > { %v2484_v12 = vmul.f32 %v2468_v52, %v7170_v8  ;;  %v2306_v55 = vadd.f32 1.0, %v6030_v50  ;;  %v6032_v59 = vpop.eup %6031  ;;  %6041 = vtanh.f32 %v7245_v4  ;;  %v2569_v8 = vadd.f32 %v7203_v10, %v2553_v15 }
  0xf1   : > { %v7249_v60 = vpack.c.bf16 %v1521_v5, %v1520_v24  ;;  %v2485_v39 = vmul.f32 %v2469_v37, %v7178_v30  ;;  %v2307_v40 = vadd.f32 1.0, %v6032_v59  ;;  %6043 = vtanh.f32 %v7251_v58 }
  0xf2   : > { %v2322_v44 = vmul.f32 %v2306_v55, %v7182_v61  ;;  %v7264_v28 = vmul.f32 0.5, %v2569_v8  ;;  %v5364_v30 = vunpack.c.h.bf16 %v5586_v53  ;;  %v1584_v14 = vmul.f32 %v7187_v7, %v5363_v20  ;;  %v6034_v45 = vpop.eup %6033 }
  0xf3   : > { %v7262_v49 = vpack.c.bf16 %v2485_v39, %v2484_v12  ;;  %v2323_v27 = vmul.f32 %v2307_v40, %v7196_v16  ;;  %v7268_v21 = vmul.f32 0.5, %v2570_v9  ;;  %v5556_v24 = vunpack.c.h.bf16 %v5634_v3  ;;  %v6036_v61 = vpop.eup %6035  ;;  %v5635_v9 = vld [vmem:[%s6741_s20 + $0x1d8] sm:$0xff]  }
  0xf4   : > { %v1644_v54 = vadd.f32 1.0, %v6034_v45  ;;  %6045 = vtanh.f32 %v7264_v28  ;;  %v1585_v52 = vmul.f32 %v7187_v7, %v5364_v30  ;;  %v1600_v35 = vadd.f32 %v7203_v10, %v1584_v14 }
  0xf5   : > { %3143 = vmatmul.mubr.bf16.gmra.mrb[24].mxu0 %v8982_v1  ;;  %3527 = vmatmul.mubr.bf16.gmra.mrb[24].mxu1 %v7226_v48  ;;  %8997 = vst [vmem:[#allocation7_spill] sm:$0xff] %v7262_v49  ;;  %v7275_v36 = vpack.c.bf16 %v2323_v27, %v2322_v44  ;;  %v1645_v5 = vadd.f32 1.0, %v6036_v61  ;;  %6047 = vtanh.f32 %v7268_v21  ;;  %v2555_v16 = vmul.f32 %v7187_v7, %v5555_v23 }
  0xf6   : > { %3150 = vmatprep.mubr.bf16.mxu0 %v7249_v60  ;;  %3534 = vmatprep.mubr.bf16.mxu1 %v7262_v49  ;;  %v1660_v0 = vmul.f32 %v1644_v54, %v7215_v25  ;;  %v1601_v15 = vadd.f32 %v7203_v10, %v1585_v52  ;;  %v7281_v53 = vmul.f32 0.5, %v1600_v35  ;;  %v2556_v50 = vmul.f32 %v7187_v7, %v5556_v24  ;;  %v6038_v37 = vpop.eup %6037  ;;  %v5588_v52 = vld [vmem:[%s6741_s20 + $0x60] sm:$0xff]  }
  0xf7   : > { %v1661_v12 = vmul.f32 %v1645_v5, %v7217_v34  ;;  %v2571_v55 = vadd.f32 %v7203_v10, %v2555_v16  ;;  %v5367_v42 = vunpack.c.l.bf16 %v5587_v13  ;;  %v5368_v59 = vunpack.c.h.bf16 %v5587_v13  ;;  %v6040_v39 = vpop.eup %6039 }
  0xf8   : > { %v2615_v25 = vadd.f32 1.0, %v6038_v37  ;;  %v7288_v8 = vmul.f32 0.5, %v1601_v15  ;;  %6049 = vtanh.f32 %v7281_v53  ;;  %v2572_v20 = vadd.f32 %v7203_v10, %v2556_v50 }
  0xf9   : > { %v7292_v3 = vpack.c.bf16 %v1661_v12, %v1660_v0  ;;  %v2616_v40 = vadd.f32 1.0, %v6040_v39  ;;  %v7294_v44 = vmul.f32 0.5, %v2571_v55  ;;  %v1586_v34 = vmul.f32 %v7187_v7, %v5367_v42 }
  0xfa   : > { %v6042_v30 = vpop.eup %6041  ;;  %v2631_v14 = vmul.f32 %v2615_v25, %v7232_v26  ;;  %6051 = vtanh.f32 %v7288_v8  ;;  %v7300_v45 = vmul.f32 0.5, %v2572_v20  ;;  %v1587_v27 = vmul.f32 %v7187_v7, %v5368_v59  ;;  %v5636_v25 = vld [vmem:[%s6741_s20 + $0x1e0] sm:$0xff]  }
  0xfb   : > { %v6044_v23 = vpop.eup %6043  ;;  %v2632_v24 = vmul.f32 %v2616_v40, %v7235_v62  ;;  %v1646_v61 = vadd.f32 1.0, %v6042_v30  ;;  %6053 = vtanh.f32 %v7294_v44  ;;  %v1602_v54 = vadd.f32 %v7203_v10, %v1586_v34 }
  0xfc   : > { %v1647_v35 = vadd.f32 1.0, %v6044_v23  ;;  %6055 = vtanh.f32 %v7300_v45  ;;  %v1603_v26 = vadd.f32 %v7203_v10, %v1587_v27  ;;  %v5559_v13 = vunpack.c.l.bf16 %v5635_v9 }
  0xfd   : > { %3151 = vmatmul.mubr.bf16.gmra.mrb[28].mxu0 %v8982_v1  ;;  %3535 = vmatmul.mubr.bf16.gmra.mrb[28].mxu1 %v7275_v36  ;;  %v7310_v5 = vpack.c.bf16 %v2632_v24, %v2631_v14  ;;  %v1662_v16 = vmul.f32 %v1646_v61, %v7245_v4  ;;  %v7313_v0 = vmul.f32 0.5, %v1602_v54  ;;  %v5560_v62 = vunpack.c.h.bf16 %v5635_v9 }
  0xfe   : > { %3158 = vmatprep.mubr.bf16.mxu0 %v7292_v3  ;;  %v6046_v15 = vpop.eup %6045  ;;  %v1663_v50 = vmul.f32 %v1647_v35, %v7251_v58  ;;  %v7316_v37 = vmul.f32 0.5, %v1603_v26  ;;  %v2557_v12 = vmul.f32 %v7187_v7, %v5559_v13  ;;  %v5371_v55 = vunpack.c.l.bf16 %v5588_v52 }
  0xff   : > { %8998 = vst [vmem:[#allocation8_spill] sm:$0xff] %v7310_v5  ;;  %v6048_v42 = vpop.eup %6047  ;;  %3542 = vmatprep.mubr.bf16.mxu1 %v7310_v5  ;;  %v2617_v59 = vadd.f32 1.0, %v6046_v15  ;;  %6057 = vtanh.f32 %v7313_v0  ;;  %v2558_v4 = vmul.f32 %v7187_v7, %v5560_v62  ;;  %v5372_v39 = vunpack.c.h.bf16 %v5588_v52  ;;  %v5589_v62 = vld [vmem:[%s6741_s20 + $0x68] sm:$0xff]  }
 0x100   : > { %v7325_v58 = vpack.c.bf16 %v1663_v50, %v1662_v16  ;;  %v2618_v20 = vadd.f32 1.0, %v6048_v42  ;;  %6059 = vtanh.f32 %v7316_v37  ;;  %v2573_v40 = vadd.f32 %v7203_v10, %v2557_v12 }
 0x101   : > { %v2633_v34 = vmul.f32 %v2617_v59, %v7264_v28  ;;  %v1588_v9 = vmul.f32 %v7187_v7, %v5371_v55  ;;  %v1589_v30 = vmul.f32 %v7187_v7, %v5372_v39  ;;  %v5563_v24 = vunpack.c.l.bf16 %v5636_v25 }
 0x102   : > { %v6050_v14 = vpop.eup %6049  ;;  %v2634_v27 = vmul.f32 %v2618_v20, %v7268_v21  ;;  %v7335_v23 = vmul.f32 0.5, %v2573_v40  ;;  %v5564_v61 = vunpack.c.h.bf16 %v5636_v25 }
 0x103   : > { %v1648_v54 = vadd.f32 1.0, %v6050_v14  ;;  %v1604_v28 = vadd.f32 %v7203_v10, %v1588_v9  ;;  %v1605_v35 = vadd.f32 %v7203_v10, %v1589_v30  ;;  %v2559_v16 = vmul.f32 %v7187_v7, %v5563_v24 }
 0x104   : > { %v6052_v26 = vpop.eup %6051  ;;  %v7341_v13 = vpack.c.bf16 %v2634_v27, %v2633_v34  ;;  %6061 = vtanh.f32 %v7335_v23  ;;  %v2560_v21 = vmul.f32 %v7187_v7, %v5564_v61  ;;  %v5637_v34 = vld [vmem:[%s6741_s20 + $0x1e8] sm:$0xff]   ;;  %v5376_v27 = vunpack.c.h.bf16 %v5589_v62 }
 0x105   : > { %3159 = vmatmul.mubr.bf16.gmra.mrb[32].mxu0 %v6874_v56  ;;  %3543 = vmatmul.mubr.bf16.gmra.mrb[32].mxu1 %v6888_v43  ;;  %v2574_v56 = vadd.f32 %v7203_v10, %v2558_v4  ;;  %v6054_v15 = vpop.eup %6053  ;;  %v1649_v50 = vadd.f32 1.0, %v6052_v26  ;;  %v1664_v12 = vmul.f32 %v1648_v54, %v7281_v53  ;;  %v7349_v55 = vmul.f32 0.5, %v1604_v28 }
 0x106   : > { %3166 = vmatprep.mubr.bf16.mxu0 %v7325_v58  ;;  %8999 = vst [vmem:[#allocation9_spill] sm:$0xff] %v7341_v13  ;;  %v6056_v42 = vpop.eup %6055  ;;  %3550 = vmatprep.mubr.bf16.mxu1 %v7341_v13  ;;  %v2619_v59 = vadd.f32 1.0, %v6054_v15  ;;  %v7352_v4 = vmul.f32 0.5, %v1605_v35  ;;  %v2575_v39 = vadd.f32 %v7203_v10, %v2559_v16  ;;  %v2576_v25 = vadd.f32 %v7203_v10, %v2560_v21  ;;  %v5590_v35 = vld [vmem:[%s6741_s20 + $0x70] sm:$0xff]  }
 0x107   : > { %v7337_v52 = vmul.f32 0.5, %v2574_v56  ;;  %v1665_v20 = vmul.f32 %v1649_v50, %v7288_v8  ;;  %v2620_v40 = vadd.f32 1.0, %v6056_v42  ;;  %v5375_v53 = vunpack.c.l.bf16 %v5589_v62 }
 0x108   : > { %v2635_v56 = vmul.f32 %v2619_v59, %v7294_v44  ;;  %v7363_v9 = vmul.f32 0.5, %v2575_v39  ;;  %v7365_v30 = vmul.f32 0.5, %v2576_v25  ;;  %v5567_v44 = vunpack.c.l.bf16 %v5637_v34 }
 0x109   : > { %6063 = vtanh.f32 %v7337_v52  ;;  %v6058_v14 = vpop.eup %6057  ;;  %v2636_v8 = vmul.f32 %v2620_v40, %v7300_v45  ;;  %v1590_v24 = vmul.f32 %v7187_v7, %v5375_v53  ;;  %v5568_v28 = vunpack.c.h.bf16 %v5637_v34  ;;  %v5638_v45 = vld [vmem:[%s6741_s20 + $0x1f0] sm:$0xff]  }
 0x10a   : > { %6065 = vtanh.f32 %v7349_v55  ;;  %v6060_v61 = vpop.eup %6059  ;;  %v1650_v54 = vadd.f32 1.0, %v6058_v14  ;;  %v1591_v21 = vmul.f32 %v7187_v7, %v5376_v27  ;;  %v2561_v50 = vmul.f32 %v7187_v7, %v5567_v44 }
 0x10b   : > { %6067 = vtanh.f32 %v7352_v4  ;;  %v7374_v26 = vpack.c.bf16 %v2636_v8, %v2635_v56  ;;  %v1651_v16 = vadd.f32 1.0, %v6060_v61  ;;  %v1606_v15 = vadd.f32 %v7203_v10, %v1590_v24 }
 0x10c   : > { %6069 = vtanh.f32 %v7363_v9  ;;  %v1666_v62 = vmul.f32 %v1650_v54, %v7313_v0  ;;  %v1607_v59 = vadd.f32 %v7203_v10, %v1591_v21  ;;  %v5379_v39 = vunpack.c.l.bf16 %v5590_v35 }
 0x10d   : > { %3167 = vmatmul.mubr.bf16.gmra.mrb[36].mxu0 %v6910_v51  ;;  %3551 = vmatmul.mubr.bf16.gmra.mrb[36].mxu1 %v6917_v32  ;;  %v7367_v51 = vpack.c.bf16 %v1665_v20, %v1664_v12  ;;  %9000 = vst [vmem:[#allocation10_spill] sm:$0xff] %v7374_v26  ;;  %6071 = vtanh.f32 %v7365_v30  ;;  %v2562_v12 = vmul.f32 %v7187_v7, %v5568_v28  ;;  %v5380_v25 = vunpack.c.h.bf16 %v5590_v35 }
 0x10e   : > { %3558 = vmatprep.mubr.bf16.mxu1 %v7374_v26  ;;  %v1667_v42 = vmul.f32 %v1651_v16, %v7316_v37  ;;  %v6062_v20 = vpop.eup %6061  ;;  %v7386_v40 = vmul.f32 0.5, %v1606_v15  ;;  %v2577_v53 = vadd.f32 %v7203_v10, %v2561_v50  ;;  %v5571_v34 = vunpack.c.l.bf16 %v5638_v45 }
 0x10f   : > { %3174 = vmatprep.mubr.bf16.mxu0 %v7367_v51  ;;  %v2578_v0 = vadd.f32 %v7203_v10, %v2562_v12  ;;  %v2621_v8 = vadd.f32 1.0, %v6062_v20  ;;  %v7393_v27 = vmul.f32 0.5, %v1607_v59  ;;  %v1592_v37 = vmul.f32 %v7187_v7, %v5379_v39 }
 0x110   : > { %v7391_v14 = vpack.c.bf16 %v1667_v42, %v1666_v62  ;;  %6073 = vtanh.f32 %v7386_v40  ;;  %v7398_v61 = vmul.f32 0.5, %v2577_v53  ;;  %v1593_v28 = vmul.f32 %v7187_v7, %v5380_v25 }
 0x111   : > { %v7400_v54 = vmul.f32 0.5, %v2578_v0  ;;  %6075 = vtanh.f32 %v7393_v27  ;;  %v1608_v35 = vadd.f32 %v7203_v10, %v1592_v37  ;;  %v5572_v15 = vunpack.c.h.bf16 %v5638_v45 }
 0x112   : > { %6077 = vtanh.f32 %v7398_v61  ;;  %v1609_v12 = vadd.f32 %v7203_v10, %v1593_v28 }
 0x113   : > { %v6064_v56 = vpop.eup %6063  ;;  %6079 = vtanh.f32 %v7400_v54  ;;  %v7411_v42 = vmul.f32 0.5, %v1608_v35  ;;  %v2564_v20 = vmul.f32 %v7187_v7, %v5572_v15 }
 0x114   : > { %v2622_v24 = vadd.f32 1.0, %v6064_v56  ;;  %v6066_v44 = vpop.eup %6065  ;;  %v7420_v56 = vmul.f32 0.5, %v1609_v12 }
 0x115   : > { %3175 = vmatmul.mubr.bf16.gmra.mrb[40].mxu0 %v6938_v57  ;;  %3559 = vmatmul.mubr.bf16.gmra.mrb[40].mxu1 %v6955_v11  ;;  %v2637_v57 = vmul.f32 %v2621_v8, %v7335_v23  ;;  %v6068_v16 = vpop.eup %6067  ;;  %v1652_v62 = vadd.f32 1.0, %v6066_v44  ;;  %v5591_v23 = vld [vmem:[%s6741_s20 + $0x78] sm:$0xff]   ;;  %6081 = vtanh.f32 %v7411_v42 }
 0x116   : > { %3182 = vmatprep.mubr.bf16.mxu0 %v7391_v14  ;;  %v2638_v21 = vmul.f32 %v2622_v24, %v7337_v52  ;;  %v1653_v50 = vadd.f32 1.0, %v6068_v16  ;;  %v6070_v59 = vpop.eup %6069  ;;  %v2563_v52 = vmul.f32 %v7187_v7, %v5571_v34  ;;  %v2580_v24 = vadd.f32 %v7203_v10, %v2564_v20  ;;  %v5639_v44 = vld [vmem:[%s6741_s20 + $0x1f8] sm:$0xff]   ;;  %v5592_v34 = vld [vmem:[%s6741_s20 + $0x80] sm:$0xff]  }
 0x117   : > { %v1668_v25 = vmul.f32 %v1652_v62, %v7349_v55  ;;  %v6072_v45 = vpop.eup %6071  ;;  %v2623_v0 = vadd.f32 1.0, %v6070_v59  ;;  %v5383_v55 = vunpack.c.l.bf16 %v5591_v23  ;;  %6083 = vtanh.f32 %v7420_v56 }
 0x118   : > { %v7414_v39 = vpack.c.bf16 %v2638_v21, %v2637_v57  ;;  %v1669_v53 = vmul.f32 %v1653_v50, %v7352_v4  ;;  %v2624_v8 = vadd.f32 1.0, %v6072_v45  ;;  %v2579_v37 = vadd.f32 %v7203_v10, %v2563_v52 }
 0x119   : > { %v2639_v4 = vmul.f32 %v2623_v0, %v7363_v9  ;;  %v5384_v28 = vunpack.c.h.bf16 %v5591_v23  ;;  %v7437_v21 = vmul.f32 0.5, %v2580_v24  ;;  %v1594_v62 = vmul.f32 %v7187_v7, %v5383_v55 }
 0x11a   : > { %9001 = vst [vmem:[#allocation11_spill] sm:$0xff] %v7414_v39  ;;  %3566 = vmatprep.mubr.bf16.mxu1 %v7414_v39  ;;  %v7429_v57 = vpack.c.bf16 %v1669_v53, %v1668_v25  ;;  %v2640_v35 = vmul.f32 %v2624_v8, %v7365_v30  ;;  %v7435_v16 = vmul.f32 0.5, %v2579_v37  ;;  %v5575_v15 = vunpack.c.l.bf16 %v5639_v44  ;;  %v6074_v12 = vpop.eup %6073 }
 0x11b   : > { %v5576_v50 = vunpack.c.h.bf16 %v5639_v44  ;;  %v5387_v9 = vunpack.c.l.bf16 %v5592_v34  ;;  %v1610_v30 = vadd.f32 %v7203_v10, %v1594_v62  ;;  %v5388_v23 = vunpack.c.h.bf16 %v5592_v34  ;;  %v6076_v25 = vpop.eup %6075 }
 0x11c   : > { %v7442_v59 = vpack.c.bf16 %v2640_v35, %v2639_v4  ;;  %6085 = vtanh.f32 %v7435_v16  ;;  %v1654_v52 = vadd.f32 1.0, %v6074_v12  ;;  %v2565_v45 = vmul.f32 %v7187_v7, %v5575_v15  ;;  %v6078_v53 = vpop.eup %6077  ;;  %v5593_v15 = vld [vmem:[%s6741_s20 + $0x88] sm:$0xff]  }
 0x11d   : > { %3183 = vmatmul.mubr.bf16.gmra.mrb[44].mxu0 %v7016_v41  ;;  %3567 = vmatmul.mubr.bf16.gmra.mrb[44].mxu1 %v7038_v29  ;;  %v1595_v41 = vmul.f32 %v7187_v7, %v5384_v28  ;;  %6087 = vtanh.f32 %v7437_v21  ;;  %v1655_v0 = vadd.f32 1.0, %v6076_v25  ;;  %v7450_v8 = vmul.f32 0.5, %v1610_v30  ;;  %v6080_v55 = vpop.eup %6079 }
 0x11e   : > { %3190 = vmatprep.mubr.bf16.mxu0 %v7429_v57  ;;  %9002 = vst [vmem:[#allocation12_spill] sm:$0xff] %v7442_v59  ;;  %3574 = vmatprep.mubr.bf16.mxu1 %v7442_v59  ;;  %v2566_v37 = vmul.f32 %v7187_v7, %v5576_v50  ;;  %v1742_v24 = vmul.f32 %v7187_v7, %v5387_v9  ;;  %v2625_v34 = vadd.f32 1.0, %v6078_v53  ;;  %v2626_v62 = vadd.f32 1.0, %v6080_v55  ;;  %v5594_v53 = vld [vmem:[%s6741_s20 + $0x90] sm:$0xff]  }
 0x11f   : > { %v1611_v20 = vadd.f32 %v7203_v10, %v1595_v41  ;;  %v1670_v44 = vmul.f32 %v1654_v52, %v7386_v40  ;;  %v2581_v28 = vadd.f32 %v7203_v10, %v2565_v45  ;;  %v1671_v35 = vmul.f32 %v1655_v0, %v7393_v27  ;;  %v6082_v12 = vpop.eup %6081  ;;  %v5595_v0 = vld [vmem:[%s6741_s20 + $0x98] sm:$0xff]  }
 0x120   : > { %6089 = vtanh.f32 %v7450_v8  ;;  %v2582_v41 = vadd.f32 %v7203_v10, %v2566_v37  ;;  %v2641_v40 = vmul.f32 %v2625_v34, %v7398_v61  ;;  %v1743_v9 = vmul.f32 %v7187_v7, %v5388_v23 }
 0x121   : > { %v7455_v4 = vmul.f32 0.5, %v1611_v20  ;;  %v7465_v50 = vmul.f32 0.5, %v2581_v28  ;;  %v7469_v27 = vpack.c.bf16 %v1671_v35, %v1670_v44  ;;  %v2642_v30 = vmul.f32 %v2626_v62, %v7400_v54  ;;  %v6084_v20 = vpop.eup %6083 }
 0x122   : > { %v1656_v25 = vadd.f32 1.0, %v6082_v12  ;;  %v7472_v52 = vmul.f32 0.5, %v2582_v41  ;;  %v1759_v61 = vadd.f32 %v7203_v10, %v1743_v9  ;;  %v5391_v45 = vunpack.c.l.bf16 %v5593_v15 }
 0x123   : > { %6091 = vtanh.f32 %v7455_v4  ;;  %v7480_v23 = vpack.c.bf16 %v2642_v30, %v2641_v40  ;;  %v1657_v37 = vadd.f32 1.0, %v6084_v20  ;;  %v5392_v34 = vunpack.c.h.bf16 %v5593_v15 }
 0x124   : > { %6093 = vtanh.f32 %v7465_v50  ;;  %v1672_v54 = vmul.f32 %v1656_v25, %v7411_v42  ;;  %v7486_v44 = vmul.f32 0.5, %v1759_v61  ;;  %v5395_v62 = vunpack.c.l.bf16 %v5594_v53 }
 0x125   : > { %3191 = vmatmul.mubr.bf16.gmra.mrb[48].mxu0 %v7076_v18  ;;  %3575 = vmatmul.mubr.bf16.gmra.mrb[48].mxu1 %v7095_v63  ;;  %v1758_v18 = vadd.f32 %v7203_v10, %v1742_v24  ;;  %9003 = vst [vmem:[#allocation13_spill] sm:$0xff] %v7480_v23  ;;  %6095 = vtanh.f32 %v7472_v52  ;;  %v1744_v24 = vmul.f32 %v7187_v7, %v5391_v45  ;;  %v5396_v41 = vunpack.c.h.bf16 %v5594_v53 }
 0x126   : > { %3198 = vmatprep.mubr.bf16.mxu0 %v7469_v27  ;;  %v6086_v28 = vpop.eup %6085  ;;  %3582 = vmatprep.mubr.bf16.mxu1 %v7480_v23  ;;  %v1673_v35 = vmul.f32 %v1657_v37, %v7420_v56  ;;  %v5399_v12 = vunpack.c.l.bf16 %v5595_v0  ;;  %v1745_v42 = vmul.f32 %v7187_v7, %v5392_v34  ;;  %v1746_v20 = vmul.f32 %v7187_v7, %v5395_v62 }
 0x127   : > { %v7484_v55 = vmul.f32 0.5, %v1758_v18  ;;  %v6088_v40 = vpop.eup %6087  ;;  %v2627_v9 = vadd.f32 1.0, %v6086_v28  ;;  %v1760_v30 = vadd.f32 %v7203_v10, %v1744_v24  ;;  %v1747_v45 = vmul.f32 %v7187_v7, %v5396_v41 }
 0x128   : > { %v7494_v25 = vpack.c.bf16 %v1673_v35, %v1672_v54  ;;  %v2628_v15 = vadd.f32 1.0, %v6088_v40  ;;  %v1761_v18 = vadd.f32 %v7203_v10, %v1745_v42  ;;  %v1762_v54 = vadd.f32 %v7203_v10, %v1746_v20 }
 0x129   : > { %6097 = vtanh.f32 %v7484_v55  ;;  %v2643_v56 = vmul.f32 %v2627_v9, %v7435_v16  ;;  %v7501_v61 = vmul.f32 0.5, %v1760_v30  ;;  %v5400_v34 = vunpack.c.h.bf16 %v5595_v0 }
 0x12a   : > { %6099 = vtanh.f32 %v7486_v44  ;;  %v6090_v53 = vpop.eup %6089  ;;  %v2644_v37 = vmul.f32 %v2628_v15, %v7437_v21  ;;  %v1777_v28 = vmul.f32 0.5, %v1761_v18  ;;  %v1763_v35 = vadd.f32 %v7203_v10, %v1747_v45 }
 0x12b   : > { %v1658_v24 = vadd.f32 1.0, %v6090_v53  ;;  %6101 = vtanh.f32 %v7501_v61  ;;  %v7513_v40 = vmul.f32 0.5, %v1762_v54  ;;  %v1749_v0 = vmul.f32 %v7187_v7, %v5400_v34 }
 0x12c   : > { %v7511_v62 = vpack.c.bf16 %v2644_v37, %v2643_v56  ;;  %6103 = vtanh.f32 %v1777_v28  ;;  %v7516_v42 = vmul.f32 0.5, %v1763_v35 }
 0x12d   : > { %3199 = vmatmul.mubr.bf16.gmra.mrb[52].mxu0 %v7131_v33  ;;  %3583 = vmatmul.mubr.bf16.gmra.mrb[52].mxu1 %v7146_v6  ;;  %v1748_v33 = vmul.f32 %v7187_v7, %v5399_v12  ;;  %v6092_v16 = vpop.eup %6091  ;;  %v1674_v21 = vmul.f32 %v1658_v24, %v7450_v8  ;;  %v5596_v12 = vld [vmem:[%s6741_s20 + $0xa0] sm:$0xff]   ;;  %6105 = vtanh.f32 %v7513_v40 }
 0x12e   : > { %3206 = vmatprep.mubr.bf16.mxu0 %v7494_v25  ;;  %9004 = vst [vmem:[#allocation14_spill] sm:$0xff] %v7511_v62  ;;  %v1659_v41 = vadd.f32 1.0, %v6092_v16  ;;  %v6094_v9 = vpop.eup %6093  ;;  %3590 = vmatprep.mubr.bf16.mxu1 %v7511_v62  ;;  %v5403_v8 = vunpack.c.l.bf16 %v5596_v12  ;;  %6107 = vtanh.f32 %v7516_v42  ;;  %v5404_v34 = vunpack.c.h.bf16 %v5596_v12  ;;  %v5597_v12 = vld [vmem:[%s6741_s20 + $0xa8] sm:$0xff]  }
 0x12f   : > { %v6096_v30 = vpop.eup %6095  ;;  %v2629_v20 = vadd.f32 1.0, %v6094_v9  ;;  %v1764_v18 = vadd.f32 %v7203_v10, %v1748_v33 }
 0x130   : > { %v1675_v15 = vmul.f32 %v1659_v41, %v7455_v4  ;;  %v2630_v56 = vadd.f32 1.0, %v6096_v30  ;;  %v1765_v4 = vadd.f32 %v7203_v10, %v1749_v0  ;;  %v1751_v0 = vmul.f32 %v7187_v7, %v5404_v34 }
 0x131   : > { %v2645_v53 = vmul.f32 %v2629_v20, %v7465_v50 }
 0x132   : > { %v7523_v45 = vpack.c.bf16 %v1675_v15, %v1674_v21  ;;  %v2646_v54 = vmul.f32 %v2630_v56, %v7472_v52  ;;  %v1750_v52 = vmul.f32 %v7187_v7, %v5403_v8  ;;  %v1781_v21 = vmul.f32 0.5, %v1765_v4 }
 0x133   : > { %v6098_v37 = vpop.eup %6097 }
 0x134   : > { %v6100_v16 = vpop.eup %6099  ;;  %v1806_v50 = vadd.f32 1.0, %v6098_v37  ;;  %v7533_v33 = vpack.c.bf16 %v2646_v54, %v2645_v53  ;;  %v5408_v53 = vunpack.c.h.bf16 %v5597_v12 }
 0x135   : > { %3207 = vmatmul.mubr.bf16.gmra.mrb[56].mxu0 %v7191_v31  ;;  %3591 = vmatmul.mubr.bf16.gmra.mrb[56].mxu1 %v7213_v47  ;;  %v1807_v24 = vadd.f32 1.0, %v6100_v16  ;;  %v7536_v31 = vmul.f32 0.5, %v1764_v18  ;;  %v6102_v41 = vpop.eup %6101  ;;  %v5407_v18 = vunpack.c.l.bf16 %v5597_v12 }
 0x136   : > { %3214 = vmatprep.mubr.bf16.mxu0 %v7523_v45  ;;  %9005 = vst [vmem:[#allocation15_spill] sm:$0xff] %v7533_v33  ;;  %v1822_v35 = vmul.f32 %v1806_v50, %v7484_v55  ;;  %3598 = vmatprep.mubr.bf16.mxu1 %v7533_v33  ;;  %v1808_v30 = vadd.f32 1.0, %v6102_v41  ;;  %v6104_v15 = vpop.eup %6103  ;;  %v1766_v55 = vadd.f32 %v7203_v10, %v1750_v52  ;;  %v5607_v33 = vld [vmem:[%s6741_s20 + $0xf8] sm:$0xff]  }
 0x137   : > { %v1823_v9 = vmul.f32 %v1807_v24, %v7486_v44  ;;  %v1809_v56 = vadd.f32 1.0, %v6104_v15  ;;  %6109 = vtanh.f32 %v7536_v31  ;;  %v1767_v44 = vadd.f32 %v7203_v10, %v1751_v0  ;;  %v6106_v8 = vpop.eup %6105  ;;  %v5598_v24 = vld [vmem:[%s6741_s20 + $0xb0] sm:$0xff]  }
 0x138   : > { %6111 = vtanh.f32 %v1781_v21  ;;  %v1824_v37 = vmul.f32 %v1808_v30, %v7501_v61  ;;  %v6108_v4 = vpop.eup %6107  ;;  %v1782_v34 = vmul.f32 0.5, %v1766_v55  ;;  %v1752_v16 = vmul.f32 %v7187_v7, %v5407_v18 }
 0x139   : > { %v7543_v20 = vpack.c.bf16 %v1823_v9, %v1822_v35  ;;  %v1825_v54 = vmul.f32 %v1809_v56, %v1777_v28  ;;  %v1783_v50 = vmul.f32 0.5, %v1767_v44  ;;  %v1810_v52 = vadd.f32 1.0, %v6106_v8 }
 0x13a   : > { %v1811_v41 = vadd.f32 1.0, %v6108_v4  ;;  %6113 = vtanh.f32 %v1782_v34  ;;  %v1768_v9 = vadd.f32 %v7203_v10, %v1752_v16  ;;  %v5411_v0 = vunpack.c.l.bf16 %v5598_v24 }
 0x13b   : > { %v7556_v35 = vpack.c.bf16 %v1825_v54, %v1824_v37  ;;  %6115 = vtanh.f32 %v1783_v50  ;;  %v5412_v28 = vunpack.c.h.bf16 %v5598_v24  ;;  %v1826_v30 = vmul.f32 %v1810_v52, %v7513_v40 }
 0x13c   : > { %v1827_v15 = vmul.f32 %v1811_v41, %v7516_v42  ;;  %v7566_v55 = vmul.f32 0.5, %v1768_v9 }
 0x13d   : > { %3215 = vmatmul.mubr.bf16.gmra.mrb[60].mxu0 %v7249_v60  ;;  %3599 = vmatmul.mubr.bf16.gmra.mrb[60].mxu1 %v7262_v49  ;;  %v1753_v60 = vmul.f32 %v7187_v7, %v5408_v53  ;;  %v1755_v44 = vmul.f32 %v7187_v7, %v5412_v28  ;;  %v5599_v53 = vld [vmem:[%s6741_s20 + $0xb8] sm:$0xff]  }
 0x13e   : > { %3222 = vmatprep.mubr.bf16.mxu0 %v7543_v20  ;;  %5728 = vmatprep.mubr.bf16.mxu1 %v7292_v3  ;;  %v7573_v8 = vpack.c.bf16 %v1827_v15, %v1826_v30  ;;  %6117 = vtanh.f32 %v7566_v55  ;;  %v5415_v42 = vunpack.c.l.bf16 %v5599_v53  ;;  %v5416_v16 = vunpack.c.h.bf16 %v5599_v53 }
 0x13f   : > { %v1769_v61 = vadd.f32 %v7203_v10, %v1753_v60  ;;  %v1771_v4 = vadd.f32 %v7203_v10, %v1755_v44 }
 0x140   : > { %v1757_v28 = vmul.f32 %v7187_v7, %v5416_v16 }
 0x141   : > { %v6110_v12 = vpop.eup %6109  ;;  %v7569_v18 = vmul.f32 0.5, %v1769_v61  ;;  %v7588_v61 = vmul.f32 0.5, %v1771_v4 }
 0x142   : > { %v6112_v56 = vpop.eup %6111  ;;  %v1812_v37 = vadd.f32 1.0, %v6110_v12 }
 0x143   : > { %v1813_v54 = vadd.f32 1.0, %v6112_v56  ;;  %6119 = vtanh.f32 %v7569_v18 }
 0x144   : > { %v6114_v60 = vpop.eup %6113  ;;  %v1828_v24 = vmul.f32 %v1812_v37, %v7536_v31 }
 0x145   : > { %3223 = vmatmul.mubr.bf16.gmra.mrb[64].mxu0 %v7292_v3  ;;  %5729 = vmatmul.mubr.bf16.vlgmr.msra.gmra.mrb[64].mxu1 %v7325_v58  ;;  %v1754_v3 = vmul.f32 %v7187_v7, %v5411_v0  ;;  %v1829_v52 = vmul.f32 %v1813_v54, %v1781_v21  ;;  %v6116_v41 = vpop.eup %6115  ;;  %v5600_v0 = vld [vmem:[%s6741_s20 + $0xc0] sm:$0xff]   ;;  %v1814_v30 = vadd.f32 1.0, %v6114_v60  ;;  %v5601_v54 = vld [vmem:[%s6741_s20 + $0xc8] sm:$0xff]  }
 0x146   : > { %3230 = vmatprep.mubr.bf16.mxu0 %v7556_v35  ;;  %5732 = vmatprep.mubr.bf16.mxu1 %v7367_v51  ;;  %v1815_v15 = vadd.f32 1.0, %v6116_v41  ;;  %v5419_v56 = vunpack.c.l.bf16 %v5600_v0  ;;  %v5420_v21 = vunpack.c.h.bf16 %v5600_v0  ;;  %v5423_v60 = vunpack.c.l.bf16 %v5601_v54 }
 0x147   : > { %v1770_v40 = vadd.f32 %v7203_v10, %v1754_v3  ;;  %v7591_v12 = vpack.c.bf16 %v1829_v52, %v1828_v24  ;;  %v1773_v3 = vadd.f32 %v7203_v10, %v1757_v28  ;;  %v1830_v53 = vmul.f32 %v1814_v30, %v1782_v34  ;;  %v5602_v24 = vld [vmem:[%s6741_s20 + $0xd0] sm:$0xff]  }
 0x148   : > { %v6118_v44 = vpop.eup %6117  ;;  %v1831_v37 = vmul.f32 %v1815_v15, %v1783_v50  ;;  %v5424_v50 = vunpack.c.h.bf16 %v5601_v54  ;;  %v5427_v28 = vunpack.c.l.bf16 %v5602_v24  ;;  %v5428_v15 = vunpack.c.h.bf16 %v5602_v24  ;;  %v7637_v54 = vld [vmem:[%s8978_s3] ss:$0 sm:$0xff] }
 0x149   : > { %v7584_v9 = vmul.f32 0.5, %v1770_v40  ;;  %v7606_v16 = vmul.f32 0.5, %v1773_v3  ;;  %v1816_v41 = vadd.f32 1.0, %v6118_v44 }
 0x14a   : > { %v7609_v52 = vpack.c.bf16 %v1831_v37, %v1830_v53 }
 0x14b   : > { %6121 = vtanh.f32 %v7584_v9 }
 0x14c   : > { %6123 = vtanh.f32 %v7588_v61 }
 0x14d   : > { %3231 = vmatmul.mubr.bf16.gmra.mrb[68].mxu0 %v7325_v58  ;;  %5733 = vmatmul.mubr.bf16.gmra.mrb[68].mxu1 %v7391_v14  ;;  %v1756_v58 = vmul.f32 %v7187_v7, %v5415_v42  ;;  %v6120_v40 = vpop.eup %6119  ;;  %v1904_v42 = vmul.f32 %v7187_v7, %v5419_v56 }
 0x14e   : > { %3238 = vmatprep.mubr.bf16.mxu0 %v7573_v8  ;;  %5736 = vmatprep.mubr.bf16.mxu1 %v7429_v57 }
 0x14f   : > { %v1772_v31 = vadd.f32 %v7203_v10, %v1756_v58  ;;  %v1817_v58 = vadd.f32 1.0, %v6120_v40  ;;  %v1920_v34 = vadd.f32 %v7203_v10, %v1904_v42  ;;  %v5604_v42 = vld [vmem:[%s6741_s20 + $0xe0] sm:$0xff]  }
 0x151   : > { %v7603_v4 = vmul.f32 0.5, %v1772_v31  ;;  %v5603_v31 = vld [vmem:[%s6741_s20 + $0xd8] sm:$0xff]   ;;  %v7628_v3 = vmul.f32 0.5, %v1920_v34 }
 0x152   : > { %v5431_v40 = vunpack.c.l.bf16 %v5603_v31 }
 0x153   : > { %6125 = vtanh.f32 %v7603_v4 }
 0x154   : > { %6127 = vtanh.f32 %v7606_v16 }
 0x155   : > { %3239 = vmatmul.mubr.bf16.gmra.mrb[72].mxu0 %v7367_v51  ;;  %5737 = vmatmul.mubr.bf16.gmra.mrb[72].mxu1 %v7469_v27  ;;  %v1905_v51 = vmul.f32 %v7187_v7, %v5420_v21  ;;  %v7619_v7 = vld [vmem:[%s8977_s2] ss:$0 sm:$0xff]  ;;  %v6122_v56 = vpop.eup %6121  ;;  %6129 = vtanh.f32 %v7628_v3 }
 0x156   : > { %3246 = vmatprep.mubr.bf16.mxu0 %v7591_v12  ;;  %5740 = vmatprep.mubr.bf16.mxu1 %v7494_v25  ;;  %v1906_v30 = vmul.f32 %v7619_v7, %v5423_v60  ;;  %v6124_v21 = vpop.eup %6123  ;;  %v1907_v44 = vmul.f32 %v7619_v7, %v5424_v50  ;;  %v1908_v37 = vmul.f32 %v7619_v7, %v5427_v28  ;;  %v1818_v60 = vadd.f32 1.0, %v6122_v56 }
 0x157   : > { %v1921_v0 = vadd.f32 %v7203_v10, %v1905_v51  ;;  %v1832_v10 = vmul.f32 %v1816_v41, %v7566_v55  ;;  %v1819_v24 = vadd.f32 1.0, %v6124_v21  ;;  %v5435_v50 = vunpack.c.l.bf16 %v5604_v42 }
 0x158   : > { %v1922_v55 = vadd.f32 %v7637_v54, %v1906_v30  ;;  %v1923_v41 = vadd.f32 %v7637_v54, %v1907_v44  ;;  %v1924_v34 = vadd.f32 %v7637_v54, %v1908_v37  ;;  %v1910_v30 = vmul.f32 %v7619_v7, %v5431_v40  ;;  %v5605_v44 = vld [vmem:[%s6741_s20 + $0xe8] sm:$0xff]   ;;  %v5606_v40 = vld [vmem:[%s6741_s20 + $0xf0] sm:$0xff]  }
 0x159   : > { %v7631_v53 = vmul.f32 0.5, %v1921_v0 }
 0x15a   : > { %v7649_v0 = vmul.f32 0.5, %v1922_v55  ;;  %v7662_v37 = vmul.f32 0.5, %v1924_v34  ;;  %v1912_v55 = vmul.f32 %v7619_v7, %v5435_v50  ;;  %v5440_v34 = vunpack.c.h.bf16 %v5605_v44 }
 0x15b   : > { %6131 = vtanh.f32 %v7631_v53 }
 0x15c   : > { %6133 = vtanh.f32 %v7649_v0  ;;  %v1928_v50 = vadd.f32 %v7637_v54, %v1912_v55 }
 0x15d   : > { %3247 = vmatmul.mubr.bf16.gmra.mrb[76].mxu0 %v7391_v14  ;;  %5741 = vmatmul.mubr.bf16.gmra.mrb[76].mxu1 %v7523_v45  ;;  %v1833_v14 = vmul.f32 %v1817_v58, %v7569_v18  ;;  %v1909_v18 = vmul.f32 %v7619_v7, %v5428_v15  ;;  %v5432_v58 = vunpack.c.h.bf16 %v5603_v31  ;;  %v5436_v15 = vunpack.c.h.bf16 %v5604_v42  ;;  %v6126_v56 = vpop.eup %6125 }
 0x15e   : > { %3254 = vmatprep.mubr.bf16.mxu0 %v7609_v52  ;;  %5744 = vmatprep.mubr.bf16.mxu1 %v7543_v20  ;;  %v6128_v31 = vpop.eup %6127 }
 0x15f   : > { %v7642_v51 = vpack.c.bf16 %v1833_v14, %v1832_v10  ;;  %v1925_v28 = vadd.f32 %v7637_v54, %v1909_v18  ;;  %v1834_v10 = vmul.f32 %v1818_v60, %v7584_v9  ;;  %v1835_v14 = vmul.f32 %v1819_v24, %v7588_v61  ;;  %v6130_v1 = vpop.eup %6129 }
 0x160   : > { %v1911_v21 = vmul.f32 %v7619_v7, %v5432_v58  ;;  %v1926_v9 = vadd.f32 %v7637_v54, %v1910_v30  ;;  %v1913_v61 = vmul.f32 %v7619_v7, %v5436_v15  ;;  %v1820_v60 = vadd.f32 1.0, %v6126_v56 }
 0x161   : > { %v7666_v18 = vmul.f32 0.5, %v1925_v28  ;;  %v7671_v42 = vpack.c.bf16 %v1835_v14, %v1834_v10  ;;  %v1821_v24 = vadd.f32 1.0, %v6128_v31  ;;  %v5443_v28 = vunpack.c.l.bf16 %v5606_v40 }
 0x162   : > { %v1927_v58 = vadd.f32 %v7637_v54, %v1911_v21  ;;  %v1929_v30 = vadd.f32 %v7637_v54, %v1913_v61  ;;  %v5444_v15 = vunpack.c.h.bf16 %v5606_v40  ;;  %v1836_v10 = vmul.f32 %v1820_v60, %v7603_v4 }
 0x163   : > { %v1837_v14 = vmul.f32 %v1821_v24, %v7606_v16  ;;  %v7684_v31 = vmul.f32 0.5, %v1926_v9  ;;  %v1968_v55 = vadd.f32 1.0, %v6130_v1  ;;  %v7691_v61 = vmul.f32 0.5, %v1928_v50 }
 0x164   : > { %v7688_v21 = vmul.f32 0.5, %v1927_v58  ;;  %v1916_v40 = vmul.f32 %v7619_v7, %v5443_v28  ;;  %v7695_v60 = vmul.f32 0.5, %v1929_v30  ;;  %v1917_v16 = vmul.f32 %v7619_v7, %v5444_v15 }
 0x165   : > { %3255 = vmatmul.mubr.bf16.gmra.mrb[80].mxu0 %v7429_v57  ;;  %5745 = vmatmul.mubr.bf16.gmra.mrb[80].mxu1 %v7556_v35  ;;  %v7658_v57 = vmul.f32 0.5, %v1923_v41  ;;  %v5439_v41 = vunpack.c.l.bf16 %v5605_v44  ;;  %v6132_v56 = vpop.eup %6131  ;;  %v1915_v44 = vmul.f32 %v7619_v7, %v5440_v34  ;;  %v7698_v9 = vpack.c.bf16 %v1837_v14, %v1836_v10 }
 0x166   : > { %3262 = vmatprep.mubr.bf16.mxu0 %v7642_v51  ;;  %5748 = vmatprep.mubr.bf16.mxu1 %v7573_v8  ;;  %v1969_v4 = vadd.f32 1.0, %v6132_v56  ;;  %v6134_v58 = vpop.eup %6133  ;;  %v5447_v34 = vunpack.c.l.bf16 %v5607_v33  ;;  %v1984_v50 = vmul.f32 %v1968_v55, %v7628_v3  ;;  %v1932_v28 = vadd.f32 %v7637_v54, %v1916_v40 }
 0x167   : > { %6135 = vtanh.f32 %v7658_v57  ;;  %v1931_v1 = vadd.f32 %v7637_v54, %v1915_v44  ;;  %v5448_v30 = vunpack.c.h.bf16 %v5607_v33  ;;  %v1933_v10 = vadd.f32 %v7637_v54, %v1917_v16  ;;  %v5609_v16 = vld [vmem:[%s6741_s20 + $0x108] sm:$0xff]  }
 0x168   : > { %6137 = vtanh.f32 %v7662_v37  ;;  %v1985_v56 = vmul.f32 %v1969_v4, %v7631_v53  ;;  %v1918_v53 = vmul.f32 %v7619_v7, %v5447_v34  ;;  %v1970_v55 = vadd.f32 1.0, %v6134_v58  ;;  %v5610_v34 = vld [vmem:[%s6741_s20 + $0x110] sm:$0xff]  }
 0x169   : > { %6139 = vtanh.f32 %v7666_v18  ;;  %v7720_v40 = vmul.f32 0.5, %v1932_v28  ;;  %v1919_v4 = vmul.f32 %v7619_v7, %v5448_v30  ;;  %v5455_v28 = vunpack.c.l.bf16 %v5609_v16 }
 0x16a   : > { %6141 = vtanh.f32 %v7684_v31  ;;  %v7724_v62 = vpack.c.bf16 %v1985_v56, %v1984_v50  ;;  %v1934_v58 = vadd.f32 %v7637_v54, %v1918_v53  ;;  %v1986_v50 = vmul.f32 %v1970_v55, %v7649_v0 }
 0x16b   : > { %6143 = vtanh.f32 %v7688_v21  ;;  %v5456_v56 = vunpack.c.h.bf16 %v5609_v16  ;;  %v2068_v16 = vmul.f32 %v7619_v7, %v5455_v28 }
 0x16c   : > { %6145 = vtanh.f32 %v7691_v61 }
 0x16d   : > { %3263 = vmatmul.mubr.bf16.gmra.mrb[84].mxu0 %v7469_v27  ;;  %5749 = vmatmul.mubr.bf16.gmra.mrb[84].mxu1 %v7591_v12  ;;  %v1914_v27 = vmul.f32 %v7619_v7, %v5439_v41  ;;  %v5608_v41 = vld [vmem:[%s6741_s20 + $0x100] sm:$0xff]   ;;  %6147 = vtanh.f32 %v7695_v60  ;;  %v2069_v13 = vmul.f32 %v7619_v7, %v5456_v56 }
 0x16e   : > { %3270 = vmatprep.mubr.bf16.mxu0 %v7671_v42  ;;  %5752 = vmatprep.mubr.bf16.mxu1 %v7609_v52  ;;  %v5451_v14 = vunpack.c.l.bf16 %v5608_v41  ;;  %v5452_v44 = vunpack.c.h.bf16 %v5608_v41 }
 0x16f   : > { %v1930_v24 = vadd.f32 %v7637_v54, %v1914_v27 }
 0x170   : > { %v2066_v41 = vmul.f32 %v7619_v7, %v5451_v14 }
 0x171   : > { %v6136_v15 = vpop.eup %6135  ;;  %v7714_v3 = vmul.f32 0.5, %v1930_v24  ;;  %v7726_v24 = vmul.f32 0.5, %v1933_v10 }
 0x172   : > { %v6138_v27 = vpop.eup %6137  ;;  %v1971_v23 = vadd.f32 1.0, %v6136_v15  ;;  %v1935_v15 = vadd.f32 %v7637_v54, %v1919_v4 }
 0x173   : > { %v6140_v33 = vpop.eup %6139  ;;  %v1972_v59 = vadd.f32 1.0, %v6138_v27  ;;  %6149 = vtanh.f32 %v7714_v3  ;;  %v2082_v27 = vadd.f32 %v7637_v54, %v2066_v41 }
 0x174   : > { %v1973_v39 = vadd.f32 1.0, %v6140_v33  ;;  %v6142_v30 = vpop.eup %6141  ;;  %v1987_v14 = vmul.f32 %v1971_v23, %v7658_v57  ;;  %v7747_v57 = vmul.f32 0.5, %v1934_v58  ;;  %v7750_v26 = vmul.f32 0.5, %v1935_v15 }
 0x175   : > { %3271 = vmatmul.mubr.bf16.gmra.mrb[88].mxu0 %v7494_v25  ;;  %5753 = vmatmul.mubr.bf16.gmra.mrb[88].mxu1 %v7642_v51  ;;  %v7717_v25 = vmul.f32 0.5, %v1931_v1  ;;  %v2067_v1 = vmul.f32 %v7619_v7, %v5452_v44  ;;  %v6144_v10 = vpop.eup %6143  ;;  %v5459_v44 = vunpack.c.l.bf16 %v5610_v34  ;;  %v1988_v0 = vmul.f32 %v1972_v59, %v7662_v37  ;;  %v5611_v59 = vld [vmem:[%s6741_s20 + $0x118] sm:$0xff]  }
 0x176   : > { %3278 = vmatprep.mubr.bf16.mxu0 %v7698_v9  ;;  %5756 = vmatprep.mubr.bf16.mxu1 %v7671_v42  ;;  %v6146_v33 = vpop.eup %6145  ;;  %v1989_v53 = vmul.f32 %v1973_v39, %v7666_v18  ;;  %v1974_v23 = vadd.f32 1.0, %v6142_v30  ;;  %v1975_v41 = vadd.f32 1.0, %v6144_v10  ;;  %v7754_v37 = vpack.c.bf16 %v1987_v14, %v1986_v50  ;;  %v5612_v10 = vld [vmem:[%s6741_s20 + $0x120] sm:$0xff]  }
 0x177   : > { %6151 = vtanh.f32 %v7717_v25  ;;  %v2083_v55 = vadd.f32 %v7637_v54, %v2067_v1  ;;  %v6148_v4 = vpop.eup %6147  ;;  %v1976_v39 = vadd.f32 1.0, %v6146_v33  ;;  %v7756_v18 = vmul.f32 0.5, %v2082_v27 }
 0x178   : > { %6153 = vtanh.f32 %v7720_v40  ;;  %v2070_v1 = vmul.f32 %v7619_v7, %v5459_v44  ;;  %v1977_v30 = vadd.f32 1.0, %v6148_v4  ;;  %v1990_v15 = vmul.f32 %v1974_v23, %v7684_v31 }
 0x179   : > { %6155 = vtanh.f32 %v7726_v24  ;;  %v7761_v58 = vmul.f32 0.5, %v2083_v55  ;;  %v2084_v50 = vadd.f32 %v7637_v54, %v2068_v16  ;;  %v5463_v56 = vunpack.c.l.bf16 %v5611_v59 }
 0x17a   : > { %6157 = vtanh.f32 %v7747_v57  ;;  %v1991_v27 = vmul.f32 %v1975_v41, %v7688_v21  ;;  %v2085_v44 = vadd.f32 %v7637_v54, %v2069_v13  ;;  %v5464_v33 = vunpack.c.h.bf16 %v5611_v59 }
 0x17b   : > { %6159 = vtanh.f32 %v7750_v26  ;;  %v2086_v31 = vadd.f32 %v7637_v54, %v2070_v1  ;;  %v5467_v55 = vunpack.c.l.bf16 %v5612_v10  ;;  %v1993_v21 = vmul.f32 %v1977_v30, %v7695_v60  ;;  %v5613_v60 = vld [vmem:[%s6741_s20 + $0x128] sm:$0xff]  }
 0x17c   : > { %6161 = vtanh.f32 %v7756_v18  ;;  %v7781_v23 = vmul.f32 0.5, %v2084_v50  ;;  %v2072_v16 = vmul.f32 %v7619_v7, %v5463_v56  ;;  %v7784_v59 = vmul.f32 0.5, %v2085_v44 }
 0x17d   : > { %3279 = vmatmul.mubr.bf16.gmra.mrb[92].mxu0 %v7523_v45  ;;  %5757 = vmatmul.mubr.bf16.gmra.mrb[92].mxu1 %v7698_v9  ;;  %v5460_v45 = vunpack.c.h.bf16 %v5610_v34  ;;  %v7759_v34 = vpack.c.bf16 %v1989_v53, %v1988_v0  ;;  %v6150_v14 = vpop.eup %6149  ;;  %v1992_v53 = vmul.f32 %v1976_v39, %v7691_v61  ;;  %6163 = vtanh.f32 %v7761_v58 }
 0x17e   : > { %3286 = vmatprep.mubr.bf16.mxu0 %v7724_v62  ;;  %5760 = vmatprep.mubr.bf16.mxu1 %v7724_v62  ;;  %v1978_v61 = vadd.f32 1.0, %v6150_v14  ;;  %v2073_v39 = vmul.f32 %v7619_v7, %v5464_v33  ;;  %v7788_v1 = vpack.c.bf16 %v1991_v27, %v1990_v15  ;;  %6165 = vtanh.f32 %v7781_v23 }
 0x17f   : > { %v2071_v28 = vmul.f32 %v7619_v7, %v5460_v45  ;;  %v7793_v5 = vpack.c.bf16 %v1993_v21, %v1992_v53  ;;  %v2088_v15 = vadd.f32 %v7637_v54, %v2072_v16  ;;  %v5471_v27 = vunpack.c.l.bf16 %v5613_v60 }
 0x180   : > { %v1994_v44 = vmul.f32 %v1978_v61, %v7714_v3  ;;  %6167 = vtanh.f32 %v7784_v59  ;;  %v2089_v53 = vadd.f32 %v7637_v54, %v2073_v39 }
 0x181   : > { %v6152_v0 = vpop.eup %6151  ;;  %v2087_v13 = vadd.f32 %v7637_v54, %v2071_v28  ;;  %v7790_v28 = vmul.f32 0.5, %v2086_v31  ;;  %v5472_v31 = vunpack.c.h.bf16 %v5613_v60  ;;  %v2076_v61 = vmul.f32 %v7619_v7, %v5471_v27 }
 0x182   : > { %v6154_v45 = vpop.eup %6153  ;;  %v1979_v41 = vadd.f32 1.0, %v6152_v0  ;;  %v5614_v0 = vld [vmem:[%s6741_s20 + $0x130] sm:$0xff]  }
 0x183   : > { %v6156_v4 = vpop.eup %6155  ;;  %v1980_v30 = vadd.f32 1.0, %v6154_v45  ;;  %v7795_v50 = vmul.f32 0.5, %v2087_v13  ;;  %6169 = vtanh.f32 %v7790_v28  ;;  %v5475_v21 = vunpack.c.l.bf16 %v5614_v0 }
 0x184   : > { %v1981_v14 = vadd.f32 1.0, %v6156_v4  ;;  %v1995_v33 = vmul.f32 %v1979_v41, %v7717_v25  ;;  %v7818_v41 = vmul.f32 0.5, %v2089_v53  ;;  %v2077_v39 = vmul.f32 %v7619_v7, %v5472_v31 }
 0x185   : > { %3287 = vmatmul.mubr.bf16.gmra.mrb[96].mxu0 %v7543_v20  ;;  %5761 = vmatmul.mubr.bf16.gmra.mrb[96].mxu1 %v7754_v37  ;;  %v5468_v20 = vunpack.c.h.bf16 %v5612_v10  ;;  %v2074_v10 = vmul.f32 %v7619_v7, %v5467_v55  ;;  %v6158_v55 = vpop.eup %6157  ;;  %v1996_v45 = vmul.f32 %v1980_v30, %v7720_v40  ;;  %6171 = vtanh.f32 %v7795_v50 }
 0x186   : > { %3294 = vmatprep.mubr.bf16.mxu0 %v7754_v37  ;;  %5764 = vmatprep.mubr.bf16.mxu1 %v7759_v34  ;;  %v6160_v13 = vpop.eup %6159  ;;  %v1997_v25 = vmul.f32 %v1981_v14, %v7726_v24  ;;  %v7815_v40 = vmul.f32 0.5, %v2088_v15  ;;  %v7821_v60 = vpack.c.bf16 %v1995_v33, %v1994_v44  ;;  %v1982_v24 = vadd.f32 1.0, %v6158_v55  ;;  %v5615_v14 = vld [vmem:[%s6741_s20 + $0x138] sm:$0xff]   ;;  %s8090_s20 = sshll.u32 %s1320_s10, 10 }
 0x187   : > { %v2075_v56 = vmul.f32 %v7619_v7, %v5468_v20  ;;  %v2090_v3 = vadd.f32 %v7637_v54, %v2074_v10  ;;  %v6162_v4 = vpop.eup %6161  ;;  %v2078_v10 = vmul.f32 %v7619_v7, %v5475_v21  ;;  %v2092_v44 = vadd.f32 %v7637_v54, %v2076_v61  ;;  %s8110_s21 = scalar_lea.vmem [#allocation4], %s8090_s20  ;;  %s8124_s10 = scalar_lea.vmem [#allocation5], %s8090_s20 }
 0x188   : > { %v6164_v16 = vpop.eup %6163  ;;  %v2130_v49 = vadd.f32 1.0, %v6162_v4  ;;  %6173 = vtanh.f32 %v7815_v40  ;;  %v2093_v33 = vadd.f32 %v7637_v54, %v2077_v39  ;;  %v5479_v31 = vunpack.c.l.bf16 %v5615_v14 }
 0x189   : > { %v2091_v20 = vadd.f32 %v7637_v54, %v2075_v56  ;;  %v7823_v30 = vmul.f32 0.5, %v2090_v3  ;;  %v7827_v56 = vpack.c.bf16 %v1997_v25, %v1996_v45  ;;  %v2131_v53 = vadd.f32 1.0, %v6164_v16  ;;  %v6166_v55 = vpop.eup %6165 }
 0x18a   : > { %6175 = vtanh.f32 %v7818_v41  ;;  %v2094_v45 = vadd.f32 %v7637_v54, %v2078_v10  ;;  %v5480_v3 = vunpack.c.h.bf16 %v5615_v14  ;;  %v6168_v21 = vpop.eup %6167  ;;  %v7848_v61 = vmul.f32 0.5, %v2092_v44 }
 0x18b   : > { %v7829_v15 = vmul.f32 0.5, %v2091_v20  ;;  %6177 = vtanh.f32 %v7823_v30  ;;  %v2147_v4 = vmul.f32 %v2131_v53, %v7761_v58  ;;  %v2132_v53 = vadd.f32 1.0, %v6166_v55 }
 0x18c   : > { %v2133_v44 = vadd.f32 1.0, %v6168_v21 }
 0x18d   : > { %3295 = vmatmul.mubr.bf16.gmra.mrb[100].mxu0 %v7556_v35  ;;  %5765 = vmatmul.mubr.bf16.gmra.mrb[100].mxu1 %v7788_v1  ;;  %v5476_v35 = vunpack.c.h.bf16 %v5614_v0  ;;  %v1983_v0 = vadd.f32 1.0, %v6160_v13  ;;  %v1998_v13 = vmul.f32 %v1982_v24, %v7747_v57  ;;  %6179 = vtanh.f32 %v7829_v15 }
 0x18e   : > { %3302 = vmatprep.mubr.bf16.mxu0 %v7759_v34  ;;  %5768 = vmatprep.mubr.bf16.mxu1 %v7793_v5  ;;  %v7854_v57 = vmul.f32 0.5, %v2093_v33  ;;  %6181 = vtanh.f32 %v7848_v61  ;;  %v2148_v21 = vmul.f32 %v2132_v53, %v7781_v23 }
 0x18f   : > { %v2079_v27 = vmul.f32 %v7619_v7, %v5476_v35  ;;  %v1999_v25 = vmul.f32 %v1983_v0, %v7750_v26  ;;  %v6170_v35 = vpop.eup %6169  ;;  %v2080_v26 = vmul.f32 %v7619_v7, %v5479_v31  ;;  %v7857_v0 = vmul.f32 0.5, %v2094_v45 }
 0x190   : > { %v6172_v16 = vpop.eup %6171  ;;  %v2134_v31 = vadd.f32 1.0, %v6170_v35  ;;  %6183 = vtanh.f32 %v7854_v57 }
 0x191   : > { %v2095_v20 = vadd.f32 %v7637_v54, %v2079_v27  ;;  %v2081_v27 = vmul.f32 %v7619_v7, %v5480_v3  ;;  %v7864_v58 = vpack.c.bf16 %v1999_v25, %v1998_v13  ;;  %v2096_v7 = vadd.f32 %v7637_v54, %v2080_v26 }
 0x192   : > { %v6174_v45 = vpop.eup %6173  ;;  %6185 = vtanh.f32 %v7857_v0  ;;  %v2149_v13 = vmul.f32 %v2133_v44, %v7784_v59 }
 0x193   : > { %v2097_v55 = vadd.f32 %v7637_v54, %v2081_v27 }
 0x194   : > { %v6176_v3 = vpop.eup %6175 }
 0x195   : > { %3303 = vmatmul.mubr.bf16.gmra.mrb[104].mxu0 %v7573_v8  ;;  %5769 = vmatmul.mubr.bf16.gmra.mrb[104].mxu1 %v7821_v60  ;;  %v2146_v8 = vmul.f32 %v2130_v49, %v7756_v18  ;;  %v6178_v25 = vpop.eup %6177  ;;  %v2137_v27 = vadd.f32 1.0, %v6176_v3 }
 0x196   : > { %3310 = vmatprep.mubr.bf16.mxu0 %v7788_v1  ;;  %5772 = vmatprep.mubr.bf16.mxu1 %v7827_v56 }
 0x197   : > { %v7868_v47 = vpack.c.bf16 %v2147_v4, %v2146_v8  ;;  %v6180_v35 = vpop.eup %6179  ;;  %v7888_v4 = vmul.f32 0.5, %v2096_v7 }
 0x198   : > { %v7850_v39 = vpop.f32.mrb[0].mxu0  ;;  %v7852_v10 = vpop.f32.mrb[0].mxu1 }
 0x199   : > { %9006 = vst [vmem:[#allocation16_spill] sm:$0xff] %v7850_v39  ;;  %9007 = vst [vmem:[#allocation17_spill] sm:$0xff] %v7852_v10  ;;  %v3098_v24 = vpop.f32.mrb[1].mxu0  ;;  %v3482_v14 = vpop.f32.mrb[1].mxu1  ;;  %v7866_v39 = vmul.f32 0.5, %v2095_v20 }
 0x19a   : > { %v7860_v49 = vpop.f32.mrb[2].mxu0  ;;  %v7862_v18 = vpop.f32.mrb[2].mxu1  ;;  %v2135_v24 = vadd.f32 1.0, %v6172_v16  ;;  %v7896_v14 = vpack.c.bf16 %v2149_v13, %v2148_v21 }
 0x19b   : > { %v3101_v33 = vpop.f32.mrb[3].mxu0  ;;  %v3485_v10 = vpop.f32.mrb[3].mxu1  ;;  %6187 = vtanh.f32 %v7866_v39 }
 0x19c   : > { %v2151_v20 = vmul.f32 %v2135_v24, %v7795_v50  ;;  %v7890_v10 = vmul.f32 0.5, %v2097_v55  ;;  %v2138_v33 = vadd.f32 1.0, %v6178_v25  ;;  %6189 = vtanh.f32 %v7888_v4  ;;  %v6182_v24 = vpop.eup %6181 }
 0x19d   : > { %3311 = vmatmul.mubr.bf16.gmra.mrb[108].mxu0 %v7591_v12  ;;  %5773 = vmatmul.mubr.bf16.gmra.mrb[108].mxu1 %v7864_v58  ;;  %v2150_v12 = vmul.f32 %v2134_v31, %v7790_v28  ;;  %v2136_v28 = vadd.f32 1.0, %v6174_v45  ;;  %v2139_v31 = vadd.f32 1.0, %v6180_v35  ;;  %v6184_v7 = vpop.eup %6183  ;;  %v2153_v55 = vmul.f32 %v2137_v27, %v7818_v41 }
 0x19e   : > { %3318 = vmatprep.mubr.bf16.mxu0 %v7793_v5  ;;  %5776 = vmatprep.mubr.bf16.mxu1 %v7868_v47  ;;  %6191 = vtanh.f32 %v7890_v10  ;;  %v6186_v3 = vpop.eup %6185  ;;  %v2154_v21 = vmul.f32 %v2138_v33, %v7823_v30  ;;  %v2140_v41 = vadd.f32 1.0, %v6182_v24 }
 0x19f   : > { %v7898_v44 = vpack.c.bf16 %v2151_v20, %v2150_v12  ;;  %v2152_v45 = vmul.f32 %v2136_v28, %v7815_v40  ;;  %v2155_v13 = vmul.f32 %v2139_v31, %v7829_v15  ;;  %v2141_v28 = vadd.f32 1.0, %v6184_v7 }
 0x1a0   : > { %v7884_v54 = vpop.f32.mrb[4].mxu0  ;;  %v7886_v8 = vpop.f32.mrb[4].mxu1  ;;  %v2142_v15 = vadd.f32 1.0, %v6186_v3  ;;  %v2156_v31 = vmul.f32 %v2140_v41, %v7848_v61 }
 0x1a1   : > { %v3106_v16 = vpop.f32.mrb[5].mxu0  ;;  %v3490_v23 = vpop.f32.mrb[5].mxu1  ;;  %v7918_v40 = vpack.c.bf16 %v2153_v55, %v2152_v45  ;;  %v7920_v30 = vpack.c.bf16 %v2155_v13, %v2154_v21  ;;  %v2157_v45 = vmul.f32 %v2141_v28, %v7854_v57 }
 0x1a2   : > { %v7892_v59 = vpop.f32.mrb[6].mxu0  ;;  %v7894_v26 = vpop.f32.mrb[6].mxu1  ;;  %v2158_v24 = vmul.f32 %v2142_v15, %v7857_v0 }
 0x1a3   : > { %v3109_v50 = vpop.f32.mrb[7].mxu0  ;;  %v3493_v53 = vpop.f32.mrb[7].mxu1  ;;  %v7938_v61 = vpack.c.bf16 %v2157_v45, %v2156_v31 }
 0x1a5   : > { %3319 = vmatmul.mubr.bf16.gmra.mrb[112].mxu0 %v7609_v52  ;;  %5777 = vmatmul.mubr.bf16.gmra.mrb[112].mxu1 %v7896_v14  ;;  %v6188_v25 = vpop.eup %6187 }
 0x1a6   : > { %3326 = vmatprep.mubr.bf16.mxu0 %v7821_v60  ;;  %5780 = vmatprep.mubr.bf16.mxu1 %v7898_v44  ;;  %v2143_v53 = vadd.f32 1.0, %v6188_v25  ;;  %v6190_v33 = vpop.eup %6189 }
 0x1a7   : > { %v2144_v57 = vadd.f32 1.0, %v6190_v33 }
 0x1a8   : > { %v7910_v52 = vpop.f32.mrb[8].mxu0  ;;  %v7912_v12 = vpop.f32.mrb[8].mxu1  ;;  %v2159_v7 = vmul.f32 %v2143_v53, %v7866_v39 }
 0x1a9   : > { %9008 = vst [vmem:[#allocation18_spill] sm:$0xff] %v7912_v12  ;;  %v3114_v20 = vpop.f32.mrb[9].mxu0  ;;  %v3498_v35 = vpop.f32.mrb[9].mxu1  ;;  %v2160_v39 = vmul.f32 %v2144_v57, %v7888_v4 }
 0x1aa   : > { %v7914_v16 = vpop.f32.mrb[10].mxu0  ;;  %v7916_v23 = vpop.f32.mrb[10].mxu1 }
 0x1ab   : > { %9009 = vst [vmem:[#allocation19_spill] sm:$0xff] %v7916_v23  ;;  %v3117_v27 = vpop.f32.mrb[11].mxu0  ;;  %v3501_v50 = vpop.f32.mrb[11].mxu1 }
 0x1ac   : > { %v6192_v55 = vpop.eup %6191  ;;  %v7940_v27 = vpack.c.bf16 %v2159_v7, %v2158_v24 }
 0x1ad   : > { %3327 = vmatmul.mubr.bf16.gmra.mrb[116].mxu0 %v7642_v51  ;;  %5781 = vmatmul.mubr.bf16.gmra.mrb[116].mxu1 %v7918_v40  ;;  %v2145_v35 = vadd.f32 1.0, %v6192_v55 }
 0x1ae   : > { %3334 = vmatprep.mubr.bf16.mxu0 %v7827_v56  ;;  %5784 = vmatprep.mubr.bf16.mxu1 %v7920_v30 }
 0x1af   : > { %v2161_v0 = vmul.f32 %v2145_v35, %v7890_v10 }
 0x1b0   : > { %v7930_v3 = vpop.f32.mrb[12].mxu0  ;;  %v7932_v21 = vpop.f32.mrb[12].mxu1 }
 0x1b1   : > { %9010 = vst [vmem:[#allocation20_spill] sm:$0xff] %v7932_v21  ;;  %v3122_v51 = vpop.f32.mrb[13].mxu0  ;;  %v3506_v13 = vpop.f32.mrb[13].mxu1 }
 0x1b2   : > { %v7934_v25 = vpop.f32.mrb[14].mxu0  ;;  %v7936_v20 = vpop.f32.mrb[14].mxu1 }
 0x1b3   : > { %9011 = vst [vmem:[#allocation21_spill] sm:$0xff] %v7936_v20  ;;  %v3125_v41 = vpop.f32.mrb[15].mxu0  ;;  %v3509_v28 = vpop.f32.mrb[15].mxu1 }
 0x1b5   : > { %3335 = vmatmul.mubr.bf16.gmra.mrb[120].mxu0 %v7671_v42  ;;  %5785 = vmatmul.mubr.bf16.gmra.mrb[120].mxu1 %v7938_v61  ;;  %v7956_v42 = vpack.c.bf16 %v2161_v0, %v2160_v39 }
 0x1b6   : > { %3342 = vmatprep.mubr.bf16.mxu0 %v7864_v58  ;;  %5788 = vmatprep.mubr.bf16.mxu1 %v7940_v27 }
 0x1b8   : > { %v7948_v50 = vpop.f32.mrb[16].mxu0  ;;  %v7950_v15 = vpop.f32.mrb[16].mxu1 }
 0x1b9   : > { %9012 = vst [vmem:[#allocation22_spill] sm:$0xff] %v7950_v15  ;;  %v3130_v53 = vpop.f32.mrb[17].mxu0  ;;  %v3514_v33 = vpop.f32.mrb[17].mxu1 }
 0x1ba   : > { %v7952_v31 = vpop.f32.mrb[18].mxu0  ;;  %v7954_v45 = vpop.f32.mrb[18].mxu1 }
 0x1bb   : > { %9013 = vst [vmem:[#allocation23_spill] sm:$0xff] %v7954_v45  ;;  %v3133_v55 = vpop.f32.mrb[19].mxu0  ;;  %v3517_v24 = vpop.f32.mrb[19].mxu1 }
 0x1bd   : > { %3343 = vmatmul.mubr.bf16.gmra.mrb[124].mxu0 %v7698_v9  ;;  %5789 = vmatmul.mubr.bf16.gmra.mrb[124].mxu1 %v7956_v42 }
 0x1be   : > { %3350 = vmatprep.mubr.bf16.mxu0 %v7868_v47  ;;  %5792 = vmatprep.mubr.bf16.mxu1 %v6898_v17 }
 0x1c0   : > { %v7962_v4 = vpop.f32.mrb[20].mxu0  ;;  %v7964_v10 = vpop.f32.mrb[20].mxu1 }
 0x1c1   : > { %9014 = vst [vmem:[#allocation24_spill] sm:$0xff] %v7964_v10  ;;  %v3138_v7 = vpop.f32.mrb[21].mxu0  ;;  %v3522_v51 = vpop.f32.mrb[21].mxu1 }
 0x1c2   : > { %v7966_v13 = vpop.f32.mrb[22].mxu0  ;;  %v7968_v57 = vpop.f32.mrb[22].mxu1 }
 0x1c3   : > { %9015 = vst [vmem:[#allocation25_spill] sm:$0xff] %v7968_v57  ;;  %v3141_v35 = vpop.f32.mrb[23].mxu0  ;;  %v3525_v41 = vpop.f32.mrb[23].mxu1  ;;  %v4155_v57 = vld [vmem:[%s8110_s21 + $0x18] sm:$0xff] }
 0x1c5   : > { %3351 = vmatmul.mubr.bf16.gmra.mrb[128].mxu0 %v7724_v62  ;;  %5793 = vmatmul.mubr.bf16.gmra.mrb[128].mxu1 %v6931_v46 }
 0x1c6   : > { %3358 = vmatprep.mubr.bf16.mxu0 %v7896_v14  ;;  %5796 = vmatprep.mubr.bf16.mxu1 %v6979_v2 }
 0x1c8   : > { %v7974_v9 = vpop.f32.mrb[24].mxu0  ;;  %v7976_v28 = vpop.f32.mrb[24].mxu1 }
 0x1c9   : > { %9016 = vst [vmem:[#allocation26_spill] sm:$0xff] %v7976_v28  ;;  %v3146_v39 = vpop.f32.mrb[25].mxu0  ;;  %v3530_v0 = vpop.f32.mrb[25].mxu1 }
 0x1ca   : > { %v7978_v53 = vpop.f32.mrb[26].mxu0  ;;  %v7980_v33 = vpop.f32.mrb[26].mxu1 }
 0x1cb   : > { %9017 = vst [vmem:[#allocation27_spill] sm:$0xff] %v7980_v33  ;;  %v3149_v55 = vpop.f32.mrb[27].mxu0  ;;  %v3533_v24 = vpop.f32.mrb[27].mxu1 }
 0x1cd   : > { %3359 = vmatmul.mubr.bf16.gmra.mrb[132].mxu0 %v7754_v37  ;;  %5797 = vmatmul.mubr.bf16.gmra.mrb[132].mxu1 %v7062_v38 }
 0x1ce   : > { %3366 = vmatprep.mubr.bf16.mxu0 %v7898_v44  ;;  %5800 = vmatprep.mubr.bf16.mxu1 %v7109_v22 }
 0x1d0   : > { %v7986_v62 = vpop.f32.mrb[28].mxu0  ;;  %v7988_v7 = vpop.f32.mrb[28].mxu1 }
 0x1d1   : > { %9018 = vst [vmem:[#allocation28_spill] sm:$0xff] %v7988_v7  ;;  %v3154_v51 = vpop.f32.mrb[29].mxu0  ;;  %v3538_v35 = vpop.f32.mrb[29].mxu1 }
 0x1d2   : > { %v7990_v41 = vpop.f32.mrb[30].mxu0  ;;  %v7992_v39 = vpop.f32.mrb[30].mxu1 }
 0x1d3   : > { %9019 = vst [vmem:[#allocation29_spill] sm:$0xff] %v7992_v39  ;;  %v3157_v0 = vpop.f32.mrb[31].mxu0  ;;  %v3541_v55 = vpop.f32.mrb[31].mxu1 }
 0x1d5   : > { %3367 = vmatmul.mubr.bf16.gmra.mrb[136].mxu0 %v7759_v34  ;;  %5801 = vmatmul.mubr.bf16.gmra.mrb[136].mxu1 %v7160_v19 }
 0x1d6   : > { %3374 = vmatprep.mubr.bf16.mxu0 %v7918_v40  ;;  %5804 = vmatprep.mubr.bf16.mxu1 %v7226_v48 }
 0x1d8   : > { %v7998_v37 = vpop.f32.mrb[32].mxu0  ;;  %v8000_v24 = vpop.f32.mrb[32].mxu1 }
 0x1d9   : > { %9020 = vst [vmem:[#allocation30_spill] sm:$0xff] %v8000_v24  ;;  %v3162_v51 = vpop.f32.mrb[33].mxu0  ;;  %v3546_v35 = vpop.f32.mrb[33].mxu1 }
 0x1da   : > { %v8002_v33 = vpop.f32.mrb[34].mxu0  ;;  %v8004_v28 = vpop.f32.mrb[34].mxu1 }
 0x1db   : > { %9021 = vst [vmem:[#allocation31_spill] sm:$0xff] %v8004_v28  ;;  %v3165_v0 = vpop.f32.mrb[35].mxu0  ;;  %v3549_v55 = vpop.f32.mrb[35].mxu1 }
 0x1dd   : > { %3375 = vmatmul.mubr.bf16.gmra.mrb[140].mxu0 %v7788_v1  ;;  %5805 = vmatmul.mubr.bf16.gmra.mrb[140].mxu1 %v7275_v36 }
 0x1de   : > { %3382 = vmatprep.mubr.bf16.mxu0 %v7920_v30  ;;  %5808 = vmatprep.mubr.bf16.mxu1 %v6888_v43 }
 0x1e0   : > { %v8010_v34 = vpop.f32.mrb[36].mxu0  ;;  %v8012_v39 = vpop.f32.mrb[36].mxu1 }
 0x1e1   : > { %9022 = vst [vmem:[#allocation32_spill] sm:$0xff] %v8012_v39  ;;  %v3170_v51 = vpop.f32.mrb[37].mxu0  ;;  %v3554_v35 = vpop.f32.mrb[37].mxu1 }
 0x1e2   : > { %v8014_v24 = vpop.f32.mrb[38].mxu0  ;;  %v8016_v7 = vpop.f32.mrb[38].mxu1 }
 0x1e3   : > { %9023 = vst [vmem:[#allocation33_spill] sm:$0xff] %v8016_v7  ;;  %v3173_v0 = vpop.f32.mrb[39].mxu0  ;;  %v3557_v55 = vpop.f32.mrb[39].mxu1 }
 0x1e5   : > { %3383 = vmatmul.mubr.bf16.gmra.mrb[144].mxu0 %v7793_v5  ;;  %5809 = vmatmul.mubr.bf16.gmra.mrb[144].mxu1 %v6917_v32 }
 0x1e6   : > { %3390 = vmatprep.mubr.bf16.mxu0 %v7938_v61  ;;  %5812 = vmatprep.mubr.bf16.mxu1 %v6955_v11 }
 0x1e8   : > { %v8022_v43 = vpop.f32.mrb[40].mxu0  ;;  %v8024_v1 = vpop.f32.mrb[40].mxu1 }
 0x1e9   : > { %9024 = vst [vmem:[#allocation34_spill] sm:$0xff] %v8024_v1  ;;  %v3178_v51 = vpop.f32.mrb[41].mxu0  ;;  %v3562_v35 = vpop.f32.mrb[41].mxu1 }
 0x1ea   : > { %v8026_v28 = vpop.f32.mrb[42].mxu0  ;;  %v8028_v39 = vpop.f32.mrb[42].mxu1 }
 0x1eb   : > { %9025 = vst [vmem:[#allocation35_spill] sm:$0xff] %v8028_v39  ;;  %v3181_v0 = vpop.f32.mrb[43].mxu0  ;;  %v3565_v55 = vpop.f32.mrb[43].mxu1 }
 0x1ed   : > { %3391 = vmatmul.mubr.bf16.gmra.mrb[148].mxu0 %v7821_v60  ;;  %5813 = vmatmul.mubr.bf16.gmra.mrb[148].mxu1 %v7038_v29  ;;  %v9028_v29 = vld [vmem:[#allocation6_spill] sm:$0xff] }
 0x1ee   : > { %3398 = vmatprep.mubr.bf16.mxu0 %v7940_v27  ;;  %5816 = vmatprep.mubr.bf16.mxu1 %v7095_v63 }
 0x1f0   : > { %v8034_v32 = vpop.f32.mrb[44].mxu0  ;;  %v8036_v11 = vpop.f32.mrb[44].mxu1 }
 0x1f1   : > { %9026 = vst [vmem:[#allocation36_spill] sm:$0xff] %v8036_v11  ;;  %v3186_v5 = vpop.f32.mrb[45].mxu0  ;;  %v3570_v51 = vpop.f32.mrb[45].mxu1 }
 0x1f2   : > { %v8038_v35 = vpop.f32.mrb[46].mxu0  ;;  %v8040_v1 = vpop.f32.mrb[46].mxu1 }
 0x1f3   : > { %9027 = vst [vmem:[#allocation37_spill] sm:$0xff] %v8040_v1  ;;  %v3189_v0 = vpop.f32.mrb[47].mxu0  ;;  %v3573_v55 = vpop.f32.mrb[47].mxu1 }
 0x1f5   : > { %3399 = vmatmul.mubr.bf16.gmra.mrb[152].mxu0 %v7827_v56  ;;  %5817 = vmatmul.mubr.bf16.gmra.mrb[152].mxu1 %v7146_v6  ;;  %v9031_v56 = vld [vmem:[#allocation7_spill] sm:$0xff]  ;;  %v9032_v6 = vld [vmem:[#allocation8_spill] sm:$0xff] }
 0x1f6   : > { %3406 = vmatprep.mubr.bf16.mxu0 %v7956_v42  ;;  %5820 = vmatprep.mubr.bf16.mxu1 %v9028_v29 }
 0x1f8   : > { %v8046_v63 = vpop.f32.mrb[48].mxu0  ;;  %v8048_v60 = vpop.f32.mrb[48].mxu1 }
 0x1f9   : > { %9029 = vst [vmem:[#allocation6_spill] sm:$0xff] %v8048_v60  ;;  %v3194_v5 = vpop.f32.mrb[49].mxu0  ;;  %v3578_v51 = vpop.f32.mrb[49].mxu1 }
 0x1fa   : > { %v8050_v39 = vpop.f32.mrb[50].mxu0  ;;  %v8052_v11 = vpop.f32.mrb[50].mxu1 }
 0x1fb   : > { %9030 = vst [vmem:[#allocation38_spill] sm:$0xff] %v8052_v11  ;;  %v3197_v0 = vpop.f32.mrb[51].mxu0  ;;  %v3581_v55 = vpop.f32.mrb[51].mxu1 }
 0x1fd   : > { %3407 = vmatmul.mubr.bf16.gmra.mrb[156].mxu0 %v7864_v58  ;;  %5821 = vmatmul.mubr.bf16.gmra.mrb[156].mxu1 %v9031_v56  ;;  %v9035_v58 = vld [vmem:[#allocation9_spill] sm:$0xff] }
 0x1fe   : > { %3414 = vmatprep.mubr.bf16.mxu0 %v6898_v17  ;;  %5824 = vmatprep.mubr.bf16.mxu1 %v9032_v6  ;;  %v9036_v17 = vld [vmem:[#allocation10_spill] sm:$0xff] }
 0x200   : > { %v8058_v29 = vpop.f32.mrb[52].mxu0  ;;  %v8060_v1 = vpop.f32.mrb[52].mxu1 }
 0x201   : > { %9033 = vst [vmem:[#allocation7_spill] sm:$0xff] %v8060_v1  ;;  %v3202_v5 = vpop.f32.mrb[53].mxu0  ;;  %v3586_v51 = vpop.f32.mrb[53].mxu1 }
 0x202   : > { %v8062_v60 = vpop.f32.mrb[54].mxu0  ;;  %v8064_v7 = vpop.f32.mrb[54].mxu1 }
 0x203   : > { %9034 = vst [vmem:[#allocation8_spill] sm:$0xff] %v8064_v7  ;;  %v3205_v0 = vpop.f32.mrb[55].mxu0  ;;  %v3589_v55 = vpop.f32.mrb[55].mxu1 }
 0x205   : > { %3415 = vmatmul.mubr.bf16.gmra.mrb[160].mxu0 %v7868_v47  ;;  %5825 = vmatmul.mubr.bf16.gmra.mrb[160].mxu1 %v9035_v58  ;;  %v9039_v47 = vld [vmem:[#allocation11_spill] sm:$0xff] }
 0x206   : > { %3422 = vmatprep.mubr.bf16.mxu0 %v6931_v46  ;;  %5828 = vmatprep.mubr.bf16.mxu1 %v9036_v17  ;;  %v9040_v46 = vld [vmem:[#allocation12_spill] sm:$0xff] }
 0x208   : > { %v8070_v56 = vpop.f32.mrb[56].mxu0  ;;  %v8072_v6 = vpop.f32.mrb[56].mxu1 }
 0x209   : > { %9037 = vst [vmem:[#allocation9_spill] sm:$0xff] %v8072_v6  ;;  %v3210_v5 = vpop.f32.mrb[57].mxu0  ;;  %v3594_v51 = vpop.f32.mrb[57].mxu1 }
 0x20a   : > { %v8074_v11 = vpop.f32.mrb[58].mxu0  ;;  %v8076_v7 = vpop.f32.mrb[58].mxu1 }
 0x20b   : > { %9038 = vst [vmem:[#allocation10_spill] sm:$0xff] %v8076_v7  ;;  %v3213_v0 = vpop.f32.mrb[59].mxu0  ;;  %v3597_v55 = vpop.f32.mrb[59].mxu1 }
 0x20d   : > { %3423 = vmatmul.mubr.bf16.gmra.mrb[164].mxu0 %v7896_v14  ;;  %5829 = vmatmul.mubr.bf16.gmra.mrb[164].mxu1 %v9039_v47  ;;  %v9043_v47 = vld [vmem:[#allocation13_spill] sm:$0xff] }
 0x20e   : > { %3430 = vmatprep.mubr.bf16.mxu0 %v6979_v2  ;;  %5832 = vmatprep.mubr.bf16.mxu1 %v9040_v46  ;;  %v8098_v2 = vld [vmem:[%s8980_s5] ss:$0 sm:$0xff] }
 0x20f   : > { %v9044_v46 = vld [vmem:[#allocation14_spill] sm:$0xff] }
 0x210   : > { %v8082_v58 = vpop.f32.mrb[60].mxu0  ;;  %v8084_v17 = vpop.f32.mrb[60].mxu1 }
 0x211   : > { %9041 = vst [vmem:[#allocation11_spill] sm:$0xff] %v8084_v17  ;;  %v3218_v5 = vpop.f32.mrb[61].mxu0  ;;  %v3602_v51 = vpop.f32.mrb[61].mxu1 }
 0x212   : > { %v8086_v6 = vpop.f32.mrb[62].mxu0  ;;  %v8092_v0 = vpop.f32.mrb[62].mxu1  ;;  %v3105_v5 = vadd.f32 %v8098_v2, %v7884_v54 }
 0x213   : > { %9042 = vst [vmem:[#allocation12_spill] sm:$0xff] %v8092_v0  ;;  %v3221_v14 = vpop.f32.mrb[63].mxu0  ;;  %v3605_v55 = vpop.f32.mrb[63].mxu1  ;;  %v4152_v0 = vld [vmem:[%s8110_s21] sm:$0xff] }
 0x214   : > { %v9045_v14 = vld [vmem:[#allocation16_spill] sm:$0xff] }
 0x215   : > { %3431 = vmatmul.mubr.bf16.gmra.mrb[168].mxu0 %v7898_v44  ;;  %5833 = vmatmul.mubr.bf16.gmra.mrb[168].mxu1 %v9043_v47  ;;  %v3097_v55 = vadd.f32 %v8098_v2, %v9045_v14  ;;  %v4154_v47 = vld [vmem:[%s8110_s21 + $0x10] sm:$0xff]  ;;  %v3100_v14 = vadd.f32 %v8098_v2, %v7860_v49 }
 0x216   : > { %3438 = vmatprep.mubr.bf16.mxu0 %v7062_v38  ;;  %5836 = vmatprep.mubr.bf16.mxu1 %v9044_v46  ;;  %v3108_v38 = vadd.f32 %v8098_v2, %v7892_v59  ;;  %v9046_v59 = vld [vmem:[#allocation15_spill] sm:$0xff] }
 0x218   : > { %v8105_v51 = vpop.f32.mrb[64].mxu0  ;;  %v5730_v44 = vpop.f32.mrb[64].mxu1 }
 0x219   : > { %v3226_v7 = vpop.f32.mrb[65].mxu0  ;;  %v3650_v46 = vadd.f32 %v5730_v44, %v3105_v5  ;;  %v3641_v54 = vpop.f32.mrb[65].mxu1  ;;  %v3116_v5 = vadd.f32 %v8098_v2, %v7914_v16  ;;  %v4159_v44 = vld [vmem:[%s8110_s21 + $0x38] sm:$0xff] }
 0x21a   : > { %v8116_v17 = vpop.f32.mrb[66].mxu0  ;;  %v3642_v1 = vadd.f32 %v3641_v54, %v3097_v55  ;;  %v5731_v45 = vpop.f32.mrb[66].mxu1  ;;  %v4153_v7 = vld [vmem:[%s8110_s21 + $0x8] sm:$0xff] }
 0x21b   : > { %v3229_v15 = vpop.f32.mrb[67].mxu0  ;;  %v4282_v10 = vadd.f32 %v4154_v47, %v3650_v46  ;;  %v3653_v23 = vadd.f32 %v5731_v45, %v3108_v38  ;;  %v3644_v20 = vpop.f32.mrb[67].mxu1  ;;  %v9047_v45 = vmov 0  }
 0x21c   : > { %v4280_v12 = vadd.f32 %v4152_v0, %v3642_v1  ;;  %v3645_v21 = vadd.f32 %v3644_v20, %v3100_v14  ;;  %v4156_v0 = vld [vmem:[%s8110_s21 + $0x20] sm:$0xff] }
 0x21d   : > { %3439 = vmatmul.mubr.bf16.gmra.mrb[172].mxu0 %v7918_v40  ;;  %4410 = vst [vmem:[%s8124_s10 + $0x10] sm:$0xff] %v4282_v10  ;;  %v4283_v49 = vadd.f32 %v4155_v57, %v3653_v23  ;;  %5837 = vmatmul.mubr.bf16.gmra.mrb[172].mxu1 %v9046_v59  ;;  %v3121_v40 = vadd.f32 %v8098_v2, %v7930_v3  ;;  %v4158_v57 = vld [vmem:[%s8110_s21 + $0x30] sm:$0xff] }
 0x21e   : > { %3446 = vmatprep.mubr.bf16.mxu0 %v7109_v22  ;;  %4408 = vst [vmem:[%s8124_s10] sm:$0xff] %v4280_v12  ;;  %v4281_v15 = vadd.f32 %v4153_v7, %v3645_v21  ;;  %5840 = vmatprep.mubr.bf16.mxu1 %v9047_v45  ;;  %v3113_v10 = vadd.f32 %v8098_v2, %v7910_v52 }
 0x21f   : > { %4411 = vst [vmem:[%s8124_s10 + $0x18] sm:$0xff] %v4283_v49  ;;  %v3124_v22 = vadd.f32 %v8098_v2, %v7934_v25  ;;  %v4157_v25 = vld [vmem:[%s8110_s21 + $0x28] sm:$0xff]  ;;  %v3137_v59 = vadd.f32 %v8098_v2, %v7962_v4 }
 0x220   : > { %v8134_v20 = vpop.f32.mrb[68].mxu0  ;;  %4409 = vst [vmem:[%s8124_s10 + $0x8] sm:$0xff] %v4281_v15  ;;  %v5734_v23 = vpop.f32.mrb[68].mxu1 }
 0x221   : > { %v3234_v1 = vpop.f32.mrb[69].mxu0  ;;  %v3666_v12 = vadd.f32 %v5734_v23, %v3121_v40  ;;  %v3657_v21 = vpop.f32.mrb[69].mxu1 }
 0x222   : > { %v8143_v3 = vpop.f32.mrb[70].mxu0  ;;  %v3658_v55 = vadd.f32 %v3657_v21, %v3113_v10  ;;  %v5735_v52 = vpop.f32.mrb[70].mxu1  ;;  %v4162_v10 = vld [vmem:[%s8110_s21 + $0x50] sm:$0xff] }
 0x223   : > { %v3237_v47 = vpop.f32.mrb[71].mxu0  ;;  %v4286_v38 = vadd.f32 %v4158_v57, %v3666_v12  ;;  %v3669_v46 = vadd.f32 %v5735_v52, %v3124_v22  ;;  %v3660_v54 = vpop.f32.mrb[71].mxu1  ;;  %v4160_v22 = vld [vmem:[%s8110_s21 + $0x40] sm:$0xff]  ;;  %v3132_v12 = vadd.f32 %v8098_v2, %v7952_v31 }
 0x224   : > { %v4284_v14 = vadd.f32 %v4156_v0, %v3658_v55  ;;  %v3661_v7 = vadd.f32 %v3660_v54, %v3116_v5  ;;  %v4163_v0 = vld [vmem:[%s8110_s21 + $0x58] sm:$0xff]  ;;  %v3153_v54 = vadd.f32 %v8098_v2, %v7986_v62 }
 0x225   : > { %3447 = vmatmul.mubr.bf16.gmra.mrb[176].mxu0 %v7920_v30  ;;  %4414 = vst [vmem:[%s8124_s10 + $0x30] sm:$0xff] %v4286_v38  ;;  %v4287_v49 = vadd.f32 %v4159_v44, %v3669_v46  ;;  %5841 = vmatmul.mubr.bf16.gmra.mrb[176].mxu1 %v9047_v45  ;;  %v3129_v30 = vadd.f32 %v8098_v2, %v7948_v50 }
 0x226   : > { %3454 = vmatprep.mubr.bf16.mxu0 %v7160_v19  ;;  %4412 = vst [vmem:[%s8124_s10 + $0x20] sm:$0xff] %v4284_v14  ;;  %v4285_v16 = vadd.f32 %v4157_v25, %v3661_v7  ;;  %5844 = vmatprep.mubr.bf16.mxu1 %v9047_v45  ;;  %v3140_v19 = vadd.f32 %v8098_v2, %v7966_v13  ;;  %v4161_v13 = vld [vmem:[%s8110_s21 + $0x48] sm:$0xff]  ;;  %v4166_v7 = vld [vmem:[%s8110_s21 + $0x70] sm:$0xff] }
 0x227   : > { %4415 = vst [vmem:[%s8124_s10 + $0x38] sm:$0xff] %v4287_v49 }
 0x228   : > { %v8158_v15 = vpop.f32.mrb[72].mxu0  ;;  %4413 = vst [vmem:[%s8124_s10 + $0x28] sm:$0xff] %v4285_v16  ;;  %v5738_v40 = vpop.f32.mrb[72].mxu1 }
 0x229   : > { %v3242_v23 = vpop.f32.mrb[73].mxu0  ;;  %v3682_v57 = vadd.f32 %v5738_v40, %v3137_v59  ;;  %v3673_v1 = vpop.f32.mrb[73].mxu1  ;;  %v3148_v40 = vadd.f32 %v8098_v2, %v7978_v53 }
 0x22a   : > { %v8167_v4 = vpop.f32.mrb[74].mxu0  ;;  %v3674_v21 = vadd.f32 %v3673_v1, %v3129_v30  ;;  %v5739_v50 = vpop.f32.mrb[74].mxu1  ;;  %v4164_v30 = vld [vmem:[%s8110_s21 + $0x60] sm:$0xff]  ;;  %v4167_v23 = vld [vmem:[%s8110_s21 + $0x78] sm:$0xff] }
 0x22b   : > { %v3245_v5 = vpop.f32.mrb[75].mxu0  ;;  %v4290_v55 = vadd.f32 %v4162_v10, %v3682_v57  ;;  %v3685_v52 = vadd.f32 %v5739_v50, %v3140_v19  ;;  %v3676_v44 = vpop.f32.mrb[75].mxu1 }
 0x22c   : > { %v4288_v47 = vadd.f32 %v4160_v22, %v3674_v21  ;;  %v3677_v38 = vadd.f32 %v3676_v44, %v3132_v12 }
 0x22d   : > { %3455 = vmatmul.mubr.bf16.gmra.mrb[180].mxu0 %v7938_v61  ;;  %4418 = vst [vmem:[%s8124_s10 + $0x50] sm:$0xff] %v4290_v55  ;;  %v4291_v46 = vadd.f32 %v4163_v0, %v3685_v52  ;;  %5845 = vmatmul.mubr.bf16.gmra.mrb[180].mxu1 %v9047_v45  ;;  %v3145_v61 = vadd.f32 %v8098_v2, %v7974_v9  ;;  %v4170_v52 = vld [vmem:[%s8110_s21 + $0x90] sm:$0xff] }
 0x22e   : > { %3462 = vmatprep.mubr.bf16.mxu0 %v7226_v48  ;;  %4416 = vst [vmem:[%s8124_s10 + $0x40] sm:$0xff] %v4288_v47  ;;  %v4289_v31 = vadd.f32 %v4161_v13, %v3677_v38  ;;  %5848 = vmatprep.mubr.bf16.mxu1 %v9047_v45  ;;  %v3156_v48 = vadd.f32 %v8098_v2, %v7990_v41  ;;  %v4165_v41 = vld [vmem:[%s8110_s21 + $0x68] sm:$0xff]  ;;  %v4168_v38 = vld [vmem:[%s8110_s21 + $0x80] sm:$0xff] }
 0x22f   : > { %4419 = vst [vmem:[%s8124_s10 + $0x58] sm:$0xff] %v4291_v46  ;;  %v3169_v0 = vadd.f32 %v8098_v2, %v8010_v34  ;;  %v3164_v46 = vadd.f32 %v8098_v2, %v8002_v33 }
 0x230   : > { %v8182_v25 = vpop.f32.mrb[76].mxu0  ;;  %4417 = vst [vmem:[%s8124_s10 + $0x48] sm:$0xff] %v4289_v31  ;;  %v5742_v14 = vpop.f32.mrb[76].mxu1 }
 0x231   : > { %v3250_v49 = vpop.f32.mrb[77].mxu0  ;;  %v3698_v16 = vadd.f32 %v5742_v14, %v3153_v54  ;;  %v3689_v59 = vpop.f32.mrb[77].mxu1  ;;  %v4171_v54 = vld [vmem:[%s8110_s21 + $0x98] sm:$0xff] }
 0x232   : > { %v8191_v62 = vpop.f32.mrb[78].mxu0  ;;  %v3690_v10 = vadd.f32 %v3689_v59, %v3145_v61  ;;  %v5743_v9 = vpop.f32.mrb[78].mxu1 }
 0x233   : > { %v3253_v19 = vpop.f32.mrb[79].mxu0  ;;  %v4294_v57 = vadd.f32 %v4166_v7, %v3698_v16  ;;  %v3701_v1 = vadd.f32 %v5743_v9, %v3156_v48  ;;  %v3692_v22 = vpop.f32.mrb[79].mxu1 }
 0x234   : > { %v4292_v12 = vadd.f32 %v4164_v30, %v3690_v10  ;;  %v3693_v21 = vadd.f32 %v3692_v22, %v3148_v40  ;;  %v3185_v30 = vadd.f32 %v8098_v2, %v8034_v32  ;;  %v3177_v10 = vadd.f32 %v8098_v2, %v8022_v43  ;;  %v4172_v32 = vld [vmem:[%s8110_s21 + $0xa0] sm:$0xff] }
 0x235   : > { %3463 = vmatmul.mubr.bf16.gmra.mrb[184].mxu0 %v7940_v27  ;;  %4422 = vst [vmem:[%s8124_s10 + $0x70] sm:$0xff] %v4294_v57  ;;  %v4295_v50 = vadd.f32 %v4167_v23, %v3701_v1  ;;  %5849 = vmatmul.mubr.bf16.gmra.mrb[184].mxu1 %v9047_v45  ;;  %v3161_v27 = vadd.f32 %v8098_v2, %v7998_v37 }
 0x236   : > { %3470 = vmatprep.mubr.bf16.mxu0 %v7275_v36  ;;  %4420 = vst [vmem:[%s8124_s10 + $0x60] sm:$0xff] %v4292_v12  ;;  %v4293_v53 = vadd.f32 %v4165_v41, %v3693_v21  ;;  %5852 = vmatprep.mubr.bf16.mxu1 %v9047_v45  ;;  %v3172_v36 = vadd.f32 %v8098_v2, %v8014_v24  ;;  %v4169_v24 = vld [vmem:[%s8110_s21 + $0x88] sm:$0xff]  ;;  %v4175_v12 = vld [vmem:[%s8110_s21 + $0xb8] sm:$0xff] }
 0x237   : > { %4423 = vst [vmem:[%s8124_s10 + $0x78] sm:$0xff] %v4295_v50  ;;  %v3180_v22 = vadd.f32 %v8098_v2, %v8026_v28  ;;  %v3201_v28 = vadd.f32 %v8098_v2, %v8058_v29  ;;  %v4176_v29 = vld [vmem:[%s8110_s21 + $0xc0] sm:$0xff] }
 0x238   : > { %v8206_v5 = vpop.f32.mrb[80].mxu0  ;;  %4421 = vst [vmem:[%s8124_s10 + $0x68] sm:$0xff] %v4293_v53  ;;  %v5746_v55 = vpop.f32.mrb[80].mxu1 }
 0x239   : > { %v3258_v44 = vpop.f32.mrb[81].mxu0  ;;  %v3714_v13 = vadd.f32 %v5746_v55, %v3169_v0  ;;  %v3705_v47 = vpop.f32.mrb[81].mxu1  ;;  %v4173_v0 = vld [vmem:[%s8110_s21 + $0xa8] sm:$0xff] }
 0x23a   : > { %v8215_v34 = vpop.f32.mrb[82].mxu0  ;;  %v3706_v31 = vadd.f32 %v3705_v47, %v3161_v27  ;;  %v5747_v37 = vpop.f32.mrb[82].mxu1 }
 0x23b   : > { %v3261_v61 = vpop.f32.mrb[83].mxu0  ;;  %v4298_v14 = vadd.f32 %v4170_v52, %v3714_v13  ;;  %v3717_v7 = vadd.f32 %v5747_v37, %v3172_v36  ;;  %v3708_v49 = vpop.f32.mrb[83].mxu1  ;;  %v3193_v13 = vadd.f32 %v8098_v2, %v8046_v63 }
 0x23c   : > { %v4296_v48 = vadd.f32 %v4168_v38, %v3706_v31  ;;  %v3709_v16 = vadd.f32 %v3708_v49, %v3164_v46  ;;  %v4178_v38 = vld [vmem:[%s8110_s21 + $0xd0] sm:$0xff]  ;;  %v3204_v31 = vadd.f32 %v8098_v2, %v8062_v60  ;;  %v4179_v49 = vld [vmem:[%s8110_s21 + $0xd8] sm:$0xff] }
 0x23d   : > { %3471 = vmatmul.mubr.bf16.gmra.mrb[188].mxu0 %v7956_v42  ;;  %4426 = vst [vmem:[%s8124_s10 + $0x90] sm:$0xff] %v4298_v14  ;;  %v4299_v59 = vadd.f32 %v4171_v54, %v3717_v7  ;;  %5853 = vmatmul.mubr.bf16.gmra.mrb[188].mxu1 %v9047_v45  ;;  %v4174_v42 = vld [vmem:[%s8110_s21 + $0xb0] sm:$0xff]  ;;  %v3188_v45 = vadd.f32 %v8098_v2, %v8038_v35 }
 0x23e   : > { %4424 = vst [vmem:[%s8124_s10 + $0x80] sm:$0xff] %v4296_v48  ;;  %v4297_v33 = vadd.f32 %v4169_v24, %v3709_v16  ;;  %v3196_v14 = vadd.f32 %v8098_v2, %v8050_v39  ;;  %v3217_v39 = vadd.f32 %v8098_v2, %v8082_v58  ;;  %v4180_v58 = vld [vmem:[%s8110_s21 + $0xe0] sm:$0xff] }
 0x23f   : > { %4427 = vst [vmem:[%s8124_s10 + $0x98] sm:$0xff] %v4299_v59  ;;  %v4177_v59 = vld [vmem:[%s8110_s21 + $0xc8] sm:$0xff] }
 0x240   : > { %v8228_v40 = vpop.f32.mrb[84].mxu0  ;;  %4425 = vst [vmem:[%s8124_s10 + $0x88] sm:$0xff] %v4297_v33  ;;  %v5750_v9 = vpop.f32.mrb[84].mxu1 }
 0x241   : > { %v3266_v23 = vpop.f32.mrb[85].mxu0  ;;  %v3730_v19 = vadd.f32 %v5750_v9, %v3185_v30  ;;  %v3721_v57 = vpop.f32.mrb[85].mxu1 }
 0x242   : > { %v8237_v1 = vpop.f32.mrb[86].mxu0  ;;  %v3722_v43 = vadd.f32 %v3721_v57, %v3177_v10  ;;  %v5751_v41 = vpop.f32.mrb[86].mxu1  ;;  %v3209_v23 = vadd.f32 %v8098_v2, %v8070_v56 }
 0x243   : > { %v3269_v21 = vpop.f32.mrb[87].mxu0  ;;  %v4302_v50 = vadd.f32 %v4174_v42, %v3730_v19  ;;  %v3733_v53 = vadd.f32 %v5751_v41, %v3188_v45  ;;  %v3724_v35 = vpop.f32.mrb[87].mxu1  ;;  %v4182_v19 = vld [vmem:[%s8110_s21 + $0xf0] sm:$0xff] }
 0x244   : > { %v4300_v27 = vadd.f32 %v4172_v32, %v3722_v43  ;;  %v3725_v55 = vadd.f32 %v3724_v35, %v3180_v22  ;;  %v3220_v32 = vadd.f32 %v8098_v2, %v8086_v6 }
 0x245   : > { %4430 = vst [vmem:[%s8124_s10 + $0xb0] sm:$0xff] %v4302_v50  ;;  %v4303_v52 = vadd.f32 %v4175_v12, %v3733_v53  ;;  %v3212_v12 = vadd.f32 %v8098_v2, %v8074_v11  ;;  %v4183_v50 = vld [vmem:[%s8110_s21 + $0xf8] sm:$0xff]  ;;  %v3233_v11 = vadd.f32 %v8098_v2, %v8134_v20  ;;  %v4184_v20 = vld [vmem:[%s8110_s21 + $0x100] sm:$0xff] }
 0x246   : > { %4428 = vst [vmem:[%s8124_s10 + $0xa0] sm:$0xff] %v4300_v27  ;;  %v4301_v44 = vadd.f32 %v4173_v0, %v3725_v55  ;;  %v4181_v27 = vld [vmem:[%s8110_s21 + $0xe8] sm:$0xff] }
 0x247   : > { %4431 = vst [vmem:[%s8124_s10 + $0xb8] sm:$0xff] %v4303_v52 }
 0x248   : > { %v8248_v36 = vpop.f32.mrb[88].mxu0  ;;  %4429 = vst [vmem:[%s8124_s10 + $0xa8] sm:$0xff] %v4301_v44  ;;  %v5754_v47 = vpop.f32.mrb[88].mxu1 }
 0x249   : > { %v3274_v46 = vpop.f32.mrb[89].mxu0  ;;  %v3746_v37 = vadd.f32 %v5754_v47, %v3201_v28  ;;  %v3737_v54 = vpop.f32.mrb[89].mxu1  ;;  %v3225_v47 = vadd.f32 %v8098_v2, %v8105_v51 }
 0x24a   : > { %v8257_v61 = vpop.f32.mrb[90].mxu0  ;;  %v3738_v63 = vadd.f32 %v3737_v54, %v3193_v13  ;;  %v5755_v7 = vpop.f32.mrb[90].mxu1  ;;  %v4186_v46 = vld [vmem:[%s8110_s21 + $0x110] sm:$0xff] }
 0x24b   : > { %v3277_v24 = vpop.f32.mrb[91].mxu0  ;;  %v4306_v48 = vadd.f32 %v4178_v38, %v3746_v37  ;;  %v3749_v16 = vadd.f32 %v5755_v7, %v3204_v31  ;;  %v3740_v60 = vpop.f32.mrb[91].mxu1  ;;  %v3236_v37 = vadd.f32 %v8098_v2, %v8143_v3 }
 0x24c   : > { %v4304_v33 = vadd.f32 %v4176_v29, %v3738_v63  ;;  %v3741_v30 = vadd.f32 %v3740_v60, %v3196_v14  ;;  %v3228_v63 = vadd.f32 %v8098_v2, %v8116_v17  ;;  %v4185_v60 = vld [vmem:[%s8110_s21 + $0x108] sm:$0xff]  ;;  %v3249_v17 = vadd.f32 %v8098_v2, %v8182_v25  ;;  %v4188_v25 = vld [vmem:[%s8110_s21 + $0x120] sm:$0xff] }
 0x24d   : > { %4434 = vst [vmem:[%s8124_s10 + $0xd0] sm:$0xff] %v4306_v48  ;;  %v4307_v10 = vadd.f32 %v4179_v49, %v3749_v16  ;;  %v4187_v49 = vld [vmem:[%s8110_s21 + $0x118] sm:$0xff] }
 0x24e   : > { %4432 = vst [vmem:[%s8124_s10 + $0xc0] sm:$0xff] %v4304_v33  ;;  %v4305_v9 = vadd.f32 %v4177_v59, %v3741_v30 }
 0x24f   : > { %4435 = vst [vmem:[%s8124_s10 + $0xd8] sm:$0xff] %v4307_v10 }
 0x250   : > { %v8268_v42 = vpop.f32.mrb[92].mxu0  ;;  %4433 = vst [vmem:[%s8124_s10 + $0xc8] sm:$0xff] %v4305_v9  ;;  %v5758_v45 = vpop.f32.mrb[92].mxu1 }
 0x251   : > { %v3282_v57 = vpop.f32.mrb[93].mxu0  ;;  %v3762_v22 = vadd.f32 %v5758_v45, %v3217_v39  ;;  %v3753_v43 = vpop.f32.mrb[93].mxu1  ;;  %v3241_v39 = vadd.f32 %v8098_v2, %v8158_v15  ;;  %v4190_v45 = vld [vmem:[%s8110_s21 + $0x130] sm:$0xff] }
 0x252   : > { %v8277_v41 = vpop.f32.mrb[94].mxu0  ;;  %v3754_v56 = vadd.f32 %v3753_v43, %v3209_v23  ;;  %v5759_v21 = vpop.f32.mrb[94].mxu1  ;;  %v3252_v57 = vadd.f32 %v8098_v2, %v8191_v62 }
 0x253   : > { %v3285_v53 = vpop.f32.mrb[95].mxu0  ;;  %v4310_v35 = vadd.f32 %v4182_v19, %v3762_v22  ;;  %v3765_v0 = vadd.f32 %v5759_v21, %v3220_v32  ;;  %v3756_v6 = vpop.f32.mrb[95].mxu1 }
 0x254   : > { %v4308_v55 = vadd.f32 %v4180_v58, %v3754_v56  ;;  %v3757_v52 = vadd.f32 %v3756_v6, %v3212_v12  ;;  %v3244_v58 = vadd.f32 %v8098_v2, %v8167_v4  ;;  %v4191_v56 = vld [vmem:[%s8110_s21 + $0x138] sm:$0xff]  ;;  %v3265_v4 = vadd.f32 %v8098_v2, %v8228_v40  ;;  %v4192_v40 = vld [vmem:[%s8110_s21 + $0x140] sm:$0xff] }
 0x255   : > { %4438 = vst [vmem:[%s8124_s10 + $0xf0] sm:$0xff] %v4310_v35  ;;  %v4311_v44 = vadd.f32 %v4183_v50, %v3765_v0  ;;  %v4189_v35 = vld [vmem:[%s8110_s21 + $0x128] sm:$0xff] }
 0x256   : > { %4436 = vst [vmem:[%s8124_s10 + $0xe0] sm:$0xff] %v4308_v55  ;;  %v4309_v28 = vadd.f32 %v4181_v27, %v3757_v52 }
 0x257   : > { %4439 = vst [vmem:[%s8124_s10 + $0xf8] sm:$0xff] %v4311_v44  ;;  %v3257_v44 = vadd.f32 %v8098_v2, %v8206_v5 }
 0x258   : > { %v8288_v13 = vpop.f32.mrb[96].mxu0  ;;  %4437 = vst [vmem:[%s8124_s10 + $0xe8] sm:$0xff] %v4309_v28  ;;  %v5762_v38 = vpop.f32.mrb[96].mxu1 }
 0x259   : > { %v3290_v31 = vpop.f32.mrb[97].mxu0  ;;  %v3778_v54 = vadd.f32 %v5762_v38, %v3233_v11  ;;  %v3769_v29 = vpop.f32.mrb[97].mxu1  ;;  %v4194_v11 = vld [vmem:[%s8110_s21 + $0x150] sm:$0xff]  ;;  %v3268_v38 = vadd.f32 %v8098_v2, %v8237_v1 }
 0x25a   : > { %v8297_v14 = vpop.f32.mrb[98].mxu0  ;;  %v3770_v51 = vadd.f32 %v3769_v29, %v3225_v47  ;;  %v5763_v7 = vpop.f32.mrb[98].mxu1 }
 0x25b   : > { %v3293_v24 = vpop.f32.mrb[99].mxu0  ;;  %v4314_v48 = vadd.f32 %v4186_v46, %v3778_v54  ;;  %v3781_v16 = vadd.f32 %v5763_v7, %v3236_v37  ;;  %v3772_v3 = vpop.f32.mrb[99].mxu1  ;;  %v3260_v54 = vadd.f32 %v8098_v2, %v8215_v34  ;;  %v3281_v34 = vadd.f32 %v8098_v2, %v8268_v42 }
 0x25c   : > { %v4312_v59 = vadd.f32 %v4184_v20, %v3770_v51  ;;  %v3773_v33 = vadd.f32 %v3772_v3, %v3228_v63  ;;  %v4195_v20 = vld [vmem:[%s8110_s21 + $0x158] sm:$0xff] }
 0x25d   : > { %4442 = vst [vmem:[%s8124_s10 + $0x110] sm:$0xff] %v4314_v48  ;;  %v4315_v30 = vadd.f32 %v4187_v49, %v3781_v16  ;;  %v4193_v49 = vld [vmem:[%s8110_s21 + $0x148] sm:$0xff] }
 0x25e   : > { %4440 = vst [vmem:[%s8124_s10 + $0x100] sm:$0xff] %v4312_v59  ;;  %v4313_v10 = vadd.f32 %v4185_v60, %v3773_v33  ;;  %v3273_v59 = vadd.f32 %v8098_v2, %v8248_v36 }
 0x25f   : > { %4443 = vst [vmem:[%s8124_s10 + $0x118] sm:$0xff] %v4315_v30  ;;  %v4198_v30 = vld [vmem:[%s8110_s21 + $0x170] sm:$0xff] }
 0x260   : > { %v8308_v9 = vpop.f32.mrb[100].mxu0  ;;  %4441 = vst [vmem:[%s8124_s10 + $0x108] sm:$0xff] %v4313_v10  ;;  %v5766_v23 = vpop.f32.mrb[100].mxu1 }
 0x261   : > { %v3298_v19 = vpop.f32.mrb[101].mxu0  ;;  %v3794_v32 = vadd.f32 %v5766_v23, %v3249_v17  ;;  %v3785_v22 = vpop.f32.mrb[101].mxu1  ;;  %v3284_v17 = vadd.f32 %v8098_v2, %v8277_v41  ;;  %v4197_v41 = vld [vmem:[%s8110_s21 + $0x168] sm:$0xff] }
 0x262   : > { %v8317_v43 = vpop.f32.mrb[102].mxu0  ;;  %v3786_v15 = vadd.f32 %v3785_v22, %v3241_v39  ;;  %v5767_v12 = vpop.f32.mrb[102].mxu1  ;;  %v3276_v19 = vadd.f32 %v8098_v2, %v8257_v61  ;;  %v3297_v61 = vadd.f32 %v8098_v2, %v8308_v9 }
 0x263   : > { %v3301_v21 = vpop.f32.mrb[103].mxu0  ;;  %v4318_v50 = vadd.f32 %v4190_v45, %v3794_v32  ;;  %v3797_v53 = vadd.f32 %v5767_v12, %v3252_v57  ;;  %v3788_v62 = vpop.f32.mrb[103].mxu1  ;;  %v4196_v45 = vld [vmem:[%s8110_s21 + $0x160] sm:$0xff]  ;;  %v4199_v32 = vld [vmem:[%s8110_s21 + $0x178] sm:$0xff] }
 0x264   : > { %v4316_v0 = vadd.f32 %v4188_v25, %v3786_v15  ;;  %v3789_v6 = vadd.f32 %v3788_v62, %v3244_v58  ;;  %v3289_v62 = vadd.f32 %v8098_v2, %v8288_v13 }
 0x265   : > { %4446 = vst [vmem:[%s8124_s10 + $0x130] sm:$0xff] %v4318_v50  ;;  %v4319_v27 = vadd.f32 %v4191_v56, %v3797_v53 }
 0x266   : > { %4444 = vst [vmem:[%s8124_s10 + $0x120] sm:$0xff] %v4316_v0  ;;  %v4317_v55 = vadd.f32 %v4189_v35, %v3789_v6  ;;  %v4202_v0 = vld [vmem:[%s8110_s21 + $0x190] sm:$0xff] }
 0x267   : > { %4447 = vst [vmem:[%s8124_s10 + $0x138] sm:$0xff] %v4319_v27  ;;  %v3300_v27 = vadd.f32 %v8098_v2, %v8317_v43  ;;  %v4201_v43 = vld [vmem:[%s8110_s21 + $0x188] sm:$0xff] }
 0x268   : > { %v8328_v52 = vpop.f32.mrb[104].mxu0  ;;  %4445 = vst [vmem:[%s8124_s10 + $0x128] sm:$0xff] %v4317_v55  ;;  %v5770_v28 = vpop.f32.mrb[104].mxu1 }
 0x269   : > { %v3306_v47 = vpop.f32.mrb[105].mxu0  ;;  %v3810_v46 = vadd.f32 %v5770_v28, %v3265_v4  ;;  %v3801_v31 = vpop.f32.mrb[105].mxu1  ;;  %v3292_v28 = vadd.f32 %v8098_v2, %v8297_v14 }
 0x26a   : > { %v8337_v37 = vpop.f32.mrb[106].mxu0  ;;  %v3802_v5 = vadd.f32 %v3801_v31, %v3257_v44  ;;  %v5771_v29 = vpop.f32.mrb[106].mxu1  ;;  %v4200_v44 = vld [vmem:[%s8110_s21 + $0x180] sm:$0xff]  ;;  %v4203_v47 = vld [vmem:[%s8110_s21 + $0x198] sm:$0xff] }
 0x26b   : > { %v3309_v63 = vpop.f32.mrb[107].mxu0  ;;  %v4322_v51 = vadd.f32 %v4194_v11, %v3810_v46  ;;  %v3813_v7 = vadd.f32 %v5771_v29, %v3268_v38  ;;  %v3804_v1 = vpop.f32.mrb[107].mxu1 }
 0x26c   : > { %v4320_v24 = vadd.f32 %v4192_v40, %v3802_v5  ;;  %v3805_v48 = vadd.f32 %v3804_v1, %v3260_v54  ;;  %v4206_v1 = vld [vmem:[%s8110_s21 + $0x1b0] sm:$0xff] }
 0x26d   : > { %4450 = vst [vmem:[%s8124_s10 + $0x150] sm:$0xff] %v4322_v51  ;;  %v4323_v16 = vadd.f32 %v4195_v20, %v3813_v7  ;;  %v3305_v51 = vadd.f32 %v8098_v2, %v8328_v52  ;;  %v4207_v52 = vld [vmem:[%s8110_s21 + $0x1b8] sm:$0xff] }
 0x26e   : > { %4448 = vst [vmem:[%s8124_s10 + $0x140] sm:$0xff] %v4320_v24  ;;  %v4321_v3 = vadd.f32 %v4193_v49, %v3805_v48 }
 0x26f   : > { %4451 = vst [vmem:[%s8124_s10 + $0x158] sm:$0xff] %v4323_v16 }
 0x270   : > { %v3312_v60 = vpop.f32.mrb[108].mxu0  ;;  %4449 = vst [vmem:[%s8124_s10 + $0x148] sm:$0xff] %v4321_v3  ;;  %v5774_v33 = vpop.f32.mrb[108].mxu1  ;;  %v4204_v3 = vld [vmem:[%s8110_s21 + $0x1a0] sm:$0xff] }
 0x271   : > { %v3314_v10 = vpop.f32.mrb[109].mxu0  ;;  %v3826_v39 = vadd.f32 %v5774_v33, %v3281_v34  ;;  %v3817_v23 = vpop.f32.mrb[109].mxu1  ;;  %v3313_v14 = vadd.f32 %v8098_v2, %v3312_v60  ;;  %v3308_v60 = vadd.f32 %v8098_v2, %v8337_v37 }
 0x272   : > { %v3315_v42 = vpop.f32.mrb[110].mxu0  ;;  %v3818_v57 = vadd.f32 %v3817_v23, %v3273_v59  ;;  %v5775_v36 = vpop.f32.mrb[110].mxu1  ;;  %v4205_v23 = vld [vmem:[%s8110_s21 + $0x1a8] sm:$0xff] }
 0x273   : > { %v3317_v22 = vpop.f32.mrb[111].mxu0  ;;  %v4326_v25 = vadd.f32 %v4198_v30, %v3826_v39  ;;  %v3829_v58 = vadd.f32 %v5775_v36, %v3284_v17  ;;  %v3820_v15 = vpop.f32.mrb[111].mxu1  ;;  %v3316_v24 = vadd.f32 %v8098_v2, %v3315_v42 }
 0x274   : > { %v4324_v12 = vadd.f32 %v4196_v45, %v3818_v57  ;;  %v3821_v56 = vadd.f32 %v3820_v15, %v3276_v19 }
 0x275   : > { %4454 = vst [vmem:[%s8124_s10 + $0x170] sm:$0xff] %v4326_v25  ;;  %v4327_v21 = vadd.f32 %v4199_v32, %v3829_v58  ;;  %v4210_v25 = vld [vmem:[%s8110_s21 + $0x1d0] sm:$0xff] }
 0x276   : > { %4452 = vst [vmem:[%s8124_s10 + $0x160] sm:$0xff] %v4324_v12  ;;  %v4325_v50 = vadd.f32 %v4197_v41, %v3821_v56  ;;  %v4208_v56 = vld [vmem:[%s8110_s21 + $0x1c0] sm:$0xff] }
 0x277   : > { %4455 = vst [vmem:[%s8124_s10 + $0x178] sm:$0xff] %v4327_v21 }
 0x278   : > { %v3320_v53 = vpop.f32.mrb[112].mxu0  ;;  %4453 = vst [vmem:[%s8124_s10 + $0x168] sm:$0xff] %v4325_v50  ;;  %v5778_v35 = vpop.f32.mrb[112].mxu1 }
 0x279   : > { %v3322_v6 = vpop.f32.mrb[113].mxu0  ;;  %v3842_v55 = vadd.f32 %v5778_v35, %v3297_v61  ;;  %v3833_v4 = vpop.f32.mrb[113].mxu1  ;;  %v3321_v32 = vadd.f32 %v8098_v2, %v3320_v53  ;;  %v4211_v53 = vld [vmem:[%s8110_s21 + $0x1d8] sm:$0xff] }
 0x27a   : > { %v3323_v9 = vpop.f32.mrb[114].mxu0  ;;  %v3834_v11 = vadd.f32 %v3833_v4, %v3289_v62  ;;  %v5779_v13 = vpop.f32.mrb[114].mxu1 }
 0x27b   : > { %v3325_v38 = vpop.f32.mrb[115].mxu0  ;;  %v4330_v46 = vadd.f32 %v4202_v0, %v3842_v55  ;;  %v3845_v31 = vadd.f32 %v5779_v13, %v3300_v27  ;;  %v3836_v40 = vpop.f32.mrb[115].mxu1  ;;  %v3324_v50 = vadd.f32 %v8098_v2, %v3323_v9  ;;  %v4209_v55 = vld [vmem:[%s8110_s21 + $0x1c8] sm:$0xff] }
 0x27c   : > { %v4328_v54 = vadd.f32 %v4200_v44, %v3834_v11  ;;  %v3837_v5 = vadd.f32 %v3836_v40, %v3292_v28 }
 0x27d   : > { %4458 = vst [vmem:[%s8124_s10 + $0x190] sm:$0xff] %v4330_v46  ;;  %v4331_v29 = vadd.f32 %v4203_v47, %v3845_v31  ;;  %v4214_v31 = vld [vmem:[%s8110_s21 + $0x1f0] sm:$0xff] }
 0x27e   : > { %4456 = vst [vmem:[%s8124_s10 + $0x180] sm:$0xff] %v4328_v54  ;;  %v4329_v20 = vadd.f32 %v4201_v43, %v3837_v5  ;;  %v4212_v43 = vld [vmem:[%s8110_s21 + $0x1e0] sm:$0xff] }
 0x27f   : > { %4459 = vst [vmem:[%s8124_s10 + $0x198] sm:$0xff] %v4331_v29 }
 0x280   : > { %v3328_v63 = vpop.f32.mrb[116].mxu0  ;;  %4457 = vst [vmem:[%s8124_s10 + $0x188] sm:$0xff] %v4329_v20  ;;  %v5782_v7 = vpop.f32.mrb[116].mxu1 }
 0x281   : > { %v3330_v49 = vpop.f32.mrb[117].mxu0  ;;  %v3858_v48 = vadd.f32 %v5782_v7, %v3313_v14  ;;  %v3849_v16 = vpop.f32.mrb[117].mxu1  ;;  %v3329_v37 = vadd.f32 %v8098_v2, %v3328_v63  ;;  %v4215_v7 = vld [vmem:[%s8110_s21 + $0x1f8] sm:$0xff] }
 0x282   : > { %v3331_v34 = vpop.f32.mrb[118].mxu0  ;;  %v3850_v59 = vadd.f32 %v3849_v16, %v3305_v51  ;;  %v5783_v33 = vpop.f32.mrb[118].mxu1  ;;  %v4213_v49 = vld [vmem:[%s8110_s21 + $0x1e8] sm:$0xff] }
 0x283   : > { %v3333_v30 = vpop.f32.mrb[119].mxu0  ;;  %v4334_v10 = vadd.f32 %v4206_v1, %v3858_v48  ;;  %v3861_v17 = vadd.f32 %v5783_v33, %v3316_v24  ;;  %v3852_v39 = vpop.f32.mrb[119].mxu1  ;;  %v3332_v15 = vadd.f32 %v8098_v2, %v3331_v34 }
 0x284   : > { %v4332_v45 = vadd.f32 %v4204_v3, %v3850_v59  ;;  %v3853_v42 = vadd.f32 %v3852_v39, %v3308_v60 }
 0x285   : > { %4462 = vst [vmem:[%s8124_s10 + $0x1b0] sm:$0xff] %v4334_v10  ;;  %v4335_v19 = vadd.f32 %v4207_v52, %v3861_v17  ;;  %v4216_v17 = vld [vmem:[%s8110_s21 + $0x200] sm:$0xff] }
 0x286   : > { %4460 = vst [vmem:[%s8124_s10 + $0x1a0] sm:$0xff] %v4332_v45  ;;  %v4333_v57 = vadd.f32 %v4205_v23, %v3853_v42 }
 0x287   : > { %4463 = vst [vmem:[%s8124_s10 + $0x1b8] sm:$0xff] %v4335_v19 }
 0x288   : > { %v3336_v36 = vpop.f32.mrb[120].mxu0  ;;  %4461 = vst [vmem:[%s8124_s10 + $0x1a8] sm:$0xff] %v4333_v57  ;;  %v5786_v22 = vpop.f32.mrb[120].mxu1 }
 0x289   : > { %v3338_v58 = vpop.f32.mrb[121].mxu0  ;;  %v3874_v41 = vadd.f32 %v5786_v22, %v3329_v37  ;;  %v3865_v12 = vpop.f32.mrb[121].mxu1  ;;  %v3337_v9 = vadd.f32 %v8098_v2, %v3336_v36  ;;  %v4217_v37 = vld [vmem:[%s8110_s21 + $0x208] sm:$0xff] }
 0x28a   : > { %v3339_v21 = vpop.f32.mrb[122].mxu0  ;;  %v3866_v61 = vadd.f32 %v3865_v12, %v3321_v32  ;;  %v5787_v62 = vpop.f32.mrb[122].mxu1  ;;  %v4218_v12 = vld [vmem:[%s8110_s21 + $0x210] sm:$0xff] }
 0x28b   : > { %v3341_v35 = vpop.f32.mrb[123].mxu0  ;;  %v4338_v0 = vadd.f32 %v4210_v25, %v3874_v41  ;;  %v3877_v6 = vadd.f32 %v5787_v62, %v3332_v15  ;;  %v3868_v27 = vpop.f32.mrb[123].mxu1  ;;  %v3340_v5 = vadd.f32 %v8098_v2, %v3339_v21 }
 0x28c   : > { %v4336_v4 = vadd.f32 %v4208_v56, %v3866_v61  ;;  %v3869_v44 = vadd.f32 %v3868_v27, %v3324_v50  ;;  %v4219_v35 = vld [vmem:[%s8110_s21 + $0x218] sm:$0xff] }
 0x28d   : > { %4466 = vst [vmem:[%s8124_s10 + $0x1d0] sm:$0xff] %v4338_v0  ;;  %v4339_v28 = vadd.f32 %v4211_v53, %v3877_v6 }
 0x28e   : > { %4464 = vst [vmem:[%s8124_s10 + $0x1c0] sm:$0xff] %v4336_v4  ;;  %v4337_v11 = vadd.f32 %v4209_v55, %v3869_v44 }
 0x28f   : > { %4467 = vst [vmem:[%s8124_s10 + $0x1d8] sm:$0xff] %v4339_v28 }
 0x290   : > { %v3344_v13 = vpop.f32.mrb[124].mxu0  ;;  %4465 = vst [vmem:[%s8124_s10 + $0x1c8] sm:$0xff] %v4337_v11  ;;  %v5790_v38 = vpop.f32.mrb[124].mxu1 }
 0x291   : > { %v3345_v47 = vadd.f32 %v8098_v2, %v3344_v13  ;;  %v3346_v46 = vpop.f32.mrb[125].mxu0  ;;  %v3881_v40 = vpop.f32.mrb[125].mxu1  ;;  %v4220_v13 = vld [vmem:[%s8110_s21 + $0x220] sm:$0xff] }
 0x292   : > { %v3347_v54 = vpop.f32.mrb[126].mxu0  ;;  %v3882_v20 = vadd.f32 %v3881_v40, %v3337_v9  ;;  %v5791_v63 = vpop.f32.mrb[126].mxu1  ;;  %v8434_v46 = vld [vmem:[%s8980_s5] ss:$0 sm:$0xff] }
 0x293   : > { %v3890_v29 = vadd.f32 %v5790_v38, %v3345_v47  ;;  %v3348_v14 = vadd.f32 %v8098_v2, %v3347_v54  ;;  %v3349_v51 = vpop.f32.mrb[127].mxu0  ;;  %v3884_v1 = vpop.f32.mrb[127].mxu1  ;;  %v4221_v54 = vld [vmem:[%s8110_s21 + $0x228] sm:$0xff] }
 0x294   : > { %v4340_v48 = vadd.f32 %v4212_v43, %v3882_v20  ;;  %v3885_v3 = vadd.f32 %v3884_v1, %v3340_v5  ;;  %v4222_v1 = vld [vmem:[%s8110_s21 + $0x230] sm:$0xff] }
 0x295   : > { %v4342_v24 = vadd.f32 %v4214_v31, %v3890_v29  ;;  %v3893_v16 = vadd.f32 %v5791_v63, %v3348_v14 }
 0x296   : > { %4468 = vst [vmem:[%s8124_s10 + $0x1e0] sm:$0xff] %v4340_v48  ;;  %v4341_v60 = vadd.f32 %v4213_v49, %v3885_v3 }
 0x297   : > { %4470 = vst [vmem:[%s8124_s10 + $0x1f0] sm:$0xff] %v4342_v24  ;;  %v4343_v34 = vadd.f32 %v4215_v7, %v3893_v16 }
 0x298   : > { %v3352_v59 = vpop.f32.mrb[128].mxu0  ;;  %4469 = vst [vmem:[%s8124_s10 + $0x1e8] sm:$0xff] %v4341_v60  ;;  %v5794_v52 = vpop.f32.mrb[128].mxu1  ;;  %v4223_v60 = vld [vmem:[%s8110_s21 + $0x238] sm:$0xff] }
 0x299   : > { %4471 = vst [vmem:[%s8124_s10 + $0x1f8] sm:$0xff] %v4343_v34  ;;  %v3353_v33 = vadd.f32 %v8098_v2, %v3352_v59  ;;  %v3354_v30 = vpop.f32.mrb[129].mxu0  ;;  %v3897_v10 = vpop.f32.mrb[129].mxu1 }
 0x29a   : > { %v3355_v39 = vpop.f32.mrb[130].mxu0  ;;  %v5795_v42 = vpop.f32.mrb[130].mxu1 }
 0x29b   : > { %v3898_v23 = vadd.f32 %v3897_v10, %v3353_v33  ;;  %v3356_v45 = vadd.f32 %v8098_v2, %v3355_v39  ;;  %v3357_v19 = vpop.f32.mrb[131].mxu0  ;;  %v3900_v57 = vpop.f32.mrb[131].mxu1 }
 0x29d   : > { %v4344_v36 = vadd.f32 %v4216_v17, %v3898_v23  ;;  %v3901_v32 = vadd.f32 %v3900_v57, %v3356_v45  ;;  %v4224_v45 = vld [vmem:[%s8110_s21 + $0x240] sm:$0xff] }
 0x29f   : > { %4472 = vst [vmem:[%s8124_s10 + $0x200] sm:$0xff] %v4344_v36  ;;  %v4345_v22 = vadd.f32 %v4217_v37, %v3901_v32 }
 0x2a0   : > { %v3360_v25 = vpop.f32.mrb[132].mxu0  ;;  %v5798_v15 = vpop.f32.mrb[132].mxu1 }
 0x2a1   : > { %4473 = vst [vmem:[%s8124_s10 + $0x208] sm:$0xff] %v4345_v22  ;;  %v3361_v58 = vadd.f32 %v8098_v2, %v3360_v25  ;;  %v3362_v41 = vpop.f32.mrb[133].mxu0  ;;  %v3913_v56 = vpop.f32.mrb[133].mxu1  ;;  %v4225_v22 = vld [vmem:[%s8110_s21 + $0x248] sm:$0xff] }
 0x2a2   : > { %v3363_v21 = vpop.f32.mrb[134].mxu0  ;;  %v5799_v62 = vpop.f32.mrb[134].mxu1 }
 0x2a3   : > { %v3906_v50 = vadd.f32 %v5794_v52, %v3361_v58  ;;  %v3364_v61 = vadd.f32 %v8098_v2, %v3363_v21  ;;  %v3365_v53 = vpop.f32.mrb[135].mxu0  ;;  %v3916_v0 = vpop.f32.mrb[135].mxu1 }
 0x2a5   : > { %v4346_v6 = vadd.f32 %v4218_v12, %v3906_v50  ;;  %v3909_v27 = vadd.f32 %v5795_v42, %v3364_v61  ;;  %v4226_v61 = vld [vmem:[%s8110_s21 + $0x250] sm:$0xff] }
 0x2a7   : > { %4474 = vst [vmem:[%s8124_s10 + $0x210] sm:$0xff] %v4346_v6  ;;  %v4347_v55 = vadd.f32 %v4219_v35, %v3909_v27 }
 0x2a8   : > { %v3368_v4 = vpop.f32.mrb[136].mxu0  ;;  %v5802_v28 = vpop.f32.mrb[136].mxu1 }
 0x2a9   : > { %4475 = vst [vmem:[%s8124_s10 + $0x218] sm:$0xff] %v4347_v55  ;;  %v3369_v44 = vadd.f32 %v8098_v2, %v3368_v4  ;;  %v3370_v11 = vpop.f32.mrb[137].mxu0  ;;  %v3929_v9 = vpop.f32.mrb[137].mxu1  ;;  %v4227_v55 = vld [vmem:[%s8110_s21 + $0x258] sm:$0xff] }
 0x2aa   : > { %v3371_v47 = vpop.f32.mrb[138].mxu0  ;;  %v5803_v40 = vpop.f32.mrb[138].mxu1 }
 0x2ab   : > { %v3914_v38 = vadd.f32 %v3913_v56, %v3369_v44  ;;  %v3372_v31 = vadd.f32 %v8434_v46, %v3371_v47  ;;  %v3373_v43 = vpop.f32.mrb[139].mxu0  ;;  %v3932_v5 = vpop.f32.mrb[139].mxu1 }
 0x2ad   : > { %v4348_v2 = vadd.f32 %v4220_v13, %v3914_v38  ;;  %v3917_v29 = vadd.f32 %v3916_v0, %v3372_v31  ;;  %v4228_v31 = vld [vmem:[%s8110_s21 + $0x260] sm:$0xff] }
 0x2af   : > { %4476 = vst [vmem:[%s8124_s10 + $0x220] sm:$0xff] %v4348_v2  ;;  %v4349_v20 = vadd.f32 %v4221_v54, %v3917_v29 }
 0x2b0   : > { %v3376_v14 = vpop.f32.mrb[140].mxu0  ;;  %v8441_v51 = vpop.f32.mrb[140].mxu1 }
 0x2b1   : > { %4477 = vst [vmem:[%s8124_s10 + $0x228] sm:$0xff] %v4349_v20  ;;  %v3377_v63 = vadd.f32 %v8434_v46, %v3376_v14  ;;  %v3378_v7 = vpop.f32.mrb[141].mxu0  ;;  %v3945_v49 = vpop.f32.mrb[141].mxu1  ;;  %v4229_v20 = vld [vmem:[%s8110_s21 + $0x268] sm:$0xff] }
 0x2b2   : > { %v3379_v24 = vpop.f32.mrb[142].mxu0  ;;  %v8445_v3 = vpop.f32.mrb[142].mxu1 }
 0x2b3   : > { %v3922_v48 = vadd.f32 %v5798_v15, %v3377_v63  ;;  %v3380_v16 = vadd.f32 %v8434_v46, %v3379_v24  ;;  %v3381_v34 = vpop.f32.mrb[143].mxu0  ;;  %v3948_v59 = vpop.f32.mrb[143].mxu1 }
 0x2b4   : > { %v4230_v34 = vld [vmem:[%s8110_s21 + $0x270] sm:$0xff] }
 0x2b5   : > { %v4350_v33 = vadd.f32 %v4222_v1, %v3922_v48  ;;  %v3925_v52 = vadd.f32 %v5799_v62, %v3380_v16 }
 0x2b7   : > { %4478 = vst [vmem:[%s8124_s10 + $0x230] sm:$0xff] %v4350_v33  ;;  %v4351_v30 = vadd.f32 %v4223_v60, %v3925_v52 }
 0x2b8   : > { %v3384_v10 = vpop.f32.mrb[144].mxu0  ;;  %v8451_v39 = vpop.f32.mrb[144].mxu1 }
 0x2b9   : > { %4479 = vst [vmem:[%s8124_s10 + $0x238] sm:$0xff] %v4351_v30  ;;  %v3385_v17 = vadd.f32 %v8434_v46, %v3384_v10  ;;  %v3386_v23 = vpop.f32.mrb[145].mxu0  ;;  %v8454_v42 = vpop.f32.mrb[145].mxu1 }
 0x2ba   : > { %v3387_v19 = vpop.f32.mrb[146].mxu0  ;;  %v8457_v36 = vpop.f32.mrb[146].mxu1 }
 0x2bb   : > { %v3930_v57 = vadd.f32 %v3929_v9, %v3385_v17  ;;  %v3388_v37 = vadd.f32 %v8434_v46, %v3387_v19  ;;  %v3389_v32 = vpop.f32.mrb[147].mxu0  ;;  %v8460_v25 = vpop.f32.mrb[147].mxu1  ;;  %v4231_v17 = vld [vmem:[%s8110_s21 + $0x278] sm:$0xff] }
 0x2bc   : > { %v9048_v32 = vld [vmem:[#allocation17_spill] sm:$0xff] }
 0x2bd   : > { %v4352_v58 = vadd.f32 %v4224_v45, %v3930_v57  ;;  %v3933_v15 = vadd.f32 %v3932_v5, %v3388_v37  ;;  %v3489_v37 = vadd.f32 %v8434_v46, %v7886_v8  ;;  %v4248_v8 = vld [vmem:[%s8110_s21 + $0x300] sm:$0xff] }
 0x2bf   : > { %4480 = vst [vmem:[%s8124_s10 + $0x240] sm:$0xff] %v4352_v58  ;;  %v4353_v41 = vadd.f32 %v4225_v22, %v3933_v15  ;;  %v3481_v22 = vadd.f32 %v8434_v46, %v9048_v32 }
 0x2c0   : > { %v3392_v12 = vpop.f32.mrb[148].mxu0  ;;  %v8465_v21 = vpop.f32.mrb[148].mxu1 }
 0x2c1   : > { %4481 = vst [vmem:[%s8124_s10 + $0x248] sm:$0xff] %v4353_v41  ;;  %v3393_v56 = vadd.f32 %v8434_v46, %v3392_v12  ;;  %v3394_v50 = vpop.f32.mrb[149].mxu0  ;;  %v8468_v62 = vpop.f32.mrb[149].mxu1  ;;  %v4250_v41 = vld [vmem:[%s8110_s21 + $0x310] sm:$0xff] }
 0x2c2   : > { %v3395_v53 = vpop.f32.mrb[150].mxu0  ;;  %v8471_v6 = vpop.f32.mrb[150].mxu1 }
 0x2c3   : > { %v3938_v35 = vadd.f32 %v5802_v28, %v3393_v56  ;;  %v3396_v0 = vadd.f32 %v8434_v46, %v3395_v53  ;;  %v3397_v27 = vpop.f32.mrb[151].mxu0  ;;  %v8474_v4 = vpop.f32.mrb[151].mxu1  ;;  %v4232_v56 = vld [vmem:[%s8110_s21 + $0x280] sm:$0xff] }
 0x2c5   : > { %v4354_v44 = vadd.f32 %v4226_v61, %v3938_v35  ;;  %v3941_v11 = vadd.f32 %v5803_v40, %v3396_v0  ;;  %v3484_v35 = vadd.f32 %v8434_v46, %v7862_v18 }
 0x2c7   : > { %4482 = vst [vmem:[%s8124_s10 + $0x250] sm:$0xff] %v4354_v44  ;;  %v4355_v13 = vadd.f32 %v4227_v55, %v3941_v11  ;;  %v4251_v11 = vld [vmem:[%s8110_s21 + $0x318] sm:$0xff] }
 0x2c8   : > { %v3400_v9 = vpop.f32.mrb[152].mxu0  ;;  %v8479_v38 = vpop.f32.mrb[152].mxu1 }
 0x2c9   : > { %4483 = vst [vmem:[%s8124_s10 + $0x258] sm:$0xff] %v4355_v13  ;;  %v3401_v47 = vadd.f32 %v8434_v46, %v3400_v9  ;;  %v3402_v28 = vpop.f32.mrb[153].mxu0  ;;  %v8482_v43 = vpop.f32.mrb[153].mxu1  ;;  %v4233_v9 = vld [vmem:[%s8110_s21 + $0x288] sm:$0xff] }
 0x2ca   : > { %v3403_v54 = vpop.f32.mrb[154].mxu0  ;;  %v8485_v40 = vpop.f32.mrb[154].mxu1 }
 0x2cb   : > { %v3946_v5 = vadd.f32 %v3945_v49, %v3401_v47  ;;  %v3404_v2 = vadd.f32 %v8434_v46, %v3403_v54  ;;  %v3405_v29 = vpop.f32.mrb[155].mxu0  ;;  %v8488_v14 = vpop.f32.mrb[155].mxu1 }
 0x2cd   : > { %v4356_v63 = vadd.f32 %v4228_v31, %v3946_v5  ;;  %v3949_v7 = vadd.f32 %v3948_v59, %v3404_v2  ;;  %v4249_v31 = vld [vmem:[%s8110_s21 + $0x308] sm:$0xff] }
 0x2cf   : > { %4484 = vst [vmem:[%s8124_s10 + $0x260] sm:$0xff] %v4356_v63  ;;  %v4357_v1 = vadd.f32 %v4229_v20, %v3949_v7  ;;  %v9049_v63 = vld [vmem:[#allocation20_spill] sm:$0xff] }
 0x2d0   : > { %v3408_v24 = vpop.f32.mrb[156].mxu0  ;;  %v8493_v16 = vpop.f32.mrb[156].mxu1  ;;  %v3505_v7 = vadd.f32 %v8434_v46, %v9049_v63 }
 0x2d1   : > { %4485 = vst [vmem:[%s8124_s10 + $0x268] sm:$0xff] %v4357_v1  ;;  %v3409_v48 = vadd.f32 %v8434_v46, %v3408_v24  ;;  %v3410_v49 = vpop.f32.mrb[157].mxu0  ;;  %v8496_v60 = vpop.f32.mrb[157].mxu1  ;;  %v9050_v24 = vld [vmem:[#allocation18_spill] sm:$0xff] }
 0x2d2   : > { %v3411_v33 = vpop.f32.mrb[158].mxu0  ;;  %v8500_v30 = vpop.f32.mrb[158].mxu1 }
 0x2d3   : > { %v3954_v52 = vadd.f32 %v8441_v51, %v3409_v48  ;;  %v3412_v59 = vadd.f32 %v8434_v46, %v3411_v33  ;;  %v3413_v10 = vpop.f32.mrb[159].mxu0  ;;  %v8503_v23 = vpop.f32.mrb[159].mxu1  ;;  %v3497_v48 = vadd.f32 %v8434_v46, %v9050_v24 }
 0x2d4   : > { %v4234_v10 = vld [vmem:[%s8110_s21 + $0x290] sm:$0xff] }
 0x2d5   : > { %v4358_v45 = vadd.f32 %v4230_v34, %v3954_v52  ;;  %v3957_v19 = vadd.f32 %v8445_v3, %v3412_v59  ;;  %v3492_v3 = vadd.f32 %v8434_v46, %v7894_v26  ;;  %v4254_v34 = vld [vmem:[%s8110_s21 + $0x330] sm:$0xff]  ;;  %v9051_v52 = vld [vmem:[#allocation21_spill] sm:$0xff] }
 0x2d6   : > { %v3508_v59 = vadd.f32 %v8434_v46, %v9051_v52 }
 0x2d7   : > { %4486 = vst [vmem:[%s8124_s10 + $0x270] sm:$0xff] %v4358_v45  ;;  %v4359_v57 = vadd.f32 %v4231_v17, %v3957_v19  ;;  %v4252_v19 = vld [vmem:[%s8110_s21 + $0x320] sm:$0xff] }
 0x2d8   : > { %v3416_v51 = vpop.f32.mrb[160].mxu0  ;;  %v5826_v15 = vpop.f32.mrb[160].mxu1 }
 0x2d9   : > { %4487 = vst [vmem:[%s8124_s10 + $0x278] sm:$0xff] %v4359_v57  ;;  %v3417_v58 = vadd.f32 %v8434_v46, %v3416_v51  ;;  %v3418_v12 = vpop.f32.mrb[161].mxu0  ;;  %v4034_v50 = vadd.f32 %v5826_v15, %v3489_v37  ;;  %v4025_v61 = vpop.f32.mrb[161].mxu1  ;;  %v9052_v37 = vld [vmem:[#allocation19_spill] sm:$0xff] }
 0x2da   : > { %v3419_v53 = vpop.f32.mrb[162].mxu0  ;;  %v4026_v27 = vadd.f32 %v4025_v61, %v3481_v22  ;;  %v5827_v44 = vpop.f32.mrb[162].mxu1  ;;  %v3500_v51 = vadd.f32 %v8434_v46, %v9052_v37 }
 0x2db   : > { %v3962_v0 = vadd.f32 %v8454_v42, %v3417_v58  ;;  %v3420_v55 = vadd.f32 %v8434_v46, %v3419_v53  ;;  %v3421_v26 = vpop.f32.mrb[163].mxu0  ;;  %v4378_v13 = vadd.f32 %v4250_v41, %v4034_v50  ;;  %v4037_v47 = vadd.f32 %v5827_v44, %v3492_v3  ;;  %v4028_v28 = vpop.f32.mrb[163].mxu1  ;;  %v4255_v41 = vld [vmem:[%s8110_s21 + $0x338] sm:$0xff] }
 0x2dc   : > { %v4376_v54 = vadd.f32 %v4248_v8, %v4026_v27  ;;  %v4029_v5 = vadd.f32 %v4028_v28, %v3484_v35  ;;  %v4253_v8 = vld [vmem:[%s8110_s21 + $0x328] sm:$0xff] }
 0x2dd   : > { %v4360_v18 = vadd.f32 %v4232_v56, %v3962_v0  ;;  %v3965_v42 = vadd.f32 %v8460_v25, %v3420_v55  ;;  %4506 = vst [vmem:[%s8124_s10 + $0x310] sm:$0xff] %v4378_v13  ;;  %v4379_v2 = vadd.f32 %v4251_v11, %v4037_v47  ;;  %v4235_v56 = vld [vmem:[%s8110_s21 + $0x298] sm:$0xff]  ;;  %v9053_v11 = vld [vmem:[#allocation24_spill] sm:$0xff] }
 0x2de   : > { %4504 = vst [vmem:[%s8124_s10 + $0x300] sm:$0xff] %v4376_v54  ;;  %v4377_v20 = vadd.f32 %v4249_v31, %v4029_v5  ;;  %v3521_v26 = vadd.f32 %v8434_v46, %v9053_v11  ;;  %v4258_v31 = vld [vmem:[%s8110_s21 + $0x350] sm:$0xff]  ;;  %v9055_v54 = vld [vmem:[#allocation25_spill] sm:$0xff]  ;;  %v4236_v5 = vld [vmem:[%s8110_s21 + $0x2a0] sm:$0xff] }
 0x2df   : > { %4488 = vst [vmem:[%s8124_s10 + $0x280] sm:$0xff] %v4360_v18  ;;  %v4361_v29 = vadd.f32 %v4233_v9, %v3965_v42  ;;  %4507 = vst [vmem:[%s8124_s10 + $0x318] sm:$0xff] %v4379_v2  ;;  %v9054_v9 = vld [vmem:[#allocation22_spill] sm:$0xff]  ;;  %v3524_v42 = vadd.f32 %v8434_v46, %v9055_v54 }
 0x2e0   : > { %v3424_v1 = vpop.f32.mrb[164].mxu0  ;;  %4505 = vst [vmem:[%s8124_s10 + $0x308] sm:$0xff] %v4377_v20  ;;  %v5830_v49 = vpop.f32.mrb[164].mxu1  ;;  %v3513_v47 = vadd.f32 %v8434_v46, %v9054_v9  ;;  %v4256_v20 = vld [vmem:[%s8110_s21 + $0x340] sm:$0xff] }
 0x2e1   : > { %4489 = vst [vmem:[%s8124_s10 + $0x288] sm:$0xff] %v4361_v29  ;;  %v3425_v25 = vadd.f32 %v8434_v46, %v3424_v1  ;;  %v3426_v33 = vpop.f32.mrb[165].mxu0  ;;  %v4050_v17 = vadd.f32 %v5830_v49, %v3505_v7  ;;  %v4041_v45 = vpop.f32.mrb[165].mxu1  ;;  %v9056_v7 = vld [vmem:[#allocation23_spill] sm:$0xff] }
 0x2e2   : > { %v3427_v57 = vpop.f32.mrb[166].mxu0  ;;  %v4042_v22 = vadd.f32 %v4041_v45, %v3497_v48  ;;  %v5831_v15 = vpop.f32.mrb[166].mxu1  ;;  %v3516_v1 = vadd.f32 %v8434_v46, %v9056_v7  ;;  %v4257_v45 = vld [vmem:[%s8110_s21 + $0x348] sm:$0xff] }
 0x2e3   : > { %v3970_v32 = vadd.f32 %v8451_v39, %v3425_v25  ;;  %v3428_v58 = vadd.f32 %v8434_v46, %v3427_v57  ;;  %v3429_v12 = vpop.f32.mrb[167].mxu0  ;;  %v4382_v3 = vadd.f32 %v4254_v34, %v4050_v17  ;;  %v4053_v50 = vadd.f32 %v5831_v15, %v3508_v59  ;;  %v4044_v61 = vpop.f32.mrb[167].mxu1  ;;  %v4259_v34 = vld [vmem:[%s8110_s21 + $0x358] sm:$0xff]  ;;  %v4237_v59 = vld [vmem:[%s8110_s21 + $0x2a8] sm:$0xff] }
 0x2e4   : > { %v4380_v35 = vadd.f32 %v4252_v19, %v4042_v22  ;;  %v4045_v0 = vadd.f32 %v4044_v61, %v3500_v51  ;;  %v9058_v12 = vld [vmem:[#allocation26_spill] sm:$0xff] }
 0x2e5   : > { %v4362_v53 = vadd.f32 %v4234_v10, %v3970_v32  ;;  %v3973_v39 = vadd.f32 %v8457_v36, %v3428_v58  ;;  %4510 = vst [vmem:[%s8124_s10 + $0x330] sm:$0xff] %v4382_v3  ;;  %v4383_v27 = vadd.f32 %v4255_v41, %v4053_v50  ;;  %v9057_v58 = vld [vmem:[#allocation28_spill] sm:$0xff]  ;;  %v3529_v3 = vadd.f32 %v8434_v46, %v9058_v12  ;;  %v4267_v12 = vld [vmem:[%s8110_s21 + $0x398] sm:$0xff] }
 0x2e6   : > { %4508 = vst [vmem:[%s8124_s10 + $0x320] sm:$0xff] %v4380_v35  ;;  %v4381_v44 = vadd.f32 %v4253_v8, %v4045_v0  ;;  %v3537_v15 = vadd.f32 %v8434_v46, %v9057_v58  ;;  %v4262_v50 = vld [vmem:[%s8110_s21 + $0x370] sm:$0xff]  ;;  %v9059_v8 = vld [vmem:[#allocation29_spill] sm:$0xff] }
 0x2e7   : > { %4490 = vst [vmem:[%s8124_s10 + $0x290] sm:$0xff] %v4362_v53  ;;  %v4363_v55 = vadd.f32 %v4235_v56, %v3973_v39  ;;  %4511 = vst [vmem:[%s8124_s10 + $0x338] sm:$0xff] %v4383_v27  ;;  %v3540_v53 = vadd.f32 %v8434_v46, %v9059_v8  ;;  %v4238_v35 = vld [vmem:[%s8110_s21 + $0x2b0] sm:$0xff]  ;;  %v4260_v27 = vld [vmem:[%s8110_s21 + $0x360] sm:$0xff] }
 0x2e8   : > { %v3432_v13 = vpop.f32.mrb[168].mxu0  ;;  %4509 = vst [vmem:[%s8124_s10 + $0x328] sm:$0xff] %v4381_v44  ;;  %v5834_v28 = vpop.f32.mrb[168].mxu1  ;;  %v9060_v44 = vld [vmem:[#allocation27_spill] sm:$0xff] }
 0x2e9   : > { %4491 = vst [vmem:[%s8124_s10 + $0x298] sm:$0xff] %v4363_v55  ;;  %v3433_v36 = vadd.f32 %v8434_v46, %v3432_v13  ;;  %v3434_v18 = vpop.f32.mrb[169].mxu0  ;;  %v4066_v2 = vadd.f32 %v5834_v28, %v3521_v26  ;;  %v4057_v29 = vpop.f32.mrb[169].mxu1  ;;  %v3532_v11 = vadd.f32 %v8434_v46, %v9060_v44  ;;  %v4265_v8 = vld [vmem:[%s8110_s21 + $0x388] sm:$0xff]  ;;  %v9065_v44 = vld [vmem:[#allocation36_spill] sm:$0xff] }
 0x2ea   : > { %v3435_v63 = vpop.f32.mrb[170].mxu0  ;;  %v4058_v48 = vadd.f32 %v4057_v29, %v3513_v47  ;;  %v5835_v49 = vpop.f32.mrb[170].mxu1  ;;  %v4239_v18 = vld [vmem:[%s8110_s21 + $0x2b8] sm:$0xff] }
 0x2eb   : > { %v3978_v24 = vadd.f32 %v8468_v62, %v3433_v36  ;;  %v3436_v25 = vadd.f32 %v8434_v46, %v3435_v63  ;;  %v3437_v33 = vpop.f32.mrb[171].mxu0  ;;  %v4386_v52 = vadd.f32 %v4258_v31, %v4066_v2  ;;  %v4069_v10 = vadd.f32 %v5835_v49, %v3524_v42  ;;  %v4060_v17 = vpop.f32.mrb[171].mxu1  ;;  %v4263_v36 = vld [vmem:[%s8110_s21 + $0x378] sm:$0xff]  ;;  %v9062_v49 = vld [vmem:[#allocation30_spill] sm:$0xff] }
 0x2ec   : > { %v4384_v57 = vadd.f32 %v4256_v20, %v4058_v48  ;;  %v4061_v37 = vadd.f32 %v4060_v17, %v3516_v1 }
 0x2ed   : > { %v4364_v19 = vadd.f32 %v4236_v5, %v3978_v24  ;;  %v3981_v62 = vadd.f32 %v8474_v4, %v3436_v25  ;;  %4514 = vst [vmem:[%s8124_s10 + $0x350] sm:$0xff] %v4386_v52  ;;  %v4387_v51 = vadd.f32 %v4259_v34, %v4069_v10  ;;  %v4261_v5 = vld [vmem:[%s8110_s21 + $0x368] sm:$0xff]  ;;  %v9061_v24 = vld [vmem:[#allocation32_spill] sm:$0xff]  ;;  %v3545_v34 = vadd.f32 %v8434_v46, %v9062_v49  ;;  %v9063_v10 = vld [vmem:[#allocation33_spill] sm:$0xff] }
 0x2ee   : > { %4512 = vst [vmem:[%s8124_s10 + $0x340] sm:$0xff] %v4384_v57  ;;  %v4385_v22 = vadd.f32 %v4257_v45, %v4061_v37  ;;  %v3553_v48 = vadd.f32 %v8434_v46, %v9061_v24  ;;  %v4266_v52 = vld [vmem:[%s8110_s21 + $0x390] sm:$0xff]  ;;  %v3556_v17 = vadd.f32 %v8434_v46, %v9063_v10  ;;  %v4240_v45 = vld [vmem:[%s8110_s21 + $0x2c0] sm:$0xff] }
 0x2ef   : > { %4492 = vst [vmem:[%s8124_s10 + $0x2a0] sm:$0xff] %v4364_v19  ;;  %v4365_v32 = vadd.f32 %v4237_v59, %v3981_v62  ;;  %4515 = vst [vmem:[%s8124_s10 + $0x358] sm:$0xff] %v4387_v51  ;;  %v4264_v62 = vld [vmem:[%s8110_s21 + $0x380] sm:$0xff]  ;;  %v9064_v51 = vld [vmem:[#allocation31_spill] sm:$0xff] }
 0x2f0   : > { %v3440_v41 = vpop.f32.mrb[172].mxu0  ;;  %4513 = vst [vmem:[%s8124_s10 + $0x348] sm:$0xff] %v4385_v22  ;;  %v5838_v56 = vpop.f32.mrb[172].mxu1 }
 0x2f1   : > { %4493 = vst [vmem:[%s8124_s10 + $0x2a8] sm:$0xff] %v4365_v32  ;;  %v3441_v4 = vadd.f32 %v8434_v46, %v3440_v41  ;;  %v3442_v61 = vpop.f32.mrb[173].mxu0  ;;  %v4082_v39 = vadd.f32 %v5838_v56, %v3537_v15  ;;  %v4073_v0 = vpop.f32.mrb[173].mxu1  ;;  %v3548_v32 = vadd.f32 %v8434_v46, %v9064_v51  ;;  %v4241_v56 = vld [vmem:[%s8110_s21 + $0x2c8] sm:$0xff] }
 0x2f2   : > { %v3443_v55 = vpop.f32.mrb[174].mxu0  ;;  %v4074_v13 = vadd.f32 %v4073_v0, %v3529_v3  ;;  %v5839_v47 = vpop.f32.mrb[174].mxu1 }
 0x2f3   : > { %v3986_v26 = vadd.f32 %v8465_v21, %v3441_v4  ;;  %v3444_v9 = vadd.f32 %v8434_v46, %v3443_v55  ;;  %v3445_v28 = vpop.f32.mrb[175].mxu0  ;;  %v4390_v31 = vadd.f32 %v4262_v50, %v4082_v39  ;;  %v4085_v54 = vadd.f32 %v5839_v47, %v3540_v53  ;;  %v4076_v42 = vpop.f32.mrb[175].mxu1 }
 0x2f4   : > { %v4388_v29 = vadd.f32 %v4260_v27, %v4074_v13  ;;  %v4077_v20 = vadd.f32 %v4076_v42, %v3532_v11  ;;  %v3569_v11 = vadd.f32 %v8434_v46, %v9065_v44  ;;  %v9066_v13 = vld [vmem:[#allocation34_spill] sm:$0xff] }
 0x2f5   : > { %v4366_v2 = vadd.f32 %v4238_v35, %v3986_v26  ;;  %v3989_v21 = vadd.f32 %v8471_v6, %v3444_v9  ;;  %4518 = vst [vmem:[%s8124_s10 + $0x370] sm:$0xff] %v4390_v31  ;;  %v4391_v63 = vadd.f32 %v4263_v36, %v4085_v54  ;;  %v3561_v9 = vadd.f32 %v8434_v46, %v9066_v13  ;;  %v4270_v36 = vld [vmem:[%s8110_s21 + $0x3b0] sm:$0xff]  ;;  %v9067_v31 = vld [vmem:[#allocation37_spill] sm:$0xff] }
 0x2f6   : > { %4516 = vst [vmem:[%s8124_s10 + $0x360] sm:$0xff] %v4388_v29  ;;  %v4389_v1 = vadd.f32 %v4261_v5, %v4077_v20  ;;  %v4242_v54 = vld [vmem:[%s8110_s21 + $0x2d0] sm:$0xff] }
 0x2f7   : > { %4494 = vst [vmem:[%s8124_s10 + $0x2b0] sm:$0xff] %v4366_v2  ;;  %v4367_v7 = vadd.f32 %v4239_v18, %v3989_v21  ;;  %4519 = vst [vmem:[%s8124_s10 + $0x378] sm:$0xff] %v4391_v63  ;;  %v3572_v18 = vadd.f32 %v8434_v46, %v9067_v31  ;;  %v4268_v2 = vld [vmem:[%s8110_s21 + $0x3a0] sm:$0xff]  ;;  %v9068_v21 = vld [vmem:[#allocation35_spill] sm:$0xff] }
 0x2f8   : > { %v3448_v25 = vpop.f32.mrb[176].mxu0  ;;  %4517 = vst [vmem:[%s8124_s10 + $0x368] sm:$0xff] %v4389_v1  ;;  %v5842_v33 = vpop.f32.mrb[176].mxu1  ;;  %v3564_v20 = vadd.f32 %v8434_v46, %v9068_v21 }
 0x2f9   : > { %4495 = vst [vmem:[%s8124_s10 + $0x2b8] sm:$0xff] %v4367_v7  ;;  %v3449_v6 = vadd.f32 %v8434_v46, %v3448_v25  ;;  %v3450_v59 = vpop.f32.mrb[177].mxu0  ;;  %v4098_v19 = vadd.f32 %v5842_v33, %v3553_v48  ;;  %v4089_v57 = vpop.f32.mrb[177].mxu1  ;;  %v4271_v48 = vld [vmem:[%s8110_s21 + $0x3b8] sm:$0xff] }
 0x2fa   : > { %v3451_v37 = vpop.f32.mrb[178].mxu0  ;;  %v4090_v58 = vadd.f32 %v4089_v57, %v3545_v34  ;;  %v5843_v41 = vpop.f32.mrb[178].mxu1  ;;  %v4243_v34 = vld [vmem:[%s8110_s21 + $0x2d8] sm:$0xff] }
 0x2fb   : > { %v3994_v22 = vadd.f32 %v8482_v43, %v3449_v6  ;;  %v3452_v15 = vadd.f32 %v8434_v46, %v3451_v37  ;;  %v3453_v3 = vpop.f32.mrb[179].mxu0  ;;  %v4394_v4 = vadd.f32 %v4266_v52, %v4098_v19  ;;  %v4101_v50 = vadd.f32 %v5843_v41, %v3556_v17  ;;  %v4092_v61 = vpop.f32.mrb[179].mxu1  ;;  %v4269_v52 = vld [vmem:[%s8110_s21 + $0x3a8] sm:$0xff] }
 0x2fc   : > { %v4392_v35 = vadd.f32 %v4264_v62, %v4090_v58  ;;  %v4093_v39 = vadd.f32 %v4092_v61, %v3548_v32  ;;  %v9069_v62 = vld [vmem:[#allocation7_spill] sm:$0xff]  ;;  %v9070_v32 = vld [vmem:[#allocation6_spill] sm:$0xff] }
 0x2fd   : > { %v4368_v53 = vadd.f32 %v4240_v45, %v3994_v22  ;;  %v3997_v43 = vadd.f32 %v8488_v14, %v3452_v15  ;;  %4522 = vst [vmem:[%s8124_s10 + $0x390] sm:$0xff] %v4394_v4  ;;  %v4395_v0 = vadd.f32 %v4267_v12, %v4101_v50  ;;  %v3585_v37 = vadd.f32 %v8434_v46, %v9069_v62  ;;  %v4274_v15 = vld [vmem:[%s8110_s21 + $0x3d0] sm:$0xff]  ;;  %v4244_v4 = vld [vmem:[%s8110_s21 + $0x2e0] sm:$0xff]  ;;  %v4247_v62 = vld [vmem:[%s8110_s21 + $0x2f8] sm:$0xff] }
 0x2fe   : > { %4520 = vst [vmem:[%s8124_s10 + $0x380] sm:$0xff] %v4392_v35  ;;  %v4393_v55 = vadd.f32 %v4265_v8, %v4093_v39  ;;  %v3577_v22 = vadd.f32 %v8434_v46, %v9070_v32  ;;  %v9071_v12 = vld [vmem:[#allocation8_spill] sm:$0xff]  ;;  %v4272_v61 = vld [vmem:[%s8110_s21 + $0x3c0] sm:$0xff]  ;;  %v4277_v32 = vld [vmem:[%s8110_s21 + $0x3e8] sm:$0xff] }
 0x2ff   : > { %4496 = vst [vmem:[%s8124_s10 + $0x2c0] sm:$0xff] %v4368_v53  ;;  %v4369_v27 = vadd.f32 %v4241_v56, %v3997_v43  ;;  %4523 = vst [vmem:[%s8124_s10 + $0x398] sm:$0xff] %v4395_v0  ;;  %v3588_v3 = vadd.f32 %v8434_v46, %v9071_v12  ;;  %v9072_v53 = vld [vmem:[#allocation38_spill] sm:$0xff]  ;;  %v4829_v12 = vld [vmem:[%s8124_s10 + $0x8] sm:$0xff] (%p6292_p5) }
 0x300   : > { %v3456_v26 = vpop.f32.mrb[180].mxu0  ;;  %4521 = vst [vmem:[%s8124_s10 + $0x388] sm:$0xff] %v4393_v55  ;;  %v5846_v47 = vpop.f32.mrb[180].mxu1  ;;  %v3580_v35 = vadd.f32 %v8434_v46, %v9072_v53  ;;  %v4275_v55 = vld [vmem:[%s8110_s21 + $0x3d8] sm:$0xff]  ;;  %4830 = vst [vmem:[%s8710_s30 + $0x8] sm:$0xff] (%p6292_p5), %v4829_v12  ;;  %v4843_v53 = vld [vmem:[%s8124_s10 + $0x40] sm:$0xff] (%p6292_p5) }
 0x301   : > { %4497 = vst [vmem:[%s8124_s10 + $0x2c8] sm:$0xff] %v4369_v27  ;;  %v3457_v14 = vadd.f32 %v8434_v46, %v3456_v26  ;;  %v3458_v28 = vpop.f32.mrb[181].mxu0  ;;  %v4114_v42 = vadd.f32 %v5846_v47, %v3569_v11  ;;  %v4105_v5 = vpop.f32.mrb[181].mxu1  ;;  %v4245_v26 = vld [vmem:[%s8110_s21 + $0x2e8] sm:$0xff]  ;;  %4844 = vst [vmem:[%s8710_s30 + $0x40] sm:$0xff] (%p6292_p5), %v4843_v53  ;;  %v4971_v53 = vld [vmem:[%s8124_s10 + $0x240] sm:$0xff] (%p6292_p5) }
 0x302   : > { %v3459_v29 = vpop.f32.mrb[182].mxu0  ;;  %v4106_v7 = vadd.f32 %v4105_v5, %v3561_v9  ;;  %v5847_v24 = vpop.f32.mrb[182].mxu1  ;;  %v4957_v12 = vld [vmem:[%s8124_s10 + $0x208] sm:$0xff] (%p6292_p5)  ;;  %4972 = vst [vmem:[%s8710_s30 + $0x440] sm:$0xff] (%p6292_p5), %v4971_v53 }
 0x303   : > { %v4002_v63 = vadd.f32 %v8479_v38, %v3457_v14  ;;  %v3460_v1 = vadd.f32 %v8434_v46, %v3459_v29  ;;  %v3461_v25 = vpop.f32.mrb[183].mxu0  ;;  %v4398_v49 = vadd.f32 %v4270_v36, %v4114_v42  ;;  %v4117_v6 = vadd.f32 %v5847_v24, %v3572_v18  ;;  %v4108_v33 = vpop.f32.mrb[183].mxu1  ;;  %v4273_v14 = vld [vmem:[%s8110_s21 + $0x3c8] sm:$0xff]  ;;  %v9074_v29 = vld [vmem:[#allocation9_spill] sm:$0xff]  ;;  %4958 = vst [vmem:[%s8710_s30 + $0x408] sm:$0xff] (%p6292_p5), %v4957_v12 }
 0x304   : > { %v4396_v10 = vadd.f32 %v4268_v2, %v4106_v7  ;;  %v4109_v17 = vadd.f32 %v4108_v33, %v3564_v20  ;;  %v9073_v42 = vld [vmem:[#allocation11_spill] sm:$0xff]  ;;  %v3593_v21 = vadd.f32 %v8434_v46, %v9074_v29  ;;  %v9076_v33 = vld [vmem:[#allocation10_spill] sm:$0xff]  ;;  %v4889_v29 = vld [vmem:[%s8124_s10 + $0xf8] sm:$0xff] (%p6292_p5) }
 0x305   : > { %v4370_v59 = vadd.f32 %v4242_v54, %v4002_v63  ;;  %v4005_v38 = vadd.f32 %v8485_v40, %v3460_v1  ;;  %4526 = vst [vmem:[%s8124_s10 + $0x3b0] sm:$0xff] %v4398_v49  ;;  %v4399_v45 = vadd.f32 %v4271_v48, %v4117_v6  ;;  %v3601_v5 = vadd.f32 %v8434_v46, %v9073_v42  ;;  %v4278_v63 = vld [vmem:[%s8110_s21 + $0x3f0] sm:$0xff]  ;;  %v4883_v42 = vld [vmem:[%s8124_s10 + $0xe0] sm:$0xff] (%p6292_p5) }
 0x306   : > { %4524 = vst [vmem:[%s8124_s10 + $0x3a0] sm:$0xff] %v4396_v10  ;;  %v4397_v57 = vadd.f32 %v4269_v52, %v4109_v17  ;;  %v9075_v1 = vld [vmem:[#allocation12_spill] sm:$0xff]  ;;  %v3596_v52 = vadd.f32 %v8434_v46, %v9076_v33  ;;  %4884 = vst [vmem:[%s8710_s30 + $0x160] sm:$0xff] (%p6292_p5), %v4883_v42  ;;  %v4915_v33 = vld [vmem:[%s8124_s10 + $0x160] sm:$0xff] (%p6292_p5) }
 0x307   : > { %4498 = vst [vmem:[%s8124_s10 + $0x2d0] sm:$0xff] %v4370_v59  ;;  %v4371_v19 = vadd.f32 %v4243_v34, %v4005_v38  ;;  %4527 = vst [vmem:[%s8124_s10 + $0x3b8] sm:$0xff] %v4399_v45  ;;  %v3604_v24 = vadd.f32 %v8434_v46, %v9075_v1  ;;  %v4246_v48 = vld [vmem:[%s8110_s21 + $0x2f0] sm:$0xff]  ;;  %v4276_v34 = vld [vmem:[%s8110_s21 + $0x3e0] sm:$0xff] }
 0x308   : > { %v3464_v51 = vpop.f32.mrb[184].mxu0  ;;  %4525 = vst [vmem:[%s8124_s10 + $0x3a8] sm:$0xff] %v4397_v57  ;;  %v5850_v58 = vpop.f32.mrb[184].mxu1  ;;  %v4279_v45 = vld [vmem:[%s8110_s21 + $0x3f8] sm:$0xff]  ;;  %4890 = vst [vmem:[%s8710_s30 + $0x178] sm:$0xff] (%p6292_p5), %v4889_v29  ;;  %v4901_v1 = vld [vmem:[%s8124_s10 + $0x128] sm:$0xff] (%p6292_p5) }
 0x309   : > { %4499 = vst [vmem:[%s8124_s10 + $0x2d8] sm:$0xff] %v4371_v19  ;;  %v3465_v40 = vadd.f32 %v8434_v46, %v3464_v51  ;;  %v3466_v41 = vpop.f32.mrb[185].mxu0  ;;  %v4130_v56 = vadd.f32 %v5850_v58, %v3585_v37  ;;  %v4121_v50 = vpop.f32.mrb[185].mxu1  ;;  %4902 = vst [vmem:[%s8710_s30 + $0x228] sm:$0xff] (%p6292_p5), %v4901_v1  ;;  %v5029_v1 = vld [vmem:[%s8124_s10 + $0x328] sm:$0xff] (%p6292_p5) }
 0x30a   : > { %v3467_v8 = vpop.f32.mrb[186].mxu0  ;;  %v4122_v39 = vadd.f32 %v4121_v50, %v3577_v22  ;;  %v5851_v27 = vpop.f32.mrb[186].mxu1  ;;  %v4837_v50 = vld [vmem:[%s8124_s10 + $0x28] sm:$0xff] (%p6292_p5)  ;;  %4916 = vst [vmem:[%s8710_s30 + $0x260] sm:$0xff] (%p6292_p5), %v4915_v33  ;;  %5030 = vst [vmem:[%s8710_s30 + $0x628] sm:$0xff] (%p6292_p5), %v5029_v1  ;;  %v5043_v33 = vld [vmem:[%s8124_s10 + $0x360] sm:$0xff] (%p6292_p5) }
 0x30b   : > { %v4010_v43 = vadd.f32 %v8496_v60, %v3465_v40  ;;  %v3468_v0 = vadd.f32 %v8434_v46, %v3467_v8  ;;  %v3469_v44 = vpop.f32.mrb[187].mxu0  ;;  %v4402_v11 = vadd.f32 %v4274_v15, %v4130_v56  ;;  %v4133_v13 = vadd.f32 %v5851_v27, %v3588_v3  ;;  %v4124_v9 = vpop.f32.mrb[187].mxu1  ;;  %v4831_v3 = vld [vmem:[%s8124_s10 + $0x10] sm:$0xff] (%p6292_p5)  ;;  %v4835_v56 = vld [vmem:[%s8124_s10 + $0x20] sm:$0xff] (%p6292_p5)  ;;  %4838 = vst [vmem:[%s8710_s30 + $0x28] sm:$0xff] (%p6292_p5), %v4837_v50  ;;  %v4841_v8 = vld [vmem:[%s8124_s10 + $0x38] sm:$0xff] (%p6292_p5) }
 0x30c   : > { %v4400_v36 = vadd.f32 %v4272_v61, %v4122_v39  ;;  %v4125_v28 = vadd.f32 %v4124_v9, %v3580_v35  ;;  %4832 = vst [vmem:[%s8710_s30 + $0x10] sm:$0xff] (%p6292_p5), %v4831_v3  ;;  %4836 = vst [vmem:[%s8710_s30 + $0x20] sm:$0xff] (%p6292_p5), %v4835_v56  ;;  %v4839_v61 = vld [vmem:[%s8124_s10 + $0x30] sm:$0xff] (%p6292_p5)  ;;  %v4845_v35 = vld [vmem:[%s8124_s10 + $0x48] sm:$0xff] (%p6292_p5) }
 0x30d   : > { %v4372_v47 = vadd.f32 %v4244_v4, %v4010_v43  ;;  %v4013_v60 = vadd.f32 %v8503_v23, %v3468_v0  ;;  %4530 = vst [vmem:[%s8124_s10 + $0x3d0] sm:$0xff] %v4402_v11  ;;  %v4403_v31 = vadd.f32 %v4275_v55, %v4133_v13  ;;  %v4833_v4 = vld [vmem:[%s8124_s10 + $0x18] sm:$0xff] (%p6292_p5)  ;;  %4840 = vst [vmem:[%s8710_s30 + $0x30] sm:$0xff] (%p6292_p5), %v4839_v61  ;;  %v4847_v43 = vld [vmem:[%s8124_s10 + $0x50] sm:$0xff] (%p6292_p5) }
 0x30e   : > { %4528 = vst [vmem:[%s8124_s10 + $0x3c0] sm:$0xff] %v4400_v36  ;;  %v4401_v54 = vadd.f32 %v4273_v14, %v4125_v28  ;;  %4834 = vst [vmem:[%s8710_s30 + $0x18] sm:$0xff] (%p6292_p5), %v4833_v4  ;;  %v4849_v39 = vld [vmem:[%s8124_s10 + $0x58] sm:$0xff] (%p6292_p5)  ;;  %v4851_v0 = vld [vmem:[%s8124_s10 + $0x60] sm:$0xff] (%p6292_p5) }
 0x30f   : > { %4500 = vst [vmem:[%s8124_s10 + $0x2e0] sm:$0xff] %v4372_v47  ;;  %v4373_v18 = vadd.f32 %v4245_v26, %v4013_v60  ;;  %4531 = vst [vmem:[%s8124_s10 + $0x3d8] sm:$0xff] %v4403_v31  ;;  %v4853_v27 = vld [vmem:[%s8124_s10 + $0x68] sm:$0xff] (%p6292_p5)  ;;  %v4855_v55 = vld [vmem:[%s8124_s10 + $0x70] sm:$0xff] (%p6292_p5) }
 0x310   : > { %v3472_v2 = vpop.f32.mrb[188].mxu0  ;;  %4529 = vst [vmem:[%s8124_s10 + $0x3c8] sm:$0xff] %v4401_v54  ;;  %v5854_v20 = vpop.f32.mrb[188].mxu1  ;;  %4842 = vst [vmem:[%s8710_s30 + $0x38] sm:$0xff] (%p6292_p5), %v4841_v8  ;;  %v4857_v44 = vld [vmem:[%s8124_s10 + $0x78] sm:$0xff] (%p6292_p5)  ;;  %v4859_v11 = vld [vmem:[%s8124_s10 + $0x80] sm:$0xff] (%p6292_p5) }
 0x311   : > { %4501 = vst [vmem:[%s8124_s10 + $0x2e8] sm:$0xff] %v4373_v18  ;;  %v3473_v23 = vadd.f32 %v8434_v46, %v3472_v2  ;;  %v3474_v7 = vpop.f32.mrb[189].mxu0  ;;  %v4146_v25 = vadd.f32 %v5854_v20, %v3601_v5  ;;  %v4137_v49 = vpop.f32.mrb[189].mxu1  ;;  %4846 = vst [vmem:[%s8710_s30 + $0x48] sm:$0xff] (%p6292_p5), %v4845_v35  ;;  %v4861_v26 = vld [vmem:[%s8124_s10 + $0x88] sm:$0xff] (%p6292_p5)  ;;  %v4863_v13 = vld [vmem:[%s8124_s10 + $0x90] sm:$0xff] (%p6292_p5) }
 0x312   : > { %v3475_v6 = vpop.f32.mrb[190].mxu0  ;;  %v4138_v10 = vadd.f32 %v4137_v49, %v3593_v21  ;;  %v5855_v17 = vpop.f32.mrb[190].mxu1  ;;  %4848 = vst [vmem:[%s8710_s30 + $0x50] sm:$0xff] (%p6292_p5), %v4847_v43  ;;  %4850 = vst [vmem:[%s8710_s30 + $0x58] sm:$0xff] (%p6292_p5), %v4849_v39  ;;  %v4865_v9 = vld [vmem:[%s8124_s10 + $0x98] sm:$0xff] (%p6292_p5)  ;;  %v4867_v14 = vld [vmem:[%s8124_s10 + $0xa0] sm:$0xff] (%p6292_p5) }
 0x313   : > { %v4018_v59 = vadd.f32 %v8493_v16, %v3473_v23  ;;  %v3476_v38 = vadd.f32 %v8434_v46, %v3475_v6  ;;  %v3477_v19 = vpop.f32.mrb[191].mxu0  ;;  %v4406_v57 = vadd.f32 %v4278_v63, %v4146_v25  ;;  %v4149_v37 = vadd.f32 %v5855_v17, %v3604_v24  ;;  %v4140_v51 = vpop.f32.mrb[191].mxu1  ;;  %4542 = sbr.rel (!%p6292_p5) target bundleno = 846 (0x34e), region = 127  ;;  %4852 = vst [vmem:[%s8710_s30 + $0x60] sm:$0xff] (%p6292_p5), %v4851_v0  ;;  %v4869_v47 = vld [vmem:[%s8124_s10 + $0xa8] sm:$0xff] (%p6292_p5)  ;;  %v4871_v36 = vld [vmem:[%s8124_s10 + $0xb0] sm:$0xff] (%p6292_p5) }
 0x314   : > { %v4404_v40 = vadd.f32 %v4276_v34, %v4138_v10  ;;  %v4141_v58 = vadd.f32 %v4140_v51, %v3596_v52  ;;  %4854 = vst [vmem:[%s8710_s30 + $0x68] sm:$0xff] (%p6292_p5), %v4853_v27  ;;  %4856 = vst [vmem:[%s8710_s30 + $0x70] sm:$0xff] (%p6292_p5), %v4855_v55  ;;  %v4873_v60 = vld [vmem:[%s8124_s10 + $0xb8] sm:$0xff] (%p6292_p5)  ;;  %v4875_v28 = vld [vmem:[%s8124_s10 + $0xc0] sm:$0xff] (%p6292_p5) }
 0x315   : > { %v4374_v22 = vadd.f32 %v4246_v48, %v4018_v59  ;;  %v4021_v16 = vadd.f32 %v8500_v30, %v3476_v38  ;;  %4534 = vst [vmem:[%s8124_s10 + $0x3f0] sm:$0xff] %v4406_v57  ;;  %v4407_v15 = vadd.f32 %v4279_v45, %v4149_v37  ;;  %v4827_v30 = vld [vmem:[%s8124_s10] sm:$0xff] (%p6292_p5)  ;;  %4858 = vst [vmem:[%s8710_s30 + $0x78] sm:$0xff] (%p6292_p5), %v4857_v44  ;;  %v4877_v31 = vld [vmem:[%s8124_s10 + $0xc8] sm:$0xff] (%p6292_p5) }
 0x316   : > { %4532 = vst [vmem:[%s8124_s10 + $0x3e0] sm:$0xff] %v4404_v40  ;;  %v4405_v41 = vadd.f32 %v4277_v32, %v4141_v58  ;;  %4828 = vst [vmem:[%s8710_s30] sm:$0xff] (%p6292_p5), %v4827_v30  ;;  %v4879_v18 = vld [vmem:[%s8124_s10 + $0xd0] sm:$0xff] (%p6292_p5)  ;;  %v4881_v54 = vld [vmem:[%s8124_s10 + $0xd8] sm:$0xff] (%p6292_p5) }
 0x317   : > { %4502 = vst [vmem:[%s8124_s10 + $0x2f0] sm:$0xff] %v4374_v22  ;;  %v4375_v46 = vadd.f32 %v4247_v62, %v4021_v16  ;;  %4535 = vst [vmem:[%s8124_s10 + $0x3f8] sm:$0xff] %v4407_v15  ;;  %v4885_v5 = vld [vmem:[%s8124_s10 + $0xe8] sm:$0xff] (%p6292_p5)  ;;  %v4887_v2 = vld [vmem:[%s8124_s10 + $0xf0] sm:$0xff] (%p6292_p5) }
 0x318   : > { %4533 = vst [vmem:[%s8124_s10 + $0x3e8] sm:$0xff] %v4405_v41  ;;  %4860 = vst [vmem:[%s8710_s30 + $0x100] sm:$0xff] (%p6292_p5), %v4859_v11  ;;  %v4891_v21 = vld [vmem:[%s8124_s10 + $0x100] sm:$0xff] (%p6292_p5)  ;;  %v4893_v23 = vld [vmem:[%s8124_s10 + $0x108] sm:$0xff] (%p6292_p5) }
 0x319   : > { %4503 = vst [vmem:[%s8124_s10 + $0x2f8] sm:$0xff] %v4375_v46  ;;  %4862 = vst [vmem:[%s8710_s30 + $0x108] sm:$0xff] (%p6292_p5), %v4861_v26  ;;  %v4895_v20 = vld [vmem:[%s8124_s10 + $0x110] sm:$0xff] (%p6292_p5)  ;;  %v4897_v63 = vld [vmem:[%s8124_s10 + $0x118] sm:$0xff] (%p6292_p5) }
 0x31a   : > { %4864 = vst [vmem:[%s8710_s30 + $0x110] sm:$0xff] %v4863_v13  ;;  %4866 = vst [vmem:[%s8710_s30 + $0x118] sm:$0xff] %v4865_v9  ;;  %v4899_v7 = vld [vmem:[%s8124_s10 + $0x120] sm:$0xff]  ;;  %v4903_v24 = vld [vmem:[%s8124_s10 + $0x130] sm:$0xff] }
 0x31b   : > { %4868 = vst [vmem:[%s8710_s30 + $0x120] sm:$0xff] %v4867_v14  ;;  %4870 = vst [vmem:[%s8710_s30 + $0x128] sm:$0xff] %v4869_v47  ;;  %v4905_v48 = vld [vmem:[%s8124_s10 + $0x138] sm:$0xff]  ;;  %v4907_v25 = vld [vmem:[%s8124_s10 + $0x140] sm:$0xff] }
 0x31c   : > { %4872 = vst [vmem:[%s8710_s30 + $0x130] sm:$0xff] %v4871_v36  ;;  %4874 = vst [vmem:[%s8710_s30 + $0x138] sm:$0xff] %v4873_v60  ;;  %v4909_v49 = vld [vmem:[%s8124_s10 + $0x148] sm:$0xff]  ;;  %v4911_v34 = vld [vmem:[%s8124_s10 + $0x150] sm:$0xff] }
 0x31d   : > { %4876 = vst [vmem:[%s8710_s30 + $0x140] sm:$0xff] %v4875_v28  ;;  %4878 = vst [vmem:[%s8710_s30 + $0x148] sm:$0xff] %v4877_v31  ;;  %v4913_v6 = vld [vmem:[%s8124_s10 + $0x158] sm:$0xff]  ;;  %v4917_v52 = vld [vmem:[%s8124_s10 + $0x168] sm:$0xff] }
 0x31e   : > { %4880 = vst [vmem:[%s8710_s30 + $0x150] sm:$0xff] %v4879_v18  ;;  %4882 = vst [vmem:[%s8710_s30 + $0x158] sm:$0xff] %v4881_v54  ;;  %v4919_v59 = vld [vmem:[%s8124_s10 + $0x170] sm:$0xff]  ;;  %v4921_v10 = vld [vmem:[%s8124_s10 + $0x178] sm:$0xff] }
 0x31f   : > { %4886 = vst [vmem:[%s8710_s30 + $0x168] sm:$0xff] %v4885_v5  ;;  %4888 = vst [vmem:[%s8710_s30 + $0x170] sm:$0xff] %v4887_v2  ;;  %v4923_v38 = vld [vmem:[%s8124_s10 + $0x180] sm:$0xff]  ;;  %v4925_v17 = vld [vmem:[%s8124_s10 + $0x188] sm:$0xff] }
 0x320   : > { %4892 = vst [vmem:[%s8710_s30 + $0x200] sm:$0xff] %v4891_v21  ;;  %4894 = vst [vmem:[%s8710_s30 + $0x208] sm:$0xff] %v4893_v23  ;;  %v4927_v45 = vld [vmem:[%s8124_s10 + $0x190] sm:$0xff]  ;;  %v4929_v19 = vld [vmem:[%s8124_s10 + $0x198] sm:$0xff] }
 0x321   : > { %4896 = vst [vmem:[%s8710_s30 + $0x210] sm:$0xff] %v4895_v20  ;;  %4898 = vst [vmem:[%s8710_s30 + $0x218] sm:$0xff] %v4897_v63  ;;  %v4931_v57 = vld [vmem:[%s8124_s10 + $0x1a0] sm:$0xff]  ;;  %v4933_v62 = vld [vmem:[%s8124_s10 + $0x1a8] sm:$0xff] }
 0x322   : > { %4900 = vst [vmem:[%s8710_s30 + $0x220] sm:$0xff] %v4899_v7  ;;  %4904 = vst [vmem:[%s8710_s30 + $0x230] sm:$0xff] %v4903_v24  ;;  %v4935_v37 = vld [vmem:[%s8124_s10 + $0x1b0] sm:$0xff]  ;;  %v4937_v51 = vld [vmem:[%s8124_s10 + $0x1b8] sm:$0xff] }
 0x323   : > { %4906 = vst [vmem:[%s8710_s30 + $0x238] sm:$0xff] %v4905_v48  ;;  %4908 = vst [vmem:[%s8710_s30 + $0x240] sm:$0xff] %v4907_v25  ;;  %v4939_v32 = vld [vmem:[%s8124_s10 + $0x1c0] sm:$0xff]  ;;  %v4941_v22 = vld [vmem:[%s8124_s10 + $0x1c8] sm:$0xff] }
 0x324   : > { %4910 = vst [vmem:[%s8710_s30 + $0x248] sm:$0xff] %v4909_v49  ;;  %4912 = vst [vmem:[%s8710_s30 + $0x250] sm:$0xff] %v4911_v34  ;;  %v4943_v40 = vld [vmem:[%s8124_s10 + $0x1d0] sm:$0xff]  ;;  %v4945_v16 = vld [vmem:[%s8124_s10 + $0x1d8] sm:$0xff] }
 0x325   : > { %4914 = vst [vmem:[%s8710_s30 + $0x258] sm:$0xff] %v4913_v6  ;;  %4918 = vst [vmem:[%s8710_s30 + $0x268] sm:$0xff] %v4917_v52  ;;  %v4947_v58 = vld [vmem:[%s8124_s10 + $0x1e0] sm:$0xff]  ;;  %v4949_v15 = vld [vmem:[%s8124_s10 + $0x1e8] sm:$0xff] }
 0x326   : > { %4920 = vst [vmem:[%s8710_s30 + $0x270] sm:$0xff] %v4919_v59  ;;  %4922 = vst [vmem:[%s8710_s30 + $0x278] sm:$0xff] %v4921_v10  ;;  %v4951_v46 = vld [vmem:[%s8124_s10 + $0x1f0] sm:$0xff]  ;;  %v4953_v41 = vld [vmem:[%s8124_s10 + $0x1f8] sm:$0xff] }
 0x327   : > { %4924 = vst [vmem:[%s8710_s30 + $0x300] sm:$0xff] %v4923_v38  ;;  %4926 = vst [vmem:[%s8710_s30 + $0x308] sm:$0xff] %v4925_v17  ;;  %v4955_v30 = vld [vmem:[%s8124_s10 + $0x200] sm:$0xff]  ;;  %v4959_v3 = vld [vmem:[%s8124_s10 + $0x210] sm:$0xff] }
 0x328   : > { %4928 = vst [vmem:[%s8710_s30 + $0x310] sm:$0xff] %v4927_v45  ;;  %4930 = vst [vmem:[%s8710_s30 + $0x318] sm:$0xff] %v4929_v19  ;;  %v4961_v4 = vld [vmem:[%s8124_s10 + $0x218] sm:$0xff]  ;;  %v4963_v56 = vld [vmem:[%s8124_s10 + $0x220] sm:$0xff] }
 0x329   : > { %4932 = vst [vmem:[%s8710_s30 + $0x320] sm:$0xff] %v4931_v57  ;;  %4934 = vst [vmem:[%s8710_s30 + $0x328] sm:$0xff] %v4933_v62  ;;  %v4965_v50 = vld [vmem:[%s8124_s10 + $0x228] sm:$0xff]  ;;  %v4967_v61 = vld [vmem:[%s8124_s10 + $0x230] sm:$0xff] }
 0x32a   : > { %4936 = vst [vmem:[%s8710_s30 + $0x330] sm:$0xff] %v4935_v37  ;;  %4938 = vst [vmem:[%s8710_s30 + $0x338] sm:$0xff] %v4937_v51  ;;  %v4969_v8 = vld [vmem:[%s8124_s10 + $0x238] sm:$0xff]  ;;  %v4973_v35 = vld [vmem:[%s8124_s10 + $0x248] sm:$0xff] }
 0x32b   : > { %4940 = vst [vmem:[%s8710_s30 + $0x340] sm:$0xff] %v4939_v32  ;;  %4942 = vst [vmem:[%s8710_s30 + $0x348] sm:$0xff] %v4941_v22  ;;  %v4975_v43 = vld [vmem:[%s8124_s10 + $0x250] sm:$0xff]  ;;  %v4977_v39 = vld [vmem:[%s8124_s10 + $0x258] sm:$0xff] }
 0x32c   : > { %4944 = vst [vmem:[%s8710_s30 + $0x350] sm:$0xff] %v4943_v40  ;;  %4946 = vst [vmem:[%s8710_s30 + $0x358] sm:$0xff] %v4945_v16  ;;  %v4979_v0 = vld [vmem:[%s8124_s10 + $0x260] sm:$0xff]  ;;  %v4981_v27 = vld [vmem:[%s8124_s10 + $0x268] sm:$0xff] }
 0x32d   : > { %4948 = vst [vmem:[%s8710_s30 + $0x360] sm:$0xff] %v4947_v58  ;;  %4950 = vst [vmem:[%s8710_s30 + $0x368] sm:$0xff] %v4949_v15  ;;  %v4983_v55 = vld [vmem:[%s8124_s10 + $0x270] sm:$0xff]  ;;  %v4985_v44 = vld [vmem:[%s8124_s10 + $0x278] sm:$0xff] }
 0x32e   : > { %4952 = vst [vmem:[%s8710_s30 + $0x370] sm:$0xff] %v4951_v46  ;;  %4954 = vst [vmem:[%s8710_s30 + $0x378] sm:$0xff] %v4953_v41  ;;  %v4987_v11 = vld [vmem:[%s8124_s10 + $0x280] sm:$0xff]  ;;  %v4989_v26 = vld [vmem:[%s8124_s10 + $0x288] sm:$0xff] }
 0x32f   : > { %4956 = vst [vmem:[%s8710_s30 + $0x400] sm:$0xff] %v4955_v30  ;;  %4960 = vst [vmem:[%s8710_s30 + $0x410] sm:$0xff] %v4959_v3  ;;  %v4991_v13 = vld [vmem:[%s8124_s10 + $0x290] sm:$0xff]  ;;  %v4993_v9 = vld [vmem:[%s8124_s10 + $0x298] sm:$0xff] }
 0x330   : > { %4962 = vst [vmem:[%s8710_s30 + $0x418] sm:$0xff] %v4961_v4  ;;  %4964 = vst [vmem:[%s8710_s30 + $0x420] sm:$0xff] %v4963_v56  ;;  %v4995_v14 = vld [vmem:[%s8124_s10 + $0x2a0] sm:$0xff]  ;;  %v4997_v47 = vld [vmem:[%s8124_s10 + $0x2a8] sm:$0xff] }
 0x331   : > { %4966 = vst [vmem:[%s8710_s30 + $0x428] sm:$0xff] %v4965_v50  ;;  %4968 = vst [vmem:[%s8710_s30 + $0x430] sm:$0xff] %v4967_v61  ;;  %v4999_v36 = vld [vmem:[%s8124_s10 + $0x2b0] sm:$0xff]  ;;  %v5001_v60 = vld [vmem:[%s8124_s10 + $0x2b8] sm:$0xff] }
 0x332   : > { %4970 = vst [vmem:[%s8710_s30 + $0x438] sm:$0xff] %v4969_v8  ;;  %4974 = vst [vmem:[%s8710_s30 + $0x448] sm:$0xff] %v4973_v35  ;;  %v5003_v28 = vld [vmem:[%s8124_s10 + $0x2c0] sm:$0xff]  ;;  %v5005_v31 = vld [vmem:[%s8124_s10 + $0x2c8] sm:$0xff] }
 0x333   : > { %4976 = vst [vmem:[%s8710_s30 + $0x450] sm:$0xff] %v4975_v43  ;;  %4978 = vst [vmem:[%s8710_s30 + $0x458] sm:$0xff] %v4977_v39  ;;  %v5007_v18 = vld [vmem:[%s8124_s10 + $0x2d0] sm:$0xff]  ;;  %v5009_v54 = vld [vmem:[%s8124_s10 + $0x2d8] sm:$0xff] }
 0x334   : > { %4980 = vst [vmem:[%s8710_s30 + $0x460] sm:$0xff] %v4979_v0  ;;  %4982 = vst [vmem:[%s8710_s30 + $0x468] sm:$0xff] %v4981_v27  ;;  %v5011_v42 = vld [vmem:[%s8124_s10 + $0x2e0] sm:$0xff]  ;;  %v5013_v5 = vld [vmem:[%s8124_s10 + $0x2e8] sm:$0xff] }
 0x335   : > { %4984 = vst [vmem:[%s8710_s30 + $0x470] sm:$0xff] %v4983_v55  ;;  %4986 = vst [vmem:[%s8710_s30 + $0x478] sm:$0xff] %v4985_v44  ;;  %v5015_v2 = vld [vmem:[%s8124_s10 + $0x2f0] sm:$0xff]  ;;  %v5017_v29 = vld [vmem:[%s8124_s10 + $0x2f8] sm:$0xff] }
 0x336   : > { %4988 = vst [vmem:[%s8710_s30 + $0x500] sm:$0xff] %v4987_v11  ;;  %4990 = vst [vmem:[%s8710_s30 + $0x508] sm:$0xff] %v4989_v26  ;;  %v5019_v21 = vld [vmem:[%s8124_s10 + $0x300] sm:$0xff]  ;;  %v5021_v23 = vld [vmem:[%s8124_s10 + $0x308] sm:$0xff] }
 0x337   : > { %4992 = vst [vmem:[%s8710_s30 + $0x510] sm:$0xff] %v4991_v13  ;;  %4994 = vst [vmem:[%s8710_s30 + $0x518] sm:$0xff] %v4993_v9  ;;  %v5023_v20 = vld [vmem:[%s8124_s10 + $0x310] sm:$0xff]  ;;  %v5025_v63 = vld [vmem:[%s8124_s10 + $0x318] sm:$0xff] }
 0x338   : > { %4996 = vst [vmem:[%s8710_s30 + $0x520] sm:$0xff] %v4995_v14  ;;  %4998 = vst [vmem:[%s8710_s30 + $0x528] sm:$0xff] %v4997_v47  ;;  %v5027_v7 = vld [vmem:[%s8124_s10 + $0x320] sm:$0xff]  ;;  %v5031_v24 = vld [vmem:[%s8124_s10 + $0x330] sm:$0xff] }
 0x339   : > { %5000 = vst [vmem:[%s8710_s30 + $0x530] sm:$0xff] %v4999_v36  ;;  %5002 = vst [vmem:[%s8710_s30 + $0x538] sm:$0xff] %v5001_v60  ;;  %v5033_v48 = vld [vmem:[%s8124_s10 + $0x338] sm:$0xff]  ;;  %v5035_v25 = vld [vmem:[%s8124_s10 + $0x340] sm:$0xff] }
 0x33a   : > { %5004 = vst [vmem:[%s8710_s30 + $0x540] sm:$0xff] %v5003_v28  ;;  %5006 = vst [vmem:[%s8710_s30 + $0x548] sm:$0xff] %v5005_v31  ;;  %v5037_v49 = vld [vmem:[%s8124_s10 + $0x348] sm:$0xff]  ;;  %v5039_v34 = vld [vmem:[%s8124_s10 + $0x350] sm:$0xff] }
 0x33b   : > { %5008 = vst [vmem:[%s8710_s30 + $0x550] sm:$0xff] %v5007_v18  ;;  %5010 = vst [vmem:[%s8710_s30 + $0x558] sm:$0xff] %v5009_v54  ;;  %v5041_v6 = vld [vmem:[%s8124_s10 + $0x358] sm:$0xff]  ;;  %v5045_v52 = vld [vmem:[%s8124_s10 + $0x368] sm:$0xff] }
 0x33c   : > { %5012 = vst [vmem:[%s8710_s30 + $0x560] sm:$0xff] %v5011_v42  ;;  %5014 = vst [vmem:[%s8710_s30 + $0x568] sm:$0xff] %v5013_v5  ;;  %v5047_v59 = vld [vmem:[%s8124_s10 + $0x370] sm:$0xff]  ;;  %v5049_v10 = vld [vmem:[%s8124_s10 + $0x378] sm:$0xff] }
 0x33d   : > { %5016 = vst [vmem:[%s8710_s30 + $0x570] sm:$0xff] %v5015_v2  ;;  %5018 = vst [vmem:[%s8710_s30 + $0x578] sm:$0xff] %v5017_v29  ;;  %v5051_v38 = vld [vmem:[%s8124_s10 + $0x380] sm:$0xff]  ;;  %v5053_v17 = vld [vmem:[%s8124_s10 + $0x388] sm:$0xff] }
 0x33e   : > { %5020 = vst [vmem:[%s8710_s30 + $0x600] sm:$0xff] %v5019_v21  ;;  %5022 = vst [vmem:[%s8710_s30 + $0x608] sm:$0xff] %v5021_v23  ;;  %v5055_v45 = vld [vmem:[%s8124_s10 + $0x390] sm:$0xff]  ;;  %v5057_v19 = vld [vmem:[%s8124_s10 + $0x398] sm:$0xff] }
 0x33f   : > { %5024 = vst [vmem:[%s8710_s30 + $0x610] sm:$0xff] %v5023_v20  ;;  %5026 = vst [vmem:[%s8710_s30 + $0x618] sm:$0xff] %v5025_v63  ;;  %v5059_v57 = vld [vmem:[%s8124_s10 + $0x3a0] sm:$0xff]  ;;  %v5061_v62 = vld [vmem:[%s8124_s10 + $0x3a8] sm:$0xff] }
 0x340   : > { %5028 = vst [vmem:[%s8710_s30 + $0x620] sm:$0xff] %v5027_v7  ;;  %5032 = vst [vmem:[%s8710_s30 + $0x630] sm:$0xff] %v5031_v24  ;;  %v5063_v37 = vld [vmem:[%s8124_s10 + $0x3b0] sm:$0xff]  ;;  %v5065_v51 = vld [vmem:[%s8124_s10 + $0x3b8] sm:$0xff] }
 0x341   : > { %5034 = vst [vmem:[%s8710_s30 + $0x638] sm:$0xff] %v5033_v48  ;;  %5036 = vst [vmem:[%s8710_s30 + $0x640] sm:$0xff] %v5035_v25  ;;  %v5067_v32 = vld [vmem:[%s8124_s10 + $0x3c0] sm:$0xff]  ;;  %v5069_v22 = vld [vmem:[%s8124_s10 + $0x3c8] sm:$0xff] }
 0x342   : > { %5038 = vst [vmem:[%s8710_s30 + $0x648] sm:$0xff] %v5037_v49  ;;  %5040 = vst [vmem:[%s8710_s30 + $0x650] sm:$0xff] %v5039_v34  ;;  %v5071_v40 = vld [vmem:[%s8124_s10 + $0x3d0] sm:$0xff]  ;;  %v5073_v16 = vld [vmem:[%s8124_s10 + $0x3d8] sm:$0xff] }
 0x343   : > { %5042 = vst [vmem:[%s8710_s30 + $0x658] sm:$0xff] %v5041_v6  ;;  %5044 = vst [vmem:[%s8710_s30 + $0x660] sm:$0xff] %v5043_v33  ;;  %v5075_v58 = vld [vmem:[%s8124_s10 + $0x3e0] sm:$0xff]  ;;  %v5077_v15 = vld [vmem:[%s8124_s10 + $0x3e8] sm:$0xff] }
 0x344   : > { %5046 = vst [vmem:[%s8710_s30 + $0x668] sm:$0xff] %v5045_v52  ;;  %5048 = vst [vmem:[%s8710_s30 + $0x670] sm:$0xff] %v5047_v59  ;;  %v5079_v46 = vld [vmem:[%s8124_s10 + $0x3f0] sm:$0xff]  ;;  %v5081_v41 = vld [vmem:[%s8124_s10 + $0x3f8] sm:$0xff] }
 0x345   : > { %5050 = vst [vmem:[%s8710_s30 + $0x678] sm:$0xff] %v5049_v10  ;;  %5052 = vst [vmem:[%s8710_s30 + $0x700] sm:$0xff] %v5051_v38 }
 0x346   : > { %5054 = vst [vmem:[%s8710_s30 + $0x708] sm:$0xff] %v5053_v17  ;;  %5056 = vst [vmem:[%s8710_s30 + $0x710] sm:$0xff] %v5055_v45 }
 0x347   : > { %5058 = vst [vmem:[%s8710_s30 + $0x718] sm:$0xff] %v5057_v19  ;;  %5060 = vst [vmem:[%s8710_s30 + $0x720] sm:$0xff] %v5059_v57 }
 0x348   : > { %5062 = vst [vmem:[%s8710_s30 + $0x728] sm:$0xff] %v5061_v62  ;;  %5064 = vst [vmem:[%s8710_s30 + $0x730] sm:$0xff] %v5063_v37 }
 0x349   : > { %5066 = vst [vmem:[%s8710_s30 + $0x738] sm:$0xff] %v5065_v51  ;;  %5068 = vst [vmem:[%s8710_s30 + $0x740] sm:$0xff] %v5067_v32 }
 0x34a   : > { %5070 = vst [vmem:[%s8710_s30 + $0x748] sm:$0xff] %v5069_v22  ;;  %5072 = vst [vmem:[%s8710_s30 + $0x750] sm:$0xff] %v5071_v40 }
 0x34b   : > { %5074 = vst [vmem:[%s8710_s30 + $0x758] sm:$0xff] %v5073_v16  ;;  %5076 = vst [vmem:[%s8710_s30 + $0x760] sm:$0xff] %v5075_v58 }
 0x34c   : > { %5078 = vst [vmem:[%s8710_s30 + $0x768] sm:$0xff] %v5077_v15  ;;  %5080 = vst [vmem:[%s8710_s30 + $0x770] sm:$0xff] %v5079_v46 }
 0x34d   : > { %5082 = vst [vmem:[%s8710_s30 + $0x778] sm:$0xff] %v5081_v41 }
 0x34e PF: > { %p13_p10 = scmp.ge.s32.totalorder %s6275_s25, 4   ;;  %s9077_s21 = smov %s6216_s22 }
 0x34f   : > { %s9078_s22 = smov %s6286_s28  ;;  %s9079_s23 = smov %s6275_s25 }
 0x350   :  { %15 = sbr.rel (!%p13_p10) target bundleno = 2 (0x2), region = 218 }

</bundles_post_ra>
